<compile_context>
chip_gen: v6e
topology: v6e:2x2x1
jax: 0.10.0
libtpu: 0.0.40
codegen_flags: <defaults>
</compile_context>

<pallas_src>
import numpy as np
import jax
import jax.numpy as jnp
from jax.experimental import pallas as pl
from jax.experimental.pallas import tpu as pltpu


def char_rnn_kernel(tok_ref, lens_ref,
                    table_ref, whh1_ref, b1_ref,
                    w2_ref, b2_ref,
                    wl1_ref, bl1_ref, wl2_ref, bl2_ref,
                    out_ref,
                    h1_st, c1_st, h2_st, c2_st,
                    gx_scr, h2seq_scr):
    CT, Bp = tok_ref.shape
    Vt = table_ref.shape[0]
    H = whh1_ref.shape[0]
    Vp = out_ref.shape[-1]

    # ---- zero the recurrent state once, at the first time-chunk ----
    @pl.when(pl.program_id(0) == 0)
    def _init():
        for st in (h1_st, c1_st, h2_st, c2_st):
            st[...] = jnp.zeros_like(st)

    # ---- hoisted layer-1 input projection for this chunk ----
    # Embedding -> W_ih1 (no nonlinearity in between) == row-gather of a (V,4H)
    # table, realized as a tiny one-hot MXU matmul (contraction = padded vocab).
    tok = tok_ref[...]                                            # (CT, Bp) int32
    onehot = (tok[:, :, None] ==
              jax.lax.broadcasted_iota(jnp.int32, (CT, Bp, Vt), 2)
              ).astype(jnp.bfloat16)
    gx = jnp.dot(onehot.reshape(CT * Bp, Vt), table_ref[...],
                 preferred_element_type=jnp.float32) + b1_ref[...]
    gx_scr[...] = gx.reshape(CT, Bp, 4 * H)

    lens = lens_ref[...]                                          # (Bp, 1) int32
    t0 = pl.program_id(0) * CT

    def gates_to_hc(gates, c_prev):
        # PyTorch LSTM gate order: i, f, g, o (H lane-aligned -> whole-vreg slices)
        i = jax.nn.sigmoid(gates[:, 0 * H:1 * H])
        f = jax.nn.sigmoid(gates[:, 1 * H:2 * H])
        g = jnp.tanh(gates[:, 2 * H:3 * H])
        o = jax.nn.sigmoid(gates[:, 3 * H:4 * H])
        c_new = f * c_prev + i * g
        h_new = o * jnp.tanh(c_new)
        return h_new, c_new

    def step(t, carry):
        h1, c1, h2, c2 = carry
        valid = lens > (t0 + t)                                   # packed-seq mask

        # layer 1: only the recurrent h @ W_hh stays on the serial path (bf16 MXU)
        g1 = gx_scr[t] + jnp.dot(h1.astype(jnp.bfloat16), whh1_ref[...],
                                 preferred_element_type=jnp.float32)
        h1n, c1n = gates_to_hc(g1, c1)
        h1 = jnp.where(valid, h1n, h1)
        c1 = jnp.where(valid, c1n, c1)

        # layer 2: the two per-step matmuls fused into one 2H-contraction matmul
        hcat = jnp.concatenate([h1, h2], axis=-1).astype(jnp.bfloat16)
        g2 = jnp.dot(hcat, w2_ref[...],
                     preferred_element_type=jnp.float32) + b2_ref[...]
        h2n, c2n = gates_to_hc(g2, c2)
        h2 = jnp.where(valid, h2n, h2)
        c2 = jnp.where(valid, c2n, c2)

        # pad_packed_sequence: padded timesteps feed zeros into the Linear head
        h2seq_scr[t] = jnp.where(valid, h2, 0.0).astype(jnp.bfloat16)
        return (h1, c1, h2, c2)

    carry0 = (h1_st[...], c1_st[...], h2_st[...], c2_st[...])
    h1, c1, h2, c2 = jax.lax.fori_loop(0, CT, step, carry0,
                                       unroll=True if CT <= 16 else 4)
    h1_st[...] = h1
    c1_st[...] = c1
    h2_st[...] = h2
    c2_st[...] = c2

    # ---- Linear -> ReLU -> Linear head, batched over the whole chunk ----
    h2_all = h2seq_scr[...].reshape(CT * Bp, H)                   # bf16
    hid = jnp.maximum(
        jnp.dot(h2_all, wl1_ref[...], preferred_element_type=jnp.float32)
        + bl1_ref[...], 0.0)
    y = jnp.dot(hid.astype(jnp.bfloat16), wl2_ref[...],
                preferred_element_type=jnp.float32) + bl2_ref[...]
    out_ref[...] = y.reshape(CT, Bp, Vp)                          # lane-dense store


def char_rnn_forward(batch_x, batch_x_lens, params, *, chunk_t=8):
    """batch_x: int32 [B, T] token ids (0 = <pad>).
    batch_x_lens: host-side lengths (numpy/list), mirroring PyTorch's
    pack_padded_sequence CPU lengths -> no device->host sync."""
    (emb, wih1_t, whh1_t, b1, wih2_t, whh2_t, b2, wl1_t, bl1, wl2_t, bl2) = params
    B, T = batch_x.shape
    H = whh1_t.shape[0]
    V = wl2_t.shape[1]

    lens_np = np.asarray(batch_x_lens, dtype=np.int32)
    t_max = int(lens_np.max())                         # host data -> no readback

    # time: slice to t_max before the kernel, pad up to a multiple of the chunk
    CT = max(8, -(-int(chunk_t) // 8) * 8)             # chunk length, multiple of 8
    Tp = -(-t_max // CT) * CT
    # batch: pad to a sublane multiple (>= 8); padded rows get len 0 / <pad> tokens
    Bp = max(8, -(-B // 8) * 8)
    tok_tm = jnp.pad(batch_x[:, :t_max].T.astype(jnp.int32),
                     ((0, Tp - t_max), (0, Bp - B)))   # (Tp, Bp) time-major ids
    lens_col = jnp.asarray(np.pad(lens_np, (0, Bp - B)).reshape(Bp, 1))

    # vocab (output) dim padded to 128 lanes -> unmasked lane-dense stores
    Vp = -(-V // 128) * 128
    wl2p_t = jnp.pad(wl2_t, ((0, 0), (0, Vp - V)))
    bl2p = jnp.pad(bl2, ((0, 0), (0, Vp - V)))

    # Embedding -> W_ih1 collapsed into a gather table; pad the vocab (contraction)
    # dim to 128 so the in-kernel one-hot matmul is lane-aligned.
    Vt = -(-emb.shape[0] // 128) * 128
    table = jnp.dot(emb, wih1_t, preferred_element_type=jnp.float32)
    table = jnp.pad(table, ((0, Vt - emb.shape[0]), (0, 0))).astype(jnp.bfloat16)

    # bf16 MXU weights (f32 accumulation; gates/cell state stay f32 in-kernel)
    whh1_bf = whh1_t.astype(jnp.bfloat16)
    w2_bf = jnp.concatenate([wih2_t, whh2_t], axis=0).astype(jnp.bfloat16)  # (2H,4H)
    wl1_bf = wl1_t.astype(jnp.bfloat16)
    wl2_bf = wl2p_t.astype(jnp.bfloat16)

    def full(a):
        return pl.BlockSpec(a.shape, lambda t, _nd=a.ndim: (0,) * _nd)

    # VMEM budget: resident weights (x2 safety) + double-buffered chunk I/O + scratch
    def nbytes(shape, dt):
        return int(np.prod(shape)) * jnp.dtype(dt).itemsize
    resident = sum(nbytes(a.shape, a.dtype) for a in
                   (lens_col, table, whh1_bf, b1, w2_bf, b2,
                    wl1_bf, bl1, wl2_bf, bl2p))
    chunk_io = nbytes((CT, Bp), jnp.int32) + nbytes((CT, Bp, Vp), jnp.float32)
    scratch = (4 * nbytes((Bp, H), jnp.float32)
               + nbytes((CT, Bp, 4 * H), jnp.float32)
               + nbytes((CT, Bp, H), jnp.bfloat16))
    budget = 2 * resident + 2 * chunk_io + scratch + (4 << 20)
    vmem_limit = int(min(max(budget, 32 << 20), 64 << 20))   # fits v7x's 64 MiB/TC

    out_tm = pl.pallas_call(
        char_rnn_kernel,
        grid=(Tp // CT,),
        out_shape=jax.ShapeDtypeStruct((Tp, Bp, Vp), jnp.float32),
        in_specs=[
            pl.BlockSpec((CT, Bp), lambda t: (t, 0)),         # streamed token ids
            full(lens_col), full(table), full(whh1_bf), full(b1),
            full(w2_bf), full(b2), full(wl1_bf), full(bl1),
            full(wl2_bf), full(bl2p),
        ],
        out_specs=pl.BlockSpec((CT, Bp, Vp), lambda t: (t, 0, 0)),
        scratch_shapes=[
            pltpu.VMEM((Bp, H), jnp.float32),                 # h1 (persists)
            pltpu.VMEM((Bp, H), jnp.float32),                 # c1
            pltpu.VMEM((Bp, H), jnp.float32),                 # h2
            pltpu.VMEM((Bp, H), jnp.float32),                 # c2
            pltpu.VMEM((CT, Bp, 4 * H), jnp.float32),         # per-chunk x-projection
            pltpu.VMEM((CT, Bp, H), jnp.bfloat16),            # per-chunk layer-2 out
        ],
        compiler_params=pltpu.CompilerParams(
            dimension_semantics=("arbitrary",),               # serial recurrence
            vmem_limit_bytes=vmem_limit),
    )(tok_tm, lens_col, table, whh1_bf, b1, w2_bf, b2,
      wl1_bf, bl1, wl2_bf, bl2p)

    # drop time/batch/vocab padding; back to batch-first (tiny slice)
    out = out_tm[:t_max, :B, :V]
    return jnp.transpose(out, (1, 0, 2))                      # (B, t_max, V)


def make_params(key, vocab_size, embed_dim, hidden_dim):
    ks = jax.random.split(key, 11)
    u = lambda k, shape, s: jax.random.uniform(k, shape, jnp.float32, -s, s)
    sH = 1.0 / np.sqrt(hidden_dim)

    emb = u(ks[0], (vocab_size, embed_dim), 1.0)
    emb = emb.at[0].set(0.0)                          # padding_idx = 0

    # LSTM layer 1 (PyTorch weight_ih: (4H, E); stored transposed)
    wih1_t = u(ks[1], (embed_dim, 4 * hidden_dim), sH)
    whh1_t = u(ks[2], (hidden_dim, 4 * hidden_dim), sH)
    b1 = u(ks[3], (1, 4 * hidden_dim), sH)            # b_ih + b_hh folded
    # LSTM layer 2
    wih2_t = u(ks[4], (hidden_dim, 4 * hidden_dim), sH)
    whh2_t = u(ks[5], (hidden_dim, 4 * hidden_dim), sH)
    b2 = u(ks[6], (1, 4 * hidden_dim), sH)
    # Linear head
    wl1_t = u(ks[7], (hidden_dim, hidden_dim), sH)
    bl1 = u(ks[8], (1, hidden_dim), sH)
    wl2_t = u(ks[9], (hidden_dim, vocab_size), sH)
    bl2 = u(ks[10], (1, vocab_size), sH)
    return (emb, wih1_t, whh1_t, b1, wih2_t, whh2_t, b2, wl1_t, bl1, wl2_t, bl2)


def reference_forward(batch_x, batch_x_lens, params):
    """Pure-JAX f32 reference (lax.scan) with identical packed-sequence semantics."""
    (emb, wih1_t, whh1_t, b1, wih2_t, whh2_t, b2, wl1_t, bl1, wl2_t, bl2) = params
    B, T = batch_x.shape
    H = whh1_t.shape[0]
    x_emb = jnp.take(emb, batch_x, axis=0)            # (B, T, E)
    lens = jnp.asarray(np.asarray(batch_x_lens, dtype=np.int32))

    def cell(x, h, c, wih_t, whh_t, b):
        g = (jnp.dot(x, wih_t, preferred_element_type=jnp.float32)
             + jnp.dot(h, whh_t, preferred_element_type=jnp.float32) + b)
        i, f, gg, o = jnp.split(g, 4, axis=-1)
        c_new = jax.nn.sigmoid(f) * c + jax.nn.sigmoid(i) * jnp.tanh(gg)
        h_new = jax.nn.sigmoid(o) * jnp.tanh(c_new)
        return h_new, c_new

    def step(carry, inp):
        h1, c1, h2, c2 = carry
        x_t, t = inp
        valid = (lens > t)[:, None]
        h1n, c1n = cell(x_t, h1, c1, wih1_t, whh1_t, b1)
        h1u = jnp.where(valid, h1n, h1); c1u = jnp.where(valid, c1n, c1)
        h2n, c2n = cell(h1u, h2, c2, wih2_t, whh2_t, b2)
        h2u = jnp.where(valid, h2n, h2); c2u = jnp.where(valid, c2n, c2)
        h2_out = jnp.where(valid, h2u, 0.0)
        hid = jnp.maximum(
            jnp.dot(h2_out, wl1_t, preferred_element_type=jnp.float32) + bl1, 0.0)
        y = jnp.dot(hid, wl2_t, preferred_element_type=jnp.float32) + bl2
        return (h1u, c1u, h2u, c2u), y

    init = tuple(jnp.zeros((B, H), jnp.float32) for _ in range(4))
    xs = (jnp.transpose(x_emb, (1, 0, 2)), jnp.arange(T, dtype=jnp.int32))
    _, ys = jax.lax.scan(step, init, xs)
    out = jnp.transpose(ys, (1, 0, 2))
    t_max = int(np.asarray(batch_x_lens).max())
    return out[:, :t_max, :]


if __name__ == "__main__":
    # Small, lane-aligned shapes consistent with the module's forward
    # (module defaults are embed_dim = hidden_dim = 256; 128 keeps it small).
    # T=16 with chunk_t=8 exercises state carry across two grid chunks.
    vocab_size, embed_dim, hidden_dim = 16, 128, 128
    B, T = 2, 16

    key = jax.random.PRNGKey(0)
    kp, kx = jax.random.split(key)
    params = make_params(kp, vocab_size, embed_dim, hidden_dim)

    batch_x = jax.random.randint(kx, (B, T), 1, vocab_size, dtype=jnp.int32)
    batch_x_lens = np.array([T, 11], dtype=np.int32)  # host-side lengths (as PyTorch)
    # zero out padded token ids (as a padded batch would have)
    pos = jnp.arange(T)[None, :]
    batch_x = jnp.where(pos < jnp.asarray(batch_x_lens)[:, None], batch_x, 0)

    out = char_rnn_forward(batch_x, batch_x_lens, params, chunk_t=8)
    out = jax.block_until_ready(out)

    ref = reference_forward(batch_x, batch_x_lens, params)
    # bf16 MXU operands (f32 accumulation) vs. f32 reference -> relaxed tolerance.
    np.testing.assert_allclose(np.asarray(out), np.asarray(ref), rtol=2e-2, atol=2e-2)

    print("KERNEL_OK")
</pallas_src>

<mosaic_0001>
module attributes {stable_mosaic.version = 11 : i64} {
  func.func @char_rnn_kernel(%arg0: i32, %arg1: memref<8x8xi32, #tpu.memory_space<vmem>>, %arg2: memref<8x1xi32, #tpu.memory_space<vmem>>, %arg3: memref<128x512xbf16, #tpu.memory_space<vmem>>, %arg4: memref<128x512xbf16, #tpu.memory_space<vmem>>, %arg5: memref<1x512xf32, #tpu.memory_space<vmem>>, %arg6: memref<256x512xbf16, #tpu.memory_space<vmem>>, %arg7: memref<1x512xf32, #tpu.memory_space<vmem>>, %arg8: memref<128x128xbf16, #tpu.memory_space<vmem>>, %arg9: memref<1x128xf32, #tpu.memory_space<vmem>>, %arg10: memref<128x128xbf16, #tpu.memory_space<vmem>>, %arg11: memref<1x128xf32, #tpu.memory_space<vmem>>, %arg12: memref<8x8x128xf32, #tpu.memory_space<vmem>>, %arg13: memref<8x128xf32, #tpu.memory_space<vmem>>, %arg14: memref<8x128xf32, #tpu.memory_space<vmem>>, %arg15: memref<8x128xf32, #tpu.memory_space<vmem>>, %arg16: memref<8x128xf32, #tpu.memory_space<vmem>>, %arg17: memref<8x8x512xf32, #tpu.memory_space<vmem>>, %arg18: memref<8x8x128xbf16, #tpu.memory_space<vmem>>) attributes {dimension_semantics = [#tpu.dimension_semantics<arbitrary>], iteration_bounds = array<i64: 2>, scalar_prefetch = 0 : i64, scratch_operands = 6 : i64, tpu.core_type = #tpu.core_type<tc>, window_params = [{transform_indices = @transform_0, window_bounds = array<i64: 8, 8>}, {pipeline_mode = #tpu.pipeline_mode<synchronous>, transform_indices = @transform_1, window_bounds = array<i64: 8, 1>}, {pipeline_mode = #tpu.pipeline_mode<synchronous>, transform_indices = @transform_2, window_bounds = array<i64: 128, 512>}, {pipeline_mode = #tpu.pipeline_mode<synchronous>, transform_indices = @transform_3, window_bounds = array<i64: 128, 512>}, {pipeline_mode = #tpu.pipeline_mode<synchronous>, transform_indices = @transform_4, window_bounds = array<i64: 1, 512>}, {pipeline_mode = #tpu.pipeline_mode<synchronous>, transform_indices = @transform_5, window_bounds = array<i64: 256, 512>}, {pipeline_mode = #tpu.pipeline_mode<synchronous>, transform_indices = @transform_6, window_bounds = array<i64: 1, 512>}, {pipeline_mode = #tpu.pipeline_mode<synchronous>, transform_indices = @transform_7, window_bounds = array<i64: 128, 128>}, {pipeline_mode = #tpu.pipeline_mode<synchronous>, transform_indices = @transform_8, window_bounds = array<i64: 1, 128>}, {pipeline_mode = #tpu.pipeline_mode<synchronous>, transform_indices = @transform_9, window_bounds = array<i64: 128, 128>}, {pipeline_mode = #tpu.pipeline_mode<synchronous>, transform_indices = @transform_10, window_bounds = array<i64: 1, 128>}, {transform_indices = @transform_11, window_bounds = array<i64: 8, 8, 128>}]} {
    %c0_i32 = arith.constant 0 : i32
    %0 = arith.cmpi eq, %arg0, %c0_i32 : i32
    %1 = arith.extui %0 : i1 to i32
    %c0_i32_0 = arith.constant 0 : i32
    %2 = arith.cmpi ne, %1, %c0_i32_0 : i32
    scf.if %2 {
      %cst_198 = arith.constant 0.000000e+00 : f32
      %750 = vector.broadcast %cst_198 : f32 to vector<8x128xf32>
      %c0_199 = arith.constant 0 : index
      %c0_200 = arith.constant 0 : index
      %751 = vector.load %arg13[%c0_199, %c0_200] : memref<8x128xf32, #tpu.memory_space<vmem>>, vector<8x128xf32>
      tpu.vector_store %arg13[%c0_199, %c0_200], %750 {strides = array<i32>} : memref<8x128xf32, #tpu.memory_space<vmem>>, vector<8x128xf32>,
      %cst_201 = arith.constant 0.000000e+00 : f32
      %752 = vector.broadcast %cst_201 : f32 to vector<8x128xf32>
      %c0_202 = arith.constant 0 : index
      %c0_203 = arith.constant 0 : index
      %753 = vector.load %arg14[%c0_202, %c0_203] : memref<8x128xf32, #tpu.memory_space<vmem>>, vector<8x128xf32>
      tpu.vector_store %arg14[%c0_202, %c0_203], %752 {strides = array<i32>} : memref<8x128xf32, #tpu.memory_space<vmem>>, vector<8x128xf32>,
      %cst_204 = arith.constant 0.000000e+00 : f32
      %754 = vector.broadcast %cst_204 : f32 to vector<8x128xf32>
      %c0_205 = arith.constant 0 : index
      %c0_206 = arith.constant 0 : index
      %755 = vector.load %arg15[%c0_205, %c0_206] : memref<8x128xf32, #tpu.memory_space<vmem>>, vector<8x128xf32>
      tpu.vector_store %arg15[%c0_205, %c0_206], %754 {strides = array<i32>} : memref<8x128xf32, #tpu.memory_space<vmem>>, vector<8x128xf32>,
      %cst_207 = arith.constant 0.000000e+00 : f32
      %756 = vector.broadcast %cst_207 : f32 to vector<8x128xf32>
      %c0_208 = arith.constant 0 : index
      %c0_209 = arith.constant 0 : index
      %757 = vector.load %arg16[%c0_208, %c0_209] : memref<8x128xf32, #tpu.memory_space<vmem>>, vector<8x128xf32>
      tpu.vector_store %arg16[%c0_208, %c0_209], %756 {strides = array<i32>} : memref<8x128xf32, #tpu.memory_space<vmem>>, vector<8x128xf32>,
    } else {
    }
    %c0 = arith.constant 0 : index
    %c0_1 = arith.constant 0 : index
    %3 = vector.load %arg1[%c0, %c0_1] : memref<8x8xi32, #tpu.memory_space<vmem>>, vector<8x8xi32>
    %4 = vector.shape_cast %3 : vector<8x8xi32> to vector<8x8x1xi32>
    %5 = tpu.iota {dimensions = array<i32: 2>} : vector<8x8x128xi32>
    %6 = vector.broadcast %4 : vector<8x8x1xi32> to vector<8x8x128xi32>
    %7 = arith.cmpi eq, %6, %5 : vector<8x8x128xi32>
    %8 = arith.extui %7 : vector<8x8x128xi1> to vector<8x8x128xi32>
    %9 = arith.sitofp %8 : vector<8x8x128xi32> to vector<8x8x128xf32>
    %10 = arith.truncf %9 : vector<8x8x128xf32> to vector<8x8x128xbf16>
    %11 = vector.shape_cast %10 : vector<8x8x128xbf16> to vector<64x128xbf16>
    %c0_2 = arith.constant 0 : index
    %c0_3 = arith.constant 0 : index
    %12 = vector.load %arg3[%c0_2, %c0_3] : memref<128x512xbf16, #tpu.memory_space<vmem>>, vector<128x512xbf16>
    %cst = arith.constant dense<0.000000e+00> : vector<64x512xf32>
    %13 = tpu.matmul %11, %12, %cst {dimension_numbers = #tpu.dot_dimension_numbers<[1], [0], [0], [1], [0, 0, 1, 1], [], []>} : vector<64x128xbf16>, vector<128x512xbf16>, vector<64x512xf32> -> vector<64x512xf32>
    %c0_4 = arith.constant 0 : index
    %c0_5 = arith.constant 0 : index
    %14 = vector.load %arg5[%c0_4, %c0_5] : memref<1x512xf32, #tpu.memory_space<vmem>>, vector<1x512xf32>
    %15 = vector.broadcast %14 : vector<1x512xf32> to vector<64x512xf32>
    %16 = arith.addf %13, %15 : vector<64x512xf32>
    %17 = vector.shape_cast %16 : vector<64x512xf32> to vector<8x8x512xf32>
    %c0_6 = arith.constant 0 : index
    %c0_7 = arith.constant 0 : index
    %c0_8 = arith.constant 0 : index
    %18 = vector.load %arg17[%c0_6, %c0_7, %c0_8] : memref<8x8x512xf32, #tpu.memory_space<vmem>>, vector<8x8x512xf32>
    tpu.vector_store %arg17[%c0_6, %c0_7, %c0_8], %17 {strides = array<i32>} : memref<8x8x512xf32, #tpu.memory_space<vmem>>, vector<8x8x512xf32>,
    %c0_9 = arith.constant 0 : index
    %c0_10 = arith.constant 0 : index
    %19 = vector.load %arg2[%c0_9, %c0_10] : memref<8x1xi32, #tpu.memory_space<vmem>>, vector<8x1xi32>
    %c8_i32 = arith.constant 8 : i32
    %20 = arith.muli %arg0, %c8_i32 : i32
    %c0_11 = arith.constant 0 : index
    %c0_12 = arith.constant 0 : index
    %21 = vector.load %arg13[%c0_11, %c0_12] : memref<8x128xf32, #tpu.memory_space<vmem>>, vector<8x128xf32>
    %c0_13 = arith.constant 0 : index
    %c0_14 = arith.constant 0 : index
    %22 = vector.load %arg14[%c0_13, %c0_14] : memref<8x128xf32, #tpu.memory_space<vmem>>, vector<8x128xf32>
    %c0_15 = arith.constant 0 : index
    %c0_16 = arith.constant 0 : index
    %23 = vector.load %arg15[%c0_15, %c0_16] : memref<8x128xf32, #tpu.memory_space<vmem>>, vector<8x128xf32>
    %c0_17 = arith.constant 0 : index
    %c0_18 = arith.constant 0 : index
    %24 = vector.load %arg16[%c0_17, %c0_18] : memref<8x128xf32, #tpu.memory_space<vmem>>, vector<8x128xf32>
    %c0_i32_19 = arith.constant 0 : i32
    %25 = arith.addi %20, %c0_i32_19 : i32
    %26 = vector.broadcast %25 : i32 to vector<8x1xi32>
    %27 = arith.cmpi sgt, %19, %26 : vector<8x1xi32>
    %28 = arith.index_cast %c0_i32_19 : i32 to index
    %c0_20 = arith.constant 0 : index
    %c0_21 = arith.constant 0 : index
    %29 = vector.load %arg17[%28, %c0_20, %c0_21] : memref<8x8x512xf32, #tpu.memory_space<vmem>>, vector<1x8x512xf32>
    %30 = vector.shape_cast %29 : vector<1x8x512xf32> to vector<8x512xf32>
    %31 = arith.truncf %21 : vector<8x128xf32> to vector<8x128xbf16>
    %c0_22 = arith.constant 0 : index
    %c0_23 = arith.constant 0 : index
    %32 = vector.load %arg4[%c0_22, %c0_23] : memref<128x512xbf16, #tpu.memory_space<vmem>>, vector<128x512xbf16>
    %cst_24 = arith.constant dense<0.000000e+00> : vector<8x512xf32>
    %33 = tpu.matmul %31, %32, %cst_24 {dimension_numbers = #tpu.dot_dimension_numbers<[1], [0], [0], [1], [0, 0, 1, 1], [], []>} : vector<8x128xbf16>, vector<128x512xbf16>, vector<8x512xf32> -> vector<8x512xf32>
    %34 = arith.addf %30, %33 : vector<8x512xf32>
    %35 = vector.extract_strided_slice %34 {offsets = [0, 0], sizes = [8, 128], strides = [1, 1]} : vector<8x512xf32> to vector<8x128xf32>
    %36 = arith.negf %35 : vector<8x128xf32>
    %37 = math.exp %36 : vector<8x128xf32>
    %cst_25 = arith.constant 1.000000e+00 : f32
    %38 = vector.broadcast %cst_25 : f32 to vector<8x128xf32>
    %39 = arith.addf %38, %37 : vector<8x128xf32>
    %40 = arith.divf %38, %39 : vector<8x128xf32>
    %41 = vector.extract_strided_slice %34 {offsets = [0, 128], sizes = [8, 128], strides = [1, 1]} : vector<8x512xf32> to vector<8x128xf32>
    %42 = arith.negf %41 : vector<8x128xf32>
    %43 = math.exp %42 : vector<8x128xf32>
    %cst_26 = arith.constant 1.000000e+00 : f32
    %44 = vector.broadcast %cst_26 : f32 to vector<8x128xf32>
    %45 = arith.addf %44, %43 : vector<8x128xf32>
    %46 = arith.divf %44, %45 : vector<8x128xf32>
    %47 = vector.extract_strided_slice %34 {offsets = [0, 256], sizes = [8, 128], strides = [1, 1]} : vector<8x512xf32> to vector<8x128xf32>
    %48 = math.tanh %47 : vector<8x128xf32>
    %49 = vector.extract_strided_slice %34 {offsets = [0, 384], sizes = [8, 128], strides = [1, 1]} : vector<8x512xf32> to vector<8x128xf32>
    %50 = arith.negf %49 : vector<8x128xf32>
    %51 = math.exp %50 : vector<8x128xf32>
    %cst_27 = arith.constant 1.000000e+00 : f32
    %52 = vector.broadcast %cst_27 : f32 to vector<8x128xf32>
    %53 = arith.addf %52, %51 : vector<8x128xf32>
    %54 = arith.divf %52, %53 : vector<8x128xf32>
    %55 = arith.mulf %46, %22 : vector<8x128xf32>
    %56 = arith.mulf %40, %48 : vector<8x128xf32>
    %57 = arith.addf %55, %56 : vector<8x128xf32>
    %58 = math.tanh %57 : vector<8x128xf32>
    %59 = arith.mulf %54, %58 : vector<8x128xf32>
    %60 = vector.shape_cast %27 : vector<8x1xi1> to vector<8x1xi1>
    %61 = vector.broadcast %60 : vector<8x1xi1> to vector<8x128xi1>
    %62 = arith.select %61, %59, %21 : vector<8x128xi1>, vector<8x128xf32>
    %63 = vector.shape_cast %27 : vector<8x1xi1> to vector<8x1xi1>
    %64 = vector.broadcast %63 : vector<8x1xi1> to vector<8x128xi1>
    %65 = arith.select %64, %57, %22 : vector<8x128xi1>, vector<8x128xf32>
    %66 = tpu.concatenate %62, %23 in 1 : vector<8x128xf32>, vector<8x128xf32> -> vector<8x256xf32>
    %67 = arith.truncf %66 : vector<8x256xf32> to vector<8x256xbf16>
    %c0_28 = arith.constant 0 : index
    %c0_29 = arith.constant 0 : index
    %68 = vector.load %arg6[%c0_28, %c0_29] : memref<256x512xbf16, #tpu.memory_space<vmem>>, vector<256x512xbf16>
    %cst_30 = arith.constant dense<0.000000e+00> : vector<8x512xf32>
    %69 = tpu.matmul %67, %68, %cst_30 {dimension_numbers = #tpu.dot_dimension_numbers<[1], [0], [0], [1], [0, 0, 1, 1], [], []>} : vector<8x256xbf16>, vector<256x512xbf16>, vector<8x512xf32> -> vector<8x512xf32>
    %c0_31 = arith.constant 0 : index
    %c0_32 = arith.constant 0 : index
    %70 = vector.load %arg7[%c0_31, %c0_32] : memref<1x512xf32, #tpu.memory_space<vmem>>, vector<1x512xf32>
    %71 = vector.broadcast %70 : vector<1x512xf32> to vector<8x512xf32>
    %72 = arith.addf %69, %71 : vector<8x512xf32>
    %73 = vector.extract_strided_slice %72 {offsets = [0, 0], sizes = [8, 128], strides = [1, 1]} : vector<8x512xf32> to vector<8x128xf32>
    %74 = arith.negf %73 : vector<8x128xf32>
    %75 = math.exp %74 : vector<8x128xf32>
    %cst_33 = arith.constant 1.000000e+00 : f32
    %76 = vector.broadcast %cst_33 : f32 to vector<8x128xf32>
    %77 = arith.addf %76, %75 : vector<8x128xf32>
    %78 = arith.divf %76, %77 : vector<8x128xf32>
    %79 = vector.extract_strided_slice %72 {offsets = [0, 128], sizes = [8, 128], strides = [1, 1]} : vector<8x512xf32> to vector<8x128xf32>
    %80 = arith.negf %79 : vector<8x128xf32>
    %81 = math.exp %80 : vector<8x128xf32>
    %cst_34 = arith.constant 1.000000e+00 : f32
    %82 = vector.broadcast %cst_34 : f32 to vector<8x128xf32>
    %83 = arith.addf %82, %81 : vector<8x128xf32>
    %84 = arith.divf %82, %83 : vector<8x128xf32>
    %85 = vector.extract_strided_slice %72 {offsets = [0, 256], sizes = [8, 128], strides = [1, 1]} : vector<8x512xf32> to vector<8x128xf32>
    %86 = math.tanh %85 : vector<8x128xf32>
    %87 = vector.extract_strided_slice %72 {offsets = [0, 384], sizes = [8, 128], strides = [1, 1]} : vector<8x512xf32> to vector<8x128xf32>
    %88 = arith.negf %87 : vector<8x128xf32>
    %89 = math.exp %88 : vector<8x128xf32>
    %cst_35 = arith.constant 1.000000e+00 : f32
    %90 = vector.broadcast %cst_35 : f32 to vector<8x128xf32>
    %91 = arith.addf %90, %89 : vector<8x128xf32>
    %92 = arith.divf %90, %91 : vector<8x128xf32>
    %93 = arith.mulf %84, %24 : vector<8x128xf32>
    %94 = arith.mulf %78, %86 : vector<8x128xf32>
    %95 = arith.addf %93, %94 : vector<8x128xf32>
    %96 = math.tanh %95 : vector<8x128xf32>
    %97 = arith.mulf %92, %96 : vector<8x128xf32>
    %98 = vector.shape_cast %27 : vector<8x1xi1> to vector<8x1xi1>
    %99 = vector.broadcast %98 : vector<8x1xi1> to vector<8x128xi1>
    %100 = arith.select %99, %97, %23 : vector<8x128xi1>, vector<8x128xf32>
    %101 = vector.shape_cast %27 : vector<8x1xi1> to vector<8x1xi1>
    %102 = vector.broadcast %101 : vector<8x1xi1> to vector<8x128xi1>
    %103 = arith.select %102, %95, %24 : vector<8x128xi1>, vector<8x128xf32>
    %cst_36 = arith.constant 0.000000e+00 : f32
    %104 = vector.shape_cast %27 : vector<8x1xi1> to vector<8x1xi1>
    %105 = vector.broadcast %104 : vector<8x1xi1> to vector<8x128xi1>
    %106 = vector.broadcast %cst_36 : f32 to vector<8x128xf32>
    %107 = arith.select %105, %100, %106 : vector<8x128xi1>, vector<8x128xf32>
    %108 = arith.truncf %107 : vector<8x128xf32> to vector<8x128xbf16>
    %109 = arith.index_cast %c0_i32_19 : i32 to index
    %c0_37 = arith.constant 0 : index
    %c0_38 = arith.constant 0 : index
    %110 = vector.load %arg18[%109, %c0_37, %c0_38] : memref<8x8x128xbf16, #tpu.memory_space<vmem>>, vector<1x8x128xbf16>
    %111 = vector.shape_cast %110 : vector<1x8x128xbf16> to vector<8x128xbf16>
    %112 = vector.shape_cast %108 : vector<8x128xbf16> to vector<1x8x128xbf16>
    tpu.vector_store %arg18[%109, %c0_37, %c0_38], %112 {strides = array<i32>} : memref<8x8x128xbf16, #tpu.memory_space<vmem>>, vector<1x8x128xbf16>,
    %c1_i32 = arith.constant 1 : i32
    %113 = arith.addi %20, %c1_i32 : i32
    %114 = vector.broadcast %113 : i32 to vector<8x1xi32>
    %115 = arith.cmpi sgt, %19, %114 : vector<8x1xi32>
    %116 = arith.index_cast %c1_i32 : i32 to index
    %c0_39 = arith.constant 0 : index
    %c0_40 = arith.constant 0 : index
    %117 = vector.load %arg17[%116, %c0_39, %c0_40] : memref<8x8x512xf32, #tpu.memory_space<vmem>>, vector<1x8x512xf32>
    %118 = vector.shape_cast %117 : vector<1x8x512xf32> to vector<8x512xf32>
    %119 = arith.truncf %62 : vector<8x128xf32> to vector<8x128xbf16>
    %c0_41 = arith.constant 0 : index
    %c0_42 = arith.constant 0 : index
    %120 = vector.load %arg4[%c0_41, %c0_42] : memref<128x512xbf16, #tpu.memory_space<vmem>>, vector<128x512xbf16>
    %cst_43 = arith.constant dense<0.000000e+00> : vector<8x512xf32>
    %121 = tpu.matmul %119, %120, %cst_43 {dimension_numbers = #tpu.dot_dimension_numbers<[1], [0], [0], [1], [0, 0, 1, 1], [], []>} : vector<8x128xbf16>, vector<128x512xbf16>, vector<8x512xf32> -> vector<8x512xf32>
    %122 = arith.addf %118, %121 : vector<8x512xf32>
    %123 = vector.extract_strided_slice %122 {offsets = [0, 0], sizes = [8, 128], strides = [1, 1]} : vector<8x512xf32> to vector<8x128xf32>
    %124 = arith.negf %123 : vector<8x128xf32>
    %125 = math.exp %124 : vector<8x128xf32>
    %cst_44 = arith.constant 1.000000e+00 : f32
    %126 = vector.broadcast %cst_44 : f32 to vector<8x128xf32>
    %127 = arith.addf %126, %125 : vector<8x128xf32>
    %128 = arith.divf %126, %127 : vector<8x128xf32>
    %129 = vector.extract_strided_slice %122 {offsets = [0, 128], sizes = [8, 128], strides = [1, 1]} : vector<8x512xf32> to vector<8x128xf32>
    %130 = arith.negf %129 : vector<8x128xf32>
    %131 = math.exp %130 : vector<8x128xf32>
    %cst_45 = arith.constant 1.000000e+00 : f32
    %132 = vector.broadcast %cst_45 : f32 to vector<8x128xf32>
    %133 = arith.addf %132, %131 : vector<8x128xf32>
    %134 = arith.divf %132, %133 : vector<8x128xf32>
    %135 = vector.extract_strided_slice %122 {offsets = [0, 256], sizes = [8, 128], strides = [1, 1]} : vector<8x512xf32> to vector<8x128xf32>
    %136 = math.tanh %135 : vector<8x128xf32>
    %137 = vector.extract_strided_slice %122 {offsets = [0, 384], sizes = [8, 128], strides = [1, 1]} : vector<8x512xf32> to vector<8x128xf32>
    %138 = arith.negf %137 : vector<8x128xf32>
    %139 = math.exp %138 : vector<8x128xf32>
    %cst_46 = arith.constant 1.000000e+00 : f32
    %140 = vector.broadcast %cst_46 : f32 to vector<8x128xf32>
    %141 = arith.addf %140, %139 : vector<8x128xf32>
    %142 = arith.divf %140, %141 : vector<8x128xf32>
    %143 = arith.mulf %134, %65 : vector<8x128xf32>
    %144 = arith.mulf %128, %136 : vector<8x128xf32>
    %145 = arith.addf %143, %144 : vector<8x128xf32>
    %146 = math.tanh %145 : vector<8x128xf32>
    %147 = arith.mulf %142, %146 : vector<8x128xf32>
    %148 = vector.shape_cast %115 : vector<8x1xi1> to vector<8x1xi1>
    %149 = vector.broadcast %148 : vector<8x1xi1> to vector<8x128xi1>
    %150 = arith.select %149, %147, %62 : vector<8x128xi1>, vector<8x128xf32>
    %151 = vector.shape_cast %115 : vector<8x1xi1> to vector<8x1xi1>
    %152 = vector.broadcast %151 : vector<8x1xi1> to vector<8x128xi1>
    %153 = arith.select %152, %145, %65 : vector<8x128xi1>, vector<8x128xf32>
    %154 = tpu.concatenate %150, %100 in 1 : vector<8x128xf32>, vector<8x128xf32> -> vector<8x256xf32>
    %155 = arith.truncf %154 : vector<8x256xf32> to vector<8x256xbf16>
    %c0_47 = arith.constant 0 : index
    %c0_48 = arith.constant 0 : index
    %156 = vector.load %arg6[%c0_47, %c0_48] : memref<256x512xbf16, #tpu.memory_space<vmem>>, vector<256x512xbf16>
    %cst_49 = arith.constant dense<0.000000e+00> : vector<8x512xf32>
    %157 = tpu.matmul %155, %156, %cst_49 {dimension_numbers = #tpu.dot_dimension_numbers<[1], [0], [0], [1], [0, 0, 1, 1], [], []>} : vector<8x256xbf16>, vector<256x512xbf16>, vector<8x512xf32> -> vector<8x512xf32>
    %c0_50 = arith.constant 0 : index
    %c0_51 = arith.constant 0 : index
    %158 = vector.load %arg7[%c0_50, %c0_51] : memref<1x512xf32, #tpu.memory_space<vmem>>, vector<1x512xf32>
    %159 = vector.broadcast %158 : vector<1x512xf32> to vector<8x512xf32>
    %160 = arith.addf %157, %159 : vector<8x512xf32>
    %161 = vector.extract_strided_slice %160 {offsets = [0, 0], sizes = [8, 128], strides = [1, 1]} : vector<8x512xf32> to vector<8x128xf32>
    %162 = arith.negf %161 : vector<8x128xf32>
    %163 = math.exp %162 : vector<8x128xf32>
    %cst_52 = arith.constant 1.000000e+00 : f32
    %164 = vector.broadcast %cst_52 : f32 to vector<8x128xf32>
    %165 = arith.addf %164, %163 : vector<8x128xf32>
    %166 = arith.divf %164, %165 : vector<8x128xf32>
    %167 = vector.extract_strided_slice %160 {offsets = [0, 128], sizes = [8, 128], strides = [1, 1]} : vector<8x512xf32> to vector<8x128xf32>
    %168 = arith.negf %167 : vector<8x128xf32>
    %169 = math.exp %168 : vector<8x128xf32>
    %cst_53 = arith.constant 1.000000e+00 : f32
    %170 = vector.broadcast %cst_53 : f32 to vector<8x128xf32>
    %171 = arith.addf %170, %169 : vector<8x128xf32>
    %172 = arith.divf %170, %171 : vector<8x128xf32>
    %173 = vector.extract_strided_slice %160 {offsets = [0, 256], sizes = [8, 128], strides = [1, 1]} : vector<8x512xf32> to vector<8x128xf32>
    %174 = math.tanh %173 : vector<8x128xf32>
    %175 = vector.extract_strided_slice %160 {offsets = [0, 384], sizes = [8, 128], strides = [1, 1]} : vector<8x512xf32> to vector<8x128xf32>
    %176 = arith.negf %175 : vector<8x128xf32>
    %177 = math.exp %176 : vector<8x128xf32>
    %cst_54 = arith.constant 1.000000e+00 : f32
    %178 = vector.broadcast %cst_54 : f32 to vector<8x128xf32>
    %179 = arith.addf %178, %177 : vector<8x128xf32>
    %180 = arith.divf %178, %179 : vector<8x128xf32>
    %181 = arith.mulf %172, %103 : vector<8x128xf32>
    %182 = arith.mulf %166, %174 : vector<8x128xf32>
    %183 = arith.addf %181, %182 : vector<8x128xf32>
    %184 = math.tanh %183 : vector<8x128xf32>
    %185 = arith.mulf %180, %184 : vector<8x128xf32>
    %186 = vector.shape_cast %115 : vector<8x1xi1> to vector<8x1xi1>
    %187 = vector.broadcast %186 : vector<8x1xi1> to vector<8x128xi1>
    %188 = arith.select %187, %185, %100 : vector<8x128xi1>, vector<8x128xf32>
    %189 = vector.shape_cast %115 : vector<8x1xi1> to vector<8x1xi1>
    %190 = vector.broadcast %189 : vector<8x1xi1> to vector<8x128xi1>
    %191 = arith.select %190, %183, %103 : vector<8x128xi1>, vector<8x128xf32>
    %cst_55 = arith.constant 0.000000e+00 : f32
    %192 = vector.shape_cast %115 : vector<8x1xi1> to vector<8x1xi1>
    %193 = vector.broadcast %192 : vector<8x1xi1> to vector<8x128xi1>
    %194 = vector.broadcast %cst_55 : f32 to vector<8x128xf32>
    %195 = arith.select %193, %188, %194 : vector<8x128xi1>, vector<8x128xf32>
    %196 = arith.truncf %195 : vector<8x128xf32> to vector<8x128xbf16>
    %197 = arith.index_cast %c1_i32 : i32 to index
    %c0_56 = arith.constant 0 : index
    %c0_57 = arith.constant 0 : index
    %198 = vector.load %arg18[%197, %c0_56, %c0_57] : memref<8x8x128xbf16, #tpu.memory_space<vmem>>, vector<1x8x128xbf16>
    %199 = vector.shape_cast %198 : vector<1x8x128xbf16> to vector<8x128xbf16>
    %200 = vector.shape_cast %196 : vector<8x128xbf16> to vector<1x8x128xbf16>
    tpu.vector_store %arg18[%197, %c0_56, %c0_57], %200 {strides = array<i32>} : memref<8x8x128xbf16, #tpu.memory_space<vmem>>, vector<1x8x128xbf16>,
    %c2_i32 = arith.constant 2 : i32
    %201 = arith.addi %20, %c2_i32 : i32
    %202 = vector.broadcast %201 : i32 to vector<8x1xi32>
    %203 = arith.cmpi sgt, %19, %202 : vector<8x1xi32>
    %204 = arith.index_cast %c2_i32 : i32 to index
    %c0_58 = arith.constant 0 : index
    %c0_59 = arith.constant 0 : index
    %205 = vector.load %arg17[%204, %c0_58, %c0_59] : memref<8x8x512xf32, #tpu.memory_space<vmem>>, vector<1x8x512xf32>
    %206 = vector.shape_cast %205 : vector<1x8x512xf32> to vector<8x512xf32>
    %207 = arith.truncf %150 : vector<8x128xf32> to vector<8x128xbf16>
    %c0_60 = arith.constant 0 : index
    %c0_61 = arith.constant 0 : index
    %208 = vector.load %arg4[%c0_60, %c0_61] : memref<128x512xbf16, #tpu.memory_space<vmem>>, vector<128x512xbf16>
    %cst_62 = arith.constant dense<0.000000e+00> : vector<8x512xf32>
    %209 = tpu.matmul %207, %208, %cst_62 {dimension_numbers = #tpu.dot_dimension_numbers<[1], [0], [0], [1], [0, 0, 1, 1], [], []>} : vector<8x128xbf16>, vector<128x512xbf16>, vector<8x512xf32> -> vector<8x512xf32>
    %210 = arith.addf %206, %209 : vector<8x512xf32>
    %211 = vector.extract_strided_slice %210 {offsets = [0, 0], sizes = [8, 128], strides = [1, 1]} : vector<8x512xf32> to vector<8x128xf32>
    %212 = arith.negf %211 : vector<8x128xf32>
    %213 = math.exp %212 : vector<8x128xf32>
    %cst_63 = arith.constant 1.000000e+00 : f32
    %214 = vector.broadcast %cst_63 : f32 to vector<8x128xf32>
    %215 = arith.addf %214, %213 : vector<8x128xf32>
    %216 = arith.divf %214, %215 : vector<8x128xf32>
    %217 = vector.extract_strided_slice %210 {offsets = [0, 128], sizes = [8, 128], strides = [1, 1]} : vector<8x512xf32> to vector<8x128xf32>
    %218 = arith.negf %217 : vector<8x128xf32>
    %219 = math.exp %218 : vector<8x128xf32>
    %cst_64 = arith.constant 1.000000e+00 : f32
    %220 = vector.broadcast %cst_64 : f32 to vector<8x128xf32>
    %221 = arith.addf %220, %219 : vector<8x128xf32>
    %222 = arith.divf %220, %221 : vector<8x128xf32>
    %223 = vector.extract_strided_slice %210 {offsets = [0, 256], sizes = [8, 128], strides = [1, 1]} : vector<8x512xf32> to vector<8x128xf32>
    %224 = math.tanh %223 : vector<8x128xf32>
    %225 = vector.extract_strided_slice %210 {offsets = [0, 384], sizes = [8, 128], strides = [1, 1]} : vector<8x512xf32> to vector<8x128xf32>
    %226 = arith.negf %225 : vector<8x128xf32>
    %227 = math.exp %226 : vector<8x128xf32>
    %cst_65 = arith.constant 1.000000e+00 : f32
    %228 = vector.broadcast %cst_65 : f32 to vector<8x128xf32>
    %229 = arith.addf %228, %227 : vector<8x128xf32>
    %230 = arith.divf %228, %229 : vector<8x128xf32>
    %231 = arith.mulf %222, %153 : vector<8x128xf32>
    %232 = arith.mulf %216, %224 : vector<8x128xf32>
    %233 = arith.addf %231, %232 : vector<8x128xf32>
    %234 = math.tanh %233 : vector<8x128xf32>
    %235 = arith.mulf %230, %234 : vector<8x128xf32>
    %236 = vector.shape_cast %203 : vector<8x1xi1> to vector<8x1xi1>
    %237 = vector.broadcast %236 : vector<8x1xi1> to vector<8x128xi1>
    %238 = arith.select %237, %235, %150 : vector<8x128xi1>, vector<8x128xf32>
    %239 = vector.shape_cast %203 : vector<8x1xi1> to vector<8x1xi1>
    %240 = vector.broadcast %239 : vector<8x1xi1> to vector<8x128xi1>
    %241 = arith.select %240, %233, %153 : vector<8x128xi1>, vector<8x128xf32>
    %242 = tpu.concatenate %238, %188 in 1 : vector<8x128xf32>, vector<8x128xf32> -> vector<8x256xf32>
    %243 = arith.truncf %242 : vector<8x256xf32> to vector<8x256xbf16>
    %c0_66 = arith.constant 0 : index
    %c0_67 = arith.constant 0 : index
    %244 = vector.load %arg6[%c0_66, %c0_67] : memref<256x512xbf16, #tpu.memory_space<vmem>>, vector<256x512xbf16>
    %cst_68 = arith.constant dense<0.000000e+00> : vector<8x512xf32>
    %245 = tpu.matmul %243, %244, %cst_68 {dimension_numbers = #tpu.dot_dimension_numbers<[1], [0], [0], [1], [0, 0, 1, 1], [], []>} : vector<8x256xbf16>, vector<256x512xbf16>, vector<8x512xf32> -> vector<8x512xf32>
    %c0_69 = arith.constant 0 : index
    %c0_70 = arith.constant 0 : index
    %246 = vector.load %arg7[%c0_69, %c0_70] : memref<1x512xf32, #tpu.memory_space<vmem>>, vector<1x512xf32>
    %247 = vector.broadcast %246 : vector<1x512xf32> to vector<8x512xf32>
    %248 = arith.addf %245, %247 : vector<8x512xf32>
    %249 = vector.extract_strided_slice %248 {offsets = [0, 0], sizes = [8, 128], strides = [1, 1]} : vector<8x512xf32> to vector<8x128xf32>
    %250 = arith.negf %249 : vector<8x128xf32>
    %251 = math.exp %250 : vector<8x128xf32>
    %cst_71 = arith.constant 1.000000e+00 : f32
    %252 = vector.broadcast %cst_71 : f32 to vector<8x128xf32>
    %253 = arith.addf %252, %251 : vector<8x128xf32>
    %254 = arith.divf %252, %253 : vector<8x128xf32>
    %255 = vector.extract_strided_slice %248 {offsets = [0, 128], sizes = [8, 128], strides = [1, 1]} : vector<8x512xf32> to vector<8x128xf32>
    %256 = arith.negf %255 : vector<8x128xf32>
    %257 = math.exp %256 : vector<8x128xf32>
    %cst_72 = arith.constant 1.000000e+00 : f32
    %258 = vector.broadcast %cst_72 : f32 to vector<8x128xf32>
    %259 = arith.addf %258, %257 : vector<8x128xf32>
    %260 = arith.divf %258, %259 : vector<8x128xf32>
    %261 = vector.extract_strided_slice %248 {offsets = [0, 256], sizes = [8, 128], strides = [1, 1]} : vector<8x512xf32> to vector<8x128xf32>
    %262 = math.tanh %261 : vector<8x128xf32>
    %263 = vector.extract_strided_slice %248 {offsets = [0, 384], sizes = [8, 128], strides = [1, 1]} : vector<8x512xf32> to vector<8x128xf32>
    %264 = arith.negf %263 : vector<8x128xf32>
    %265 = math.exp %264 : vector<8x128xf32>
    %cst_73 = arith.constant 1.000000e+00 : f32
    %266 = vector.broadcast %cst_73 : f32 to vector<8x128xf32>
    %267 = arith.addf %266, %265 : vector<8x128xf32>
    %268 = arith.divf %266, %267 : vector<8x128xf32>
    %269 = arith.mulf %260, %191 : vector<8x128xf32>
    %270 = arith.mulf %254, %262 : vector<8x128xf32>
    %271 = arith.addf %269, %270 : vector<8x128xf32>
    %272 = math.tanh %271 : vector<8x128xf32>
    %273 = arith.mulf %268, %272 : vector<8x128xf32>
    %274 = vector.shape_cast %203 : vector<8x1xi1> to vector<8x1xi1>
    %275 = vector.broadcast %274 : vector<8x1xi1> to vector<8x128xi1>
    %276 = arith.select %275, %273, %188 : vector<8x128xi1>, vector<8x128xf32>
    %277 = vector.shape_cast %203 : vector<8x1xi1> to vector<8x1xi1>
    %278 = vector.broadcast %277 : vector<8x1xi1> to vector<8x128xi1>
    %279 = arith.select %278, %271, %191 : vector<8x128xi1>, vector<8x128xf32>
    %cst_74 = arith.constant 0.000000e+00 : f32
    %280 = vector.shape_cast %203 : vector<8x1xi1> to vector<8x1xi1>
    %281 = vector.broadcast %280 : vector<8x1xi1> to vector<8x128xi1>
    %282 = vector.broadcast %cst_74 : f32 to vector<8x128xf32>
    %283 = arith.select %281, %276, %282 : vector<8x128xi1>, vector<8x128xf32>
    %284 = arith.truncf %283 : vector<8x128xf32> to vector<8x128xbf16>
    %285 = arith.index_cast %c2_i32 : i32 to index
    %c0_75 = arith.constant 0 : index
    %c0_76 = arith.constant 0 : index
    %286 = vector.load %arg18[%285, %c0_75, %c0_76] : memref<8x8x128xbf16, #tpu.memory_space<vmem>>, vector<1x8x128xbf16>
    %287 = vector.shape_cast %286 : vector<1x8x128xbf16> to vector<8x128xbf16>
    %288 = vector.shape_cast %284 : vector<8x128xbf16> to vector<1x8x128xbf16>
    tpu.vector_store %arg18[%285, %c0_75, %c0_76], %288 {strides = array<i32>} : memref<8x8x128xbf16, #tpu.memory_space<vmem>>, vector<1x8x128xbf16>,
    %c3_i32 = arith.constant 3 : i32
    %289 = arith.addi %20, %c3_i32 : i32
    %290 = vector.broadcast %289 : i32 to vector<8x1xi32>
    %291 = arith.cmpi sgt, %19, %290 : vector<8x1xi32>
    %292 = arith.index_cast %c3_i32 : i32 to index
    %c0_77 = arith.constant 0 : index
    %c0_78 = arith.constant 0 : index
    %293 = vector.load %arg17[%292, %c0_77, %c0_78] : memref<8x8x512xf32, #tpu.memory_space<vmem>>, vector<1x8x512xf32>
    %294 = vector.shape_cast %293 : vector<1x8x512xf32> to vector<8x512xf32>
    %295 = arith.truncf %238 : vector<8x128xf32> to vector<8x128xbf16>
    %c0_79 = arith.constant 0 : index
    %c0_80 = arith.constant 0 : index
    %296 = vector.load %arg4[%c0_79, %c0_80] : memref<128x512xbf16, #tpu.memory_space<vmem>>, vector<128x512xbf16>
    %cst_81 = arith.constant dense<0.000000e+00> : vector<8x512xf32>
    %297 = tpu.matmul %295, %296, %cst_81 {dimension_numbers = #tpu.dot_dimension_numbers<[1], [0], [0], [1], [0, 0, 1, 1], [], []>} : vector<8x128xbf16>, vector<128x512xbf16>, vector<8x512xf32> -> vector<8x512xf32>
    %298 = arith.addf %294, %297 : vector<8x512xf32>
    %299 = vector.extract_strided_slice %298 {offsets = [0, 0], sizes = [8, 128], strides = [1, 1]} : vector<8x512xf32> to vector<8x128xf32>
    %300 = arith.negf %299 : vector<8x128xf32>
    %301 = math.exp %300 : vector<8x128xf32>
    %cst_82 = arith.constant 1.000000e+00 : f32
    %302 = vector.broadcast %cst_82 : f32 to vector<8x128xf32>
    %303 = arith.addf %302, %301 : vector<8x128xf32>
    %304 = arith.divf %302, %303 : vector<8x128xf32>
    %305 = vector.extract_strided_slice %298 {offsets = [0, 128], sizes = [8, 128], strides = [1, 1]} : vector<8x512xf32> to vector<8x128xf32>
    %306 = arith.negf %305 : vector<8x128xf32>
    %307 = math.exp %306 : vector<8x128xf32>
    %cst_83 = arith.constant 1.000000e+00 : f32
    %308 = vector.broadcast %cst_83 : f32 to vector<8x128xf32>
    %309 = arith.addf %308, %307 : vector<8x128xf32>
    %310 = arith.divf %308, %309 : vector<8x128xf32>
    %311 = vector.extract_strided_slice %298 {offsets = [0, 256], sizes = [8, 128], strides = [1, 1]} : vector<8x512xf32> to vector<8x128xf32>
    %312 = math.tanh %311 : vector<8x128xf32>
    %313 = vector.extract_strided_slice %298 {offsets = [0, 384], sizes = [8, 128], strides = [1, 1]} : vector<8x512xf32> to vector<8x128xf32>
    %314 = arith.negf %313 : vector<8x128xf32>
    %315 = math.exp %314 : vector<8x128xf32>
    %cst_84 = arith.constant 1.000000e+00 : f32
    %316 = vector.broadcast %cst_84 : f32 to vector<8x128xf32>
    %317 = arith.addf %316, %315 : vector<8x128xf32>
    %318 = arith.divf %316, %317 : vector<8x128xf32>
    %319 = arith.mulf %310, %241 : vector<8x128xf32>
    %320 = arith.mulf %304, %312 : vector<8x128xf32>
    %321 = arith.addf %319, %320 : vector<8x128xf32>
    %322 = math.tanh %321 : vector<8x128xf32>
    %323 = arith.mulf %318, %322 : vector<8x128xf32>
    %324 = vector.shape_cast %291 : vector<8x1xi1> to vector<8x1xi1>
    %325 = vector.broadcast %324 : vector<8x1xi1> to vector<8x128xi1>
    %326 = arith.select %325, %323, %238 : vector<8x128xi1>, vector<8x128xf32>
    %327 = vector.shape_cast %291 : vector<8x1xi1> to vector<8x1xi1>
    %328 = vector.broadcast %327 : vector<8x1xi1> to vector<8x128xi1>
    %329 = arith.select %328, %321, %241 : vector<8x128xi1>, vector<8x128xf32>
    %330 = tpu.concatenate %326, %276 in 1 : vector<8x128xf32>, vector<8x128xf32> -> vector<8x256xf32>
    %331 = arith.truncf %330 : vector<8x256xf32> to vector<8x256xbf16>
    %c0_85 = arith.constant 0 : index
    %c0_86 = arith.constant 0 : index
    %332 = vector.load %arg6[%c0_85, %c0_86] : memref<256x512xbf16, #tpu.memory_space<vmem>>, vector<256x512xbf16>
    %cst_87 = arith.constant dense<0.000000e+00> : vector<8x512xf32>
    %333 = tpu.matmul %331, %332, %cst_87 {dimension_numbers = #tpu.dot_dimension_numbers<[1], [0], [0], [1], [0, 0, 1, 1], [], []>} : vector<8x256xbf16>, vector<256x512xbf16>, vector<8x512xf32> -> vector<8x512xf32>
    %c0_88 = arith.constant 0 : index
    %c0_89 = arith.constant 0 : index
    %334 = vector.load %arg7[%c0_88, %c0_89] : memref<1x512xf32, #tpu.memory_space<vmem>>, vector<1x512xf32>
    %335 = vector.broadcast %334 : vector<1x512xf32> to vector<8x512xf32>
    %336 = arith.addf %333, %335 : vector<8x512xf32>
    %337 = vector.extract_strided_slice %336 {offsets = [0, 0], sizes = [8, 128], strides = [1, 1]} : vector<8x512xf32> to vector<8x128xf32>
    %338 = arith.negf %337 : vector<8x128xf32>
    %339 = math.exp %338 : vector<8x128xf32>
    %cst_90 = arith.constant 1.000000e+00 : f32
    %340 = vector.broadcast %cst_90 : f32 to vector<8x128xf32>
    %341 = arith.addf %340, %339 : vector<8x128xf32>
    %342 = arith.divf %340, %341 : vector<8x128xf32>
    %343 = vector.extract_strided_slice %336 {offsets = [0, 128], sizes = [8, 128], strides = [1, 1]} : vector<8x512xf32> to vector<8x128xf32>
    %344 = arith.negf %343 : vector<8x128xf32>
    %345 = math.exp %344 : vector<8x128xf32>
    %cst_91 = arith.constant 1.000000e+00 : f32
    %346 = vector.broadcast %cst_91 : f32 to vector<8x128xf32>
    %347 = arith.addf %346, %345 : vector<8x128xf32>
    %348 = arith.divf %346, %347 : vector<8x128xf32>
    %349 = vector.extract_strided_slice %336 {offsets = [0, 256], sizes = [8, 128], strides = [1, 1]} : vector<8x512xf32> to vector<8x128xf32>
    %350 = math.tanh %349 : vector<8x128xf32>
    %351 = vector.extract_strided_slice %336 {offsets = [0, 384], sizes = [8, 128], strides = [1, 1]} : vector<8x512xf32> to vector<8x128xf32>
    %352 = arith.negf %351 : vector<8x128xf32>
    %353 = math.exp %352 : vector<8x128xf32>
    %cst_92 = arith.constant 1.000000e+00 : f32
    %354 = vector.broadcast %cst_92 : f32 to vector<8x128xf32>
    %355 = arith.addf %354, %353 : vector<8x128xf32>
    %356 = arith.divf %354, %355 : vector<8x128xf32>
    %357 = arith.mulf %348, %279 : vector<8x128xf32>
    %358 = arith.mulf %342, %350 : vector<8x128xf32>
    %359 = arith.addf %357, %358 : vector<8x128xf32>
    %360 = math.tanh %359 : vector<8x128xf32>
    %361 = arith.mulf %356, %360 : vector<8x128xf32>
    %362 = vector.shape_cast %291 : vector<8x1xi1> to vector<8x1xi1>
    %363 = vector.broadcast %362 : vector<8x1xi1> to vector<8x128xi1>
    %364 = arith.select %363, %361, %276 : vector<8x128xi1>, vector<8x128xf32>
    %365 = vector.shape_cast %291 : vector<8x1xi1> to vector<8x1xi1>
    %366 = vector.broadcast %365 : vector<8x1xi1> to vector<8x128xi1>
    %367 = arith.select %366, %359, %279 : vector<8x128xi1>, vector<8x128xf32>
    %cst_93 = arith.constant 0.000000e+00 : f32
    %368 = vector.shape_cast %291 : vector<8x1xi1> to vector<8x1xi1>
    %369 = vector.broadcast %368 : vector<8x1xi1> to vector<8x128xi1>
    %370 = vector.broadcast %cst_93 : f32 to vector<8x128xf32>
    %371 = arith.select %369, %364, %370 : vector<8x128xi1>, vector<8x128xf32>
    %372 = arith.truncf %371 : vector<8x128xf32> to vector<8x128xbf16>
    %373 = arith.index_cast %c3_i32 : i32 to index
    %c0_94 = arith.constant 0 : index
    %c0_95 = arith.constant 0 : index
    %374 = vector.load %arg18[%373, %c0_94, %c0_95] : memref<8x8x128xbf16, #tpu.memory_space<vmem>>, vector<1x8x128xbf16>
    %375 = vector.shape_cast %374 : vector<1x8x128xbf16> to vector<8x128xbf16>
    %376 = vector.shape_cast %372 : vector<8x128xbf16> to vector<1x8x128xbf16>
    tpu.vector_store %arg18[%373, %c0_94, %c0_95], %376 {strides = array<i32>} : memref<8x8x128xbf16, #tpu.memory_space<vmem>>, vector<1x8x128xbf16>,
    %c4_i32 = arith.constant 4 : i32
    %377 = arith.addi %20, %c4_i32 : i32
    %378 = vector.broadcast %377 : i32 to vector<8x1xi32>
    %379 = arith.cmpi sgt, %19, %378 : vector<8x1xi32>
    %380 = arith.index_cast %c4_i32 : i32 to index
    %c0_96 = arith.constant 0 : index
    %c0_97 = arith.constant 0 : index
    %381 = vector.load %arg17[%380, %c0_96, %c0_97] : memref<8x8x512xf32, #tpu.memory_space<vmem>>, vector<1x8x512xf32>
    %382 = vector.shape_cast %381 : vector<1x8x512xf32> to vector<8x512xf32>
    %383 = arith.truncf %326 : vector<8x128xf32> to vector<8x128xbf16>
    %c0_98 = arith.constant 0 : index
    %c0_99 = arith.constant 0 : index
    %384 = vector.load %arg4[%c0_98, %c0_99] : memref<128x512xbf16, #tpu.memory_space<vmem>>, vector<128x512xbf16>
    %cst_100 = arith.constant dense<0.000000e+00> : vector<8x512xf32>
    %385 = tpu.matmul %383, %384, %cst_100 {dimension_numbers = #tpu.dot_dimension_numbers<[1], [0], [0], [1], [0, 0, 1, 1], [], []>} : vector<8x128xbf16>, vector<128x512xbf16>, vector<8x512xf32> -> vector<8x512xf32>
    %386 = arith.addf %382, %385 : vector<8x512xf32>
    %387 = vector.extract_strided_slice %386 {offsets = [0, 0], sizes = [8, 128], strides = [1, 1]} : vector<8x512xf32> to vector<8x128xf32>
    %388 = arith.negf %387 : vector<8x128xf32>
    %389 = math.exp %388 : vector<8x128xf32>
    %cst_101 = arith.constant 1.000000e+00 : f32
    %390 = vector.broadcast %cst_101 : f32 to vector<8x128xf32>
    %391 = arith.addf %390, %389 : vector<8x128xf32>
    %392 = arith.divf %390, %391 : vector<8x128xf32>
    %393 = vector.extract_strided_slice %386 {offsets = [0, 128], sizes = [8, 128], strides = [1, 1]} : vector<8x512xf32> to vector<8x128xf32>
    %394 = arith.negf %393 : vector<8x128xf32>
    %395 = math.exp %394 : vector<8x128xf32>
    %cst_102 = arith.constant 1.000000e+00 : f32
    %396 = vector.broadcast %cst_102 : f32 to vector<8x128xf32>
    %397 = arith.addf %396, %395 : vector<8x128xf32>
    %398 = arith.divf %396, %397 : vector<8x128xf32>
    %399 = vector.extract_strided_slice %386 {offsets = [0, 256], sizes = [8, 128], strides = [1, 1]} : vector<8x512xf32> to vector<8x128xf32>
    %400 = math.tanh %399 : vector<8x128xf32>
    %401 = vector.extract_strided_slice %386 {offsets = [0, 384], sizes = [8, 128], strides = [1, 1]} : vector<8x512xf32> to vector<8x128xf32>
    %402 = arith.negf %401 : vector<8x128xf32>
    %403 = math.exp %402 : vector<8x128xf32>
    %cst_103 = arith.constant 1.000000e+00 : f32
    %404 = vector.broadcast %cst_103 : f32 to vector<8x128xf32>
    %405 = arith.addf %404, %403 : vector<8x128xf32>
    %406 = arith.divf %404, %405 : vector<8x128xf32>
    %407 = arith.mulf %398, %329 : vector<8x128xf32>
    %408 = arith.mulf %392, %400 : vector<8x128xf32>
    %409 = arith.addf %407, %408 : vector<8x128xf32>
    %410 = math.tanh %409 : vector<8x128xf32>
    %411 = arith.mulf %406, %410 : vector<8x128xf32>
    %412 = vector.shape_cast %379 : vector<8x1xi1> to vector<8x1xi1>
    %413 = vector.broadcast %412 : vector<8x1xi1> to vector<8x128xi1>
    %414 = arith.select %413, %411, %326 : vector<8x128xi1>, vector<8x128xf32>
    %415 = vector.shape_cast %379 : vector<8x1xi1> to vector<8x1xi1>
    %416 = vector.broadcast %415 : vector<8x1xi1> to vector<8x128xi1>
    %417 = arith.select %416, %409, %329 : vector<8x128xi1>, vector<8x128xf32>
    %418 = tpu.concatenate %414, %364 in 1 : vector<8x128xf32>, vector<8x128xf32> -> vector<8x256xf32>
    %419 = arith.truncf %418 : vector<8x256xf32> to vector<8x256xbf16>
    %c0_104 = arith.constant 0 : index
    %c0_105 = arith.constant 0 : index
    %420 = vector.load %arg6[%c0_104, %c0_105] : memref<256x512xbf16, #tpu.memory_space<vmem>>, vector<256x512xbf16>
    %cst_106 = arith.constant dense<0.000000e+00> : vector<8x512xf32>
    %421 = tpu.matmul %419, %420, %cst_106 {dimension_numbers = #tpu.dot_dimension_numbers<[1], [0], [0], [1], [0, 0, 1, 1], [], []>} : vector<8x256xbf16>, vector<256x512xbf16>, vector<8x512xf32> -> vector<8x512xf32>
    %c0_107 = arith.constant 0 : index
    %c0_108 = arith.constant 0 : index
    %422 = vector.load %arg7[%c0_107, %c0_108] : memref<1x512xf32, #tpu.memory_space<vmem>>, vector<1x512xf32>
    %423 = vector.broadcast %422 : vector<1x512xf32> to vector<8x512xf32>
    %424 = arith.addf %421, %423 : vector<8x512xf32>
    %425 = vector.extract_strided_slice %424 {offsets = [0, 0], sizes = [8, 128], strides = [1, 1]} : vector<8x512xf32> to vector<8x128xf32>
    %426 = arith.negf %425 : vector<8x128xf32>
    %427 = math.exp %426 : vector<8x128xf32>
    %cst_109 = arith.constant 1.000000e+00 : f32
    %428 = vector.broadcast %cst_109 : f32 to vector<8x128xf32>
    %429 = arith.addf %428, %427 : vector<8x128xf32>
    %430 = arith.divf %428, %429 : vector<8x128xf32>
    %431 = vector.extract_strided_slice %424 {offsets = [0, 128], sizes = [8, 128], strides = [1, 1]} : vector<8x512xf32> to vector<8x128xf32>
    %432 = arith.negf %431 : vector<8x128xf32>
    %433 = math.exp %432 : vector<8x128xf32>
    %cst_110 = arith.constant 1.000000e+00 : f32
    %434 = vector.broadcast %cst_110 : f32 to vector<8x128xf32>
    %435 = arith.addf %434, %433 : vector<8x128xf32>
    %436 = arith.divf %434, %435 : vector<8x128xf32>
    %437 = vector.extract_strided_slice %424 {offsets = [0, 256], sizes = [8, 128], strides = [1, 1]} : vector<8x512xf32> to vector<8x128xf32>
    %438 = math.tanh %437 : vector<8x128xf32>
    %439 = vector.extract_strided_slice %424 {offsets = [0, 384], sizes = [8, 128], strides = [1, 1]} : vector<8x512xf32> to vector<8x128xf32>
    %440 = arith.negf %439 : vector<8x128xf32>
    %441 = math.exp %440 : vector<8x128xf32>
    %cst_111 = arith.constant 1.000000e+00 : f32
    %442 = vector.broadcast %cst_111 : f32 to vector<8x128xf32>
    %443 = arith.addf %442, %441 : vector<8x128xf32>
    %444 = arith.divf %442, %443 : vector<8x128xf32>
    %445 = arith.mulf %436, %367 : vector<8x128xf32>
    %446 = arith.mulf %430, %438 : vector<8x128xf32>
    %447 = arith.addf %445, %446 : vector<8x128xf32>
    %448 = math.tanh %447 : vector<8x128xf32>
    %449 = arith.mulf %444, %448 : vector<8x128xf32>
    %450 = vector.shape_cast %379 : vector<8x1xi1> to vector<8x1xi1>
    %451 = vector.broadcast %450 : vector<8x1xi1> to vector<8x128xi1>
    %452 = arith.select %451, %449, %364 : vector<8x128xi1>, vector<8x128xf32>
    %453 = vector.shape_cast %379 : vector<8x1xi1> to vector<8x1xi1>
    %454 = vector.broadcast %453 : vector<8x1xi1> to vector<8x128xi1>
    %455 = arith.select %454, %447, %367 : vector<8x128xi1>, vector<8x128xf32>
    %cst_112 = arith.constant 0.000000e+00 : f32
    %456 = vector.shape_cast %379 : vector<8x1xi1> to vector<8x1xi1>
    %457 = vector.broadcast %456 : vector<8x1xi1> to vector<8x128xi1>
    %458 = vector.broadcast %cst_112 : f32 to vector<8x128xf32>
    %459 = arith.select %457, %452, %458 : vector<8x128xi1>, vector<8x128xf32>
    %460 = arith.truncf %459 : vector<8x128xf32> to vector<8x128xbf16>
    %461 = arith.index_cast %c4_i32 : i32 to index
    %c0_113 = arith.constant 0 : index
    %c0_114 = arith.constant 0 : index
    %462 = vector.load %arg18[%461, %c0_113, %c0_114] : memref<8x8x128xbf16, #tpu.memory_space<vmem>>, vector<1x8x128xbf16>
    %463 = vector.shape_cast %462 : vector<1x8x128xbf16> to vector<8x128xbf16>
    %464 = vector.shape_cast %460 : vector<8x128xbf16> to vector<1x8x128xbf16>
    tpu.vector_store %arg18[%461, %c0_113, %c0_114], %464 {strides = array<i32>} : memref<8x8x128xbf16, #tpu.memory_space<vmem>>, vector<1x8x128xbf16>,
    %c5_i32 = arith.constant 5 : i32
    %465 = arith.addi %20, %c5_i32 : i32
    %466 = vector.broadcast %465 : i32 to vector<8x1xi32>
    %467 = arith.cmpi sgt, %19, %466 : vector<8x1xi32>
    %468 = arith.index_cast %c5_i32 : i32 to index
    %c0_115 = arith.constant 0 : index
    %c0_116 = arith.constant 0 : index
    %469 = vector.load %arg17[%468, %c0_115, %c0_116] : memref<8x8x512xf32, #tpu.memory_space<vmem>>, vector<1x8x512xf32>
    %470 = vector.shape_cast %469 : vector<1x8x512xf32> to vector<8x512xf32>
    %471 = arith.truncf %414 : vector<8x128xf32> to vector<8x128xbf16>
    %c0_117 = arith.constant 0 : index
    %c0_118 = arith.constant 0 : index
    %472 = vector.load %arg4[%c0_117, %c0_118] : memref<128x512xbf16, #tpu.memory_space<vmem>>, vector<128x512xbf16>
    %cst_119 = arith.constant dense<0.000000e+00> : vector<8x512xf32>
    %473 = tpu.matmul %471, %472, %cst_119 {dimension_numbers = #tpu.dot_dimension_numbers<[1], [0], [0], [1], [0, 0, 1, 1], [], []>} : vector<8x128xbf16>, vector<128x512xbf16>, vector<8x512xf32> -> vector<8x512xf32>
    %474 = arith.addf %470, %473 : vector<8x512xf32>
    %475 = vector.extract_strided_slice %474 {offsets = [0, 0], sizes = [8, 128], strides = [1, 1]} : vector<8x512xf32> to vector<8x128xf32>
    %476 = arith.negf %475 : vector<8x128xf32>
    %477 = math.exp %476 : vector<8x128xf32>
    %cst_120 = arith.constant 1.000000e+00 : f32
    %478 = vector.broadcast %cst_120 : f32 to vector<8x128xf32>
    %479 = arith.addf %478, %477 : vector<8x128xf32>
    %480 = arith.divf %478, %479 : vector<8x128xf32>
    %481 = vector.extract_strided_slice %474 {offsets = [0, 128], sizes = [8, 128], strides = [1, 1]} : vector<8x512xf32> to vector<8x128xf32>
    %482 = arith.negf %481 : vector<8x128xf32>
    %483 = math.exp %482 : vector<8x128xf32>
    %cst_121 = arith.constant 1.000000e+00 : f32
    %484 = vector.broadcast %cst_121 : f32 to vector<8x128xf32>
    %485 = arith.addf %484, %483 : vector<8x128xf32>
    %486 = arith.divf %484, %485 : vector<8x128xf32>
    %487 = vector.extract_strided_slice %474 {offsets = [0, 256], sizes = [8, 128], strides = [1, 1]} : vector<8x512xf32> to vector<8x128xf32>
    %488 = math.tanh %487 : vector<8x128xf32>
    %489 = vector.extract_strided_slice %474 {offsets = [0, 384], sizes = [8, 128], strides = [1, 1]} : vector<8x512xf32> to vector<8x128xf32>
    %490 = arith.negf %489 : vector<8x128xf32>
    %491 = math.exp %490 : vector<8x128xf32>
    %cst_122 = arith.constant 1.000000e+00 : f32
    %492 = vector.broadcast %cst_122 : f32 to vector<8x128xf32>
    %493 = arith.addf %492, %491 : vector<8x128xf32>
    %494 = arith.divf %492, %493 : vector<8x128xf32>
    %495 = arith.mulf %486, %417 : vector<8x128xf32>
    %496 = arith.mulf %480, %488 : vector<8x128xf32>
    %497 = arith.addf %495, %496 : vector<8x128xf32>
    %498 = math.tanh %497 : vector<8x128xf32>
    %499 = arith.mulf %494, %498 : vector<8x128xf32>
    %500 = vector.shape_cast %467 : vector<8x1xi1> to vector<8x1xi1>
    %501 = vector.broadcast %500 : vector<8x1xi1> to vector<8x128xi1>
    %502 = arith.select %501, %499, %414 : vector<8x128xi1>, vector<8x128xf32>
    %503 = vector.shape_cast %467 : vector<8x1xi1> to vector<8x1xi1>
    %504 = vector.broadcast %503 : vector<8x1xi1> to vector<8x128xi1>
    %505 = arith.select %504, %497, %417 : vector<8x128xi1>, vector<8x128xf32>
    %506 = tpu.concatenate %502, %452 in 1 : vector<8x128xf32>, vector<8x128xf32> -> vector<8x256xf32>
    %507 = arith.truncf %506 : vector<8x256xf32> to vector<8x256xbf16>
    %c0_123 = arith.constant 0 : index
    %c0_124 = arith.constant 0 : index
    %508 = vector.load %arg6[%c0_123, %c0_124] : memref<256x512xbf16, #tpu.memory_space<vmem>>, vector<256x512xbf16>
    %cst_125 = arith.constant dense<0.000000e+00> : vector<8x512xf32>
    %509 = tpu.matmul %507, %508, %cst_125 {dimension_numbers = #tpu.dot_dimension_numbers<[1], [0], [0], [1], [0, 0, 1, 1], [], []>} : vector<8x256xbf16>, vector<256x512xbf16>, vector<8x512xf32> -> vector<8x512xf32>
    %c0_126 = arith.constant 0 : index
    %c0_127 = arith.constant 0 : index
    %510 = vector.load %arg7[%c0_126, %c0_127] : memref<1x512xf32, #tpu.memory_space<vmem>>, vector<1x512xf32>
    %511 = vector.broadcast %510 : vector<1x512xf32> to vector<8x512xf32>
    %512 = arith.addf %509, %511 : vector<8x512xf32>
    %513 = vector.extract_strided_slice %512 {offsets = [0, 0], sizes = [8, 128], strides = [1, 1]} : vector<8x512xf32> to vector<8x128xf32>
    %514 = arith.negf %513 : vector<8x128xf32>
    %515 = math.exp %514 : vector<8x128xf32>
    %cst_128 = arith.constant 1.000000e+00 : f32
    %516 = vector.broadcast %cst_128 : f32 to vector<8x128xf32>
    %517 = arith.addf %516, %515 : vector<8x128xf32>
    %518 = arith.divf %516, %517 : vector<8x128xf32>
    %519 = vector.extract_strided_slice %512 {offsets = [0, 128], sizes = [8, 128], strides = [1, 1]} : vector<8x512xf32> to vector<8x128xf32>
    %520 = arith.negf %519 : vector<8x128xf32>
    %521 = math.exp %520 : vector<8x128xf32>
    %cst_129 = arith.constant 1.000000e+00 : f32
    %522 = vector.broadcast %cst_129 : f32 to vector<8x128xf32>
    %523 = arith.addf %522, %521 : vector<8x128xf32>
    %524 = arith.divf %522, %523 : vector<8x128xf32>
    %525 = vector.extract_strided_slice %512 {offsets = [0, 256], sizes = [8, 128], strides = [1, 1]} : vector<8x512xf32> to vector<8x128xf32>
    %526 = math.tanh %525 : vector<8x128xf32>
    %527 = vector.extract_strided_slice %512 {offsets = [0, 384], sizes = [8, 128], strides = [1, 1]} : vector<8x512xf32> to vector<8x128xf32>
    %528 = arith.negf %527 : vector<8x128xf32>
    %529 = math.exp %528 : vector<8x128xf32>
    %cst_130 = arith.constant 1.000000e+00 : f32
    %530 = vector.broadcast %cst_130 : f32 to vector<8x128xf32>
    %531 = arith.addf %530, %529 : vector<8x128xf32>
    %532 = arith.divf %530, %531 : vector<8x128xf32>
    %533 = arith.mulf %524, %455 : vector<8x128xf32>
    %534 = arith.mulf %518, %526 : vector<8x128xf32>
    %535 = arith.addf %533, %534 : vector<8x128xf32>
    %536 = math.tanh %535 : vector<8x128xf32>
    %537 = arith.mulf %532, %536 : vector<8x128xf32>
    %538 = vector.shape_cast %467 : vector<8x1xi1> to vector<8x1xi1>
    %539 = vector.broadcast %538 : vector<8x1xi1> to vector<8x128xi1>
    %540 = arith.select %539, %537, %452 : vector<8x128xi1>, vector<8x128xf32>
    %541 = vector.shape_cast %467 : vector<8x1xi1> to vector<8x1xi1>
    %542 = vector.broadcast %541 : vector<8x1xi1> to vector<8x128xi1>
    %543 = arith.select %542, %535, %455 : vector<8x128xi1>, vector<8x128xf32>
    %cst_131 = arith.constant 0.000000e+00 : f32
    %544 = vector.shape_cast %467 : vector<8x1xi1> to vector<8x1xi1>
    %545 = vector.broadcast %544 : vector<8x1xi1> to vector<8x128xi1>
    %546 = vector.broadcast %cst_131 : f32 to vector<8x128xf32>
    %547 = arith.select %545, %540, %546 : vector<8x128xi1>, vector<8x128xf32>
    %548 = arith.truncf %547 : vector<8x128xf32> to vector<8x128xbf16>
    %549 = arith.index_cast %c5_i32 : i32 to index
    %c0_132 = arith.constant 0 : index
    %c0_133 = arith.constant 0 : index
    %550 = vector.load %arg18[%549, %c0_132, %c0_133] : memref<8x8x128xbf16, #tpu.memory_space<vmem>>, vector<1x8x128xbf16>
    %551 = vector.shape_cast %550 : vector<1x8x128xbf16> to vector<8x128xbf16>
    %552 = vector.shape_cast %548 : vector<8x128xbf16> to vector<1x8x128xbf16>
    tpu.vector_store %arg18[%549, %c0_132, %c0_133], %552 {strides = array<i32>} : memref<8x8x128xbf16, #tpu.memory_space<vmem>>, vector<1x8x128xbf16>,
    %c6_i32 = arith.constant 6 : i32
    %553 = arith.addi %20, %c6_i32 : i32
    %554 = vector.broadcast %553 : i32 to vector<8x1xi32>
    %555 = arith.cmpi sgt, %19, %554 : vector<8x1xi32>
    %556 = arith.index_cast %c6_i32 : i32 to index
    %c0_134 = arith.constant 0 : index
    %c0_135 = arith.constant 0 : index
    %557 = vector.load %arg17[%556, %c0_134, %c0_135] : memref<8x8x512xf32, #tpu.memory_space<vmem>>, vector<1x8x512xf32>
    %558 = vector.shape_cast %557 : vector<1x8x512xf32> to vector<8x512xf32>
    %559 = arith.truncf %502 : vector<8x128xf32> to vector<8x128xbf16>
    %c0_136 = arith.constant 0 : index
    %c0_137 = arith.constant 0 : index
    %560 = vector.load %arg4[%c0_136, %c0_137] : memref<128x512xbf16, #tpu.memory_space<vmem>>, vector<128x512xbf16>
    %cst_138 = arith.constant dense<0.000000e+00> : vector<8x512xf32>
    %561 = tpu.matmul %559, %560, %cst_138 {dimension_numbers = #tpu.dot_dimension_numbers<[1], [0], [0], [1], [0, 0, 1, 1], [], []>} : vector<8x128xbf16>, vector<128x512xbf16>, vector<8x512xf32> -> vector<8x512xf32>
    %562 = arith.addf %558, %561 : vector<8x512xf32>
    %563 = vector.extract_strided_slice %562 {offsets = [0, 0], sizes = [8, 128], strides = [1, 1]} : vector<8x512xf32> to vector<8x128xf32>
    %564 = arith.negf %563 : vector<8x128xf32>
    %565 = math.exp %564 : vector<8x128xf32>
    %cst_139 = arith.constant 1.000000e+00 : f32
    %566 = vector.broadcast %cst_139 : f32 to vector<8x128xf32>
    %567 = arith.addf %566, %565 : vector<8x128xf32>
    %568 = arith.divf %566, %567 : vector<8x128xf32>
    %569 = vector.extract_strided_slice %562 {offsets = [0, 128], sizes = [8, 128], strides = [1, 1]} : vector<8x512xf32> to vector<8x128xf32>
    %570 = arith.negf %569 : vector<8x128xf32>
    %571 = math.exp %570 : vector<8x128xf32>
    %cst_140 = arith.constant 1.000000e+00 : f32
    %572 = vector.broadcast %cst_140 : f32 to vector<8x128xf32>
    %573 = arith.addf %572, %571 : vector<8x128xf32>
    %574 = arith.divf %572, %573 : vector<8x128xf32>
    %575 = vector.extract_strided_slice %562 {offsets = [0, 256], sizes = [8, 128], strides = [1, 1]} : vector<8x512xf32> to vector<8x128xf32>
    %576 = math.tanh %575 : vector<8x128xf32>
    %577 = vector.extract_strided_slice %562 {offsets = [0, 384], sizes = [8, 128], strides = [1, 1]} : vector<8x512xf32> to vector<8x128xf32>
    %578 = arith.negf %577 : vector<8x128xf32>
    %579 = math.exp %578 : vector<8x128xf32>
    %cst_141 = arith.constant 1.000000e+00 : f32
    %580 = vector.broadcast %cst_141 : f32 to vector<8x128xf32>
    %581 = arith.addf %580, %579 : vector<8x128xf32>
    %582 = arith.divf %580, %581 : vector<8x128xf32>
    %583 = arith.mulf %574, %505 : vector<8x128xf32>
    %584 = arith.mulf %568, %576 : vector<8x128xf32>
    %585 = arith.addf %583, %584 : vector<8x128xf32>
    %586 = math.tanh %585 : vector<8x128xf32>
    %587 = arith.mulf %582, %586 : vector<8x128xf32>
    %588 = vector.shape_cast %555 : vector<8x1xi1> to vector<8x1xi1>
    %589 = vector.broadcast %588 : vector<8x1xi1> to vector<8x128xi1>
    %590 = arith.select %589, %587, %502 : vector<8x128xi1>, vector<8x128xf32>
    %591 = vector.shape_cast %555 : vector<8x1xi1> to vector<8x1xi1>
    %592 = vector.broadcast %591 : vector<8x1xi1> to vector<8x128xi1>
    %593 = arith.select %592, %585, %505 : vector<8x128xi1>, vector<8x128xf32>
    %594 = tpu.concatenate %590, %540 in 1 : vector<8x128xf32>, vector<8x128xf32> -> vector<8x256xf32>
    %595 = arith.truncf %594 : vector<8x256xf32> to vector<8x256xbf16>
    %c0_142 = arith.constant 0 : index
    %c0_143 = arith.constant 0 : index
    %596 = vector.load %arg6[%c0_142, %c0_143] : memref<256x512xbf16, #tpu.memory_space<vmem>>, vector<256x512xbf16>
    %cst_144 = arith.constant dense<0.000000e+00> : vector<8x512xf32>
    %597 = tpu.matmul %595, %596, %cst_144 {dimension_numbers = #tpu.dot_dimension_numbers<[1], [0], [0], [1], [0, 0, 1, 1], [], []>} : vector<8x256xbf16>, vector<256x512xbf16>, vector<8x512xf32> -> vector<8x512xf32>
    %c0_145 = arith.constant 0 : index
    %c0_146 = arith.constant 0 : index
    %598 = vector.load %arg7[%c0_145, %c0_146] : memref<1x512xf32, #tpu.memory_space<vmem>>, vector<1x512xf32>
    %599 = vector.broadcast %598 : vector<1x512xf32> to vector<8x512xf32>
    %600 = arith.addf %597, %599 : vector<8x512xf32>
    %601 = vector.extract_strided_slice %600 {offsets = [0, 0], sizes = [8, 128], strides = [1, 1]} : vector<8x512xf32> to vector<8x128xf32>
    %602 = arith.negf %601 : vector<8x128xf32>
    %603 = math.exp %602 : vector<8x128xf32>
    %cst_147 = arith.constant 1.000000e+00 : f32
    %604 = vector.broadcast %cst_147 : f32 to vector<8x128xf32>
    %605 = arith.addf %604, %603 : vector<8x128xf32>
    %606 = arith.divf %604, %605 : vector<8x128xf32>
    %607 = vector.extract_strided_slice %600 {offsets = [0, 128], sizes = [8, 128], strides = [1, 1]} : vector<8x512xf32> to vector<8x128xf32>
    %608 = arith.negf %607 : vector<8x128xf32>
    %609 = math.exp %608 : vector<8x128xf32>
    %cst_148 = arith.constant 1.000000e+00 : f32
    %610 = vector.broadcast %cst_148 : f32 to vector<8x128xf32>
    %611 = arith.addf %610, %609 : vector<8x128xf32>
    %612 = arith.divf %610, %611 : vector<8x128xf32>
    %613 = vector.extract_strided_slice %600 {offsets = [0, 256], sizes = [8, 128], strides = [1, 1]} : vector<8x512xf32> to vector<8x128xf32>
    %614 = math.tanh %613 : vector<8x128xf32>
    %615 = vector.extract_strided_slice %600 {offsets = [0, 384], sizes = [8, 128], strides = [1, 1]} : vector<8x512xf32> to vector<8x128xf32>
    %616 = arith.negf %615 : vector<8x128xf32>
    %617 = math.exp %616 : vector<8x128xf32>
    %cst_149 = arith.constant 1.000000e+00 : f32
    %618 = vector.broadcast %cst_149 : f32 to vector<8x128xf32>
    %619 = arith.addf %618, %617 : vector<8x128xf32>
    %620 = arith.divf %618, %619 : vector<8x128xf32>
    %621 = arith.mulf %612, %543 : vector<8x128xf32>
    %622 = arith.mulf %606, %614 : vector<8x128xf32>
    %623 = arith.addf %621, %622 : vector<8x128xf32>
    %624 = math.tanh %623 : vector<8x128xf32>
    %625 = arith.mulf %620, %624 : vector<8x128xf32>
    %626 = vector.shape_cast %555 : vector<8x1xi1> to vector<8x1xi1>
    %627 = vector.broadcast %626 : vector<8x1xi1> to vector<8x128xi1>
    %628 = arith.select %627, %625, %540 : vector<8x128xi1>, vector<8x128xf32>
    %629 = vector.shape_cast %555 : vector<8x1xi1> to vector<8x1xi1>
    %630 = vector.broadcast %629 : vector<8x1xi1> to vector<8x128xi1>
    %631 = arith.select %630, %623, %543 : vector<8x128xi1>, vector<8x128xf32>
    %cst_150 = arith.constant 0.000000e+00 : f32
    %632 = vector.shape_cast %555 : vector<8x1xi1> to vector<8x1xi1>
    %633 = vector.broadcast %632 : vector<8x1xi1> to vector<8x128xi1>
    %634 = vector.broadcast %cst_150 : f32 to vector<8x128xf32>
    %635 = arith.select %633, %628, %634 : vector<8x128xi1>, vector<8x128xf32>
    %636 = arith.truncf %635 : vector<8x128xf32> to vector<8x128xbf16>
    %637 = arith.index_cast %c6_i32 : i32 to index
    %c0_151 = arith.constant 0 : index
    %c0_152 = arith.constant 0 : index
    %638 = vector.load %arg18[%637, %c0_151, %c0_152] : memref<8x8x128xbf16, #tpu.memory_space<vmem>>, vector<1x8x128xbf16>
    %639 = vector.shape_cast %638 : vector<1x8x128xbf16> to vector<8x128xbf16>
    %640 = vector.shape_cast %636 : vector<8x128xbf16> to vector<1x8x128xbf16>
    tpu.vector_store %arg18[%637, %c0_151, %c0_152], %640 {strides = array<i32>} : memref<8x8x128xbf16, #tpu.memory_space<vmem>>, vector<1x8x128xbf16>,
    %c7_i32 = arith.constant 7 : i32
    %641 = arith.addi %20, %c7_i32 : i32
    %642 = vector.broadcast %641 : i32 to vector<8x1xi32>
    %643 = arith.cmpi sgt, %19, %642 : vector<8x1xi32>
    %644 = arith.index_cast %c7_i32 : i32 to index
    %c0_153 = arith.constant 0 : index
    %c0_154 = arith.constant 0 : index
    %645 = vector.load %arg17[%644, %c0_153, %c0_154] : memref<8x8x512xf32, #tpu.memory_space<vmem>>, vector<1x8x512xf32>
    %646 = vector.shape_cast %645 : vector<1x8x512xf32> to vector<8x512xf32>
    %647 = arith.truncf %590 : vector<8x128xf32> to vector<8x128xbf16>
    %c0_155 = arith.constant 0 : index
    %c0_156 = arith.constant 0 : index
    %648 = vector.load %arg4[%c0_155, %c0_156] : memref<128x512xbf16, #tpu.memory_space<vmem>>, vector<128x512xbf16>
    %cst_157 = arith.constant dense<0.000000e+00> : vector<8x512xf32>
    %649 = tpu.matmul %647, %648, %cst_157 {dimension_numbers = #tpu.dot_dimension_numbers<[1], [0], [0], [1], [0, 0, 1, 1], [], []>} : vector<8x128xbf16>, vector<128x512xbf16>, vector<8x512xf32> -> vector<8x512xf32>
    %650 = arith.addf %646, %649 : vector<8x512xf32>
    %651 = vector.extract_strided_slice %650 {offsets = [0, 0], sizes = [8, 128], strides = [1, 1]} : vector<8x512xf32> to vector<8x128xf32>
    %652 = arith.negf %651 : vector<8x128xf32>
    %653 = math.exp %652 : vector<8x128xf32>
    %cst_158 = arith.constant 1.000000e+00 : f32
    %654 = vector.broadcast %cst_158 : f32 to vector<8x128xf32>
    %655 = arith.addf %654, %653 : vector<8x128xf32>
    %656 = arith.divf %654, %655 : vector<8x128xf32>
    %657 = vector.extract_strided_slice %650 {offsets = [0, 128], sizes = [8, 128], strides = [1, 1]} : vector<8x512xf32> to vector<8x128xf32>
    %658 = arith.negf %657 : vector<8x128xf32>
    %659 = math.exp %658 : vector<8x128xf32>
    %cst_159 = arith.constant 1.000000e+00 : f32
    %660 = vector.broadcast %cst_159 : f32 to vector<8x128xf32>
    %661 = arith.addf %660, %659 : vector<8x128xf32>
    %662 = arith.divf %660, %661 : vector<8x128xf32>
    %663 = vector.extract_strided_slice %650 {offsets = [0, 256], sizes = [8, 128], strides = [1, 1]} : vector<8x512xf32> to vector<8x128xf32>
    %664 = math.tanh %663 : vector<8x128xf32>
    %665 = vector.extract_strided_slice %650 {offsets = [0, 384], sizes = [8, 128], strides = [1, 1]} : vector<8x512xf32> to vector<8x128xf32>
    %666 = arith.negf %665 : vector<8x128xf32>
    %667 = math.exp %666 : vector<8x128xf32>
    %cst_160 = arith.constant 1.000000e+00 : f32
    %668 = vector.broadcast %cst_160 : f32 to vector<8x128xf32>
    %669 = arith.addf %668, %667 : vector<8x128xf32>
    %670 = arith.divf %668, %669 : vector<8x128xf32>
    %671 = arith.mulf %662, %593 : vector<8x128xf32>
    %672 = arith.mulf %656, %664 : vector<8x128xf32>
    %673 = arith.addf %671, %672 : vector<8x128xf32>
    %674 = math.tanh %673 : vector<8x128xf32>
    %675 = arith.mulf %670, %674 : vector<8x128xf32>
    %676 = vector.shape_cast %643 : vector<8x1xi1> to vector<8x1xi1>
    %677 = vector.broadcast %676 : vector<8x1xi1> to vector<8x128xi1>
    %678 = arith.select %677, %675, %590 : vector<8x128xi1>, vector<8x128xf32>
    %679 = vector.shape_cast %643 : vector<8x1xi1> to vector<8x1xi1>
    %680 = vector.broadcast %679 : vector<8x1xi1> to vector<8x128xi1>
    %681 = arith.select %680, %673, %593 : vector<8x128xi1>, vector<8x128xf32>
    %682 = tpu.concatenate %678, %628 in 1 : vector<8x128xf32>, vector<8x128xf32> -> vector<8x256xf32>
    %683 = arith.truncf %682 : vector<8x256xf32> to vector<8x256xbf16>
    %c0_161 = arith.constant 0 : index
    %c0_162 = arith.constant 0 : index
    %684 = vector.load %arg6[%c0_161, %c0_162] : memref<256x512xbf16, #tpu.memory_space<vmem>>, vector<256x512xbf16>
    %cst_163 = arith.constant dense<0.000000e+00> : vector<8x512xf32>
    %685 = tpu.matmul %683, %684, %cst_163 {dimension_numbers = #tpu.dot_dimension_numbers<[1], [0], [0], [1], [0, 0, 1, 1], [], []>} : vector<8x256xbf16>, vector<256x512xbf16>, vector<8x512xf32> -> vector<8x512xf32>
    %c0_164 = arith.constant 0 : index
    %c0_165 = arith.constant 0 : index
    %686 = vector.load %arg7[%c0_164, %c0_165] : memref<1x512xf32, #tpu.memory_space<vmem>>, vector<1x512xf32>
    %687 = vector.broadcast %686 : vector<1x512xf32> to vector<8x512xf32>
    %688 = arith.addf %685, %687 : vector<8x512xf32>
    %689 = vector.extract_strided_slice %688 {offsets = [0, 0], sizes = [8, 128], strides = [1, 1]} : vector<8x512xf32> to vector<8x128xf32>
    %690 = arith.negf %689 : vector<8x128xf32>
    %691 = math.exp %690 : vector<8x128xf32>
    %cst_166 = arith.constant 1.000000e+00 : f32
    %692 = vector.broadcast %cst_166 : f32 to vector<8x128xf32>
    %693 = arith.addf %692, %691 : vector<8x128xf32>
    %694 = arith.divf %692, %693 : vector<8x128xf32>
    %695 = vector.extract_strided_slice %688 {offsets = [0, 128], sizes = [8, 128], strides = [1, 1]} : vector<8x512xf32> to vector<8x128xf32>
    %696 = arith.negf %695 : vector<8x128xf32>
    %697 = math.exp %696 : vector<8x128xf32>
    %cst_167 = arith.constant 1.000000e+00 : f32
    %698 = vector.broadcast %cst_167 : f32 to vector<8x128xf32>
    %699 = arith.addf %698, %697 : vector<8x128xf32>
    %700 = arith.divf %698, %699 : vector<8x128xf32>
    %701 = vector.extract_strided_slice %688 {offsets = [0, 256], sizes = [8, 128], strides = [1, 1]} : vector<8x512xf32> to vector<8x128xf32>
    %702 = math.tanh %701 : vector<8x128xf32>
    %703 = vector.extract_strided_slice %688 {offsets = [0, 384], sizes = [8, 128], strides = [1, 1]} : vector<8x512xf32> to vector<8x128xf32>
    %704 = arith.negf %703 : vector<8x128xf32>
    %705 = math.exp %704 : vector<8x128xf32>
    %cst_168 = arith.constant 1.000000e+00 : f32
    %706 = vector.broadcast %cst_168 : f32 to vector<8x128xf32>
    %707 = arith.addf %706, %705 : vector<8x128xf32>
    %708 = arith.divf %706, %707 : vector<8x128xf32>
    %709 = arith.mulf %700, %631 : vector<8x128xf32>
    %710 = arith.mulf %694, %702 : vector<8x128xf32>
    %711 = arith.addf %709, %710 : vector<8x128xf32>
    %712 = math.tanh %711 : vector<8x128xf32>
    %713 = arith.mulf %708, %712 : vector<8x128xf32>
    %714 = vector.shape_cast %643 : vector<8x1xi1> to vector<8x1xi1>
    %715 = vector.broadcast %714 : vector<8x1xi1> to vector<8x128xi1>
    %716 = arith.select %715, %713, %628 : vector<8x128xi1>, vector<8x128xf32>
    %717 = vector.shape_cast %643 : vector<8x1xi1> to vector<8x1xi1>
    %718 = vector.broadcast %717 : vector<8x1xi1> to vector<8x128xi1>
    %719 = arith.select %718, %711, %631 : vector<8x128xi1>, vector<8x128xf32>
    %cst_169 = arith.constant 0.000000e+00 : f32
    %720 = vector.shape_cast %643 : vector<8x1xi1> to vector<8x1xi1>
    %721 = vector.broadcast %720 : vector<8x1xi1> to vector<8x128xi1>
    %722 = vector.broadcast %cst_169 : f32 to vector<8x128xf32>
    %723 = arith.select %721, %716, %722 : vector<8x128xi1>, vector<8x128xf32>
    %724 = arith.truncf %723 : vector<8x128xf32> to vector<8x128xbf16>
    %725 = arith.index_cast %c7_i32 : i32 to index
    %c0_170 = arith.constant 0 : index
    %c0_171 = arith.constant 0 : index
    %726 = vector.load %arg18[%725, %c0_170, %c0_171] : memref<8x8x128xbf16, #tpu.memory_space<vmem>>, vector<1x8x128xbf16>
    %727 = vector.shape_cast %726 : vector<1x8x128xbf16> to vector<8x128xbf16>
    %728 = vector.shape_cast %724 : vector<8x128xbf16> to vector<1x8x128xbf16>
    tpu.vector_store %arg18[%725, %c0_170, %c0_171], %728 {strides = array<i32>} : memref<8x8x128xbf16, #tpu.memory_space<vmem>>, vector<1x8x128xbf16>,
    %c8_i32_172 = arith.constant 8 : i32
    %c0_173 = arith.constant 0 : index
    %c0_174 = arith.constant 0 : index
    %729 = vector.load %arg13[%c0_173, %c0_174] : memref<8x128xf32, #tpu.memory_space<vmem>>, vector<8x128xf32>
    tpu.vector_store %arg13[%c0_173, %c0_174], %678 {strides = array<i32>} : memref<8x128xf32, #tpu.memory_space<vmem>>, vector<8x128xf32>,
    %c0_175 = arith.constant 0 : index
    %c0_176 = arith.constant 0 : index
    %730 = vector.load %arg14[%c0_175, %c0_176] : memref<8x128xf32, #tpu.memory_space<vmem>>, vector<8x128xf32>
    tpu.vector_store %arg14[%c0_175, %c0_176], %681 {strides = array<i32>} : memref<8x128xf32, #tpu.memory_space<vmem>>, vector<8x128xf32>,
    %c0_177 = arith.constant 0 : index
    %c0_178 = arith.constant 0 : index
    %731 = vector.load %arg15[%c0_177, %c0_178] : memref<8x128xf32, #tpu.memory_space<vmem>>, vector<8x128xf32>
    tpu.vector_store %arg15[%c0_177, %c0_178], %716 {strides = array<i32>} : memref<8x128xf32, #tpu.memory_space<vmem>>, vector<8x128xf32>,
    %c0_179 = arith.constant 0 : index
    %c0_180 = arith.constant 0 : index
    %732 = vector.load %arg16[%c0_179, %c0_180] : memref<8x128xf32, #tpu.memory_space<vmem>>, vector<8x128xf32>
    tpu.vector_store %arg16[%c0_179, %c0_180], %719 {strides = array<i32>} : memref<8x128xf32, #tpu.memory_space<vmem>>, vector<8x128xf32>,
    %c0_181 = arith.constant 0 : index
    %c0_182 = arith.constant 0 : index
    %c0_183 = arith.constant 0 : index
    %733 = vector.load %arg18[%c0_181, %c0_182, %c0_183] : memref<8x8x128xbf16, #tpu.memory_space<vmem>>, vector<8x8x128xbf16>
    %734 = vector.shape_cast %733 : vector<8x8x128xbf16> to vector<64x128xbf16>
    %c0_184 = arith.constant 0 : index
    %c0_185 = arith.constant 0 : index
    %735 = vector.load %arg8[%c0_184, %c0_185] : memref<128x128xbf16, #tpu.memory_space<vmem>>, vector<128x128xbf16>
    %cst_186 = arith.constant dense<0.000000e+00> : vector<64x128xf32>
    %736 = tpu.matmul %734, %735, %cst_186 {dimension_numbers = #tpu.dot_dimension_numbers<[1], [0], [0], [1], [0, 0, 1, 1], [], []>} : vector<64x128xbf16>, vector<128x128xbf16>, vector<64x128xf32> -> vector<64x128xf32>
    %c0_187 = arith.constant 0 : index
    %c0_188 = arith.constant 0 : index
    %737 = vector.load %arg9[%c0_187, %c0_188] : memref<1x128xf32, #tpu.memory_space<vmem>>, vector<1x128xf32>
    %738 = vector.broadcast %737 : vector<1x128xf32> to vector<64x128xf32>
    %739 = arith.addf %736, %738 : vector<64x128xf32>
    %cst_189 = arith.constant 0.000000e+00 : f32
    %740 = vector.broadcast %cst_189 : f32 to vector<64x128xf32>
    %741 = arith.maximumf %739, %740 : vector<64x128xf32>
    %742 = arith.truncf %741 : vector<64x128xf32> to vector<64x128xbf16>
    %c0_190 = arith.constant 0 : index
    %c0_191 = arith.constant 0 : index
    %743 = vector.load %arg10[%c0_190, %c0_191] : memref<128x128xbf16, #tpu.memory_space<vmem>>, vector<128x128xbf16>
    %cst_192 = arith.constant dense<0.000000e+00> : vector<64x128xf32>
    %744 = tpu.matmul %742, %743, %cst_192 {dimension_numbers = #tpu.dot_dimension_numbers<[1], [0], [0], [1], [0, 0, 1, 1], [], []>} : vector<64x128xbf16>, vector<128x128xbf16>, vector<64x128xf32> -> vector<64x128xf32>
    %c0_193 = arith.constant 0 : index
    %c0_194 = arith.constant 0 : index
    %745 = vector.load %arg11[%c0_193, %c0_194] : memref<1x128xf32, #tpu.memory_space<vmem>>, vector<1x128xf32>
    %746 = vector.broadcast %745 : vector<1x128xf32> to vector<64x128xf32>
    %747 = arith.addf %744, %746 : vector<64x128xf32>
    %748 = vector.shape_cast %747 : vector<64x128xf32> to vector<8x8x128xf32>
    %c0_195 = arith.constant 0 : index
    %c0_196 = arith.constant 0 : index
    %c0_197 = arith.constant 0 : index
    %749 = vector.load %arg12[%c0_195, %c0_196, %c0_197] : memref<8x8x128xf32, #tpu.memory_space<vmem>>, vector<8x8x128xf32>
    tpu.vector_store %arg12[%c0_195, %c0_196, %c0_197], %748 {strides = array<i32>} : memref<8x8x128xf32, #tpu.memory_space<vmem>>, vector<8x8x128xf32>,
    return
  }
  func.func @transform_0(%arg0: i32) -> (i32, i32) {
    %c0_i32 = arith.constant 0 : i32
    %c0_i32_0 = arith.constant 0 : i32
    return %arg0, %c0_i32 : i32, i32
  }
  func.func @transform_1(%arg0: i32) -> (i32, i32) {
    %c0_i32 = arith.constant 0 : i32
    %c0_i32_0 = arith.constant 0 : i32
    %c0_i32_1 = arith.constant 0 : i32
    return %c0_i32, %c0_i32_0 : i32, i32
  }
  func.func @transform_2(%arg0: i32) -> (i32, i32) {
    %c0_i32 = arith.constant 0 : i32
    %c0_i32_0 = arith.constant 0 : i32
    %c0_i32_1 = arith.constant 0 : i32
    return %c0_i32, %c0_i32_0 : i32, i32
  }
  func.func @transform_3(%arg0: i32) -> (i32, i32) {
    %c0_i32 = arith.constant 0 : i32
    %c0_i32_0 = arith.constant 0 : i32
    %c0_i32_1 = arith.constant 0 : i32
    return %c0_i32, %c0_i32_0 : i32, i32
  }
  func.func @transform_4(%arg0: i32) -> (i32, i32) {
    %c0_i32 = arith.constant 0 : i32
    %c0_i32_0 = arith.constant 0 : i32
    %c0_i32_1 = arith.constant 0 : i32
    return %c0_i32, %c0_i32_0 : i32, i32
  }
  func.func @transform_5(%arg0: i32) -> (i32, i32) {
    %c0_i32 = arith.constant 0 : i32
    %c0_i32_0 = arith.constant 0 : i32
    %c0_i32_1 = arith.constant 0 : i32
    return %c0_i32, %c0_i32_0 : i32, i32
  }
  func.func @transform_6(%arg0: i32) -> (i32, i32) {
    %c0_i32 = arith.constant 0 : i32
    %c0_i32_0 = arith.constant 0 : i32
    %c0_i32_1 = arith.constant 0 : i32
    return %c0_i32, %c0_i32_0 : i32, i32
  }
  func.func @transform_7(%arg0: i32) -> (i32, i32) {
    %c0_i32 = arith.constant 0 : i32
    %c0_i32_0 = arith.constant 0 : i32
    %c0_i32_1 = arith.constant 0 : i32
    return %c0_i32, %c0_i32_0 : i32, i32
  }
  func.func @transform_8(%arg0: i32) -> (i32, i32) {
    %c0_i32 = arith.constant 0 : i32
    %c0_i32_0 = arith.constant 0 : i32
    %c0_i32_1 = arith.constant 0 : i32
    return %c0_i32, %c0_i32_0 : i32, i32
  }
  func.func @transform_9(%arg0: i32) -> (i32, i32) {
    %c0_i32 = arith.constant 0 : i32
    %c0_i32_0 = arith.constant 0 : i32
    %c0_i32_1 = arith.constant 0 : i32
    return %c0_i32, %c0_i32_0 : i32, i32
  }
  func.func @transform_10(%arg0: i32) -> (i32, i32) {
    %c0_i32 = arith.constant 0 : i32
    %c0_i32_0 = arith.constant 0 : i32
    %c0_i32_1 = arith.constant 0 : i32
    return %c0_i32, %c0_i32_0 : i32, i32
  }
  func.func @transform_11(%arg0: i32) -> (i32, i32, i32) {
    %c0_i32 = arith.constant 0 : i32
    %c0_i32_0 = arith.constant 0 : i32
    %c0_i32_1 = arith.constant 0 : i32
    return %arg0, %c0_i32, %c0_i32_0 : i32, i32, i32
  }
}

</mosaic_0001>

<bundles_post_ra>
// kernel: tpu_custom_call.1
= control target key start
LH: loop header
LB: loop body
LE: loop exit
PB: predicated region body
PF: predicated region fallthrough
CT: control target
= control target key end

     0   :  { %s12704_s0 = inlined_call_operand.vmem [shape: s32[16,8], index: 0, kind: input, shape index: {}]   ;;  %s12705_s1 = inlined_call_operand.vmem [shape: s32[8,1], index: 1, kind: input, shape index: {}]   ;;  %s12706_s2 = inlined_call_operand.hbm [shape: bf16[128,512], index: 2, kind: input, shape index: {}]   ;;  %s12707_s3 = inlined_call_operand.hbm [shape: bf16[128,512], index: 3, kind: input, shape index: {}]   ;;  %s12708_s4 = inlined_call_operand.vmem [shape: f32[1,512], index: 4, kind: input, shape index: {}]   ;;  %s12709_s5 = inlined_call_operand.hbm [shape: bf16[256,512], index: 5, kind: input, shape index: {}]   ;;  %s12710_s6 = inlined_call_operand.vmem [shape: f32[1,512], index: 6, kind: input, shape index: {}]   ;;  %s12711_s7 = inlined_call_operand.hbm [shape: bf16[128,128], index: 7, kind: input, shape index: {}]   ;;  %s12712_s8 = inlined_call_operand.vmem [shape: f32[1,128], index: 8, kind: input, shape index: {}]   ;;  %s12713_s9 = inlined_call_operand.hbm [shape: bf16[128,128], index: 9, kind: input, shape index: {}]   ;;  %s12714_s10 = inlined_call_operand.vmem [shape: f32[1,128], index: 10, kind: input, shape index: {}]   ;;  %s12715_s11 = inlined_call_operand.hbm [shape: f32[16,8,128], index: 11, kind: output, shape index: {}]  }
   0x1   :  { %12974 = sst [smem:[#allocation112_spill]] %s12707_s3 }
   0x2   :  { %16 = vsyncpa [#allocation9], 0 }
   0x3   :  { %17 = vsyncpa [#allocation12], 0 }
   0x4   :  { %18 = vsyncpa [#allocation15], 0 }
   0x5   :  { %19 = vsyncpa [#allocation10], 0 }
   0x6   :  { %21 = vsyncpa [#allocation10 + $0x1], 0  ;;  %s10409_s17 = smov 0   ;;  %s10411_s18 = smov 0  }
   0x7   :  { %s10413_s19 = smov 0   ;;  %s10415_s20 = smov 0  }
   0x8 LB: > { %12975 = sst [smem:[#allocation22_spill]] %s10328_s19  ;;  %s10430_s21 = sadd.s32 4294967295, %s10332_s20   ;;  %s10332_s20 = sphi %s10415_s20, %s13543_s20   ;;  %s10328_s19 = sphi %s10413_s19, %s13540_s19   ;;  %s10324_s18 = sphi %s10411_s18, %s13542_s18   ;;  %s10320_s17 = sphi %s10409_s17, %s13541_s17  }
   0x9   : > { %s8126_s22 = sadd.s32 4294967294, %s10332_s20   ;;  %s10434_s23 = sadd.s32 1, %s10332_s20  }
   0xa   : > { %s270_s24 = sadd.s32 1, %s10328_s19  ;;  %s267_s25 = ssub.s32 %s10332_s20, %s10434_s23 }
   0xb   : > { %p280_p0 = scmp.ne.s32.totalorder %s10328_s19, %s10324_s18  ;;  %p268_p1 = scmp.eq.s32.totalorder %s267_s25, 0 }
   0xc   : > { %p281_p2 = scmp.eq.s32.totalorder %s10430_s21, 1  ;;  %p286_p3 = scmp.ne.s32.totalorder %s10324_s18, %s10320_s17 }
   0xd   : > { %p287_p4 = scmp.eq.s32.totalorder %s8126_s22, 1  ;;  %p8127_p7 = scmp.ge.s32.totalorder %s10332_s20, 1 }
   0xe   : > { %s10445_s26 = scalar_select %p268_p1, %s10328_s19, %s270_s24  }
   0xf   : > { %p10447_p5 = por %p281_p2, %p280_p0  ;;  %p10451_p6 = por %p287_p4, %p286_p3 }
  0x10   : > { %12976 = sst [smem:[#allocation23_spill]] %s10445_s26  ;;  %p294_p8 = scmp.lt.s32.totalorder %s10332_s20, 3 }
  0x11   : > { %s12978_s28 = scalar_select %p10451_p6, 1, 0 }
  0x12   : > { %p12721_p10 = scmp.eq.s32.totalorder %s10430_s21, 0  ;;  %p10459_p11 = pnand %p8127_p7, %p294_p8 }
  0x13   : > { %s10334_s30 = smov [#allocation11]   ;;  %s10335_s14 = smov [#allocation14]  }
  0x14   : > { %p9146_p12 = pneg %p10459_p11  ;;  %s322_s12 = sshll.u32 %s10334_s30, 4  ;;  %s323_s12 = int_to_ptr.vmem [resolvable:$true] %s322_s12 }
  0x15   : > { %s354_s15 = sshll.u32 %s10335_s14, 4  ;;  %s10141_s22 = scalar_lea.vmem %s323_s12, 4096  ;;  %s355_s15 = int_to_ptr.vmem [resolvable:$true] %s354_s15 }
  0x16   : > { %p10467_p13 = pnand %p12721_p10, %p9146_p12  ;;  %p10142_p1 = scmp.ne.s32.totalorder %s323_s12, %s10141_s22 }
  0x17   : > { %p10149_p4 = scmp.lt.s32.totalorder %s323_s12, %s323_s12  ;;  %p10150_p7 = scmp.lt.s32.totalorder %s10141_s22, %s10141_s22 }
  0x18   : > { %p10473_p0 = pneg %p10467_p13 }
  0x19   : > { %p10151_p8 = por %p10150_p7, %p10149_p4 }
  0x1a   : > { %p10144_p2 = pnand %p10142_p1, %p10473_p0 }
  0x1c   : > { %p10145_p3 = pneg %p10144_p2 }
  0x1e   : > { %p10152_p12 = pnand %p10151_p8, %p10145_p3 }
  0x20   : > { %10155 = shalt.err (!%p10152_p12)
}
  0x21   : > { %s12717_s24 = smov 256   ;;  %s12719_s25 = smov 16  }
  0x22   : > { %s12982_s3 = sld [smem:[#allocation112_spill]]  ;;  %s10167_s26 = scalar_lea.vmem %s355_s15, 1024 }
  0x23   : > { %p10168_p1 = scmp.ne.s32.totalorder %s355_s15, %s10167_s26  ;;  %p10175_p4 = scmp.lt.s32.totalorder %s355_s15, %s355_s15 }
  0x24   : > { %p10176_p3 = scmp.lt.s32.totalorder %s10167_s26, %s10167_s26 }
  0x25   : > { %p10170_p2 = pnand %p10168_p1, %p10473_p0 }
  0x26   : > { %p10177_p7 = por %p10176_p3, %p10175_p4 }
  0x27   : > { %p10171_p9 = pneg %p10170_p2 }
  0x28   : > { %9152 = dma.hbm_to_vmem [thread:$0]  (!%p10467_p13), %s12982_s3, 4096, %s323_s12, [#allocation12], %s12717_s24, %s12717_s24, %s12719_s25  }
  0x29   : > { %p10178_p8 = pnand %p10177_p7, %p10171_p9 }
  0x2b   : > { %10181 = shalt.err (!%p10178_p8)
}
  0x2c   : > { %s12722_s22 = smov 64   ;;  %s10339_s19 = smov 4  }
  0x2d   : > { %9158 = dma.hbm_to_vmem [thread:$0]  (!%p10467_p13), %s12711_s7, 1024, %s355_s15, [#allocation15], %s12722_s22, %s12722_s22, %s10339_s19  }
  0x2e   : > { %s10340_s14 = smov [#allocation8]   ;;  %s10341_s25 = smov [#allocation13]  }
  0x2f   : > { %s309_s24 = sshll.u32 %s10340_s14, 4  ;;  %s338_s3 = sshll.u32 %s10341_s25, 4  ;;  %s310_s24 = int_to_ptr.vmem [resolvable:$true] %s309_s24  ;;  %s339_s3 = int_to_ptr.vmem [resolvable:$true] %s338_s3 }
  0x30   : > { %s10193_s26 = scalar_lea.vmem %s310_s24, 4096  ;;  %p10201_p2 = scmp.lt.s32.totalorder %s310_s24, %s310_s24 }
  0x31   : > { %p10194_p9 = scmp.ne.s32.totalorder %s310_s24, %s10193_s26  ;;  %p10202_p4 = scmp.lt.s32.totalorder %s10193_s26, %s10193_s26 }
  0x33   : > { %p10196_p12 = pnand %p10194_p9, %p10473_p0  ;;  %p10203_p3 = por %p10202_p4, %p10201_p2 }
  0x35   : > { %p10197_p1 = pneg %p10196_p12 }
  0x37   : > { %p10204_p7 = pnand %p10203_p3, %p10197_p1 }
  0x39   : > { %10207 = shalt.err (!%p10204_p7)
}
  0x3a   : > { %s12983_s30 = smov 16   ;;  %s12984_s15 = smov 256  }
  0x3b   : > { %9149 = dma.hbm_to_vmem [thread:$0]  (!%p10467_p13), %s12706_s2, 4096, %s310_s24, [#allocation9], %s12984_s15, %s12984_s15, %s12983_s30  }
  0x3c   : > { %s10219_s25 = scalar_lea.vmem %s339_s3, 8192  ;;  %p10227_p10 = scmp.lt.s32.totalorder %s339_s3, %s339_s3 }
  0x3d   : > { %p10220_p8 = scmp.ne.s32.totalorder %s339_s3, %s10219_s25  ;;  %p10228_p6 = scmp.lt.s32.totalorder %s10219_s25, %s10219_s25 }
  0x3f   : > { %p10222_p9 = pnand %p10220_p8, %p10473_p0  ;;  %p10229_p2 = por %p10228_p6, %p10227_p10 }
  0x41   : > { %p10223_p12 = pneg %p10222_p9 }
  0x43   : > { %p10230_p1 = pnand %p10229_p2, %p10223_p12 }
  0x45   : > { %10233 = shalt.err (!%p10230_p1)
}
  0x46   : > { %9155 = dma.hbm_to_vmem [thread:$0]  (!%p10467_p13), %s12709_s5, 8192, %s339_s3, [#allocation12], %s12984_s15, %s12984_s15, %s12983_s30  }
  0x47   : > { %s10342_s24 = smov [#allocation16]  }
  0x48   : > { %s370_s12 = sshll.u32 %s10342_s24, 4  ;;  %s371_s12 = int_to_ptr.vmem [resolvable:$true] %s370_s12 }
  0x49   : > { %s10245_s14 = scalar_lea.vmem %s371_s12, 1024  ;;  %p10253_p10 = scmp.lt.s32.totalorder %s371_s12, %s371_s12 }
  0x4a   : > { %p10246_p4 = scmp.ne.s32.totalorder %s371_s12, %s10245_s14  ;;  %p10254_p7 = scmp.lt.s32.totalorder %s10245_s14, %s10245_s14 }
  0x4c   : > { %p10248_p3 = pnand %p10246_p4, %p10473_p0  ;;  %p10255_p8 = por %p10254_p7, %p10253_p10 }
  0x4e   : > { %p10249_p6 = pneg %p10248_p3 }
  0x50   : > { %p10256_p9 = pnand %p10255_p8, %p10249_p6 }
  0x52   : > { %10259 = shalt.err (!%p10256_p9)
}
  0x53   : > { %s12985_s25 = smov 64   ;;  %396 = sbr.rel (%p10459_p11) target bundleno = 3190 (0xc76), region = 64 }
  0x54   : > { %9161 = dma.hbm_to_vmem [thread:$0]  (!%p10467_p13), %s12713_s9, 1024, %s371_s12, [#allocation15], %s12985_s25, %s12985_s25, %s10339_s19  }
  0x58   : > { %p12986_p0 = scmp.eq.s32.totalorder %s10430_s21, 0 }
  0x5a   : > { %10303 = dma.done.wait (%p12986_p0), [#allocation9], 4096   ;;  %p12987_p12 = pmov %p12986_p0 }
  0x5b   : > { %p12988_p2 = pmov %p12986_p0 }
  0x5c   : > { %10305 = vsyncadd (%p12987_p12), [#allocation9], 4294963200 }
  0x5d   : > { %10307 = dma.done.wait (%p12988_p2), [#allocation12], 12288   ;;  %p12989_p1 = pmov %p12986_p0 }
  0x5e   : > { %p12990_p4 = pmov %p12986_p0 }
  0x5f   : > { %10309 = vsyncadd (%p12989_p1), [#allocation12], 4294955008 }
  0x60   : > { %10311 = dma.done.wait (%p12990_p4), [#allocation15], 2048   ;;  %p12991_p13 = pmov %p12986_p0 }
  0x61   : > { %s448_s19 = sand.u32 1, %s10324_s18   ;;  %p451_p11 = scmp.lt.s32.totalorder %s10430_s21, 1 }
  0x62   : > { %10313 = vsyncadd (%p12991_p13), [#allocation15], 4294965248  ;;  %s8140_s29 = sshll.u32 %s448_s19, 6  ;;  %p12992_p3 = scmp.ne.s32.totalorder %s10430_s21, 0 }
  0x63   : > { %s452_s13 = scalar_select %p451_p11, %s10430_s21, 1 }
  0x64   : > { %s10549_s24 = scalar_lea.vmem [#allocation17], %s8140_s29  ;;  %460 = sbr.rel (%p12992_p3) target bundleno = 108 (0x6c), region = 88 }
  0x65   : > { %s8141_s16 = sshll.u32 %s452_s13, 3 }
  0x66   : > { %s454_s26 = scalar_lea.vmem %s12704_s0, %s8141_s16 }
  0x69   : > { %v10343_v0 = vmov 0.0  }
  0x6a   : > { %461 = vst [vmem:[#allocation2] sm:$0xff] %v10343_v0  ;;  %462 = vst [vmem:[#allocation3] sm:$0xff] %v10343_v0 }
  0x6b   : > { %463 = vst [vmem:[#allocation4] sm:$0xff] %v10343_v0  ;;  %464 = vst [vmem:[#allocation5] sm:$0xff] %v10343_v0 }
  0x6c PF: > { %v466_v1 = vlaneseq  ;;  %v465_v2 = vld [vmem:[%s454_s26] sm:$0xff]  ;;  %v12723_v5 = vmov 0   ;;  %v9228_v7 = vld [vmem:[#allocation8 + $0xec] ss:$16 sps:$4 sm:$0xff]   ;;  %v9230_v8 = vld [vmem:[#allocation8 + $0xe8] ss:$16 sps:$4 sm:$0xff]  }
  0x6d   : > { %v9225_v3 = vld [vmem:[#allocation8 + $0xe4] ss:$16 sps:$4 sm:$0xff]   ;;  %v9227_v4 = vld [vmem:[#allocation8 + $0xe0] ss:$16 sps:$4 sm:$0xff]   ;;  %826 = vmatprep.mubr.bf16.mxu0 %v12723_v5  ;;  %899 = vmatprep.mubr.bf16.mxu1 %v12723_v5  ;;  %v9234_v17 = vld [vmem:[#allocation8 + $0xcc] ss:$16 sps:$4 sm:$0xff]  }
  0x6e   : > { %v467_v6 = vshrl.u32 %v466_v1, 7  ;;  %9223 = vset.pattern.permute.xlu0 %v12723_v5  ;;  %9224 = vset.pattern.permute.xlu1 %v12723_v5  ;;  %v9231_v9 = vld [vmem:[#allocation8 + $0xc4] ss:$16 sps:$4 sm:$0xff]   ;;  %v9233_v14 = vld [vmem:[#allocation8 + $0xc0] ss:$16 sps:$4 sm:$0xff]   ;;  %s10571_s12 = sshll.u32 %s10430_s21, 3 }
  0x6f   : > { %794 = vmatprep.subr.bf16.mxu0 %v9225_v3  ;;  %867 = vmatprep.subr.bf16.mxu1 %v9228_v7  ;;  %v9236_v18 = vld [vmem:[#allocation8 + $0xc8] ss:$16 sps:$4 sm:$0xff]   ;;  %v9237_v21 = vld [vmem:[#allocation8 + $0xa4] ss:$16 sps:$4 sm:$0xff]   ;;  %v9240_v24 = vld [vmem:[#allocation8 + $0xac] ss:$16 sps:$4 sm:$0xff]   ;;  %v978_v55 = vstv %s10571_s12 }
  0x70   : > { %v10558_v10 = vsub.s32 0, %v467_v6  ;;  %v10560_v11 = vsub.s32 2, %v467_v6  ;;  %v10562_v12 = vsub.s32 1, %v467_v6  ;;  %v10564_v13 = vsub.s32 3, %v467_v6  ;;  %795 = vmatpush1.bf16.msra.mxu0 %v9227_v4  ;;  %868 = vmatpush1.bf16.msra.mxu1 %v9230_v8  ;;  %v9239_v25 = vld [vmem:[#allocation8 + $0xa0] ss:$16 sps:$4 sm:$0xff]  }
  0x71   : > { %796 = vmatprep.subr.bf16.mxu0 %v9231_v9  ;;  %v503_v19 = vsub.s32 5, %v467_v6  ;;  %v496_v20 = vsub.s32 4, %v467_v6  ;;  %869 = vmatprep.subr.bf16.mxu1 %v9234_v17  ;;  %v9242_v26 = vld [vmem:[#allocation8 + $0xa8] ss:$16 sps:$4 sm:$0xff]   ;;  %v9243_v27 = vld [vmem:[#allocation8 + $0x84] ss:$16 sps:$4 sm:$0xff]  }
  0x72   : > { %12993 = vst [vmem:[#allocation24_spill] sm:$0xff] %v10558_v10  ;;  %12994 = vst [vmem:[#allocation25_spill] sm:$0xff] %v10560_v11  ;;  %v469_v15 = vrot.slane %v465_v2, %v10558_v10  ;;  %v483_v16 = vrot.slane %v465_v2, %v10560_v11  ;;  %v476_v22 = vrot.slane %v465_v2, %v10562_v12  ;;  %v9246_v28 = vld [vmem:[#allocation8 + $0x8c] ss:$16 sps:$4 sm:$0xff]   ;;  %v517_v31 = vsub.s32 7, %v467_v6  ;;  %s3487_s14 = sadd.s32 3, %s10571_s12 }
  0x73   : > { %12995 = vst [vmem:[#allocation26_spill] sm:$0xff] %v10562_v12  ;;  %12996 = vst [vmem:[#allocation27_spill] sm:$0xff] %v10564_v13  ;;  %v490_v23 = vrot.slane %v465_v2, %v10564_v13  ;;  %v504_v29 = vrot.slane %v465_v2, %v503_v19  ;;  %v497_v30 = vrot.slane %v465_v2, %v496_v20  ;;  %v510_v32 = vsub.s32 6, %v467_v6  ;;  %v9245_v33 = vld [vmem:[#allocation8 + $0x80] ss:$16 sps:$4 sm:$0xff]   ;;  %s5161_s25 = sadd.s32 5, %s10571_s12 }
  0x74   : > { %471 = vbcast.lane.b32.xlu0 %v469_v15, 256  ;;  %485 = vbcast.lane.b32.xlu1 %v483_v16, 256  ;;  %v9248_v34 = vld [vmem:[#allocation8 + $0x88] ss:$16 sps:$4 sm:$0xff]   ;;  %v9249_v35 = vld [vmem:[#allocation8 + $0x64] ss:$16 sps:$4 sm:$0xff]   ;;  %v518_v37 = vrot.slane %v465_v2, %v517_v31  ;;  %v3488_v56 = vstv %s3487_s14  ;;  %v5162_v59 = vstv %s5161_s25 }
  0x75   : > { %797 = vmatpush1.bf16.msra.mxu0 %v9233_v14  ;;  %870 = vmatpush1.bf16.msra.mxu1 %v9236_v18  ;;  %v9252_v36 = vld [vmem:[#allocation8 + $0x6c] ss:$16 sps:$4 sm:$0xff]   ;;  %v511_v38 = vrot.slane %v465_v2, %v510_v32  ;;  %v9251_v39 = vld [vmem:[#allocation8 + $0x60] ss:$16 sps:$4 sm:$0xff]   ;;  %v9254_v40 = vld [vmem:[#allocation8 + $0x68] ss:$16 sps:$4 sm:$0xff]  }
  0x76   : > { %798 = vmatprep.subr.bf16.mxu0 %v9237_v21  ;;  %871 = vmatprep.subr.bf16.mxu1 %v9240_v24  ;;  %v9255_v41 = vld [vmem:[#allocation8 + $0x44] ss:$16 sps:$4 sm:$0xff]   ;;  %v9258_v42 = vld [vmem:[#allocation8 + $0x4c] ss:$16 sps:$4 sm:$0xff]   ;;  %v9257_v43 = vld [vmem:[#allocation8 + $0x40] ss:$16 sps:$4 sm:$0xff]  }
  0x77   : > { %v9260_v44 = vld [vmem:[#allocation8 + $0x48] ss:$16 sps:$4 sm:$0xff]   ;;  %v9261_v45 = vld [vmem:[#allocation8 + $0x24] ss:$16 sps:$4 sm:$0xff]   ;;  %v9264_v46 = vld [vmem:[#allocation8 + $0x2c] ss:$16 sps:$4 sm:$0xff]  }
  0x78   : > { %478 = vbcast.lane.b32.xlu0 %v476_v22, 256  ;;  %492 = vbcast.lane.b32.xlu1 %v490_v23, 256  ;;  %v9263_v47 = vld [vmem:[#allocation8 + $0x20] ss:$16 sps:$4 sm:$0xff]   ;;  %v9266_v48 = vld [vmem:[#allocation8 + $0x28] ss:$16 sps:$4 sm:$0xff]  }
  0x79   : > { %799 = vmatpush1.bf16.msra.mxu0 %v9239_v25  ;;  %872 = vmatpush1.bf16.msra.mxu1 %v9242_v26  ;;  %v9267_v49 = vld [vmem:[#allocation8 + $0x4] ss:$16 sps:$4 sm:$0xff]   ;;  %v9270_v50 = vld [vmem:[#allocation8 + $0xc] ss:$16 sps:$4 sm:$0xff]   ;;  %v9269_v51 = vld [vmem:[#allocation8] ss:$16 sps:$4 sm:$0xff]  }
  0x7a   : > { %800 = vmatprep.subr.bf16.mxu0 %v9243_v27  ;;  %873 = vmatprep.subr.bf16.mxu1 %v9246_v28  ;;  %v9272_v52 = vld [vmem:[#allocation8 + $0x8] ss:$16 sps:$4 sm:$0xff]   ;;  %v9275_v53 = vld [vmem:[#allocation11 + $0xe4] ss:$16 sps:$4 sm:$0xff]   ;;  %v9278_v54 = vld [vmem:[#allocation11 + $0xec] ss:$16 sps:$4 sm:$0xff]  }
  0x7b   : > { %v972_v57 = vld [vmem:[%s12705_s1] sm:$0xff]  ;;  %s6835_s29 = sadd.s32 7, %s10571_s12  ;;  %v523_v3 = vand.u32 127, %v466_v1  ;;  %v9276_v6 = vld [vmem:[#allocation11 + $0xe8] ss:$16 sps:$4 sm:$0xff]   ;;  %s1813_s13 = sadd.s32 1, %s10571_s12 }
  0x7c   : > { %506 = vbcast.lane.b32.xlu1 %v504_v29, 256  ;;  %499 = vbcast.lane.b32.xlu0 %v497_v30, 256  ;;  %vm979_vm0 = vcmp.gt.s32.totalorder %v972_v57, %v978_v55  ;;  %vm3489_vm1 = vcmp.gt.s32.totalorder %v972_v57, %v3488_v56  ;;  %vm5163_vm2 = vcmp.gt.s32.totalorder %v972_v57, %v5162_v59  ;;  %v6836_v61 = vstv %s6835_s29  ;;  %v9273_v4 = vld [vmem:[#allocation11 + $0xe0] ss:$16 sps:$4 sm:$0xff]   ;;  %v10585_v7 = vld [vmem:[#allocation11 + $0xc4] ss:$16 sps:$4 sm:$0xff]  }
  0x7d   : > { %801 = vmatpush1.bf16.msra.mxu0 %v9245_v33  ;;  %874 = vmatpush1.bf16.msra.mxu1 %v9248_v34  ;;  %v1287_v58 = vsel %vm979_vm0, 1, %v12723_v5  ;;  %v3797_v60 = vsel %vm3489_vm1, 1, %v12723_v5  ;;  %v5471_v62 = vsel %vm5163_vm2, 1, %v12723_v5  ;;  %vm6837_vm3 = vcmp.gt.s32.totalorder %v972_v57, %v6836_v61  ;;  %v10587_v8 = vld [vmem:[#allocation11 + $0xcc] ss:$16 sps:$4 sm:$0xff]   ;;  %s2650_s16 = sadd.s32 2, %s10571_s12 }
  0x7e   : > { %802 = vmatprep.subr.bf16.mxu0 %v9249_v35  ;;  %875 = vmatprep.subr.bf16.mxu1 %v9252_v36  ;;  %v7145_v63 = vsel %vm6837_vm3, 1, %v12723_v5  ;;  %v10589_v15 = vld [vmem:[#allocation11 + $0xc0] ss:$16 sps:$4 sm:$0xff]   ;;  %v10591_v16 = vld [vmem:[#allocation11 + $0xc8] ss:$16 sps:$4 sm:$0xff]   ;;  %s4324_s30 = sadd.s32 4, %s10571_s12 }
  0x7f   : > { %v10345_v17 = vmov 1.0|1.0   ;;  %v10595_v1 = vld [vmem:[#allocation11 + $0xa4] ss:$16 sps:$4 sm:$0xff]   ;;  %v10597_v18 = vld [vmem:[#allocation11 + $0xac] ss:$16 sps:$4 sm:$0xff]  }
  0x80   : > { %520 = vbcast.lane.b32.xlu1 %v518_v37, 256  ;;  %513 = vbcast.lane.b32.xlu0 %v511_v38, 256  ;;  %v10607_v22 = vld [vmem:[#allocation11 + $0xa0] ss:$16 sps:$4 sm:$0xff]   ;;  %v10609_v23 = vld [vmem:[#allocation11 + $0xa8] ss:$16 sps:$4 sm:$0xff]  }
  0x81   : > { %803 = vmatpush1.bf16.msra.mxu0 %v9251_v39  ;;  %876 = vmatpush1.bf16.msra.mxu1 %v9254_v40  ;;  %v10611_v24 = vld [vmem:[#allocation11 + $0x84] ss:$16 sps:$4 sm:$0xff]   ;;  %v10613_v25 = vld [vmem:[#allocation11 + $0x8c] ss:$16 sps:$4 sm:$0xff]   ;;  %v10619_v26 = vld [vmem:[#allocation11 + $0x80] ss:$16 sps:$4 sm:$0xff]  }
  0x82   : > { %804 = vmatprep.subr.bf16.mxu0 %v9255_v41  ;;  %877 = vmatprep.subr.bf16.mxu1 %v9258_v42  ;;  %v10621_v27 = vld [vmem:[#allocation11 + $0x88] ss:$16 sps:$4 sm:$0xff]   ;;  %v10633_v31 = vld [vmem:[#allocation11 + $0x64] ss:$16 sps:$4 sm:$0xff]   ;;  %v10635_v32 = vld [vmem:[#allocation11 + $0x6c] ss:$16 sps:$4 sm:$0xff]  }
  0x83   : > { %v10643_v33 = vld [vmem:[#allocation11 + $0x60] ss:$16 sps:$4 sm:$0xff]   ;;  %v10645_v34 = vld [vmem:[#allocation11 + $0x68] ss:$16 sps:$4 sm:$0xff]   ;;  %v10647_v35 = vld [vmem:[#allocation11 + $0x44] ss:$16 sps:$4 sm:$0xff]  }
  0x84   : > { %1289 = vperm.xlu0 %9223, %v1287_v58   ;;  %v10649_v36 = vld [vmem:[#allocation11 + $0x4c] ss:$16 sps:$4 sm:$0xff]   ;;  %v10659_v38 = vld [vmem:[#allocation11 + $0x40] ss:$16 sps:$4 sm:$0xff]   ;;  %v10661_v39 = vld [vmem:[#allocation11 + $0x48] ss:$16 sps:$4 sm:$0xff]  }
  0x85   : > { %805 = vmatpush1.bf16.msra.mxu0 %v9257_v43  ;;  %878 = vmatpush1.bf16.msra.mxu1 %v9260_v44  ;;  %v10669_v40 = vld [vmem:[#allocation11 + $0x24] ss:$16 sps:$4 sm:$0xff]   ;;  %v10671_v41 = vld [vmem:[#allocation11 + $0x2c] ss:$16 sps:$4 sm:$0xff]   ;;  %v10679_v42 = vld [vmem:[#allocation11 + $0x20] ss:$16 sps:$4 sm:$0xff]  }
  0x86   : > { %806 = vmatprep.subr.bf16.mxu0 %v9261_v45  ;;  %879 = vmatprep.subr.bf16.mxu1 %v9264_v46  ;;  %v10681_v43 = vld [vmem:[#allocation11 + $0x28] ss:$16 sps:$4 sm:$0xff]   ;;  %v10683_v44 = vld [vmem:[#allocation11 + $0x4] ss:$16 sps:$4 sm:$0xff]   ;;  %v10685_v45 = vld [vmem:[#allocation11 + $0xc] ss:$16 sps:$4 sm:$0xff]  }
  0x87   : > { %v10691_v46 = vld [vmem:[#allocation11] ss:$16 sps:$4 sm:$0xff]   ;;  %v10727_v55 = vld [vmem:[#allocation13 + $0xcc] ss:$16 sps:$4 sm:$0xff]   ;;  %v10731_v57 = vld [vmem:[#allocation13 + $0xc8] ss:$16 sps:$4 sm:$0xff]  }
  0x88   : > { %3799 = vperm.xlu0 %9223, %v3797_v60   ;;  %v10729_v56 = vld [vmem:[#allocation13 + $0xc0] ss:$16 sps:$4 sm:$0xff]   ;;  %v10737_v58 = vld [vmem:[#allocation13 + $0xa4] ss:$16 sps:$4 sm:$0xff]   ;;  %v10739_v59 = vld [vmem:[#allocation13 + $0xac] ss:$16 sps:$4 sm:$0xff]  }
  0x89   : > { %807 = vmatpush1.bf16.msra.mxu0 %v9263_v47  ;;  %880 = vmatpush1.bf16.msra.mxu1 %v9266_v48  ;;  %v10693_v47 = vld [vmem:[#allocation11 + $0x8] ss:$16 sps:$4 sm:$0xff]   ;;  %v10695_v48 = vld [vmem:[#allocation2] sm:$0xff]  ;;  %v10787_v28 = vld [vmem:[#allocation13 + $0x2c] ss:$16 sps:$4 sm:$0xff]   ;;  %s5998_s22 = sadd.s32 6, %s10571_s12 }
  0x8a   : > { %808 = vmatprep.subr.bf16.mxu0 %v9267_v49  ;;  %881 = vmatprep.subr.bf16.mxu1 %v9270_v50  ;;  %v984_v49 = vpack.c.bf16 %v10695_v48, %v10695_v48  ;;  %v10713_v50 = vld [vmem:[#allocation13 + $0xe4] ss:$16 sps:$4 sm:$0xff]   ;;  %v10741_v60 = vld [vmem:[#allocation13 + $0xa0] ss:$16 sps:$4 sm:$0xff]   ;;  %v10743_v61 = vld [vmem:[#allocation13 + $0xa8] ss:$16 sps:$4 sm:$0xff]  }
  0x8b   : > { %13003 = vst [vmem:[#allocation28_spill] sm:$0xff] %v10743_v61  ;;  %v10785_v21 = vld [vmem:[#allocation13 + $0x24] ss:$16 sps:$4 sm:$0xff]   ;;  %13017 = vst [vmem:[#allocation42_spill] sm:$0xff] %v10787_v28  ;;  %s9051_s25 = sshll.u32 %s10430_s21, 10  ;;  %s12664_s21 = scalar_lea.sflag [#allocation10], %s448_s19 }
  0x8c   : > { %5473 = vperm.xlu0 %9223, %v5471_v62   ;;  %v10749_v62 = vld [vmem:[#allocation13 + $0x84] ss:$16 sps:$4 sm:$0xff]   ;;  %13016 = vst [vmem:[#allocation41_spill] sm:$0xff] %v10785_v21  ;;  %s12656_s29 = scalar_lea.hbm %s12715_s11, %s9051_s25 }
  0x8d   : > { %809 = vmatpush1.bf16.msra.mxu0 %v9269_v51  ;;  %882 = vmatpush1.bf16.msra.mxu1 %v9272_v52  ;;  %v10715_v51 = vld [vmem:[#allocation13 + $0xec] ss:$16 sps:$4 sm:$0xff]   ;;  %v10717_v52 = vld [vmem:[#allocation13 + $0xe0] ss:$16 sps:$4 sm:$0xff]   ;;  %13004 = vst [vmem:[#allocation29_spill] sm:$0xff] %v10749_v62 }
  0x8e   : > { %1177 = vmatprep.subr.bf16.mxu0 %v9275_v53  ;;  %1218 = vmatprep.subr.bf16.mxu1 %v9278_v54  ;;  %v10719_v53 = vld [vmem:[#allocation13 + $0xe8] ss:$16 sps:$4 sm:$0xff]   ;;  %v10725_v54 = vld [vmem:[#allocation13 + $0xc4] ss:$16 sps:$4 sm:$0xff]  }
  0x8f   : > { %v10797_v37 = vld [vmem:[#allocation13 + $0x4] ss:$16 sps:$4 sm:$0xff]  }
  0x90   : > { %7147 = vperm.xlu0 %9223, %v7145_v63   ;;  %v10751_v63 = vld [vmem:[#allocation13 + $0x8c] ss:$16 sps:$4 sm:$0xff]   ;;  %13020 = vst [vmem:[#allocation45_spill] sm:$0xff] %v10797_v37 }
  0x91   : > { %13005 = vst [vmem:[#allocation30_spill] sm:$0xff] %v10751_v63 }
  0xe6   : > { %v472_v0 = vpop.permute.xlu0 %471  ;;  %v486_v2 = vpop.permute.xlu1 %485 }
  0xe7   : > { %vm524_vm4 = vcmp.eq.s32.totalorder %v472_v0, %v523_v3  ;;  %vm526_vm7 = vcmp.eq.s32.totalorder %v486_v2, %v523_v3  ;;  %v10753_v0 = vld [vmem:[#allocation13 + $0x80] ss:$16 sps:$4 sm:$0xff]   ;;  %v10755_v2 = vld [vmem:[#allocation13 + $0x88] ss:$16 sps:$4 sm:$0xff]  }
  0xe8   : > { %13006 = vst [vmem:[#allocation31_spill] sm:$0xff] %v10753_v0  ;;  %13007 = vst [vmem:[#allocation32_spill] sm:$0xff] %v10755_v2 }
  0xea   : > { %v479_v9 = vpop.permute.xlu0 %478  ;;  %v493_v14 = vpop.permute.xlu1 %492 }
  0xeb   : > { %vm525_vm5 = vcmp.eq.s32.totalorder %v479_v9, %v523_v3  ;;  %vm527_vm8 = vcmp.eq.s32.totalorder %v493_v14, %v523_v3  ;;  %v10767_v9 = vld [vmem:[#allocation13 + $0x68] ss:$16 sps:$4 sm:$0xff]   ;;  %v10773_v14 = vld [vmem:[#allocation13 + $0x44] ss:$16 sps:$4 sm:$0xff]  }
  0xec   : > { %vm9035_vm6 = vmpackc.low %vm525_vm5, %vm524_vm4  ;;  %13011 = vst [vmem:[#allocation36_spill] sm:$0xff] %v10767_v9 }
  0xed   : > { %9036 = vmatmul.mubr.msk.bf16.vlgmr.msra.gmra.mxu0 %vm9035_vm6, %v10345_v17  ;;  %9044 = vmatmul.mubr.msk.bf16.vlgmr.msra.gmra.mxu1 %vm9035_vm6, %v10345_v17  ;;  %vm10601_vm9 = vmpackc.low %vm527_vm8, %vm526_vm7  ;;  %13012 = vst [vmem:[#allocation37_spill] sm:$0xff] %v10773_v14 }
  0xee   : > { %1178 = vmatpush1.bf16.msra.mxu0 %v9273_v4  ;;  %1219 = vmatpush1.bf16.msra.mxu1 %v9276_v6  ;;  %v507_v19 = vpop.permute.xlu1 %506  ;;  %v500_v20 = vpop.permute.xlu0 %499  ;;  %v10763_v4 = vld [vmem:[#allocation13 + $0x6c] ss:$16 sps:$4 sm:$0xff]   ;;  %v10765_v6 = vld [vmem:[#allocation13 + $0x60] ss:$16 sps:$4 sm:$0xff]  }
  0xef   : > { %1179 = vmatprep.subr.bf16.mxu0 %v10585_v7  ;;  %1220 = vmatprep.subr.bf16.mxu1 %v10587_v8  ;;  %vm529_vm10 = vcmp.eq.s32.totalorder %v507_v19, %v523_v3  ;;  %vm528_vm11 = vcmp.eq.s32.totalorder %v500_v20, %v523_v3  ;;  %13009 = vst [vmem:[#allocation34_spill] sm:$0xff] %v10763_v4  ;;  %13010 = vst [vmem:[#allocation35_spill] sm:$0xff] %v10765_v6  ;;  %v10777_v19 = vld [vmem:[#allocation13 + $0x40] ss:$16 sps:$4 sm:$0xff]   ;;  %v10779_v20 = vld [vmem:[#allocation13 + $0x48] ss:$16 sps:$4 sm:$0xff]  }
  0xf0   : > { %836 = vmatprep.mubr.bf16.mxu0 %v12723_v5  ;;  %909 = vmatprep.mubr.bf16.mxu1 %v12723_v5  ;;  %vm10623_vm12 = vmpackc.low %vm529_vm10, %vm528_vm11  ;;  %13014 = vst [vmem:[#allocation39_spill] sm:$0xff] %v10777_v19 }
  0xf1   : > { %13015 = vst [vmem:[#allocation40_spill] sm:$0xff] %v10779_v20 }
  0xf2   : > { %1180 = vmatpush1.bf16.msra.mxu0 %v10589_v15  ;;  %1221 = vmatpush1.bf16.msra.mxu1 %v10591_v16  ;;  %v521_v29 = vpop.permute.xlu1 %520  ;;  %v514_v30 = vpop.permute.xlu0 %513 }
  0xf3   : > { %1181 = vmatprep.subr.bf16.mxu0 %v10595_v1  ;;  %1222 = vmatprep.subr.bf16.mxu1 %v10597_v18  ;;  %vm531_vm13 = vcmp.eq.s32.totalorder %v521_v29, %v523_v3  ;;  %vm530_vm14 = vcmp.eq.s32.totalorder %v514_v30, %v523_v3  ;;  %v10761_v3 = vld [vmem:[#allocation13 + $0x64] ss:$16 sps:$4 sm:$0xff]   ;;  %v10789_v29 = vld [vmem:[#allocation13 + $0x20] ss:$16 sps:$4 sm:$0xff]   ;;  %v10791_v30 = vld [vmem:[#allocation13 + $0x28] ss:$16 sps:$4 sm:$0xff]  }
  0xf4   : > { %vm10653_vm15 = vmpackc.low %vm531_vm13, %vm530_vm14  ;;  %13008 = vst [vmem:[#allocation33_spill] sm:$0xff] %v10761_v3 }
  0xf5   : > { %9038 = vmatmul.mubr.msk.bf16.gmra.mxu0 %vm10601_vm9, %v10345_v17  ;;  %9046 = vmatmul.mubr.msk.bf16.gmra.mxu1 %vm10601_vm9, %v10345_v17  ;;  %13018 = vst [vmem:[#allocation43_spill] sm:$0xff] %v10789_v29  ;;  %13019 = vst [vmem:[#allocation44_spill] sm:$0xff] %v10791_v30 }
  0xf6   : > { %1182 = vmatpush1.bf16.msra.mxu0 %v10607_v22  ;;  %1223 = vmatpush1.bf16.msra.mxu1 %v10609_v23 }
  0xf7   : > { %1183 = vmatprep.subr.bf16.mxu0 %v10611_v24  ;;  %1224 = vmatprep.subr.bf16.mxu1 %v10613_v25 }
  0xf8   : > { %846 = vmatprep.mubr.bf16.mxu0 %v12723_v5  ;;  %919 = vmatprep.mubr.bf16.mxu1 %v12723_v5 }
  0xfa   : > { %1184 = vmatpush1.bf16.msra.mxu0 %v10619_v26  ;;  %1225 = vmatpush1.bf16.msra.mxu1 %v10621_v27 }
  0xfb   : > { %1185 = vmatprep.subr.bf16.mxu0 %v10633_v31  ;;  %1226 = vmatprep.subr.bf16.mxu1 %v10635_v32 }
  0xfd   : > { %9040 = vmatmul.mubr.msk.bf16.gmra.mxu0 %vm10623_vm12, %v10345_v17  ;;  %9048 = vmatmul.mubr.msk.bf16.gmra.mxu1 %vm10623_vm12, %v10345_v17 }
  0xfe   : > { %1186 = vmatpush1.bf16.msra.mxu0 %v10643_v33  ;;  %1227 = vmatpush1.bf16.msra.mxu1 %v10645_v34 }
  0xff   : > { %1187 = vmatprep.subr.bf16.mxu0 %v10647_v35  ;;  %1228 = vmatprep.subr.bf16.mxu1 %v10649_v36 }
 0x100   : > { %856 = vmatprep.mubr.bf16.mxu0 %v12723_v5  ;;  %929 = vmatprep.mubr.bf16.mxu1 %v12723_v5 }
 0x102   : > { %1188 = vmatpush1.bf16.msra.mxu0 %v10659_v38  ;;  %1229 = vmatpush1.bf16.msra.mxu1 %v10661_v39 }
 0x103   : > { %1189 = vmatprep.subr.bf16.mxu0 %v10669_v40  ;;  %1230 = vmatprep.subr.bf16.mxu1 %v10671_v41 }
 0x105   : > { %9042 = vmatmul.mubr.msk.bf16.gmra.mxu0 %vm10653_vm15, %v10345_v17  ;;  %9050 = vmatmul.mubr.msk.bf16.gmra.mxu1 %vm10653_vm15, %v10345_v17  ;;  %v10775_v17 = vld [vmem:[#allocation13 + $0x4c] ss:$16 sps:$4 sm:$0xff]  }
 0x106   : > { %1190 = vmatpush1.bf16.msra.mxu0 %v10679_v42  ;;  %1231 = vmatpush1.bf16.msra.mxu1 %v10681_v43  ;;  %13013 = vst [vmem:[#allocation38_spill] sm:$0xff] %v10775_v17 }
 0x107   : > { %1191 = vmatprep.subr.bf16.mxu0 %v10683_v44  ;;  %1232 = vmatprep.subr.bf16.mxu1 %v10685_v45 }
 0x108   : > { %1209 = vmatprep.mubr.bf16.mxu0 %v12723_v5  ;;  %1250 = vmatprep.mubr.bf16.mxu1 %v12723_v5  ;;  %v10801_v5 = vld [vmem:[#allocation13] ss:$16 sps:$4 sm:$0xff]  }
 0x109   : > { %13022 = vst [vmem:[#allocation47_spill] sm:$0xff] %v10801_v5 }
 0x10a   : > { %1192 = vmatpush1.bf16.msra.mxu0 %v10691_v46  ;;  %1233 = vmatpush1.bf16.msra.mxu1 %v10693_v47 }
 0x10b   : > { %1702 = vmatprep.subr.bf16.mxu0 %v10713_v50  ;;  %1743 = vmatprep.subr.bf16.mxu1 %v10715_v51 }
 0x10d   : > { %1210 = vmatmul.mubr.bf16.vlgmr.msra.gmra.mxu0 %v984_v49  ;;  %1251 = vmatmul.mubr.bf16.vlgmr.msra.gmra.mxu1 %v984_v49  ;;  %v10799_v49 = vld [vmem:[#allocation13 + $0xc] ss:$16 sps:$4 sm:$0xff]  }
 0x10e   : > { %1703 = vmatpush1.bf16.msra.mxu0 %v10717_v52  ;;  %1744 = vmatpush1.bf16.msra.mxu1 %v10719_v53  ;;  %13021 = vst [vmem:[#allocation46_spill] sm:$0xff] %v10799_v49 }
 0x10f   : > { %1704 = vmatprep.subr.bf16.mxu0 %v10725_v54  ;;  %1745 = vmatprep.subr.bf16.mxu1 %v10727_v55 }
 0x112   : > { %1705 = vmatpush1.bf16.msra.mxu0 %v10729_v56  ;;  %1746 = vmatpush1.bf16.msra.mxu1 %v10731_v57 }
 0x113   : > { %1706 = vmatprep.subr.bf16.mxu0 %v10737_v58  ;;  %1747 = vmatprep.subr.bf16.mxu1 %v10739_v59 }
 0x116   : > { %1707 = vmatpush1.bf16.msra.mxu0 %v10741_v60  ;;  %1748 = vmatpush1.bf16.msra.mxu1 %v10743_v61 }
 0x117   : > { %1708 = vmatprep.subr.bf16.mxu0 %v10749_v62  ;;  %1749 = vmatprep.subr.bf16.mxu1 %v10751_v63 }
 0x11a   : > { %1709 = vmatpush1.bf16.msra.mxu0 %v10753_v0  ;;  %1750 = vmatpush1.bf16.msra.mxu1 %v10755_v2 }
 0x11b   : > { %1710 = vmatprep.subr.bf16.mxu0 %v10761_v3  ;;  %1751 = vmatprep.subr.bf16.mxu1 %v10763_v4 }
 0x11e   : > { %1711 = vmatpush1.bf16.msra.mxu0 %v10765_v6  ;;  %1752 = vmatpush1.bf16.msra.mxu1 %v10767_v9  ;;  %v5999_v6 = vstv %s5998_s22  ;;  %s8014_s22 = sshll.u32 %s10549_s24, 4  ;;  %s12658_s22 = int_to_ptr.vmem [resolvable:$true] %s8014_s22 }
 0x11f   : > { %1712 = vmatprep.subr.bf16.mxu0 %v10773_v14  ;;  %1753 = vmatprep.subr.bf16.mxu1 %v10775_v17  ;;  %v10820_v17 = vld [vmem:[#allocation13 + $0x1cc] ss:$16 sps:$4 sm:$0xff]  }
 0x120   : > { %13029 = vst [vmem:[#allocation54_spill] sm:$0xff] %v10820_v17 }
 0x122   : > { %1713 = vmatpush1.bf16.msra.mxu0 %v10777_v19  ;;  %1754 = vmatpush1.bf16.msra.mxu1 %v10779_v20  ;;  %v10803_v20 = vld [vmem:[#allocation13 + $0x8] ss:$16 sps:$4 sm:$0xff]   ;;  %v10807_v19 = vld [vmem:[#allocation13 + $0x1e4] ss:$16 sps:$4 sm:$0xff]  }
 0x123   : > { %1714 = vmatprep.subr.bf16.mxu0 %v10785_v21  ;;  %1755 = vmatprep.subr.bf16.mxu1 %v10787_v28  ;;  %13023 = vst [vmem:[#allocation48_spill] sm:$0xff] %v10803_v20  ;;  %13024 = vst [vmem:[#allocation49_spill] sm:$0xff] %v10807_v19  ;;  %v10815_v28 = vld [vmem:[#allocation13 + $0x1ec] ss:$16 sps:$4 sm:$0xff]   ;;  %v10818_v21 = vld [vmem:[#allocation13 + $0x1c4] ss:$16 sps:$4 sm:$0xff]  }
 0x124   : > { %13027 = vst [vmem:[#allocation52_spill] sm:$0xff] %v10815_v28  ;;  %13028 = vst [vmem:[#allocation53_spill] sm:$0xff] %v10818_v21 }
 0x126   : > { %1715 = vmatpush1.bf16.msra.mxu0 %v10789_v29  ;;  %1756 = vmatpush1.bf16.msra.mxu1 %v10791_v30  ;;  %v10811_v29 = vld [vmem:[#allocation13 + $0x1e0] ss:$16 sps:$4 sm:$0xff]   ;;  %v10813_v30 = vld [vmem:[#allocation13 + $0x1e8] ss:$16 sps:$4 sm:$0xff]  }
 0x127   : > { %1716 = vmatprep.subr.bf16.mxu0 %v10797_v37  ;;  %1757 = vmatprep.subr.bf16.mxu1 %v10799_v49  ;;  %13025 = vst [vmem:[#allocation50_spill] sm:$0xff] %v10811_v29  ;;  %13026 = vst [vmem:[#allocation51_spill] sm:$0xff] %v10813_v30  ;;  %v10831_v49 = vld [vmem:[#allocation13 + $0x1a4] ss:$16 sps:$4 sm:$0xff]  }
 0x128   : > { %13032 = vst [vmem:[#allocation57_spill] sm:$0xff] %v10831_v49 }
 0x12a   : > { %1717 = vmatpush1.bf16.msra.mxu0 %v10801_v5  ;;  %1758 = vmatpush1.bf16.msra.mxu1 %v10803_v20  ;;  %v10825_v5 = vld [vmem:[#allocation13 + $0x1c0] ss:$16 sps:$4 sm:$0xff]   ;;  %v10827_v20 = vld [vmem:[#allocation13 + $0x1c8] ss:$16 sps:$4 sm:$0xff]  }
 0x12b   : > { %1718 = vmatprep.subr.bf16.mxu0 %v10807_v19  ;;  %1759 = vmatprep.subr.bf16.mxu1 %v10815_v28  ;;  %13030 = vst [vmem:[#allocation55_spill] sm:$0xff] %v10825_v5  ;;  %13031 = vst [vmem:[#allocation56_spill] sm:$0xff] %v10827_v20  ;;  %v10833_v19 = vld [vmem:[#allocation13 + $0x1ac] ss:$16 sps:$4 sm:$0xff]   ;;  %v10837_v28 = vld [vmem:[#allocation13 + $0x1a0] ss:$16 sps:$4 sm:$0xff]  }
 0x12c   : > { %13033 = vst [vmem:[#allocation58_spill] sm:$0xff] %v10833_v19  ;;  %13034 = vst [vmem:[#allocation59_spill] sm:$0xff] %v10837_v28 }
 0x12e   : > { %1719 = vmatpush2.bf16.msra.mxu0 %v10811_v29  ;;  %1760 = vmatpush2.bf16.msra.mxu1 %v10813_v30  ;;  %v10839_v29 = vld [vmem:[#allocation13 + $0x1a8] ss:$16 sps:$4 sm:$0xff]   ;;  %v10843_v30 = vld [vmem:[#allocation13 + $0x184] ss:$16 sps:$4 sm:$0xff]  }
 0x12f   : > { %1720 = vmatprep.subr.bf16.mxu0 %v10818_v21  ;;  %1761 = vmatprep.subr.bf16.mxu1 %v10820_v17  ;;  %13035 = vst [vmem:[#allocation60_spill] sm:$0xff] %v10839_v29  ;;  %13036 = vst [vmem:[#allocation61_spill] sm:$0xff] %v10843_v30  ;;  %v10845_v21 = vld [vmem:[#allocation13 + $0x18c] ss:$16 sps:$4 sm:$0xff]   ;;  %v10849_v17 = vld [vmem:[#allocation13 + $0x180] ss:$16 sps:$4 sm:$0xff]  }
 0x130   : > { %13037 = vst [vmem:[#allocation62_spill] sm:$0xff] %v10845_v21  ;;  %13038 = vst [vmem:[#allocation63_spill] sm:$0xff] %v10849_v17 }
 0x132   : > { %1721 = vmatpush2.bf16.msra.mxu0 %v10825_v5  ;;  %1762 = vmatpush2.bf16.msra.mxu1 %v10827_v20  ;;  %v10851_v5 = vld [vmem:[#allocation13 + $0x188] ss:$16 sps:$4 sm:$0xff]   ;;  %v10861_v20 = vld [vmem:[#allocation13 + $0x160] ss:$16 sps:$4 sm:$0xff]  }
 0x133   : > { %1722 = vmatprep.subr.bf16.mxu0 %v10831_v49  ;;  %1763 = vmatprep.subr.bf16.mxu1 %v10833_v19  ;;  %13039 = vst [vmem:[#allocation64_spill] sm:$0xff] %v10851_v5  ;;  %v10857_v19 = vld [vmem:[#allocation13 + $0x164] ss:$16 sps:$4 sm:$0xff]   ;;  %v10859_v49 = vld [vmem:[#allocation13 + $0x16c] ss:$16 sps:$4 sm:$0xff]   ;;  %13042 = vst [vmem:[#allocation67_spill] sm:$0xff] %v10861_v20 }
 0x134   : > { %13040 = vst [vmem:[#allocation65_spill] sm:$0xff] %v10857_v19  ;;  %13041 = vst [vmem:[#allocation66_spill] sm:$0xff] %v10859_v49 }
 0x136   : > { %1723 = vmatpush2.bf16.msra.mxu0 %v10837_v28  ;;  %1764 = vmatpush2.bf16.msra.mxu1 %v10839_v29  ;;  %v10863_v28 = vld [vmem:[#allocation13 + $0x168] ss:$16 sps:$4 sm:$0xff]   ;;  %v4325_v29 = vstv %s4324_s30 }
 0x137   : > { %1724 = vmatprep.subr.bf16.mxu0 %v10843_v30  ;;  %1765 = vmatprep.subr.bf16.mxu1 %v10845_v21  ;;  %13043 = vst [vmem:[#allocation68_spill] sm:$0xff] %v10863_v28  ;;  %v10869_v21 = vld [vmem:[#allocation13 + $0x144] ss:$16 sps:$4 sm:$0xff]   ;;  %v10875_v30 = vld [vmem:[#allocation13 + $0x148] ss:$16 sps:$4 sm:$0xff]  }
 0x138   : > { %13044 = vst [vmem:[#allocation69_spill] sm:$0xff] %v10869_v21  ;;  %13047 = vst [vmem:[#allocation72_spill] sm:$0xff] %v10875_v30 }
 0x13a   : > { %1725 = vmatpush2.bf16.msra.mxu0 %v10849_v17  ;;  %1766 = vmatpush2.bf16.msra.mxu1 %v10851_v5  ;;  %v10871_v17 = vld [vmem:[#allocation13 + $0x14c] ss:$16 sps:$4 sm:$0xff]   ;;  %v10873_v5 = vld [vmem:[#allocation13 + $0x140] ss:$16 sps:$4 sm:$0xff]  }
 0x13b   : > { %1726 = vmatprep.subr.bf16.mxu0 %v10857_v19  ;;  %1767 = vmatprep.subr.bf16.mxu1 %v10859_v49  ;;  %13045 = vst [vmem:[#allocation70_spill] sm:$0xff] %v10871_v17  ;;  %13046 = vst [vmem:[#allocation71_spill] sm:$0xff] %v10873_v5  ;;  %v10881_v49 = vld [vmem:[#allocation13 + $0x124] ss:$16 sps:$4 sm:$0xff]   ;;  %v10887_v19 = vld [vmem:[#allocation13 + $0x128] ss:$16 sps:$4 sm:$0xff]  }
 0x13c   : > { %13048 = vst [vmem:[#allocation73_spill] sm:$0xff] %v10881_v49  ;;  %13051 = vst [vmem:[#allocation76_spill] sm:$0xff] %v10887_v19 }
 0x13e   : > { %1727 = vmatpush2.bf16.msra.mxu0 %v10861_v20  ;;  %1768 = vmatpush2.bf16.msra.mxu1 %v10863_v28  ;;  %v10883_v20 = vld [vmem:[#allocation13 + $0x12c] ss:$16 sps:$4 sm:$0xff]   ;;  %v10885_v28 = vld [vmem:[#allocation13 + $0x120] ss:$16 sps:$4 sm:$0xff]  }
 0x13f   : > { %1728 = vmatprep.subr.bf16.mxu0 %v10869_v21  ;;  %1769 = vmatprep.subr.bf16.mxu1 %v10871_v17  ;;  %13049 = vst [vmem:[#allocation74_spill] sm:$0xff] %v10883_v20  ;;  %13050 = vst [vmem:[#allocation75_spill] sm:$0xff] %v10885_v28  ;;  %v10893_v17 = vld [vmem:[#allocation13 + $0x104] ss:$16 sps:$4 sm:$0xff]   ;;  %v10899_v21 = vld [vmem:[#allocation13 + $0x108] ss:$16 sps:$4 sm:$0xff]  }
 0x140   : > { %13052 = vst [vmem:[#allocation77_spill] sm:$0xff] %v10893_v17  ;;  %13055 = vst [vmem:[#allocation80_spill] sm:$0xff] %v10899_v21 }
 0x142   : > { %1729 = vmatpush2.bf16.msra.mxu0 %v10873_v5  ;;  %1770 = vmatpush2.bf16.msra.mxu1 %v10875_v30  ;;  %v10895_v30 = vld [vmem:[#allocation13 + $0x10c] ss:$16 sps:$4 sm:$0xff]   ;;  %v10897_v5 = vld [vmem:[#allocation13 + $0x100] ss:$16 sps:$4 sm:$0xff]  }
 0x143   : > { %1730 = vmatprep.subr.bf16.mxu0 %v10881_v49  ;;  %1771 = vmatprep.subr.bf16.mxu1 %v10883_v20  ;;  %13053 = vst [vmem:[#allocation78_spill] sm:$0xff] %v10895_v30  ;;  %13054 = vst [vmem:[#allocation79_spill] sm:$0xff] %v10897_v5  ;;  %v10125_v20 = vld [vmem:[#allocation11 + $0xe4] ss:$16 sps:$4 sm:$0xff]   ;;  %v10126_v49 = vld [vmem:[#allocation11 + $0xec] ss:$16 sps:$4 sm:$0xff]  }
 0x146   : > { %1731 = vmatpush2.bf16.msra.mxu0 %v10885_v28  ;;  %1772 = vmatpush2.bf16.msra.mxu1 %v10887_v19  ;;  %v10905_v19 = vld [vmem:[#allocation4] sm:$0xff] }
 0x147   : > { %1732 = vmatprep.subr.bf16.mxu0 %v10893_v17  ;;  %1773 = vmatprep.subr.bf16.mxu1 %v10895_v30  ;;  %13056 = vst [vmem:[#allocation81_spill] sm:$0xff] %v10905_v19  ;;  %v1295_v28 = vpack.c.bf16 %v10905_v19, %v10905_v19  ;;  %v1814_v17 = vstv %s1813_s13  ;;  %v2651_v30 = vstv %s2650_s16  ;;  %s10260_s13 = scalar_lea.vmem %s12658_s22, 1024  ;;  %s10346_s16 = smov [#allocation17]  }
 0x148   : > { %p10261_p6 = scmp.ne.s32.totalorder %s12658_s22, %s10260_s13  ;;  %s10264_s30 = sshll.u32 %s10346_s16, 4  ;;  %s10265_s30 = int_to_ptr.vmem [resolvable:$false] %s10264_s30 }
 0x149   : > { %1734 = vmatprep.mubr.bf16.mxu0 %v1295_v28  ;;  %1775 = vmatprep.mubr.bf16.mxu1 %v1295_v28  ;;  %s10266_s15 = scalar_lea.vmem %s10265_s30, 2048  ;;  %p10267_p8 = scmp.lt.s32.totalorder %s12658_s22, %s10265_s30 }
 0x14a   : > { %1733 = vmatpush2.bf16.msra.mxu0 %v10897_v5  ;;  %1774 = vmatpush2.bf16.msra.mxu1 %v10899_v21  ;;  %v10127_v21 = vld [vmem:[%s12705_s1] sm:$0xff]  ;;  %v13057_v5 = vmov 0   ;;  %p10262_p10 = pnand %p10261_p6, %p10447_p5  ;;  %p10268_p9 = scmp.lt.s32.totalorder %s10266_s15, %s10260_s13 }
 0x14b   : > { %2013 = vmatprep.subr.bf16.mxu0 %v10125_v20  ;;  %2054 = vmatprep.subr.bf16.mxu1 %v10126_v49  ;;  %vm1815_vm0 = vcmp.gt.s32.totalorder %v10127_v21, %v1814_v17  ;;  %vm2652_vm1 = vcmp.gt.s32.totalorder %v10127_v21, %v2651_v30  ;;  %v588_v20 = vld [vmem:[%s12708_s4] sm:$0xf]  ;;  %vm4326_vm2 = vcmp.gt.s32.totalorder %v10127_v21, %v4325_v29 }
 0x14c   : > { %v2123_v19 = vsel %vm1815_vm0, 1, %v13057_v5  ;;  %v2960_v37 = vsel %vm2652_vm1, 1, %v13057_v5  ;;  %v10930_v17 = vrot.slane %v588_v20, %v10558_v10  ;;  %v10933_v30 = vrot.slane %v588_v20, %v10560_v11  ;;  %p10263_p7 = pneg %p10262_p10  ;;  %p10269_p0 = por %p10268_p9, %p10267_p8 }
 0x14d   : > { %2125 = vperm.xlu1 %9224, %v2123_v19   ;;  %v10936_v4 = vrot.slane %v588_v20, %v10562_v12  ;;  %v10939_v2 = vrot.slane %v588_v20, %v10564_v13  ;;  %v4634_v10 = vsel %vm4326_vm2, 1, %v13057_v5  ;;  %vm6000_vm3 = vcmp.gt.s32.totalorder %v10127_v21, %v5999_v6 }
 0x14e   : > { %p10270_p12 = pnand %p10269_p0, %p10263_p7 }
 0x151   : > { %2962 = vperm.xlu1 %9224, %v2960_v37  }
 0x155   : > { %4636 = vperm.xlu1 %9224, %v4634_v10  }
 0x1ad   : > { %v10919_v49 = vpop.f32.mrf.mxu0  ;;  %v10921_v28 = vpop.f32.mrf.mxu1 }
 0x1af   : > { %v10925_v14 = vpop.f32.mrf.mxu0  ;;  %v10927_v9 = vpop.f32.mrf.mxu1 }
 0x1b1   : > { %v832_v3 = vpop.f32.mrf.mxu0  ;;  %v905_v19 = vpop.f32.mrf.mxu1 }
 0x1b2   : > { %v10942_v0 = vadd.f32 %v832_v3, %v10930_v17  ;;  %v10945_v29 = vadd.f32 %v905_v19, %v10933_v30 }
 0x1b3   : > { %v834_v11 = vpop.f32.mrf.mxu0  ;;  %v907_v63 = vpop.f32.mrf.mxu1 }
 0x1b4   : > { %13058 = vst [vmem:[#allocation82_spill] sm:$0xff] %v10942_v0  ;;  %13059 = vst [vmem:[#allocation83_spill] sm:$0xff] %v10945_v29  ;;  %v10949_v12 = vadd.f32 %v834_v11, %v10936_v4  ;;  %v10952_v62 = vadd.f32 %v907_v63, %v10939_v2  ;;  %v6308_v29 = vsel %vm6000_vm3, 1, %v13057_v5 }
 0x1b5   : > { %v838_v37 = vpop.f32.mrf.mxu0  ;;  %v911_v20 = vpop.f32.mrf.mxu1  ;;  %6310 = vperm.xlu1 %9224, %v6308_v29  }
 0x1b6   : > { %13060 = vst [vmem:[#allocation84_spill] sm:$0xff] %v10949_v12  ;;  %13061 = vst [vmem:[#allocation85_spill] sm:$0xff] %v10952_v62  ;;  %v10955_v3 = vadd.f32 %v838_v37, %v10930_v17  ;;  %v10958_v19 = vadd.f32 %v911_v20, %v10933_v30 }
 0x1b7   : > { %v840_v0 = vpop.f32.mrf.mxu0  ;;  %v913_v13 = vpop.f32.mrf.mxu1 }
 0x1b8   : > { %13062 = vst [vmem:[#allocation86_spill] sm:$0xff] %v10955_v3  ;;  %13063 = vst [vmem:[#allocation87_spill] sm:$0xff] %v10958_v19  ;;  %v10962_v6 = vadd.f32 %v840_v0, %v10936_v4  ;;  %v10965_v11 = vadd.f32 %v913_v13, %v10939_v2 }
 0x1b9   : > { %v842_v63 = vpop.f32.mrf.mxu0  ;;  %v915_v21 = vpop.f32.mrf.mxu1 }
 0x1ba   : > { %13064 = vst [vmem:[#allocation88_spill] sm:$0xff] %v10962_v6  ;;  %13065 = vst [vmem:[#allocation89_spill] sm:$0xff] %v10965_v11  ;;  %v10968_v10 = vadd.f32 %v842_v63, %v10930_v17  ;;  %v10971_v37 = vadd.f32 %v915_v21, %v10933_v30 }
 0x1bb   : > { %v844_v20 = vpop.f32.mrf.mxu0  ;;  %v917_v19 = vpop.f32.mrf.mxu1 }
 0x1bc   : > { %13066 = vst [vmem:[#allocation90_spill] sm:$0xff] %v10968_v10  ;;  %13067 = vst [vmem:[#allocation91_spill] sm:$0xff] %v10971_v37  ;;  %v10974_v3 = vadd.f32 %v844_v20, %v10936_v4  ;;  %v10977_v0 = vadd.f32 %v917_v19, %v10939_v2 }
 0x1bd   : > { %v848_v6 = vpop.f32.mrf.mxu0  ;;  %v921_v13 = vpop.f32.mrf.mxu1 }
 0x1be   : > { %13068 = vst [vmem:[#allocation92_spill] sm:$0xff] %v10974_v3  ;;  %13069 = vst [vmem:[#allocation93_spill] sm:$0xff] %v10977_v0  ;;  %v10980_v11 = vadd.f32 %v848_v6, %v10930_v17  ;;  %v10983_v29 = vadd.f32 %v921_v13, %v10933_v30 }
 0x1bf   : > { %v850_v63 = vpop.f32.mrf.mxu0  ;;  %v923_v10 = vpop.f32.mrf.mxu1 }
 0x1c0   : > { %13070 = vst [vmem:[#allocation94_spill] sm:$0xff] %v10980_v11  ;;  %13071 = vst [vmem:[#allocation95_spill] sm:$0xff] %v10983_v29  ;;  %v10986_v21 = vadd.f32 %v850_v63, %v10936_v4  ;;  %v10989_v37 = vadd.f32 %v923_v10, %v10939_v2 }
 0x1c1   : > { %v852_v20 = vpop.f32.mrf.mxu0  ;;  %v925_v3 = vpop.f32.mrf.mxu1 }
 0x1c2   : > { %13072 = vst [vmem:[#allocation96_spill] sm:$0xff] %v10986_v21  ;;  %13073 = vst [vmem:[#allocation97_spill] sm:$0xff] %v10989_v37  ;;  %v10992_v19 = vadd.f32 %v852_v20, %v10930_v17  ;;  %v10995_v0 = vadd.f32 %v925_v3, %v10933_v30 }
 0x1c3   : > { %v854_v6 = vpop.f32.mrf.mxu0  ;;  %v927_v11 = vpop.f32.mrf.mxu1 }
 0x1c4   : > { %13074 = vst [vmem:[#allocation98_spill] sm:$0xff] %v10992_v19  ;;  %13075 = vst [vmem:[#allocation99_spill] sm:$0xff] %v10995_v0  ;;  %v10998_v13 = vadd.f32 %v854_v6, %v10936_v4  ;;  %v11001_v29 = vadd.f32 %v927_v11, %v10939_v2 }
 0x1c5   : > { %v858_v63 = vpop.f32.mrf.mxu0  ;;  %v931_v21 = vpop.f32.mrf.mxu1 }
 0x1c6   : > { %13076 = vst [vmem:[#allocation100_spill] sm:$0xff] %v10998_v13  ;;  %13077 = vst [vmem:[#allocation101_spill] sm:$0xff] %v11001_v29  ;;  %v11004_v10 = vadd.f32 %v858_v63, %v10930_v17  ;;  %v11007_v37 = vadd.f32 %v931_v21, %v10933_v30  ;;  %v829_v21 = vadd.f32 %v10919_v49, %v10930_v17 }
 0x1c7   : > { %v860_v20 = vpop.f32.mrf.mxu0  ;;  %v933_v19 = vpop.f32.mrf.mxu1 }
 0x1c8   : > { %13078 = vst [vmem:[#allocation102_spill] sm:$0xff] %v11004_v10  ;;  %13079 = vst [vmem:[#allocation103_spill] sm:$0xff] %v11007_v37  ;;  %v11010_v3 = vadd.f32 %v860_v20, %v10936_v4  ;;  %v11013_v0 = vadd.f32 %v933_v19, %v10939_v2 }
 0x1c9   : > { %v862_v6 = vpop.f32.mrf.mxu0  ;;  %v935_v13 = vpop.f32.mrf.mxu1 }
 0x1ca   : > { %13080 = vst [vmem:[#allocation104_spill] sm:$0xff] %v11010_v3  ;;  %13081 = vst [vmem:[#allocation105_spill] sm:$0xff] %v11013_v0  ;;  %v11016_v11 = vadd.f32 %v862_v6, %v10930_v17  ;;  %v11019_v29 = vadd.f32 %v935_v13, %v10933_v30  ;;  %v831_v6 = vadd.f32 %v10925_v14, %v10936_v4 }
 0x1cb   : > { %v864_v63 = vpop.f32.mrf.mxu0  ;;  %v937_v10 = vpop.f32.mrf.mxu1 }
 0x1cc   : > { %13082 = vst [vmem:[#allocation106_spill] sm:$0xff] %v11016_v11  ;;  %13083 = vst [vmem:[#allocation107_spill] sm:$0xff] %v11019_v29  ;;  %v11024_v37 = vadd.f32 %v864_v63, %v10936_v4  ;;  %v11027_v20 = vadd.f32 %v937_v10, %v10939_v2  ;;  %v904_v10 = vadd.f32 %v10927_v9, %v10939_v2 }
 0x1cd   : > { %v1211_v19 = vpop.f32.mrf.mxu0  ;;  %v1252_v0 = vpop.f32.mrf.mxu1 }
 0x1ce   : > { %13084 = vst [vmem:[#allocation108_spill] sm:$0xff] %v11024_v37  ;;  %13085 = vst [vmem:[#allocation109_spill] sm:$0xff] %v11027_v20  ;;  %v1259_v11 = vadd.f32 %v1211_v19, %v829_v21  ;;  %v902_v37 = vadd.f32 %v10921_v28, %v10933_v30 }
 0x1cf   : > { %v1213_v3 = vpop.f32.mrf.mxu0  ;;  %v1254_v13 = vpop.f32.mrf.mxu1 }
 0x1d0   : > { %v8220_v29 = vmul.f32 -1.442695, %v1259_v11  ;;  %v1260_v62 = vadd.f32 %v1213_v3, %v831_v6  ;;  %v1262_v20 = vadd.f32 %v1254_v13, %v904_v10  ;;  %v1261_v21 = vadd.f32 %v1252_v0, %v902_v37  ;;  %v11041_v0 = vpop.permute.xlu0 %1289  ;;  %v10129_v10 = vld [vmem:[#allocation11 + $0xe8] ss:$16 sps:$4 sm:$0xff]  }
 0x1d1   : > { %v1215_v12 = vpop.f32.mrf.mxu0  ;;  %v1256_v61 = vpop.f32.mrf.mxu1  ;;  %vm1291_vm4 = vcmp.eq.s32.totalorder %v11041_v0, 1 }
 0x1d2   : > { %9869 = vpow2.f32 %v8220_v29  ;;  %v8221_v49 = vmul.f32 -1.442695, %v1260_v62  ;;  %v8222_v4 = vmul.f32 -1.442695, %v1262_v20  ;;  %v11035_v29 = vld [vmem:[#allocation3] sm:$0xff] }
 0x1d3   : > { %v1216_v17 = vpop.f32.mrf.mxu0  ;;  %v1257_v63 = vpop.f32.mrf.mxu1 }
 0x1d4   : > { %9871 = vpow2.f32 %v8221_v49  ;;  %v10128_v63 = vld [vmem:[#allocation11 + $0xe0] ss:$16 sps:$4 sm:$0xff]  }
 0x1d5   : > { %9873 = vpow2.f32 %v8222_v4  ;;  %v13126_v4 = vld [vmem:[#allocation68_spill] sm:$0xff] }
 0x1df   : > { %v9870_v14 = vpop.eup %9869 }
 0x1e0   : > { %v1266_v19 = vadd.f32 1.0, %v9870_v14  ;;  %v13127_v14 = vld [vmem:[#allocation69_spill] sm:$0xff] }
 0x1e1   : > { %v9872_v11 = vpop.eup %9871 }
 0x1e2   : > { %9875 = vrcp.f32 %v1266_v19  ;;  %v1272_v12 = vadd.f32 1.0, %v9872_v11  ;;  %v9874_v61 = vpop.eup %9873  ;;  %v13129_v19 = vld [vmem:[#allocation71_spill] sm:$0xff]  ;;  %v13130_v11 = vld [vmem:[#allocation72_spill] sm:$0xff] }
 0x1e3   : > { %9877 = vtanh.f32 %v1261_v21  ;;  %v1279_v9 = vadd.f32 1.0, %v9874_v61  ;;  %v13128_v21 = vld [vmem:[#allocation70_spill] sm:$0xff] }
 0x1e4   : > { %9879 = vrcp.f32 %v1272_v12  ;;  %v13131_v12 = vld [vmem:[#allocation73_spill] sm:$0xff]  ;;  %v13132_v61 = vld [vmem:[#allocation74_spill] sm:$0xff] }
 0x1e5   : > { %9881 = vrcp.f32 %v1279_v9  ;;  %v13136_v9 = vld [vmem:[#allocation78_spill] sm:$0xff] }
 0x1ef   : > { %v9876_v62 = vpop.eup %9875 }
 0x1f0   : > { %v9878_v3 = vpop.eup %9877 }
 0x1f1   : > { %v9880_v2 = vpop.eup %9879  ;;  %v1283_v28 = vmul.f32 %v9878_v3, %v9876_v62  ;;  %v13133_v62 = vld [vmem:[#allocation75_spill] sm:$0xff]  ;;  %v13134_v3 = vld [vmem:[#allocation76_spill] sm:$0xff] }
 0x1f2   : > { %v1282_v6 = vmul.f32 %v9880_v2, %v11035_v29  ;;  %v9882_v37 = vpop.eup %9881  ;;  %v13135_v2 = vld [vmem:[#allocation77_spill] sm:$0xff] }
 0x1f4   : > { %v11038_v30 = vadd.f32 %v1283_v28, %v1282_v6  ;;  %v13137_v6 = vld [vmem:[#allocation79_spill] sm:$0xff]  ;;  %v13138_v28 = vld [vmem:[#allocation80_spill] sm:$0xff] }
 0x1f6   : > { %9883 = vtanh.f32 %v11038_v30 }
 0x203   : > { %v9884_v20 = vpop.eup %9883 }
 0x204   : > { %v1286_v13 = vmul.f32 %v9884_v20, %v9882_v37  ;;  %v11145_v37 = vld [vmem:[#allocation11 + $0xe4] ss:$16 sps:$4 sm:$0xff]   ;;  %v11147_v20 = vld [vmem:[#allocation11 + $0xec] ss:$16 sps:$4 sm:$0xff]  }
 0x206   : > { %v11047_v49 = vsel %vm1291_vm4, %v1286_v13, %v10695_v48  ;;  %v13114_v48 = vld [vmem:[#allocation56_spill] sm:$0xff] }
 0x207   : > { %v1294_v17 = vpack.c.bf16 %v11047_v49, %v11047_v49  ;;  %v1360_v13 = vld [vmem:[%s12710_s6] sm:$0xf] }
 0x209   : > { %1735 = vmatmul.mubr.bf16.vlgmr.msra.gmra.mxu0 %v1294_v17  ;;  %1776 = vmatmul.mubr.bf16.vlgmr.msra.gmra.mxu1 %v1294_v17 }
 0x20a   : > { %2014 = vmatpush1.bf16.msra.mxu0 %v10128_v63  ;;  %2055 = vmatpush1.bf16.msra.mxu1 %v10129_v10  ;;  %v13140_v10 = vld [vmem:[#allocation26_spill] sm:$0xff] }
 0x20b   : > { %2015 = vmatprep.subr.bf16.mxu0 %v10585_v7  ;;  %2056 = vmatprep.subr.bf16.mxu1 %v10587_v8  ;;  %v13086_v7 = vld [vmem:[#allocation28_spill] sm:$0xff]  ;;  %v13087_v8 = vld [vmem:[#allocation29_spill] sm:$0xff] }
 0x20c   : > { %2045 = vmatprep.mubr.bf16.mxu0 %v13057_v5  ;;  %2086 = vmatprep.mubr.bf16.mxu1 %v13057_v5 }
 0x20e   : > { %2016 = vmatpush1.bf16.msra.mxu0 %v10589_v15  ;;  %2057 = vmatpush1.bf16.msra.mxu1 %v10591_v16  ;;  %v13088_v15 = vld [vmem:[#allocation30_spill] sm:$0xff]  ;;  %v13089_v16 = vld [vmem:[#allocation31_spill] sm:$0xff] }
 0x20f   : > { %2017 = vmatprep.subr.bf16.mxu0 %v10595_v1  ;;  %2058 = vmatprep.subr.bf16.mxu1 %v10597_v18  ;;  %v13090_v1 = vld [vmem:[#allocation32_spill] sm:$0xff]  ;;  %v13091_v18 = vld [vmem:[#allocation33_spill] sm:$0xff] }
 0x212   : > { %2018 = vmatpush1.bf16.msra.mxu0 %v10607_v22  ;;  %2059 = vmatpush1.bf16.msra.mxu1 %v10609_v23  ;;  %v13092_v22 = vld [vmem:[#allocation34_spill] sm:$0xff]  ;;  %v13093_v23 = vld [vmem:[#allocation35_spill] sm:$0xff] }
 0x213   : > { %2019 = vmatprep.subr.bf16.mxu0 %v10611_v24  ;;  %2060 = vmatprep.subr.bf16.mxu1 %v10613_v25  ;;  %v13094_v24 = vld [vmem:[#allocation36_spill] sm:$0xff]  ;;  %v13095_v25 = vld [vmem:[#allocation37_spill] sm:$0xff] }
 0x216   : > { %2020 = vmatpush1.bf16.msra.mxu0 %v10619_v26  ;;  %2061 = vmatpush1.bf16.msra.mxu1 %v10621_v27  ;;  %v13096_v26 = vld [vmem:[#allocation38_spill] sm:$0xff]  ;;  %v13097_v27 = vld [vmem:[#allocation39_spill] sm:$0xff] }
 0x217   : > { %2021 = vmatprep.subr.bf16.mxu0 %v10633_v31  ;;  %2062 = vmatprep.subr.bf16.mxu1 %v10635_v32  ;;  %v13098_v31 = vld [vmem:[#allocation40_spill] sm:$0xff]  ;;  %v13099_v32 = vld [vmem:[#allocation41_spill] sm:$0xff] }
 0x21a   : > { %2022 = vmatpush1.bf16.msra.mxu0 %v10643_v33  ;;  %2063 = vmatpush1.bf16.msra.mxu1 %v10645_v34  ;;  %v13100_v33 = vld [vmem:[#allocation42_spill] sm:$0xff]  ;;  %v13101_v34 = vld [vmem:[#allocation43_spill] sm:$0xff] }
 0x21b   : > { %2023 = vmatprep.subr.bf16.mxu0 %v10647_v35  ;;  %2064 = vmatprep.subr.bf16.mxu1 %v10649_v36  ;;  %v13102_v35 = vld [vmem:[#allocation44_spill] sm:$0xff]  ;;  %v13103_v36 = vld [vmem:[#allocation45_spill] sm:$0xff] }
 0x21e   : > { %2024 = vmatpush1.bf16.msra.mxu0 %v10659_v38  ;;  %2065 = vmatpush1.bf16.msra.mxu1 %v10661_v39  ;;  %v13104_v38 = vld [vmem:[#allocation46_spill] sm:$0xff]  ;;  %v13105_v39 = vld [vmem:[#allocation47_spill] sm:$0xff] }
 0x21f   : > { %2025 = vmatprep.subr.bf16.mxu0 %v10669_v40  ;;  %2066 = vmatprep.subr.bf16.mxu1 %v10671_v41  ;;  %v13106_v40 = vld [vmem:[#allocation48_spill] sm:$0xff]  ;;  %v13107_v41 = vld [vmem:[#allocation49_spill] sm:$0xff] }
 0x222   : > { %2026 = vmatpush1.bf16.msra.mxu0 %v10679_v42  ;;  %2067 = vmatpush1.bf16.msra.mxu1 %v10681_v43  ;;  %v13108_v42 = vld [vmem:[#allocation52_spill] sm:$0xff]  ;;  %v13109_v43 = vld [vmem:[#allocation50_spill] sm:$0xff] }
 0x223   : > { %2027 = vmatprep.subr.bf16.mxu0 %v10683_v44  ;;  %2068 = vmatprep.subr.bf16.mxu1 %v10685_v45  ;;  %v13110_v44 = vld [vmem:[#allocation51_spill] sm:$0xff]  ;;  %v13111_v45 = vld [vmem:[#allocation53_spill] sm:$0xff] }
 0x226   : > { %2028 = vmatpush1.bf16.msra.mxu0 %v10691_v46  ;;  %2069 = vmatpush1.bf16.msra.mxu1 %v10693_v47  ;;  %v13112_v46 = vld [vmem:[#allocation54_spill] sm:$0xff]  ;;  %v13113_v47 = vld [vmem:[#allocation55_spill] sm:$0xff] }
 0x227   : > { %2538 = vmatprep.subr.bf16.mxu0 %v10713_v50  ;;  %2579 = vmatprep.subr.bf16.mxu1 %v10715_v51  ;;  %v13115_v50 = vld [vmem:[#allocation57_spill] sm:$0xff]  ;;  %v13116_v51 = vld [vmem:[#allocation58_spill] sm:$0xff] }
 0x229   : > { %2046 = vmatmul.mubr.bf16.vlgmr.msra.gmra.mxu0 %v1294_v17  ;;  %2087 = vmatmul.mubr.bf16.vlgmr.msra.gmra.mxu1 %v1294_v17  ;;  %v13139_v17 = vld [vmem:[#allocation24_spill] sm:$0xff] }
 0x22a   : > { %2539 = vmatpush1.bf16.msra.mxu0 %v10717_v52  ;;  %2580 = vmatpush1.bf16.msra.mxu1 %v10719_v53  ;;  %v13117_v52 = vld [vmem:[#allocation59_spill] sm:$0xff]  ;;  %v13118_v53 = vld [vmem:[#allocation60_spill] sm:$0xff]  ;;  %v1365_v63 = vrot.slane %v1360_v13, %v13139_v17 }
 0x22b   : > { %2540 = vmatprep.subr.bf16.mxu0 %v10725_v54  ;;  %2581 = vmatprep.subr.bf16.mxu1 %v10727_v55  ;;  %v13119_v54 = vld [vmem:[#allocation61_spill] sm:$0xff]  ;;  %v13120_v55 = vld [vmem:[#allocation62_spill] sm:$0xff] }
 0x22e   : > { %2541 = vmatpush1.bf16.msra.mxu0 %v10729_v56  ;;  %2582 = vmatpush1.bf16.msra.mxu1 %v10731_v57  ;;  %v13121_v56 = vld [vmem:[#allocation63_spill] sm:$0xff]  ;;  %v13122_v57 = vld [vmem:[#allocation64_spill] sm:$0xff] }
 0x22f   : > { %2542 = vmatprep.subr.bf16.mxu0 %v10737_v58  ;;  %2583 = vmatprep.subr.bf16.mxu1 %v10739_v59  ;;  %v13123_v58 = vld [vmem:[#allocation65_spill] sm:$0xff]  ;;  %v13124_v59 = vld [vmem:[#allocation66_spill] sm:$0xff] }
 0x232   : > { %2543 = vmatpush1.bf16.msra.mxu0 %v10741_v60  ;;  %2584 = vmatpush1.bf16.msra.mxu1 %v13086_v7  ;;  %v13125_v60 = vld [vmem:[#allocation67_spill] sm:$0xff]  ;;  %v1369_v7 = vrot.slane %v1360_v13, %v13140_v10 }
 0x233   : > { %2544 = vmatprep.subr.bf16.mxu0 %v13087_v8  ;;  %2585 = vmatprep.subr.bf16.mxu1 %v13088_v15 }
 0x236   : > { %2545 = vmatpush1.bf16.msra.mxu0 %v13089_v16  ;;  %2586 = vmatpush1.bf16.msra.mxu1 %v13090_v1 }
 0x237   : > { %2546 = vmatprep.subr.bf16.mxu0 %v13091_v18  ;;  %2587 = vmatprep.subr.bf16.mxu1 %v13092_v22 }
 0x23a   : > { %2547 = vmatpush1.bf16.msra.mxu0 %v13093_v23  ;;  %2588 = vmatpush1.bf16.msra.mxu1 %v13094_v24 }
 0x23b   : > { %2548 = vmatprep.subr.bf16.mxu0 %v13095_v25  ;;  %2589 = vmatprep.subr.bf16.mxu1 %v13096_v26 }
 0x23e   : > { %2549 = vmatpush1.bf16.msra.mxu0 %v13097_v27  ;;  %2590 = vmatpush1.bf16.msra.mxu1 %v13098_v31 }
 0x23f   : > { %2550 = vmatprep.subr.bf16.mxu0 %v13099_v32  ;;  %2591 = vmatprep.subr.bf16.mxu1 %v13100_v33  ;;  %v13141_v32 = vld [vmem:[#allocation27_spill] sm:$0xff] }
 0x240   : > { %v1377_v33 = vrot.slane %v1360_v13, %v13141_v32 }
 0x242   : > { %2551 = vmatpush1.bf16.msra.mxu0 %v13101_v34  ;;  %2592 = vmatpush1.bf16.msra.mxu1 %v13102_v35  ;;  %v13142_v35 = vld [vmem:[#allocation25_spill] sm:$0xff] }
 0x243   : > { %2552 = vmatprep.subr.bf16.mxu0 %v13103_v36  ;;  %2593 = vmatprep.subr.bf16.mxu1 %v13104_v38  ;;  %v1373_v36 = vrot.slane %v1360_v13, %v13142_v35 }
 0x246   : > { %2553 = vmatpush1.bf16.msra.mxu0 %v13105_v39  ;;  %2594 = vmatpush1.bf16.msra.mxu1 %v13106_v40 }
 0x247   : > { %2554 = vmatprep.subr.bf16.mxu0 %v13107_v41  ;;  %2595 = vmatprep.subr.bf16.mxu1 %v13108_v42 }
 0x24a   : > { %2555 = vmatpush2.bf16.msra.mxu0 %v13109_v43  ;;  %2596 = vmatpush2.bf16.msra.mxu1 %v13110_v44 }
 0x24b   : > { %2556 = vmatprep.subr.bf16.mxu0 %v13111_v45  ;;  %2597 = vmatprep.subr.bf16.mxu1 %v13112_v46 }
 0x24e   : > { %2557 = vmatpush2.bf16.msra.mxu0 %v13113_v47  ;;  %2598 = vmatpush2.bf16.msra.mxu1 %v13114_v48  ;;  %v13143_v47 = vld [vmem:[#allocation82_spill] sm:$0xff] }
 0x24f   : > { %2558 = vmatprep.subr.bf16.mxu0 %v13115_v50  ;;  %2599 = vmatprep.subr.bf16.mxu1 %v13116_v51  ;;  %v11159_v51 = vld [vmem:[#allocation5] sm:$0xff] }
 0x252   : > { %2559 = vmatpush2.bf16.msra.mxu0 %v13117_v52  ;;  %2600 = vmatpush2.bf16.msra.mxu1 %v13118_v53 }
 0x253   : > { %2560 = vmatprep.subr.bf16.mxu0 %v13119_v54  ;;  %2601 = vmatprep.subr.bf16.mxu1 %v13120_v55 }
 0x256   : > { %2561 = vmatpush2.bf16.msra.mxu0 %v13121_v56  ;;  %2602 = vmatpush2.bf16.msra.mxu1 %v13122_v57  ;;  %v13144_v56 = vld [vmem:[#allocation84_spill] sm:$0xff] }
 0x257   : > { %2562 = vmatprep.subr.bf16.mxu0 %v13123_v58  ;;  %2603 = vmatprep.subr.bf16.mxu1 %v13124_v59 }
 0x25a   : > { %2563 = vmatpush2.bf16.msra.mxu0 %v13125_v60  ;;  %2604 = vmatpush2.bf16.msra.mxu1 %v13126_v4 }
 0x25b   : > { %2564 = vmatprep.subr.bf16.mxu0 %v13127_v14  ;;  %2605 = vmatprep.subr.bf16.mxu1 %v13128_v21 }
 0x25e   : > { %2565 = vmatpush2.bf16.msra.mxu0 %v13129_v19  ;;  %2606 = vmatpush2.bf16.msra.mxu1 %v13130_v11 }
 0x25f   : > { %2566 = vmatprep.subr.bf16.mxu0 %v13131_v12  ;;  %2607 = vmatprep.subr.bf16.mxu1 %v13132_v61 }
 0x262   : > { %2567 = vmatpush2.bf16.msra.mxu0 %v13133_v62  ;;  %2608 = vmatpush2.bf16.msra.mxu1 %v13134_v3  ;;  %v13145_v62 = vld [vmem:[#allocation85_spill] sm:$0xff] }
 0x263   : > { %2568 = vmatprep.subr.bf16.mxu0 %v13135_v2  ;;  %2609 = vmatprep.subr.bf16.mxu1 %v13136_v9  ;;  %v13146_v2 = vld [vmem:[#allocation83_spill] sm:$0xff] }
 0x266   : > { %2569 = vmatpush2.bf16.msra.mxu0 %v13137_v6  ;;  %2610 = vmatpush2.bf16.msra.mxu1 %v13138_v28 }
 0x267   : > { %2850 = vmatprep.subr.bf16.mxu0 %v11145_v37  ;;  %2891 = vmatprep.subr.bf16.mxu1 %v11147_v20 }
 0x2c9   : > { %v1736_v8 = vpop.f32.mrf.mxu0  ;;  %v1777_v15 = vpop.f32.mrf.mxu1 }
 0x2ca   : > { %v1737_v16 = vadd.f32 %v1736_v8, %v1365_v63  ;;  %v1778_v40 = vadd.f32 %v1777_v15, %v1373_v36  ;;  %v1293_v36 = vsel %vm1291_vm4, %v11038_v30, %v11035_v29  ;;  %v11193_v29 = vld [vmem:[#allocation11 + $0xe0] ss:$16 sps:$4 sm:$0xff]   ;;  %v11195_v30 = vld [vmem:[#allocation11 + $0xe8] ss:$16 sps:$4 sm:$0xff]  }
 0x2cb   : > { %v1738_v1 = vpop.f32.mrf.mxu0  ;;  %v1779_v18 = vpop.f32.mrf.mxu1 }
 0x2cc   : > { %v8287_v22 = vmul.f32 -1.442695, %v1737_v16  ;;  %v1739_v23 = vadd.f32 %v1738_v1, %v1369_v7  ;;  %v1780_v34 = vadd.f32 %v1779_v18, %v1377_v33  ;;  %v13147_v1 = vld [vmem:[#allocation81_spill] sm:$0xff] }
 0x2cd   : > { %v1740_v24 = vpop.f32.mrf.mxu0  ;;  %v1781_v25 = vpop.f32.mrf.mxu1 }
 0x2ce   : > { %9885 = vpow2.f32 %v8287_v22  ;;  %v8288_v26 = vmul.f32 -1.442695, %v1739_v23  ;;  %v8289_v38 = vmul.f32 -1.442695, %v1780_v34 }
 0x2cf   : > { %v1741_v27 = vpop.f32.mrf.mxu0  ;;  %v1782_v31 = vpop.f32.mrf.mxu1 }
 0x2d0   : > { %9887 = vpow2.f32 %v8288_v26  ;;  %v11177_v31 = vpop.permute.xlu1 %2125 }
 0x2d1   : > { %9889 = vpow2.f32 %v8289_v38  ;;  %vm2127_vm5 = vcmp.eq.s32.totalorder %v11177_v31, 1 }
 0x2db   : > { %v9886_v39 = vpop.eup %9885 }
 0x2dc   : > { %v1787_v41 = vadd.f32 1.0, %v9886_v39 }
 0x2dd   : > { %v9888_v42 = vpop.eup %9887 }
 0x2de   : > { %9891 = vrcp.f32 %v1787_v41  ;;  %v1793_v43 = vadd.f32 1.0, %v9888_v42  ;;  %v9890_v46 = vpop.eup %9889 }
 0x2df   : > { %9893 = vtanh.f32 %v1778_v40  ;;  %v1800_v59 = vadd.f32 1.0, %v9890_v46 }
 0x2e0   : > { %9895 = vrcp.f32 %v1793_v43 }
 0x2e9   : > { %v2047_v44 = vpop.f32.mrf.mxu0  ;;  %v2088_v45 = vpop.f32.mrf.mxu1 }
 0x2ea   : > { %v2095_v48 = vadd.f32 %v2047_v44, %v13143_v47  ;;  %v2097_v9 = vadd.f32 %v2088_v45, %v13146_v2  ;;  %v11201_v47 = vld [vmem:[#allocation11 + $0xc4] ss:$16 sps:$4 sm:$0xff]   ;;  %v11267_v2 = vld [vmem:[#allocation11 + $0x2c] ss:$16 sps:$4 sm:$0xff]  }
 0x2eb   : > { %v9892_v50 = vpop.eup %9891  ;;  %v2049_v52 = vpop.f32.mrf.mxu0 }
 0x2ec   : > { %v2090_v53 = vpop.f32.mrf.mxu1  ;;  %v9894_v54 = vpop.eup %9893  ;;  %v8322_v55 = vmul.f32 -1.442695, %v2095_v48  ;;  %v2096_v57 = vadd.f32 %v2049_v52, %v13144_v56  ;;  %v11203_v48 = vld [vmem:[#allocation11 + $0xcc] ss:$16 sps:$4 sm:$0xff]   ;;  %v11215_v52 = vld [vmem:[#allocation11 + $0xa4] ss:$16 sps:$4 sm:$0xff]  }
 0x2ed   : > { %v9896_v58 = vpop.eup %9895  ;;  %v2051_v60 = vpop.f32.mrf.mxu0  ;;  %v1804_v14 = vmul.f32 %v9894_v54, %v9892_v50  ;;  %v2098_v3 = vadd.f32 %v2090_v53, %v13145_v62  ;;  %v11211_v50 = vld [vmem:[#allocation11 + $0xc8] ss:$16 sps:$4 sm:$0xff]   ;;  %v11217_v53 = vld [vmem:[#allocation11 + $0xac] ss:$16 sps:$4 sm:$0xff]   ;;  %v11223_v54 = vld [vmem:[#allocation11 + $0xa0] ss:$16 sps:$4 sm:$0xff]  }
 0x2ee   : > { %v2092_v4 = vpop.f32.mrf.mxu1  ;;  %v1803_v21 = vmul.f32 %v9896_v58, %v11159_v51  ;;  %9897 = vpow2.f32 %v8322_v55  ;;  %v8323_v19 = vmul.f32 -1.442695, %v2096_v57  ;;  %v11225_v55 = vld [vmem:[#allocation11 + $0xa8] ss:$16 sps:$4 sm:$0xff]   ;;  %v11229_v56 = vld [vmem:[#allocation11 + $0x84] ss:$16 sps:$4 sm:$0xff]  }
 0x2ef   : > { %v2052_v11 = vpop.f32.mrf.mxu0  ;;  %v8324_v6 = vmul.f32 -1.442695, %v2098_v3  ;;  %v11231_v57 = vld [vmem:[#allocation11 + $0x8c] ss:$16 sps:$4 sm:$0xff]   ;;  %v11235_v58 = vld [vmem:[#allocation11 + $0x80] ss:$16 sps:$4 sm:$0xff]  }
 0x2f0   : > { %v2093_v12 = vpop.f32.mrf.mxu1  ;;  %v11163_v61 = vadd.f32 %v1804_v14, %v1803_v21  ;;  %9899 = vpow2.f32 %v8323_v19  ;;  %v11241_v60 = vld [vmem:[#allocation11 + $0x64] ss:$16 sps:$4 sm:$0xff]   ;;  %v11243_v4 = vld [vmem:[#allocation11 + $0x6c] ss:$16 sps:$4 sm:$0xff]   ;;  %v11247_v14 = vld [vmem:[#allocation11 + $0x60] ss:$16 sps:$4 sm:$0xff]  }
 0x2f1   : > { %9901 = vrcp.f32 %v1800_v59  ;;  %v11237_v59 = vld [vmem:[#allocation11 + $0x88] ss:$16 sps:$4 sm:$0xff]   ;;  %v11253_v19 = vld [vmem:[#allocation11 + $0x44] ss:$16 sps:$4 sm:$0xff]   ;;  %v11255_v11 = vld [vmem:[#allocation11 + $0x4c] ss:$16 sps:$4 sm:$0xff]  }
 0x2f2   : > { %9903 = vtanh.f32 %v11163_v61  ;;  %v11249_v21 = vld [vmem:[#allocation11 + $0x68] ss:$16 sps:$4 sm:$0xff]   ;;  %v11259_v12 = vld [vmem:[#allocation11 + $0x40] ss:$16 sps:$4 sm:$0xff]   ;;  %v11265_v3 = vld [vmem:[#allocation11 + $0x24] ss:$16 sps:$4 sm:$0xff]  }
 0x2f3   : > { %9905 = vtanh.f32 %v2097_v9  ;;  %v11261_v62 = vld [vmem:[#allocation11 + $0x48] ss:$16 sps:$4 sm:$0xff]   ;;  %v11271_v9 = vld [vmem:[#allocation11 + $0x20] ss:$16 sps:$4 sm:$0xff]  }
 0x2f4   : > { %9907 = vpow2.f32 %v8324_v6  ;;  %v11273_v6 = vld [vmem:[#allocation11 + $0x28] ss:$16 sps:$4 sm:$0xff]  }
 0x2fb   : > { %v9898_v28 = vpop.eup %9897 }
 0x2fc   : > { %v2102_v13 = vadd.f32 1.0, %v9898_v28  ;;  %v11277_v28 = vld [vmem:[#allocation11 + $0x4] ss:$16 sps:$4 sm:$0xff]  }
 0x2fd   : > { %v9900_v63 = vpop.eup %9899 }
 0x2fe   : > { %v9902_v7 = vpop.eup %9901  ;;  %9909 = vrcp.f32 %v2102_v13  ;;  %v2108_v8 = vadd.f32 1.0, %v9900_v63  ;;  %v11279_v13 = vld [vmem:[#allocation11 + $0xc] ss:$16 sps:$4 sm:$0xff]   ;;  %v11283_v63 = vld [vmem:[#allocation11] ss:$16 sps:$4 sm:$0xff]  }
 0x2ff   : > { %v9904_v15 = vpop.eup %9903 }
 0x300   : > { %9911 = vrcp.f32 %v2108_v8  ;;  %v1807_v16 = vmul.f32 %v9904_v15, %v9902_v7  ;;  %v9906_v25 = vpop.eup %9905  ;;  %v11285_v7 = vld [vmem:[#allocation11 + $0x8] ss:$16 sps:$4 sm:$0xff]   ;;  %v11293_v8 = vld [vmem:[#allocation13 + $0xe4] ss:$16 sps:$4 sm:$0xff]   ;;  %v11295_v15 = vld [vmem:[#allocation13 + $0xec] ss:$16 sps:$4 sm:$0xff]  }
 0x301   : > { %v9908_v26 = vpop.eup %9907 }
 0x302   : > { %v11171_v18 = vsel %vm1291_vm4, %v1807_v16, %v13147_v1  ;;  %v1810_v22 = vsel %vm1291_vm4, %v1807_v16, 0.0  ;;  %v2115_v38 = vadd.f32 1.0, %v9908_v26  ;;  %v11297_v16 = vld [vmem:[#allocation13 + $0xe0] ss:$16 sps:$4 sm:$0xff]   ;;  %v11299_v1 = vld [vmem:[#allocation13 + $0xe8] ss:$16 sps:$4 sm:$0xff]  }
 0x303   : > { %v1811_v23 = vpack.c.bf16 %v1810_v22, %v1810_v22  ;;  %v2131_v24 = vpack.c.bf16 %v11171_v18, %v11171_v18  ;;  %13148 = vst [vmem:[#allocation28_spill] sm:$0xff] %v11299_v1  ;;  %v11305_v22 = vld [vmem:[#allocation13 + $0xc4] ss:$16 sps:$4 sm:$0xff]  }
 0x304   : > { %9913 = vrcp.f32 %v2115_v38  ;;  %13149 = vst [vmem:[#allocation29_spill] sm:$0xff] %v11305_v22  ;;  %v11317_v26 = vld [vmem:[#allocation13 + $0xa4] ss:$16 sps:$4 sm:$0xff]   ;;  %v11331_v38 = vld [vmem:[#allocation13 + $0x8c] ss:$16 sps:$4 sm:$0xff]  }
 0x305   : > { %1812 = vst [vmem:[#allocation7] sm:$0xf] %v1811_v23  ;;  %2570 = vmatprep.mubr.bf16.mxu0 %v2131_v24  ;;  %2611 = vmatprep.mubr.bf16.mxu1 %v2131_v24  ;;  %v11307_v23 = vld [vmem:[#allocation13 + $0xcc] ss:$16 sps:$4 sm:$0xff]   ;;  %v11309_v24 = vld [vmem:[#allocation13 + $0xc0] ss:$16 sps:$4 sm:$0xff]  }
 0x306   : > { %13150 = vst [vmem:[#allocation30_spill] sm:$0xff] %v11307_v23  ;;  %13151 = vst [vmem:[#allocation31_spill] sm:$0xff] %v11309_v24 }
 0x307   : > { %13153 = vst [vmem:[#allocation33_spill] sm:$0xff] %v11317_v26  ;;  %13158 = vst [vmem:[#allocation38_spill] sm:$0xff] %v11331_v38 }
 0x30b   : > { %v9910_v27 = vpop.eup %9909 }
 0x30c   : > { %v2119_v33 = vmul.f32 %v9910_v27, %v9906_v25  ;;  %v11311_v25 = vld [vmem:[#allocation13 + $0xc8] ss:$16 sps:$4 sm:$0xff]   ;;  %v11319_v27 = vld [vmem:[#allocation13 + $0xac] ss:$16 sps:$4 sm:$0xff]  }
 0x30d   : > { %v9912_v34 = vpop.eup %9911  ;;  %13152 = vst [vmem:[#allocation32_spill] sm:$0xff] %v11311_v25  ;;  %13154 = vst [vmem:[#allocation34_spill] sm:$0xff] %v11319_v27 }
 0x30e   : > { %v2118_v39 = vmul.f32 %v9912_v34, %v1293_v36  ;;  %v11323_v34 = vld [vmem:[#allocation13 + $0xa8] ss:$16 sps:$4 sm:$0xff]  }
 0x30f   : > { %13156 = vst [vmem:[#allocation36_spill] sm:$0xff] %v11323_v34 }
 0x310   : > { %v2120_v40 = vadd.f32 %v2119_v33, %v2118_v39  ;;  %v11321_v33 = vld [vmem:[#allocation13 + $0xa0] ss:$16 sps:$4 sm:$0xff]  }
 0x311   : > { %v9914_v42 = vpop.eup %9913  ;;  %13155 = vst [vmem:[#allocation35_spill] sm:$0xff] %v11321_v33  ;;  %v11333_v39 = vld [vmem:[#allocation13 + $0x80] ss:$16 sps:$4 sm:$0xff]  }
 0x312   : > { %9915 = vtanh.f32 %v2120_v40  ;;  %v11186_v41 = vsel %vm2127_vm5, %v2120_v40, %v1293_v36  ;;  %v11329_v36 = vld [vmem:[#allocation13 + $0x84] ss:$16 sps:$4 sm:$0xff]   ;;  %13159 = vst [vmem:[#allocation39_spill] sm:$0xff] %v11333_v39  ;;  %v11335_v40 = vld [vmem:[#allocation13 + $0x88] ss:$16 sps:$4 sm:$0xff]  }
 0x313   : > { %13157 = vst [vmem:[#allocation37_spill] sm:$0xff] %v11329_v36  ;;  %13160 = vst [vmem:[#allocation40_spill] sm:$0xff] %v11335_v40 }
 0x31f   : > { %v9916_v43 = vpop.eup %9915 }
 0x320   : > { %v2122_v44 = vmul.f32 %v9916_v43, %v9914_v42  ;;  %v11341_v42 = vld [vmem:[#allocation13 + $0x64] ss:$16 sps:$4 sm:$0xff]   ;;  %v11343_v43 = vld [vmem:[#allocation13 + $0x6c] ss:$16 sps:$4 sm:$0xff]  }
 0x321   : > { %13161 = vst [vmem:[#allocation41_spill] sm:$0xff] %v11341_v42  ;;  %13162 = vst [vmem:[#allocation42_spill] sm:$0xff] %v11343_v43 }
 0x322   : > { %v11191_v45 = vsel %vm2127_vm5, %v2122_v44, %v11047_v49  ;;  %v11209_v49 = vld [vmem:[#allocation11 + $0xc0] ss:$16 sps:$4 sm:$0xff]  }
 0x323   : > { %v11199_v46 = vpack.c.bf16 %v11191_v45, %v11191_v45  ;;  %v11345_v44 = vld [vmem:[#allocation13 + $0x60] ss:$16 sps:$4 sm:$0xff]  }
 0x324   : > { %13163 = vst [vmem:[#allocation43_spill] sm:$0xff] %v11345_v44 }
 0x325   : > { %2571 = vmatmul.mubr.bf16.vlgmr.msra.gmra.mxu0 %v11199_v46  ;;  %2612 = vmatmul.mubr.bf16.vlgmr.msra.gmra.mxu1 %v11199_v46 }
 0x326   : > { %2851 = vmatpush1.bf16.msra.mxu0 %v11193_v29  ;;  %2892 = vmatpush1.bf16.msra.mxu1 %v11195_v30 }
 0x327   : > { %2852 = vmatprep.subr.bf16.mxu0 %v11201_v47  ;;  %2893 = vmatprep.subr.bf16.mxu1 %v11203_v48 }
 0x328   : > { %2882 = vmatprep.mubr.bf16.mxu0 %v13057_v5  ;;  %2923 = vmatprep.mubr.bf16.mxu1 %v13057_v5 }
 0x32a   : > { %2853 = vmatpush1.bf16.msra.mxu0 %v11209_v49  ;;  %2894 = vmatpush1.bf16.msra.mxu1 %v11211_v50 }
 0x32b   : > { %2854 = vmatprep.subr.bf16.mxu0 %v11215_v52  ;;  %2895 = vmatprep.subr.bf16.mxu1 %v11217_v53 }
 0x32e   : > { %2855 = vmatpush1.bf16.msra.mxu0 %v11223_v54  ;;  %2896 = vmatpush1.bf16.msra.mxu1 %v11225_v55 }
 0x32f   : > { %2856 = vmatprep.subr.bf16.mxu0 %v11229_v56  ;;  %2897 = vmatprep.subr.bf16.mxu1 %v11231_v57 }
 0x332   : > { %2857 = vmatpush1.bf16.msra.mxu0 %v11235_v58  ;;  %2898 = vmatpush1.bf16.msra.mxu1 %v11237_v59 }
 0x333   : > { %2858 = vmatprep.subr.bf16.mxu0 %v11241_v60  ;;  %2899 = vmatprep.subr.bf16.mxu1 %v11243_v4 }
 0x336   : > { %2859 = vmatpush1.bf16.msra.mxu0 %v11247_v14  ;;  %2900 = vmatpush1.bf16.msra.mxu1 %v11249_v21 }
 0x337   : > { %2860 = vmatprep.subr.bf16.mxu0 %v11253_v19  ;;  %2901 = vmatprep.subr.bf16.mxu1 %v11255_v11 }
 0x33a   : > { %2861 = vmatpush1.bf16.msra.mxu0 %v11259_v12  ;;  %2902 = vmatpush1.bf16.msra.mxu1 %v11261_v62 }
 0x33b   : > { %2862 = vmatprep.subr.bf16.mxu0 %v11265_v3  ;;  %2903 = vmatprep.subr.bf16.mxu1 %v11267_v2 }
 0x33e   : > { %2863 = vmatpush1.bf16.msra.mxu0 %v11271_v9  ;;  %2904 = vmatpush1.bf16.msra.mxu1 %v11273_v6 }
 0x33f   : > { %2864 = vmatprep.subr.bf16.mxu0 %v11277_v28  ;;  %2905 = vmatprep.subr.bf16.mxu1 %v11279_v13 }
 0x342   : > { %2865 = vmatpush1.bf16.msra.mxu0 %v11283_v63  ;;  %2906 = vmatpush1.bf16.msra.mxu1 %v11285_v7 }
 0x343   : > { %3375 = vmatprep.subr.bf16.mxu0 %v11293_v8  ;;  %3416 = vmatprep.subr.bf16.mxu1 %v11295_v15 }
 0x345   : > { %2883 = vmatmul.mubr.bf16.vlgmr.msra.gmra.mxu0 %v11199_v46  ;;  %2924 = vmatmul.mubr.bf16.vlgmr.msra.gmra.mxu1 %v11199_v46  ;;  %v11347_v46 = vld [vmem:[#allocation13 + $0x68] ss:$16 sps:$4 sm:$0xff]  }
 0x346   : > { %3376 = vmatpush1.bf16.msra.mxu0 %v11297_v16  ;;  %3417 = vmatpush1.bf16.msra.mxu1 %v11299_v1  ;;  %13164 = vst [vmem:[#allocation44_spill] sm:$0xff] %v11347_v46 }
 0x347   : > { %3377 = vmatprep.subr.bf16.mxu0 %v11305_v22  ;;  %3418 = vmatprep.subr.bf16.mxu1 %v11307_v23 }
 0x34a   : > { %3378 = vmatpush1.bf16.msra.mxu0 %v11309_v24  ;;  %3419 = vmatpush1.bf16.msra.mxu1 %v11311_v25 }
 0x34b   : > { %3379 = vmatprep.subr.bf16.mxu0 %v11317_v26  ;;  %3420 = vmatprep.subr.bf16.mxu1 %v11319_v27 }
 0x34e   : > { %3380 = vmatpush1.bf16.msra.mxu0 %v11321_v33  ;;  %3421 = vmatpush1.bf16.msra.mxu1 %v11323_v34  ;;  %v11445_v34 = vld [vmem:[#allocation13 + $0x144] ss:$16 sps:$4 sm:$0xff]   ;;  %v11448_v33 = vld [vmem:[#allocation13 + $0x14c] ss:$16 sps:$4 sm:$0xff]  }
 0x34f   : > { %3381 = vmatprep.subr.bf16.mxu0 %v11329_v36  ;;  %3422 = vmatprep.subr.bf16.mxu1 %v11331_v38  ;;  %v11353_v38 = vld [vmem:[#allocation13 + $0x44] ss:$16 sps:$4 sm:$0xff]   ;;  %v11359_v36 = vld [vmem:[#allocation13 + $0x48] ss:$16 sps:$4 sm:$0xff]   ;;  %13197 = vst [vmem:[#allocation77_spill] sm:$0xff] %v11445_v34  ;;  %13198 = vst [vmem:[#allocation78_spill] sm:$0xff] %v11448_v33 }
 0x350   : > { %13165 = vst [vmem:[#allocation45_spill] sm:$0xff] %v11353_v38  ;;  %13168 = vst [vmem:[#allocation48_spill] sm:$0xff] %v11359_v36 }
 0x352   : > { %3382 = vmatpush1.bf16.msra.mxu0 %v11333_v39  ;;  %3423 = vmatpush1.bf16.msra.mxu1 %v11335_v40  ;;  %v11355_v39 = vld [vmem:[#allocation13 + $0x4c] ss:$16 sps:$4 sm:$0xff]   ;;  %v11357_v40 = vld [vmem:[#allocation13 + $0x40] ss:$16 sps:$4 sm:$0xff]  }
 0x353   : > { %3383 = vmatprep.subr.bf16.mxu0 %v11341_v42  ;;  %3424 = vmatprep.subr.bf16.mxu1 %v11343_v43  ;;  %13166 = vst [vmem:[#allocation46_spill] sm:$0xff] %v11355_v39  ;;  %13167 = vst [vmem:[#allocation47_spill] sm:$0xff] %v11357_v40  ;;  %v11365_v43 = vld [vmem:[#allocation13 + $0x24] ss:$16 sps:$4 sm:$0xff]   ;;  %v11371_v42 = vld [vmem:[#allocation13 + $0x28] ss:$16 sps:$4 sm:$0xff]  }
 0x354   : > { %13169 = vst [vmem:[#allocation49_spill] sm:$0xff] %v11365_v43  ;;  %13172 = vst [vmem:[#allocation51_spill] sm:$0xff] %v11371_v42 }
 0x356   : > { %3384 = vmatpush1.bf16.msra.mxu0 %v11345_v44  ;;  %3425 = vmatpush1.bf16.msra.mxu1 %v11347_v46  ;;  %v11367_v44 = vld [vmem:[#allocation13 + $0x2c] ss:$16 sps:$4 sm:$0xff]   ;;  %v11369_v46 = vld [vmem:[#allocation13 + $0x20] ss:$16 sps:$4 sm:$0xff]  }
 0x357   : > { %3385 = vmatprep.subr.bf16.mxu0 %v11353_v38  ;;  %3426 = vmatprep.subr.bf16.mxu1 %v11355_v39  ;;  %13170 = vst [vmem:[#allocation52_spill] sm:$0xff] %v11367_v44  ;;  %13171 = vst [vmem:[#allocation50_spill] sm:$0xff] %v11369_v46  ;;  %v11377_v39 = vld [vmem:[#allocation13 + $0x4] ss:$16 sps:$4 sm:$0xff]   ;;  %v11383_v38 = vld [vmem:[#allocation13 + $0x8] ss:$16 sps:$4 sm:$0xff]  }
 0x358   : > { %13173 = vst [vmem:[#allocation53_spill] sm:$0xff] %v11377_v39  ;;  %13176 = vst [vmem:[#allocation56_spill] sm:$0xff] %v11383_v38 }
 0x35a   : > { %3386 = vmatpush1.bf16.msra.mxu0 %v11357_v40  ;;  %3427 = vmatpush1.bf16.msra.mxu1 %v11359_v36  ;;  %v11379_v40 = vld [vmem:[#allocation13 + $0xc] ss:$16 sps:$4 sm:$0xff]   ;;  %v11381_v36 = vld [vmem:[#allocation13] ss:$16 sps:$4 sm:$0xff]  }
 0x35b   : > { %3387 = vmatprep.subr.bf16.mxu0 %v11365_v43  ;;  %3428 = vmatprep.subr.bf16.mxu1 %v11367_v44  ;;  %13174 = vst [vmem:[#allocation54_spill] sm:$0xff] %v11379_v40  ;;  %13175 = vst [vmem:[#allocation55_spill] sm:$0xff] %v11381_v36  ;;  %v11389_v44 = vld [vmem:[#allocation13 + $0x1e4] ss:$16 sps:$4 sm:$0xff]   ;;  %v11395_v43 = vld [vmem:[#allocation13 + $0x1e8] ss:$16 sps:$4 sm:$0xff]  }
 0x35c   : > { %13177 = vst [vmem:[#allocation57_spill] sm:$0xff] %v11389_v44  ;;  %13180 = vst [vmem:[#allocation60_spill] sm:$0xff] %v11395_v43 }
 0x35e   : > { %3388 = vmatpush1.bf16.msra.mxu0 %v11369_v46  ;;  %3429 = vmatpush1.bf16.msra.mxu1 %v11371_v42  ;;  %v11391_v46 = vld [vmem:[#allocation13 + $0x1ec] ss:$16 sps:$4 sm:$0xff]   ;;  %v11393_v42 = vld [vmem:[#allocation13 + $0x1e0] ss:$16 sps:$4 sm:$0xff]  }
 0x35f   : > { %3389 = vmatprep.subr.bf16.mxu0 %v11377_v39  ;;  %3430 = vmatprep.subr.bf16.mxu1 %v11379_v40  ;;  %13178 = vst [vmem:[#allocation58_spill] sm:$0xff] %v11391_v46  ;;  %13179 = vst [vmem:[#allocation59_spill] sm:$0xff] %v11393_v42  ;;  %v11401_v40 = vld [vmem:[#allocation13 + $0x1c4] ss:$16 sps:$4 sm:$0xff]   ;;  %v11407_v39 = vld [vmem:[#allocation13 + $0x1c8] ss:$16 sps:$4 sm:$0xff]  }
 0x360   : > { %13181 = vst [vmem:[#allocation61_spill] sm:$0xff] %v11401_v40  ;;  %13184 = vst [vmem:[#allocation64_spill] sm:$0xff] %v11407_v39 }
 0x362   : > { %3390 = vmatpush1.bf16.msra.mxu0 %v11381_v36  ;;  %3431 = vmatpush1.bf16.msra.mxu1 %v11383_v38  ;;  %v11403_v36 = vld [vmem:[#allocation13 + $0x1cc] ss:$16 sps:$4 sm:$0xff]   ;;  %v11405_v38 = vld [vmem:[#allocation13 + $0x1c0] ss:$16 sps:$4 sm:$0xff]  }
 0x363   : > { %3391 = vmatprep.subr.bf16.mxu0 %v11389_v44  ;;  %3432 = vmatprep.subr.bf16.mxu1 %v11391_v46  ;;  %13182 = vst [vmem:[#allocation62_spill] sm:$0xff] %v11403_v36  ;;  %13183 = vst [vmem:[#allocation63_spill] sm:$0xff] %v11405_v38  ;;  %v11413_v46 = vld [vmem:[#allocation13 + $0x1a4] ss:$16 sps:$4 sm:$0xff]   ;;  %v11419_v44 = vld [vmem:[#allocation13 + $0x1a8] ss:$16 sps:$4 sm:$0xff]  }
 0x364   : > { %13185 = vst [vmem:[#allocation65_spill] sm:$0xff] %v11413_v46  ;;  %13188 = vst [vmem:[#allocation68_spill] sm:$0xff] %v11419_v44 }
 0x366   : > { %3392 = vmatpush2.bf16.msra.mxu0 %v11393_v42  ;;  %3433 = vmatpush2.bf16.msra.mxu1 %v11395_v43  ;;  %v11415_v42 = vld [vmem:[#allocation13 + $0x1ac] ss:$16 sps:$4 sm:$0xff]   ;;  %v11417_v43 = vld [vmem:[#allocation13 + $0x1a0] ss:$16 sps:$4 sm:$0xff]  }
 0x367   : > { %3393 = vmatprep.subr.bf16.mxu0 %v11401_v40  ;;  %3434 = vmatprep.subr.bf16.mxu1 %v11403_v36  ;;  %13186 = vst [vmem:[#allocation66_spill] sm:$0xff] %v11415_v42  ;;  %13187 = vst [vmem:[#allocation67_spill] sm:$0xff] %v11417_v43  ;;  %v11425_v36 = vld [vmem:[#allocation13 + $0x184] ss:$16 sps:$4 sm:$0xff]   ;;  %v11431_v40 = vld [vmem:[#allocation13 + $0x188] ss:$16 sps:$4 sm:$0xff]  }
 0x368   : > { %13189 = vst [vmem:[#allocation69_spill] sm:$0xff] %v11425_v36  ;;  %13192 = vst [vmem:[#allocation72_spill] sm:$0xff] %v11431_v40 }
 0x36a   : > { %3394 = vmatpush2.bf16.msra.mxu0 %v11405_v38  ;;  %3435 = vmatpush2.bf16.msra.mxu1 %v11407_v39  ;;  %v11427_v38 = vld [vmem:[#allocation13 + $0x18c] ss:$16 sps:$4 sm:$0xff]   ;;  %v11429_v39 = vld [vmem:[#allocation13 + $0x180] ss:$16 sps:$4 sm:$0xff]  }
 0x36b   : > { %3395 = vmatprep.subr.bf16.mxu0 %v11413_v46  ;;  %3436 = vmatprep.subr.bf16.mxu1 %v11415_v42  ;;  %13190 = vst [vmem:[#allocation70_spill] sm:$0xff] %v11427_v38  ;;  %13191 = vst [vmem:[#allocation71_spill] sm:$0xff] %v11429_v39  ;;  %v11437_v42 = vld [vmem:[#allocation13 + $0x160] ss:$16 sps:$4 sm:$0xff]   ;;  %v11443_v46 = vld [vmem:[#allocation13 + $0x16c] ss:$16 sps:$4 sm:$0xff]  }
 0x36c   : > { %13193 = vst [vmem:[#allocation73_spill] sm:$0xff] %v11437_v42  ;;  %13196 = vst [vmem:[#allocation76_spill] sm:$0xff] %v11443_v46 }
 0x36e   : > { %3396 = vmatpush2.bf16.msra.mxu0 %v11417_v43  ;;  %3437 = vmatpush2.bf16.msra.mxu1 %v11419_v44  ;;  %v11439_v43 = vld [vmem:[#allocation13 + $0x164] ss:$16 sps:$4 sm:$0xff]   ;;  %v11441_v44 = vld [vmem:[#allocation13 + $0x168] ss:$16 sps:$4 sm:$0xff]  }
 0x36f   : > { %3397 = vmatprep.subr.bf16.mxu0 %v11425_v36  ;;  %3438 = vmatprep.subr.bf16.mxu1 %v11427_v38  ;;  %13194 = vst [vmem:[#allocation74_spill] sm:$0xff] %v11439_v43  ;;  %13195 = vst [vmem:[#allocation75_spill] sm:$0xff] %v11441_v44  ;;  %v11459_v38 = vld [vmem:[#allocation13 + $0x124] ss:$16 sps:$4 sm:$0xff]   ;;  %v11461_v36 = vld [vmem:[#allocation13 + $0x12c] ss:$16 sps:$4 sm:$0xff]  }
 0x370   : > { %13201 = vst [vmem:[#allocation27_spill] sm:$0xff] %v11459_v38  ;;  %13202 = vst [vmem:[#allocation82_spill] sm:$0xff] %v11461_v36 }
 0x372   : > { %3398 = vmatpush2.bf16.msra.mxu0 %v11429_v39  ;;  %3439 = vmatpush2.bf16.msra.mxu1 %v11431_v40  ;;  %v11453_v40 = vld [vmem:[#allocation13 + $0x140] ss:$16 sps:$4 sm:$0xff]   ;;  %v11455_v39 = vld [vmem:[#allocation13 + $0x148] ss:$16 sps:$4 sm:$0xff]  }
 0x373   : > { %3399 = vmatprep.subr.bf16.mxu0 %v11439_v43  ;;  %3440 = vmatprep.subr.bf16.mxu1 %v11443_v46  ;;  %13199 = vst [vmem:[#allocation79_spill] sm:$0xff] %v11453_v40  ;;  %13200 = vst [vmem:[#allocation80_spill] sm:$0xff] %v11455_v39  ;;  %v11465_v46 = vld [vmem:[#allocation13 + $0x120] ss:$16 sps:$4 sm:$0xff]  }
 0x374   : > { %13203 = vst [vmem:[#allocation84_spill] sm:$0xff] %v11465_v46 }
 0x376   : > { %3400 = vmatpush2.bf16.msra.mxu0 %v11437_v42  ;;  %3441 = vmatpush2.bf16.msra.mxu1 %v11441_v44  ;;  %v11467_v42 = vld [vmem:[#allocation13 + $0x128] ss:$16 sps:$4 sm:$0xff]   ;;  %v11471_v44 = vld [vmem:[#allocation13 + $0x104] ss:$16 sps:$4 sm:$0xff]  }
 0x377   : > { %3401 = vmatprep.subr.bf16.mxu0 %v11445_v34  ;;  %3442 = vmatprep.subr.bf16.mxu1 %v11448_v33  ;;  %13204 = vst [vmem:[#allocation85_spill] sm:$0xff] %v11467_v42  ;;  %13205 = vst [vmem:[#allocation83_spill] sm:$0xff] %v11471_v44  ;;  %v11473_v34 = vld [vmem:[#allocation13 + $0x10c] ss:$16 sps:$4 sm:$0xff]   ;;  %v11477_v33 = vld [vmem:[#allocation13 + $0x100] ss:$16 sps:$4 sm:$0xff]  }
 0x378   : > { %13206 = vst [vmem:[#allocation81_spill] sm:$0xff] %v11473_v34  ;;  %13207 = vst [vmem:[#allocation110_spill] sm:$0xff] %v11477_v33 }
 0x37a   : > { %3402 = vmatpush2.bf16.msra.mxu0 %v11453_v40  ;;  %3443 = vmatpush2.bf16.msra.mxu1 %v11455_v39  ;;  %v11479_v40 = vld [vmem:[#allocation13 + $0x108] ss:$16 sps:$4 sm:$0xff]  }
 0x37b   : > { %3403 = vmatprep.subr.bf16.mxu0 %v11459_v38  ;;  %3444 = vmatprep.subr.bf16.mxu1 %v11461_v36  ;;  %13208 = vst [vmem:[#allocation111_spill] sm:$0xff] %v11479_v40 }
 0x37e   : > { %3404 = vmatpush2.bf16.msra.mxu0 %v11465_v46  ;;  %3445 = vmatpush2.bf16.msra.mxu1 %v11467_v42  ;;  %v2196_v42 = vld [vmem:[%s12710_s6] sm:$0xf] }
 0x37f   : > { %3405 = vmatprep.subr.bf16.mxu0 %v11471_v44  ;;  %3446 = vmatprep.subr.bf16.mxu1 %v11473_v34  ;;  %v2201_v46 = vrot.slane %v2196_v42, %v13139_v17  ;;  %v2205_v36 = vrot.slane %v2196_v42, %v13140_v10  ;;  %v2213_v24 = vrot.slane %v2196_v42, %v13141_v32 }
 0x380   : > { %v2209_v17 = vrot.slane %v2196_v42, %v13142_v35 }
 0x382   : > { %3406 = vmatpush2.bf16.msra.mxu0 %v11477_v33  ;;  %3447 = vmatpush2.bf16.msra.mxu1 %v11479_v40 }
 0x383   : > { %3687 = vmatprep.subr.bf16.mxu0 %v11145_v37  ;;  %3728 = vmatprep.subr.bf16.mxu1 %v11147_v20 }
 0x3e5   : > { %v2572_v38 = vpop.f32.mrf.mxu0  ;;  %v2613_v44 = vpop.f32.mrf.mxu1 }
 0x3e6   : > { %v2573_v39 = vadd.f32 %v2572_v38, %v2201_v46  ;;  %v2614_v1 = vadd.f32 %v2613_v44, %v2209_v17 }
 0x3e7   : > { %v2574_v34 = vpop.f32.mrf.mxu0  ;;  %v2615_v43 = vpop.f32.mrf.mxu1 }
 0x3e8   : > { %v8389_v33 = vmul.f32 -1.442695, %v2573_v39  ;;  %v2575_v27 = vadd.f32 %v2574_v34, %v2205_v36  ;;  %v2616_v23 = vadd.f32 %v2615_v43, %v2213_v24 }
 0x3e9   : > { %v2576_v40 = vpop.f32.mrf.mxu0  ;;  %v2617_v26 = vpop.f32.mrf.mxu1 }
 0x3ea   : > { %9917 = vpow2.f32 %v8389_v33  ;;  %v8390_v37 = vmul.f32 -1.442695, %v2575_v27  ;;  %v8391_v10 = vmul.f32 -1.442695, %v2616_v23  ;;  %v13210_v23 = vld [vmem:[#allocation88_spill] sm:$0xff] }
 0x3eb   : > { %v2577_v20 = vpop.f32.mrf.mxu0  ;;  %v2618_v25 = vpop.f32.mrf.mxu1 }
 0x3ec   : > { %9919 = vpow2.f32 %v8390_v37  ;;  %v13209_v25 = vld [vmem:[#allocation86_spill] sm:$0xff] }
 0x3ed   : > { %9921 = vpow2.f32 %v8391_v10  ;;  %v1809_v10 = vsel %vm1291_vm4, %v11163_v61, %v11159_v51  ;;  %v13212_v51 = vld [vmem:[#allocation87_spill] sm:$0xff] }
 0x3f7   : > { %v9918_v22 = vpop.eup %9917 }
 0x3f8   : > { %v2623_v38 = vadd.f32 1.0, %v9918_v22 }
 0x3f9   : > { %v9920_v46 = vpop.eup %9919 }
 0x3fa   : > { %9923 = vrcp.f32 %v2623_v38  ;;  %v2629_v34 = vadd.f32 1.0, %v9920_v46  ;;  %v9922_v33 = vpop.eup %9921 }
 0x3fb   : > { %9925 = vtanh.f32 %v2614_v1  ;;  %v2636_v1 = vadd.f32 1.0, %v9922_v33 }
 0x3fc   : > { %9927 = vrcp.f32 %v2629_v34 }
 0x405   : > { %v2884_v26 = vpop.f32.mrf.mxu0  ;;  %v2925_v27 = vpop.f32.mrf.mxu1 }
 0x406   : > { %v2932_v36 = vadd.f32 %v2884_v26, %v13209_v25  ;;  %v2934_v61 = vadd.f32 %v2925_v27, %v13212_v51 }
 0x407   : > { %v9924_v39 = vpop.eup %9923  ;;  %v2886_v40 = vpop.f32.mrf.mxu0 }
 0x408   : > { %v2927_v24 = vpop.f32.mrf.mxu1  ;;  %v9926_v43 = vpop.eup %9925  ;;  %v8424_v42 = vmul.f32 -1.442695, %v2932_v36  ;;  %v2933_v37 = vadd.f32 %v2886_v40, %v13210_v23  ;;  %v13211_v40 = vld [vmem:[#allocation89_spill] sm:$0xff] }
 0x409   : > { %v9928_v17 = vpop.eup %9927  ;;  %v2888_v22 = vpop.f32.mrf.mxu0  ;;  %v2640_v20 = vmul.f32 %v9926_v43, %v9924_v39  ;;  %v2935_v0 = vadd.f32 %v2927_v24, %v13211_v40 }
 0x40a   : > { %v2929_v44 = vpop.f32.mrf.mxu1  ;;  %v2639_v38 = vmul.f32 %v9928_v17, %v1809_v10  ;;  %9929 = vpow2.f32 %v8424_v42  ;;  %v8425_v46 = vmul.f32 -1.442695, %v2933_v37 }
 0x40b   : > { %v2889_v34 = vpop.f32.mrf.mxu0  ;;  %v8426_v33 = vmul.f32 -1.442695, %v2935_v0 }
 0x40c   : > { %v2930_v26 = vpop.f32.mrf.mxu1  ;;  %v2641_v25 = vadd.f32 %v2640_v20, %v2639_v38  ;;  %9931 = vpow2.f32 %v8425_v46 }
 0x40d   : > { %9933 = vrcp.f32 %v2636_v1 }
 0x40e   : > { %9935 = vtanh.f32 %v2641_v25  ;;  %v11502_v36 = vsel %vm2127_vm5, %v2641_v25, %v1809_v10 }
 0x40f   : > { %9937 = vtanh.f32 %v2934_v61 }
 0x410   : > { %9939 = vpow2.f32 %v8426_v33 }
 0x417   : > { %v9930_v23 = vpop.eup %9929 }
 0x418   : > { %v2939_v39 = vadd.f32 1.0, %v9930_v23 }
 0x419   : > { %v9932_v43 = vpop.eup %9931 }
 0x41a   : > { %v9934_v42 = vpop.eup %9933  ;;  %9941 = vrcp.f32 %v2939_v39  ;;  %v2945_v37 = vadd.f32 1.0, %v9932_v43  ;;  %v13248_v39 = vld [vmem:[#allocation63_spill] sm:$0xff]  ;;  %v13249_v43 = vld [vmem:[#allocation64_spill] sm:$0xff] }
 0x41b   : > { %v9936_v17 = vpop.eup %9935 }
 0x41c   : > { %9943 = vrcp.f32 %v2945_v37  ;;  %v2643_v1 = vmul.f32 %v9936_v17, %v9934_v42  ;;  %v9938_v44 = vpop.eup %9937  ;;  %v13250_v42 = vld [vmem:[#allocation65_spill] sm:$0xff]  ;;  %v13251_v37 = vld [vmem:[#allocation66_spill] sm:$0xff]  ;;  %v13252_v17 = vld [vmem:[#allocation67_spill] sm:$0xff] }
 0x41d   : > { %v9940_v20 = vpop.eup %9939 }
 0x41e   : > { %v11509_v10 = vsel %vm2127_vm5, %v2643_v1, %v11171_v18  ;;  %v2646_v27 = vsel %vm2127_vm5, %v2643_v1, 0.0  ;;  %v2952_v26 = vadd.f32 1.0, %v9940_v20  ;;  %v11516_v18 = vpop.permute.xlu1 %2962  ;;  %v13253_v1 = vld [vmem:[#allocation68_spill] sm:$0xff]  ;;  %v13258_v20 = vld [vmem:[#allocation74_spill] sm:$0xff] }
 0x41f   : > { %v2647_v24 = vpack.c.bf16 %v2646_v27, %v2646_v27  ;;  %v2968_v22 = vpack.c.bf16 %v11509_v10, %v11509_v10  ;;  %vm2964_vm6 = vcmp.eq.s32.totalorder %v11516_v18, 1  ;;  %v13254_v27 = vld [vmem:[#allocation69_spill] sm:$0xff] }
 0x420   : > { %9945 = vrcp.f32 %v2952_v26  ;;  %v13262_v26 = vld [vmem:[#allocation77_spill] sm:$0xff] }
 0x421   : > { %2649 = vst [vmem:[#allocation7 + $0x4] sm:$0xf] %v2647_v24  ;;  %3407 = vmatprep.mubr.bf16.mxu0 %v2968_v22  ;;  %3448 = vmatprep.mubr.bf16.mxu1 %v2968_v22  ;;  %v13255_v24 = vld [vmem:[#allocation70_spill] sm:$0xff]  ;;  %v13256_v22 = vld [vmem:[#allocation71_spill] sm:$0xff] }
 0x427   : > { %v9942_v38 = vpop.eup %9941 }
 0x428   : > { %v2956_v46 = vmul.f32 %v9942_v38, %v9938_v44  ;;  %v13257_v44 = vld [vmem:[#allocation72_spill] sm:$0xff] }
 0x429   : > { %v9944_v34 = vpop.eup %9943  ;;  %v13259_v38 = vld [vmem:[#allocation76_spill] sm:$0xff] }
 0x42a   : > { %v2955_v25 = vmul.f32 %v9944_v34, %v11186_v41  ;;  %v13261_v34 = vld [vmem:[#allocation75_spill] sm:$0xff] }
 0x42c   : > { %v2957_v40 = vadd.f32 %v2956_v46, %v2955_v25  ;;  %v13260_v46 = vld [vmem:[#allocation73_spill] sm:$0xff]  ;;  %v13263_v25 = vld [vmem:[#allocation78_spill] sm:$0xff] }
 0x42d   : > { %v9946_v0 = vpop.eup %9945 }
 0x42e   : > { %9947 = vtanh.f32 %v2957_v40  ;;  %v11522_v31 = vsel %vm2964_vm6, %v2957_v40, %v11186_v41  ;;  %v13213_v41 = vld [vmem:[#allocation28_spill] sm:$0xff]  ;;  %v13264_v40 = vld [vmem:[#allocation79_spill] sm:$0xff] }
 0x43b   : > { %v9948_v51 = vpop.eup %9947 }
 0x43c   : > { %v2959_v61 = vmul.f32 %v9948_v51, %v9946_v0  ;;  %v13265_v0 = vld [vmem:[#allocation80_spill] sm:$0xff]  ;;  %v13266_v51 = vld [vmem:[#allocation27_spill] sm:$0xff] }
 0x43e   : > { %v11527_v33 = vsel %vm2964_vm6, %v2959_v61, %v11191_v45  ;;  %v13214_v45 = vld [vmem:[#allocation29_spill] sm:$0xff]  ;;  %v13267_v61 = vld [vmem:[#allocation82_spill] sm:$0xff] }
 0x43f   : > { %v2967_v23 = vpack.c.bf16 %v11527_v33, %v11527_v33 }
 0x441   : > { %3408 = vmatmul.mubr.bf16.vlgmr.msra.gmra.mxu0 %v2967_v23  ;;  %3449 = vmatmul.mubr.bf16.vlgmr.msra.gmra.mxu1 %v2967_v23 }
 0x442   : > { %3688 = vmatpush1.bf16.msra.mxu0 %v11193_v29  ;;  %3729 = vmatpush1.bf16.msra.mxu1 %v11195_v30  ;;  %v13215_v29 = vld [vmem:[#allocation30_spill] sm:$0xff]  ;;  %v13216_v30 = vld [vmem:[#allocation31_spill] sm:$0xff] }
 0x443   : > { %3689 = vmatprep.subr.bf16.mxu0 %v11201_v47  ;;  %3730 = vmatprep.subr.bf16.mxu1 %v11203_v48  ;;  %v13217_v47 = vld [vmem:[#allocation32_spill] sm:$0xff]  ;;  %v13218_v48 = vld [vmem:[#allocation33_spill] sm:$0xff] }
 0x444   : > { %3719 = vmatprep.mubr.bf16.mxu0 %v13057_v5  ;;  %3760 = vmatprep.mubr.bf16.mxu1 %v13057_v5 }
 0x446   : > { %3690 = vmatpush1.bf16.msra.mxu0 %v11209_v49  ;;  %3731 = vmatpush1.bf16.msra.mxu1 %v11211_v50  ;;  %v13219_v49 = vld [vmem:[#allocation34_spill] sm:$0xff]  ;;  %v13220_v50 = vld [vmem:[#allocation35_spill] sm:$0xff] }
 0x447   : > { %3691 = vmatprep.subr.bf16.mxu0 %v11215_v52  ;;  %3732 = vmatprep.subr.bf16.mxu1 %v11217_v53  ;;  %v13221_v52 = vld [vmem:[#allocation36_spill] sm:$0xff]  ;;  %v13222_v53 = vld [vmem:[#allocation37_spill] sm:$0xff] }
 0x44a   : > { %3692 = vmatpush1.bf16.msra.mxu0 %v11223_v54  ;;  %3733 = vmatpush1.bf16.msra.mxu1 %v11225_v55  ;;  %v13223_v54 = vld [vmem:[#allocation38_spill] sm:$0xff]  ;;  %v13224_v55 = vld [vmem:[#allocation39_spill] sm:$0xff] }
 0x44b   : > { %3693 = vmatprep.subr.bf16.mxu0 %v11229_v56  ;;  %3734 = vmatprep.subr.bf16.mxu1 %v11231_v57  ;;  %v13225_v56 = vld [vmem:[#allocation40_spill] sm:$0xff]  ;;  %v13226_v57 = vld [vmem:[#allocation41_spill] sm:$0xff] }
 0x44e   : > { %3694 = vmatpush1.bf16.msra.mxu0 %v11235_v58  ;;  %3735 = vmatpush1.bf16.msra.mxu1 %v11237_v59  ;;  %v13227_v58 = vld [vmem:[#allocation42_spill] sm:$0xff]  ;;  %v13228_v59 = vld [vmem:[#allocation43_spill] sm:$0xff] }
 0x44f   : > { %3695 = vmatprep.subr.bf16.mxu0 %v11241_v60  ;;  %3736 = vmatprep.subr.bf16.mxu1 %v11243_v4  ;;  %v13229_v60 = vld [vmem:[#allocation44_spill] sm:$0xff]  ;;  %v13230_v4 = vld [vmem:[#allocation45_spill] sm:$0xff] }
 0x452   : > { %3696 = vmatpush1.bf16.msra.mxu0 %v11247_v14  ;;  %3737 = vmatpush1.bf16.msra.mxu1 %v11249_v21  ;;  %v13231_v14 = vld [vmem:[#allocation46_spill] sm:$0xff]  ;;  %v13232_v21 = vld [vmem:[#allocation47_spill] sm:$0xff] }
 0x453   : > { %3697 = vmatprep.subr.bf16.mxu0 %v11253_v19  ;;  %3738 = vmatprep.subr.bf16.mxu1 %v11255_v11  ;;  %v13233_v19 = vld [vmem:[#allocation48_spill] sm:$0xff]  ;;  %v13234_v11 = vld [vmem:[#allocation49_spill] sm:$0xff] }
 0x456   : > { %3698 = vmatpush1.bf16.msra.mxu0 %v11259_v12  ;;  %3739 = vmatpush1.bf16.msra.mxu1 %v11261_v62  ;;  %v13235_v12 = vld [vmem:[#allocation52_spill] sm:$0xff]  ;;  %v13236_v62 = vld [vmem:[#allocation50_spill] sm:$0xff] }
 0x457   : > { %3699 = vmatprep.subr.bf16.mxu0 %v11265_v3  ;;  %3740 = vmatprep.subr.bf16.mxu1 %v11267_v2  ;;  %v13237_v3 = vld [vmem:[#allocation51_spill] sm:$0xff]  ;;  %v13238_v2 = vld [vmem:[#allocation53_spill] sm:$0xff] }
 0x45a   : > { %3700 = vmatpush1.bf16.msra.mxu0 %v11271_v9  ;;  %3741 = vmatpush1.bf16.msra.mxu1 %v11273_v6  ;;  %v13239_v9 = vld [vmem:[#allocation54_spill] sm:$0xff]  ;;  %v13240_v6 = vld [vmem:[#allocation55_spill] sm:$0xff] }
 0x45b   : > { %3701 = vmatprep.subr.bf16.mxu0 %v11277_v28  ;;  %3742 = vmatprep.subr.bf16.mxu1 %v11279_v13  ;;  %v13241_v28 = vld [vmem:[#allocation56_spill] sm:$0xff]  ;;  %v13242_v13 = vld [vmem:[#allocation57_spill] sm:$0xff] }
 0x45e   : > { %3702 = vmatpush1.bf16.msra.mxu0 %v11283_v63  ;;  %3743 = vmatpush1.bf16.msra.mxu1 %v11285_v7  ;;  %v13243_v63 = vld [vmem:[#allocation58_spill] sm:$0xff]  ;;  %v13244_v7 = vld [vmem:[#allocation59_spill] sm:$0xff] }
 0x45f   : > { %4212 = vmatprep.subr.bf16.mxu0 %v11293_v8  ;;  %4253 = vmatprep.subr.bf16.mxu1 %v11295_v15  ;;  %v13245_v8 = vld [vmem:[#allocation60_spill] sm:$0xff]  ;;  %v13246_v15 = vld [vmem:[#allocation61_spill] sm:$0xff] }
 0x461   : > { %3720 = vmatmul.mubr.bf16.vlgmr.msra.gmra.mxu0 %v2967_v23  ;;  %3761 = vmatmul.mubr.bf16.vlgmr.msra.gmra.mxu1 %v2967_v23  ;;  %v13268_v23 = vld [vmem:[#allocation84_spill] sm:$0xff] }
 0x462   : > { %4213 = vmatpush1.bf16.msra.mxu0 %v11297_v16  ;;  %4254 = vmatpush1.bf16.msra.mxu1 %v13213_v41  ;;  %v13247_v16 = vld [vmem:[#allocation62_spill] sm:$0xff]  ;;  %v13269_v41 = vld [vmem:[#allocation85_spill] sm:$0xff] }
 0x463   : > { %4214 = vmatprep.subr.bf16.mxu0 %v13214_v45  ;;  %4255 = vmatprep.subr.bf16.mxu1 %v13215_v29  ;;  %v13270_v45 = vld [vmem:[#allocation83_spill] sm:$0xff]  ;;  %v13271_v29 = vld [vmem:[#allocation81_spill] sm:$0xff] }
 0x466   : > { %4215 = vmatpush1.bf16.msra.mxu0 %v13216_v30  ;;  %4256 = vmatpush1.bf16.msra.mxu1 %v13217_v47  ;;  %v13272_v30 = vld [vmem:[#allocation110_spill] sm:$0xff]  ;;  %v13273_v47 = vld [vmem:[#allocation111_spill] sm:$0xff] }
 0x467   : > { %4216 = vmatprep.subr.bf16.mxu0 %v13218_v48  ;;  %4257 = vmatprep.subr.bf16.mxu1 %v13219_v49  ;;  %v11627_v48 = vld [vmem:[#allocation11 + $0xe4] ss:$16 sps:$4 sm:$0xff]   ;;  %v11629_v49 = vld [vmem:[#allocation11 + $0xec] ss:$16 sps:$4 sm:$0xff]  }
 0x46a   : > { %4217 = vmatpush1.bf16.msra.mxu0 %v13220_v50  ;;  %4258 = vmatpush1.bf16.msra.mxu1 %v13221_v52  ;;  %v3033_v50 = vld [vmem:[%s12710_s6] sm:$0xf] }
 0x46b   : > { %4218 = vmatprep.subr.bf16.mxu0 %v13222_v53  ;;  %4259 = vmatprep.subr.bf16.mxu1 %v13223_v54  ;;  %v13274_v52 = vld [vmem:[#allocation24_spill] sm:$0xff]  ;;  %v13275_v54 = vld [vmem:[#allocation26_spill] sm:$0xff] }
 0x46c   : > { %v3038_v53 = vrot.slane %v3033_v50, %v13274_v52 }
 0x46e   : > { %4219 = vmatpush1.bf16.msra.mxu0 %v13224_v55  ;;  %4260 = vmatpush1.bf16.msra.mxu1 %v13225_v56  ;;  %v3042_v55 = vrot.slane %v3033_v50, %v13275_v54 }
 0x46f   : > { %4220 = vmatprep.subr.bf16.mxu0 %v13226_v57  ;;  %4261 = vmatprep.subr.bf16.mxu1 %v13227_v58 }
 0x472   : > { %4221 = vmatpush1.bf16.msra.mxu0 %v13228_v59  ;;  %4262 = vmatpush1.bf16.msra.mxu1 %v13229_v60 }
 0x473   : > { %4222 = vmatprep.subr.bf16.mxu0 %v13230_v4  ;;  %4263 = vmatprep.subr.bf16.mxu1 %v13231_v14 }
 0x476   : > { %4223 = vmatpush1.bf16.msra.mxu0 %v13232_v21  ;;  %4264 = vmatpush1.bf16.msra.mxu1 %v13233_v19 }
 0x477   : > { %4224 = vmatprep.subr.bf16.mxu0 %v13234_v11  ;;  %4265 = vmatprep.subr.bf16.mxu1 %v13235_v12 }
 0x47a   : > { %4225 = vmatpush1.bf16.msra.mxu0 %v13236_v62  ;;  %4266 = vmatpush1.bf16.msra.mxu1 %v13237_v3  ;;  %v3050_v3 = vrot.slane %v3033_v50, %v13141_v32 }
 0x47b   : > { %4226 = vmatprep.subr.bf16.mxu0 %v13238_v2  ;;  %4267 = vmatprep.subr.bf16.mxu1 %v13239_v9  ;;  %v3046_v9 = vrot.slane %v3033_v50, %v13142_v35 }
 0x47e   : > { %4227 = vmatpush1.bf16.msra.mxu0 %v13240_v6  ;;  %4268 = vmatpush1.bf16.msra.mxu1 %v13241_v28 }
 0x47f   : > { %4228 = vmatprep.subr.bf16.mxu0 %v13242_v13  ;;  %4269 = vmatprep.subr.bf16.mxu1 %v13243_v63 }
 0x482   : > { %4229 = vmatpush2.bf16.msra.mxu0 %v13244_v7  ;;  %4270 = vmatpush2.bf16.msra.mxu1 %v13245_v8 }
 0x483   : > { %4230 = vmatprep.subr.bf16.mxu0 %v13246_v15  ;;  %4271 = vmatprep.subr.bf16.mxu1 %v13247_v16 }
 0x486   : > { %4231 = vmatpush2.bf16.msra.mxu0 %v13248_v39  ;;  %4272 = vmatpush2.bf16.msra.mxu1 %v13249_v43  ;;  %v13276_v43 = vld [vmem:[#allocation90_spill] sm:$0xff] }
 0x487   : > { %4232 = vmatprep.subr.bf16.mxu0 %v13250_v42  ;;  %4273 = vmatprep.subr.bf16.mxu1 %v13251_v37 }
 0x48a   : > { %4233 = vmatpush2.bf16.msra.mxu0 %v13252_v17  ;;  %4274 = vmatpush2.bf16.msra.mxu1 %v13253_v1 }
 0x48b   : > { %4234 = vmatprep.subr.bf16.mxu0 %v13254_v27  ;;  %4275 = vmatprep.subr.bf16.mxu1 %v13255_v24 }
 0x48e   : > { %4235 = vmatpush2.bf16.msra.mxu0 %v13256_v22  ;;  %4276 = vmatpush2.bf16.msra.mxu1 %v13257_v44  ;;  %v13277_v22 = vld [vmem:[#allocation92_spill] sm:$0xff] }
 0x48f   : > { %4236 = vmatprep.subr.bf16.mxu0 %v13258_v20  ;;  %4277 = vmatprep.subr.bf16.mxu1 %v13259_v38 }
 0x492   : > { %4237 = vmatpush2.bf16.msra.mxu0 %v13260_v46  ;;  %4278 = vmatpush2.bf16.msra.mxu1 %v13261_v34 }
 0x493   : > { %4238 = vmatprep.subr.bf16.mxu0 %v13262_v26  ;;  %4279 = vmatprep.subr.bf16.mxu1 %v13263_v25 }
 0x496   : > { %4239 = vmatpush2.bf16.msra.mxu0 %v13264_v40  ;;  %4280 = vmatpush2.bf16.msra.mxu1 %v13265_v0 }
 0x497   : > { %4240 = vmatprep.subr.bf16.mxu0 %v13266_v51  ;;  %4281 = vmatprep.subr.bf16.mxu1 %v13267_v61 }
 0x49a   : > { %4241 = vmatpush2.bf16.msra.mxu0 %v13268_v23  ;;  %4282 = vmatpush2.bf16.msra.mxu1 %v13269_v41  ;;  %v13278_v41 = vld [vmem:[#allocation93_spill] sm:$0xff] }
 0x49b   : > { %4242 = vmatprep.subr.bf16.mxu0 %v13270_v45  ;;  %4283 = vmatprep.subr.bf16.mxu1 %v13271_v29  ;;  %v13279_v29 = vld [vmem:[#allocation91_spill] sm:$0xff] }
 0x49e   : > { %4243 = vmatpush2.bf16.msra.mxu0 %v13272_v30  ;;  %4284 = vmatpush2.bf16.msra.mxu1 %v13273_v47 }
 0x49f   : > { %4524 = vmatprep.subr.bf16.mxu0 %v11627_v48  ;;  %4565 = vmatprep.subr.bf16.mxu1 %v11629_v49 }
 0x501   : > { %v3409_v56 = vpop.f32.mrf.mxu0  ;;  %v3450_v57 = vpop.f32.mrf.mxu1 }
 0x502   : > { %v3410_v58 = vadd.f32 %v3409_v56, %v3038_v53  ;;  %v3451_v13 = vadd.f32 %v3450_v57, %v3046_v9 }
 0x503   : > { %v3411_v59 = vpop.f32.mrf.mxu0  ;;  %v3452_v60 = vpop.f32.mrf.mxu1 }
 0x504   : > { %v8491_v4 = vmul.f32 -1.442695, %v3410_v58  ;;  %v3412_v14 = vadd.f32 %v3411_v59, %v3042_v55  ;;  %v3453_v2 = vadd.f32 %v3452_v60, %v3050_v3 }
 0x505   : > { %v3413_v21 = vpop.f32.mrf.mxu0  ;;  %v3454_v19 = vpop.f32.mrf.mxu1 }
 0x506   : > { %9949 = vpow2.f32 %v8491_v4  ;;  %v8492_v11 = vmul.f32 -1.442695, %v3412_v14  ;;  %v8493_v6 = vmul.f32 -1.442695, %v3453_v2 }
 0x507   : > { %v3414_v12 = vpop.f32.mrf.mxu0  ;;  %v3455_v62 = vpop.f32.mrf.mxu1 }
 0x508   : > { %9951 = vpow2.f32 %v8492_v11 }
 0x509   : > { %9953 = vpow2.f32 %v8493_v6 }
 0x513   : > { %v9950_v28 = vpop.eup %9949 }
 0x514   : > { %v3460_v63 = vadd.f32 1.0, %v9950_v28 }
 0x515   : > { %v9952_v7 = vpop.eup %9951 }
 0x516   : > { %9955 = vrcp.f32 %v3460_v63  ;;  %v3466_v8 = vadd.f32 1.0, %v9952_v7  ;;  %v9954_v39 = vpop.eup %9953  ;;  %v11668_v63 = vld [vmem:[#allocation11 + $0xe0] ss:$16 sps:$4 sm:$0xff]   ;;  %v11670_v7 = vld [vmem:[#allocation11 + $0xe8] ss:$16 sps:$4 sm:$0xff]  }
 0x517   : > { %9957 = vtanh.f32 %v3451_v13  ;;  %v3473_v38 = vadd.f32 1.0, %v9954_v39  ;;  %v11689_v39 = vld [vmem:[#allocation11 + $0xc0] ss:$16 sps:$4 sm:$0xff]  }
 0x518   : > { %9959 = vrcp.f32 %v3466_v8 }
 0x521   : > { %v3721_v15 = vpop.f32.mrf.mxu0  ;;  %v3762_v16 = vpop.f32.mrf.mxu1 }
 0x522   : > { %v3769_v42 = vadd.f32 %v3721_v15, %v13276_v43  ;;  %v3771_v30 = vadd.f32 %v3762_v16, %v13279_v29  ;;  %v11681_v16 = vld [vmem:[#allocation11 + $0xc4] ss:$16 sps:$4 sm:$0xff]   ;;  %v11759_v29 = vld [vmem:[#allocation11 + $0xc] ss:$16 sps:$4 sm:$0xff]  }
 0x523   : > { %v9956_v37 = vpop.eup %9955  ;;  %v3723_v17 = vpop.f32.mrf.mxu0  ;;  %v11695_v43 = vld [vmem:[#allocation11 + $0xa4] ss:$16 sps:$4 sm:$0xff]  }
 0x524   : > { %v3764_v1 = vpop.f32.mrf.mxu1  ;;  %v9958_v27 = vpop.eup %9957  ;;  %v8526_v24 = vmul.f32 -1.442695, %v3769_v42  ;;  %v3770_v44 = vadd.f32 %v3723_v17, %v13277_v22  ;;  %v11697_v42 = vld [vmem:[#allocation11 + $0xac] ss:$16 sps:$4 sm:$0xff]   ;;  %v11705_v17 = vld [vmem:[#allocation11 + $0xa8] ss:$16 sps:$4 sm:$0xff]  }
 0x525   : > { %v9960_v20 = vpop.eup %9959  ;;  %v3725_v46 = vpop.f32.mrf.mxu0  ;;  %v3477_v26 = vmul.f32 %v9958_v27, %v9956_v37  ;;  %v3772_v45 = vadd.f32 %v3764_v1, %v13278_v41  ;;  %v11703_v37 = vld [vmem:[#allocation11 + $0xa0] ss:$16 sps:$4 sm:$0xff]   ;;  %v11709_v1 = vld [vmem:[#allocation11 + $0x84] ss:$16 sps:$4 sm:$0xff]   ;;  %v11711_v27 = vld [vmem:[#allocation11 + $0x8c] ss:$16 sps:$4 sm:$0xff]  }
 0x526   : > { %v3766_v34 = vpop.f32.mrf.mxu1  ;;  %v3476_v25 = vmul.f32 %v9960_v20, %v11502_v36  ;;  %9961 = vpow2.f32 %v8526_v24  ;;  %v8527_v40 = vmul.f32 -1.442695, %v3770_v44  ;;  %v11715_v24 = vld [vmem:[#allocation11 + $0x80] ss:$16 sps:$4 sm:$0xff]   ;;  %v11717_v22 = vld [vmem:[#allocation11 + $0x88] ss:$16 sps:$4 sm:$0xff]  }
 0x527   : > { %v3726_v0 = vpop.f32.mrf.mxu0  ;;  %v8528_v47 = vmul.f32 -1.442695, %v3772_v45  ;;  %v11721_v44 = vld [vmem:[#allocation11 + $0x64] ss:$16 sps:$4 sm:$0xff]   ;;  %v11723_v20 = vld [vmem:[#allocation11 + $0x6c] ss:$16 sps:$4 sm:$0xff]  }
 0x528   : > { %v3767_v51 = vpop.f32.mrf.mxu1  ;;  %v3478_v61 = vadd.f32 %v3477_v26, %v3476_v25  ;;  %9963 = vpow2.f32 %v8527_v40  ;;  %v11729_v46 = vld [vmem:[#allocation11 + $0x68] ss:$16 sps:$4 sm:$0xff]   ;;  %v11733_v34 = vld [vmem:[#allocation11 + $0x44] ss:$16 sps:$4 sm:$0xff]   ;;  %v11735_v26 = vld [vmem:[#allocation11 + $0x4c] ss:$16 sps:$4 sm:$0xff]  }
 0x529   : > { %9965 = vrcp.f32 %v3473_v38  ;;  %v11727_v38 = vld [vmem:[#allocation11 + $0x60] ss:$16 sps:$4 sm:$0xff]   ;;  %v11741_v40 = vld [vmem:[#allocation11 + $0x48] ss:$16 sps:$4 sm:$0xff]   ;;  %v11745_v0 = vld [vmem:[#allocation11 + $0x24] ss:$16 sps:$4 sm:$0xff]  }
 0x52a   : > { %9967 = vtanh.f32 %v3478_v61  ;;  %v11646_v23 = vsel %vm2964_vm6, %v3478_v61, %v11502_v36  ;;  %v11739_v25 = vld [vmem:[#allocation11 + $0x40] ss:$16 sps:$4 sm:$0xff]   ;;  %v11747_v51 = vld [vmem:[#allocation11 + $0x2c] ss:$16 sps:$4 sm:$0xff]   ;;  %v11753_v41 = vld [vmem:[#allocation11 + $0x28] ss:$16 sps:$4 sm:$0xff]  }
 0x52b   : > { %9969 = vtanh.f32 %v3771_v30  ;;  %v11751_v61 = vld [vmem:[#allocation11 + $0x20] ss:$16 sps:$4 sm:$0xff]   ;;  %v11757_v45 = vld [vmem:[#allocation11 + $0x4] ss:$16 sps:$4 sm:$0xff]  }
 0x52c   : > { %9971 = vpow2.f32 %v8528_v47  ;;  %v11763_v30 = vld [vmem:[#allocation11] ss:$16 sps:$4 sm:$0xff]   ;;  %v11765_v47 = vld [vmem:[#allocation11 + $0x8] ss:$16 sps:$4 sm:$0xff]  }
 0x533   : > { %v9962_v50 = vpop.eup %9961 }
 0x534   : > { %v3776_v53 = vadd.f32 1.0, %v9962_v50  ;;  %v11773_v50 = vld [vmem:[#allocation13 + $0xe4] ss:$16 sps:$4 sm:$0xff]  }
 0x535   : > { %v9964_v55 = vpop.eup %9963 }
 0x536   : > { %v9966_v56 = vpop.eup %9965  ;;  %9973 = vrcp.f32 %v3776_v53  ;;  %v3782_v57 = vadd.f32 1.0, %v9964_v55  ;;  %v11775_v53 = vld [vmem:[#allocation13 + $0xec] ss:$16 sps:$4 sm:$0xff]   ;;  %v11777_v55 = vld [vmem:[#allocation13 + $0xe0] ss:$16 sps:$4 sm:$0xff]  }
 0x537   : > { %v9968_v58 = vpop.eup %9967 }
 0x538   : > { %9975 = vrcp.f32 %v3782_v57  ;;  %v3480_v59 = vmul.f32 %v9968_v58, %v9966_v56  ;;  %v9970_v21 = vpop.eup %9969  ;;  %v11779_v56 = vld [vmem:[#allocation13 + $0xe8] ss:$16 sps:$4 sm:$0xff]   ;;  %v11785_v57 = vld [vmem:[#allocation13 + $0xc4] ss:$16 sps:$4 sm:$0xff]   ;;  %v11787_v58 = vld [vmem:[#allocation13 + $0xcc] ss:$16 sps:$4 sm:$0xff]  }
 0x539   : > { %v9972_v19 = vpop.eup %9971  ;;  %13280 = vst [vmem:[#allocation86_spill] sm:$0xff] %v11787_v58 }
 0x53a   : > { %v11653_v36 = vsel %vm2964_vm6, %v3480_v59, %v11509_v10  ;;  %v3483_v60 = vsel %vm2964_vm6, %v3480_v59, 0.0  ;;  %v3789_v3 = vadd.f32 1.0, %v9972_v19  ;;  %v11660_v10 = vpop.permute.xlu0 %3799  ;;  %v11789_v59 = vld [vmem:[#allocation13 + $0xc0] ss:$16 sps:$4 sm:$0xff]   ;;  %v11803_v19 = vld [vmem:[#allocation13 + $0xa8] ss:$16 sps:$4 sm:$0xff]  }
 0x53b   : > { %v3484_v4 = vpack.c.bf16 %v3483_v60, %v3483_v60  ;;  %v3805_v14 = vpack.c.bf16 %v11653_v36, %v11653_v36  ;;  %vm3801_vm7 = vcmp.eq.s32.totalorder %v11660_v10, 1  ;;  %13281 = vst [vmem:[#allocation88_spill] sm:$0xff] %v11789_v59  ;;  %v11791_v60 = vld [vmem:[#allocation13 + $0xc8] ss:$16 sps:$4 sm:$0xff]   ;;  %13286 = vst [vmem:[#allocation30_spill] sm:$0xff] %v11803_v19 }
 0x53c   : > { %9977 = vrcp.f32 %v3789_v3  ;;  %13282 = vst [vmem:[#allocation89_spill] sm:$0xff] %v11791_v60  ;;  %v11815_v3 = vld [vmem:[#allocation13 + $0x88] ss:$16 sps:$4 sm:$0xff]  }
 0x53d   : > { %3486 = vst [vmem:[#allocation7 + $0x8] sm:$0xf] %v3484_v4  ;;  %4244 = vmatprep.mubr.bf16.mxu0 %v3805_v14  ;;  %4285 = vmatprep.mubr.bf16.mxu1 %v3805_v14  ;;  %v11797_v4 = vld [vmem:[#allocation13 + $0xa4] ss:$16 sps:$4 sm:$0xff]   ;;  %v11799_v14 = vld [vmem:[#allocation13 + $0xac] ss:$16 sps:$4 sm:$0xff]  }
 0x53e   : > { %13283 = vst [vmem:[#allocation87_spill] sm:$0xff] %v11797_v4  ;;  %13284 = vst [vmem:[#allocation28_spill] sm:$0xff] %v11799_v14 }
 0x53f   : > { %13290 = vst [vmem:[#allocation34_spill] sm:$0xff] %v11815_v3 }
 0x543   : > { %v9974_v11 = vpop.eup %9973 }
 0x544   : > { %v3793_v12 = vmul.f32 %v9974_v11, %v9970_v21  ;;  %v11801_v21 = vld [vmem:[#allocation13 + $0xa0] ss:$16 sps:$4 sm:$0xff]   ;;  %v11809_v11 = vld [vmem:[#allocation13 + $0x84] ss:$16 sps:$4 sm:$0xff]  }
 0x545   : > { %v9976_v62 = vpop.eup %9975  ;;  %13285 = vst [vmem:[#allocation29_spill] sm:$0xff] %v11801_v21  ;;  %13287 = vst [vmem:[#allocation31_spill] sm:$0xff] %v11809_v11 }
 0x546   : > { %v3792_v2 = vmul.f32 %v9976_v62, %v11522_v31  ;;  %v11813_v62 = vld [vmem:[#allocation13 + $0x80] ss:$16 sps:$4 sm:$0xff]  }
 0x547   : > { %13289 = vst [vmem:[#allocation33_spill] sm:$0xff] %v11813_v62 }
 0x548   : > { %v3794_v9 = vadd.f32 %v3793_v12, %v3792_v2  ;;  %v11811_v12 = vld [vmem:[#allocation13 + $0x8c] ss:$16 sps:$4 sm:$0xff]   ;;  %v11821_v2 = vld [vmem:[#allocation13 + $0x64] ss:$16 sps:$4 sm:$0xff]  }
 0x549   : > { %v9978_v6 = vpop.eup %9977  ;;  %13288 = vst [vmem:[#allocation32_spill] sm:$0xff] %v11811_v12  ;;  %13291 = vst [vmem:[#allocation35_spill] sm:$0xff] %v11821_v2 }
 0x54a   : > { %9979 = vtanh.f32 %v3794_v9  ;;  %v11666_v18 = vsel %vm3801_vm7, %v3794_v9, %v11522_v31  ;;  %v11683_v31 = vld [vmem:[#allocation11 + $0xcc] ss:$16 sps:$4 sm:$0xff]  }
 0x54b   : > { %v11823_v9 = vld [vmem:[#allocation13 + $0x6c] ss:$16 sps:$4 sm:$0xff]  }
 0x54c   : > { %13292 = vst [vmem:[#allocation36_spill] sm:$0xff] %v11823_v9 }
 0x557   : > { %v9980_v28 = vpop.eup %9979 }
 0x558   : > { %v3796_v13 = vmul.f32 %v9980_v28, %v9978_v6  ;;  %v11825_v6 = vld [vmem:[#allocation13 + $0x60] ss:$16 sps:$4 sm:$0xff]   ;;  %v11827_v28 = vld [vmem:[#allocation13 + $0x68] ss:$16 sps:$4 sm:$0xff]  }
 0x559   : > { %13293 = vst [vmem:[#allocation37_spill] sm:$0xff] %v11825_v6  ;;  %13294 = vst [vmem:[#allocation38_spill] sm:$0xff] %v11827_v28 }
 0x55a   : > { %v11675_v8 = vsel %vm3801_vm7, %v3796_v13, %v11527_v33  ;;  %v11691_v33 = vld [vmem:[#allocation11 + $0xc8] ss:$16 sps:$4 sm:$0xff]   ;;  %v11833_v13 = vld [vmem:[#allocation13 + $0x44] ss:$16 sps:$4 sm:$0xff]  }
 0x55b   : > { %v11679_v15 = vpack.c.bf16 %v11675_v8, %v11675_v8  ;;  %13295 = vst [vmem:[#allocation39_spill] sm:$0xff] %v11833_v13 }
 0x55d   : > { %4245 = vmatmul.mubr.bf16.vlgmr.msra.gmra.mxu0 %v11679_v15  ;;  %4286 = vmatmul.mubr.bf16.vlgmr.msra.gmra.mxu1 %v11679_v15 }
 0x55e   : > { %4525 = vmatpush1.bf16.msra.mxu0 %v11668_v63  ;;  %4566 = vmatpush1.bf16.msra.mxu1 %v11670_v7 }
 0x55f   : > { %4526 = vmatprep.subr.bf16.mxu0 %v11681_v16  ;;  %4567 = vmatprep.subr.bf16.mxu1 %v11683_v31 }
 0x560   : > { %4556 = vmatprep.mubr.bf16.mxu0 %v13057_v5  ;;  %4597 = vmatprep.mubr.bf16.mxu1 %v13057_v5 }
 0x562   : > { %4527 = vmatpush1.bf16.msra.mxu0 %v11689_v39  ;;  %4568 = vmatpush1.bf16.msra.mxu1 %v11691_v33 }
 0x563   : > { %4528 = vmatprep.subr.bf16.mxu0 %v11695_v43  ;;  %4569 = vmatprep.subr.bf16.mxu1 %v11697_v42 }
 0x566   : > { %4529 = vmatpush1.bf16.msra.mxu0 %v11703_v37  ;;  %4570 = vmatpush1.bf16.msra.mxu1 %v11705_v17 }
 0x567   : > { %4530 = vmatprep.subr.bf16.mxu0 %v11709_v1  ;;  %4571 = vmatprep.subr.bf16.mxu1 %v11711_v27 }
 0x56a   : > { %4531 = vmatpush1.bf16.msra.mxu0 %v11715_v24  ;;  %4572 = vmatpush1.bf16.msra.mxu1 %v11717_v22 }
 0x56b   : > { %4532 = vmatprep.subr.bf16.mxu0 %v11721_v44  ;;  %4573 = vmatprep.subr.bf16.mxu1 %v11723_v20 }
 0x56e   : > { %4533 = vmatpush1.bf16.msra.mxu0 %v11727_v38  ;;  %4574 = vmatpush1.bf16.msra.mxu1 %v11729_v46 }
 0x56f   : > { %4534 = vmatprep.subr.bf16.mxu0 %v11733_v34  ;;  %4575 = vmatprep.subr.bf16.mxu1 %v11735_v26 }
 0x572   : > { %4535 = vmatpush1.bf16.msra.mxu0 %v11739_v25  ;;  %4576 = vmatpush1.bf16.msra.mxu1 %v11741_v40 }
 0x573   : > { %4536 = vmatprep.subr.bf16.mxu0 %v11745_v0  ;;  %4577 = vmatprep.subr.bf16.mxu1 %v11747_v51 }
 0x576   : > { %4537 = vmatpush1.bf16.msra.mxu0 %v11751_v61  ;;  %4578 = vmatpush1.bf16.msra.mxu1 %v11753_v41 }
 0x577   : > { %4538 = vmatprep.subr.bf16.mxu0 %v11757_v45  ;;  %4579 = vmatprep.subr.bf16.mxu1 %v11759_v29 }
 0x57a   : > { %4539 = vmatpush1.bf16.msra.mxu0 %v11763_v30  ;;  %4580 = vmatpush1.bf16.msra.mxu1 %v11765_v47 }
 0x57b   : > { %5049 = vmatprep.subr.bf16.mxu0 %v11773_v50  ;;  %5090 = vmatprep.subr.bf16.mxu1 %v11775_v53 }
 0x57d   : > { %4557 = vmatmul.mubr.bf16.vlgmr.msra.gmra.mxu0 %v11679_v15  ;;  %4598 = vmatmul.mubr.bf16.vlgmr.msra.gmra.mxu1 %v11679_v15  ;;  %v11835_v15 = vld [vmem:[#allocation13 + $0x4c] ss:$16 sps:$4 sm:$0xff]  }
 0x57e   : > { %5050 = vmatpush1.bf16.msra.mxu0 %v11777_v55  ;;  %5091 = vmatpush1.bf16.msra.mxu1 %v11779_v56  ;;  %13296 = vst [vmem:[#allocation40_spill] sm:$0xff] %v11835_v15 }
 0x57f   : > { %5051 = vmatprep.subr.bf16.mxu0 %v11785_v57  ;;  %5092 = vmatprep.subr.bf16.mxu1 %v11787_v58 }
 0x582   : > { %5052 = vmatpush1.bf16.msra.mxu0 %v11789_v59  ;;  %5093 = vmatpush1.bf16.msra.mxu1 %v11791_v60 }
 0x583   : > { %5053 = vmatprep.subr.bf16.mxu0 %v11797_v4  ;;  %5094 = vmatprep.subr.bf16.mxu1 %v11799_v14 }
 0x586   : > { %5054 = vmatpush1.bf16.msra.mxu0 %v11801_v21  ;;  %5095 = vmatpush1.bf16.msra.mxu1 %v11803_v19 }
 0x587   : > { %5055 = vmatprep.subr.bf16.mxu0 %v11809_v11  ;;  %5096 = vmatprep.subr.bf16.mxu1 %v11811_v12  ;;  %v11925_v12 = vld [vmem:[#allocation13 + $0x144] ss:$16 sps:$4 sm:$0xff]   ;;  %v11928_v11 = vld [vmem:[#allocation13 + $0x14c] ss:$16 sps:$4 sm:$0xff]  }
 0x588   : > { %13327 = vst [vmem:[#allocation71_spill] sm:$0xff] %v11925_v12  ;;  %13328 = vst [vmem:[#allocation72_spill] sm:$0xff] %v11928_v11 }
 0x58a   : > { %5056 = vmatpush1.bf16.msra.mxu0 %v11813_v62  ;;  %5097 = vmatpush1.bf16.msra.mxu1 %v11815_v3  ;;  %v11837_v3 = vld [vmem:[#allocation13 + $0x40] ss:$16 sps:$4 sm:$0xff]   ;;  %v11839_v62 = vld [vmem:[#allocation13 + $0x48] ss:$16 sps:$4 sm:$0xff]  }
 0x58b   : > { %5057 = vmatprep.subr.bf16.mxu0 %v11821_v2  ;;  %5098 = vmatprep.subr.bf16.mxu1 %v11823_v9  ;;  %13297 = vst [vmem:[#allocation41_spill] sm:$0xff] %v11837_v3  ;;  %13298 = vst [vmem:[#allocation42_spill] sm:$0xff] %v11839_v62  ;;  %v11845_v9 = vld [vmem:[#allocation13 + $0x24] ss:$16 sps:$4 sm:$0xff]   ;;  %v11851_v2 = vld [vmem:[#allocation13 + $0x28] ss:$16 sps:$4 sm:$0xff]  }
 0x58c   : > { %13299 = vst [vmem:[#allocation43_spill] sm:$0xff] %v11845_v9  ;;  %13302 = vst [vmem:[#allocation46_spill] sm:$0xff] %v11851_v2 }
 0x58e   : > { %5058 = vmatpush1.bf16.msra.mxu0 %v11825_v6  ;;  %5099 = vmatpush1.bf16.msra.mxu1 %v11827_v28  ;;  %v11847_v6 = vld [vmem:[#allocation13 + $0x2c] ss:$16 sps:$4 sm:$0xff]   ;;  %v11849_v28 = vld [vmem:[#allocation13 + $0x20] ss:$16 sps:$4 sm:$0xff]  }
 0x58f   : > { %5059 = vmatprep.subr.bf16.mxu0 %v11833_v13  ;;  %5100 = vmatprep.subr.bf16.mxu1 %v11835_v15  ;;  %13300 = vst [vmem:[#allocation44_spill] sm:$0xff] %v11847_v6  ;;  %13301 = vst [vmem:[#allocation45_spill] sm:$0xff] %v11849_v28  ;;  %v11857_v15 = vld [vmem:[#allocation13 + $0x4] ss:$16 sps:$4 sm:$0xff]   ;;  %v11863_v13 = vld [vmem:[#allocation13 + $0x8] ss:$16 sps:$4 sm:$0xff]  }
 0x590   : > { %13303 = vst [vmem:[#allocation47_spill] sm:$0xff] %v11857_v15  ;;  %13306 = vst [vmem:[#allocation52_spill] sm:$0xff] %v11863_v13 }
 0x592   : > { %5060 = vmatpush1.bf16.msra.mxu0 %v11837_v3  ;;  %5101 = vmatpush1.bf16.msra.mxu1 %v11839_v62  ;;  %v11859_v3 = vld [vmem:[#allocation13 + $0xc] ss:$16 sps:$4 sm:$0xff]   ;;  %v11861_v62 = vld [vmem:[#allocation13] ss:$16 sps:$4 sm:$0xff]  }
 0x593   : > { %5061 = vmatprep.subr.bf16.mxu0 %v11845_v9  ;;  %5102 = vmatprep.subr.bf16.mxu1 %v11847_v6  ;;  %13304 = vst [vmem:[#allocation48_spill] sm:$0xff] %v11859_v3  ;;  %13305 = vst [vmem:[#allocation49_spill] sm:$0xff] %v11861_v62  ;;  %v11869_v6 = vld [vmem:[#allocation13 + $0x1e4] ss:$16 sps:$4 sm:$0xff]   ;;  %v11875_v9 = vld [vmem:[#allocation13 + $0x1e8] ss:$16 sps:$4 sm:$0xff]  }
 0x594   : > { %13307 = vst [vmem:[#allocation50_spill] sm:$0xff] %v11869_v6  ;;  %13310 = vst [vmem:[#allocation54_spill] sm:$0xff] %v11875_v9 }
 0x596   : > { %5062 = vmatpush1.bf16.msra.mxu0 %v11849_v28  ;;  %5103 = vmatpush1.bf16.msra.mxu1 %v11851_v2  ;;  %v11871_v28 = vld [vmem:[#allocation13 + $0x1ec] ss:$16 sps:$4 sm:$0xff]   ;;  %v11873_v2 = vld [vmem:[#allocation13 + $0x1e0] ss:$16 sps:$4 sm:$0xff]  }
 0x597   : > { %5063 = vmatprep.subr.bf16.mxu0 %v11857_v15  ;;  %5104 = vmatprep.subr.bf16.mxu1 %v11859_v3  ;;  %13308 = vst [vmem:[#allocation51_spill] sm:$0xff] %v11871_v28  ;;  %13309 = vst [vmem:[#allocation53_spill] sm:$0xff] %v11873_v2  ;;  %v11881_v3 = vld [vmem:[#allocation13 + $0x1c4] ss:$16 sps:$4 sm:$0xff]   ;;  %v11887_v15 = vld [vmem:[#allocation13 + $0x1c8] ss:$16 sps:$4 sm:$0xff]  }
 0x598   : > { %13311 = vst [vmem:[#allocation55_spill] sm:$0xff] %v11881_v3  ;;  %13314 = vst [vmem:[#allocation58_spill] sm:$0xff] %v11887_v15 }
 0x59a   : > { %5064 = vmatpush1.bf16.msra.mxu0 %v11861_v62  ;;  %5105 = vmatpush1.bf16.msra.mxu1 %v11863_v13  ;;  %v11883_v62 = vld [vmem:[#allocation13 + $0x1cc] ss:$16 sps:$4 sm:$0xff]   ;;  %v11885_v13 = vld [vmem:[#allocation13 + $0x1c0] ss:$16 sps:$4 sm:$0xff]  }
 0x59b   : > { %5065 = vmatprep.subr.bf16.mxu0 %v11869_v6  ;;  %5106 = vmatprep.subr.bf16.mxu1 %v11871_v28  ;;  %13312 = vst [vmem:[#allocation56_spill] sm:$0xff] %v11883_v62  ;;  %13313 = vst [vmem:[#allocation57_spill] sm:$0xff] %v11885_v13  ;;  %v11893_v28 = vld [vmem:[#allocation13 + $0x1a4] ss:$16 sps:$4 sm:$0xff]   ;;  %v11899_v6 = vld [vmem:[#allocation13 + $0x1a8] ss:$16 sps:$4 sm:$0xff]  }
 0x59c   : > { %13315 = vst [vmem:[#allocation59_spill] sm:$0xff] %v11893_v28  ;;  %13318 = vst [vmem:[#allocation62_spill] sm:$0xff] %v11899_v6 }
 0x59e   : > { %5066 = vmatpush2.bf16.msra.mxu0 %v11873_v2  ;;  %5107 = vmatpush2.bf16.msra.mxu1 %v11875_v9  ;;  %v11895_v2 = vld [vmem:[#allocation13 + $0x1ac] ss:$16 sps:$4 sm:$0xff]   ;;  %v11897_v9 = vld [vmem:[#allocation13 + $0x1a0] ss:$16 sps:$4 sm:$0xff]  }
 0x59f   : > { %5067 = vmatprep.subr.bf16.mxu0 %v11881_v3  ;;  %5108 = vmatprep.subr.bf16.mxu1 %v11883_v62  ;;  %13316 = vst [vmem:[#allocation60_spill] sm:$0xff] %v11895_v2  ;;  %13317 = vst [vmem:[#allocation61_spill] sm:$0xff] %v11897_v9  ;;  %v11905_v62 = vld [vmem:[#allocation13 + $0x184] ss:$16 sps:$4 sm:$0xff]   ;;  %v11911_v3 = vld [vmem:[#allocation13 + $0x188] ss:$16 sps:$4 sm:$0xff]  }
 0x5a0   : > { %13319 = vst [vmem:[#allocation63_spill] sm:$0xff] %v11905_v62  ;;  %13322 = vst [vmem:[#allocation66_spill] sm:$0xff] %v11911_v3 }
 0x5a2   : > { %5068 = vmatpush2.bf16.msra.mxu0 %v11885_v13  ;;  %5109 = vmatpush2.bf16.msra.mxu1 %v11887_v15  ;;  %v11907_v13 = vld [vmem:[#allocation13 + $0x18c] ss:$16 sps:$4 sm:$0xff]   ;;  %v11909_v15 = vld [vmem:[#allocation13 + $0x180] ss:$16 sps:$4 sm:$0xff]  }
 0x5a3   : > { %5069 = vmatprep.subr.bf16.mxu0 %v11893_v28  ;;  %5110 = vmatprep.subr.bf16.mxu1 %v11895_v2  ;;  %13320 = vst [vmem:[#allocation64_spill] sm:$0xff] %v11907_v13  ;;  %13321 = vst [vmem:[#allocation65_spill] sm:$0xff] %v11909_v15  ;;  %v11917_v2 = vld [vmem:[#allocation13 + $0x160] ss:$16 sps:$4 sm:$0xff]   ;;  %v11923_v28 = vld [vmem:[#allocation13 + $0x16c] ss:$16 sps:$4 sm:$0xff]  }
 0x5a4   : > { %13323 = vst [vmem:[#allocation67_spill] sm:$0xff] %v11917_v2  ;;  %13326 = vst [vmem:[#allocation70_spill] sm:$0xff] %v11923_v28 }
 0x5a6   : > { %5070 = vmatpush2.bf16.msra.mxu0 %v11897_v9  ;;  %5111 = vmatpush2.bf16.msra.mxu1 %v11899_v6  ;;  %v11919_v9 = vld [vmem:[#allocation13 + $0x164] ss:$16 sps:$4 sm:$0xff]   ;;  %v11921_v6 = vld [vmem:[#allocation13 + $0x168] ss:$16 sps:$4 sm:$0xff]  }
 0x5a7   : > { %5071 = vmatprep.subr.bf16.mxu0 %v11905_v62  ;;  %5112 = vmatprep.subr.bf16.mxu1 %v11907_v13  ;;  %13324 = vst [vmem:[#allocation68_spill] sm:$0xff] %v11919_v9  ;;  %13325 = vst [vmem:[#allocation69_spill] sm:$0xff] %v11921_v6  ;;  %v11939_v13 = vld [vmem:[#allocation13 + $0x124] ss:$16 sps:$4 sm:$0xff]   ;;  %v11941_v62 = vld [vmem:[#allocation13 + $0x12c] ss:$16 sps:$4 sm:$0xff]  }
 0x5a8   : > { %13331 = vst [vmem:[#allocation73_spill] sm:$0xff] %v11939_v13  ;;  %13332 = vst [vmem:[#allocation75_spill] sm:$0xff] %v11941_v62 }
 0x5aa   : > { %5072 = vmatpush2.bf16.msra.mxu0 %v11909_v15  ;;  %5113 = vmatpush2.bf16.msra.mxu1 %v11911_v3  ;;  %v11933_v3 = vld [vmem:[#allocation13 + $0x140] ss:$16 sps:$4 sm:$0xff]   ;;  %v11935_v15 = vld [vmem:[#allocation13 + $0x148] ss:$16 sps:$4 sm:$0xff]  }
 0x5ab   : > { %5073 = vmatprep.subr.bf16.mxu0 %v11919_v9  ;;  %5114 = vmatprep.subr.bf16.mxu1 %v11923_v28  ;;  %13329 = vst [vmem:[#allocation74_spill] sm:$0xff] %v11933_v3  ;;  %13330 = vst [vmem:[#allocation76_spill] sm:$0xff] %v11935_v15  ;;  %v11945_v28 = vld [vmem:[#allocation13 + $0x120] ss:$16 sps:$4 sm:$0xff]  }
 0x5ac   : > { %13333 = vst [vmem:[#allocation77_spill] sm:$0xff] %v11945_v28 }
 0x5ae   : > { %5074 = vmatpush2.bf16.msra.mxu0 %v11917_v2  ;;  %5115 = vmatpush2.bf16.msra.mxu1 %v11921_v6  ;;  %v11947_v2 = vld [vmem:[#allocation13 + $0x128] ss:$16 sps:$4 sm:$0xff]   ;;  %v11951_v6 = vld [vmem:[#allocation13 + $0x104] ss:$16 sps:$4 sm:$0xff]  }
 0x5af   : > { %5075 = vmatprep.subr.bf16.mxu0 %v11925_v12  ;;  %5116 = vmatprep.subr.bf16.mxu1 %v11928_v11  ;;  %13334 = vst [vmem:[#allocation78_spill] sm:$0xff] %v11947_v2  ;;  %13335 = vst [vmem:[#allocation79_spill] sm:$0xff] %v11951_v6  ;;  %v11953_v12 = vld [vmem:[#allocation13 + $0x10c] ss:$16 sps:$4 sm:$0xff]   ;;  %v11957_v11 = vld [vmem:[#allocation13 + $0x100] ss:$16 sps:$4 sm:$0xff]  }
 0x5b0   : > { %13336 = vst [vmem:[#allocation80_spill] sm:$0xff] %v11953_v12  ;;  %13337 = vst [vmem:[#allocation27_spill] sm:$0xff] %v11957_v11 }
 0x5b2   : > { %5076 = vmatpush2.bf16.msra.mxu0 %v11933_v3  ;;  %5117 = vmatpush2.bf16.msra.mxu1 %v11935_v15  ;;  %v11959_v3 = vld [vmem:[#allocation13 + $0x108] ss:$16 sps:$4 sm:$0xff]  }
 0x5b3   : > { %5077 = vmatprep.subr.bf16.mxu0 %v11939_v13  ;;  %5118 = vmatprep.subr.bf16.mxu1 %v11941_v62  ;;  %13338 = vst [vmem:[#allocation82_spill] sm:$0xff] %v11959_v3 }
 0x5b6   : > { %5078 = vmatpush2.bf16.msra.mxu0 %v11945_v28  ;;  %5119 = vmatpush2.bf16.msra.mxu1 %v11947_v2  ;;  %v3870_v2 = vld [vmem:[%s12710_s6] sm:$0xf] }
 0x5b7   : > { %5079 = vmatprep.subr.bf16.mxu0 %v11951_v6  ;;  %5120 = vmatprep.subr.bf16.mxu1 %v11953_v12  ;;  %v3875_v28 = vrot.slane %v3870_v2, %v13274_v52  ;;  %v3879_v62 = vrot.slane %v3870_v2, %v13275_v54  ;;  %v3887_v4 = vrot.slane %v3870_v2, %v13141_v32 }
 0x5b8   : > { %v3883_v52 = vrot.slane %v3870_v2, %v13142_v35 }
 0x5ba   : > { %5080 = vmatpush2.bf16.msra.mxu0 %v11957_v11  ;;  %5121 = vmatpush2.bf16.msra.mxu1 %v11959_v3 }
 0x5bb   : > { %5361 = vmatprep.subr.bf16.mxu0 %v11627_v48  ;;  %5402 = vmatprep.subr.bf16.mxu1 %v11629_v49 }
 0x61d   : > { %v4246_v13 = vpop.f32.mrf.mxu0  ;;  %v4287_v6 = vpop.f32.mrf.mxu1 }
 0x61e   : > { %v4247_v15 = vadd.f32 %v4246_v13, %v3875_v28  ;;  %v4288_v58 = vadd.f32 %v4287_v6, %v3883_v52 }
 0x61f   : > { %v4248_v12 = vpop.f32.mrf.mxu0  ;;  %v4289_v9 = vpop.f32.mrf.mxu1 }
 0x620   : > { %v8593_v11 = vmul.f32 -1.442695, %v4247_v15  ;;  %v4249_v19 = vadd.f32 %v4248_v12, %v3879_v62  ;;  %v4290_v60 = vadd.f32 %v4289_v9, %v3887_v4 }
 0x621   : > { %v4250_v3 = vpop.f32.mrf.mxu0  ;;  %v4291_v21 = vpop.f32.mrf.mxu1 }
 0x622   : > { %9981 = vpow2.f32 %v8593_v11  ;;  %v8594_v48 = vmul.f32 -1.442695, %v4249_v19  ;;  %v8595_v54 = vmul.f32 -1.442695, %v4290_v60  ;;  %v13340_v60 = vld [vmem:[#allocation96_spill] sm:$0xff] }
 0x623   : > { %v4251_v49 = vpop.f32.mrf.mxu0  ;;  %v4292_v14 = vpop.f32.mrf.mxu1 }
 0x624   : > { %9983 = vpow2.f32 %v8594_v48  ;;  %v13339_v14 = vld [vmem:[#allocation94_spill] sm:$0xff] }
 0x625   : > { %9985 = vpow2.f32 %v8595_v54 }
 0x62f   : > { %v9982_v59 = vpop.eup %9981 }
 0x630   : > { %v4297_v28 = vadd.f32 1.0, %v9982_v59 }
 0x631   : > { %v9984_v13 = vpop.eup %9983 }
 0x632   : > { %9987 = vrcp.f32 %v4297_v28  ;;  %v4303_v12 = vadd.f32 1.0, %v9984_v13  ;;  %v9986_v11 = vpop.eup %9985 }
 0x633   : > { %9989 = vtanh.f32 %v4288_v58  ;;  %v4310_v59 = vadd.f32 1.0, %v9986_v11 }
 0x634   : > { %9991 = vrcp.f32 %v4303_v12 }
 0x63d   : > { %v4558_v21 = vpop.f32.mrf.mxu0  ;;  %v4599_v19 = vpop.f32.mrf.mxu1 }
 0x63e   : > { %v4606_v62 = vadd.f32 %v4558_v21, %v13339_v14  ;;  %v13341_v14 = vld [vmem:[#allocation97_spill] sm:$0xff] }
 0x63f   : > { %v9988_v3 = vpop.eup %9987  ;;  %v4560_v15 = vpop.f32.mrf.mxu0 }
 0x640   : > { %v4601_v4 = vpop.f32.mrf.mxu1  ;;  %v9990_v9 = vpop.eup %9989  ;;  %v8628_v2 = vmul.f32 -1.442695, %v4606_v62  ;;  %v4607_v48 = vadd.f32 %v4560_v15, %v13340_v60  ;;  %v13342_v62 = vld [vmem:[#allocation95_spill] sm:$0xff] }
 0x641   : > { %v9992_v52 = vpop.eup %9991  ;;  %v4562_v6 = vpop.f32.mrf.mxu0  ;;  %v4314_v49 = vmul.f32 %v9990_v9, %v9988_v3  ;;  %v4609_v11 = vadd.f32 %v4601_v4, %v13341_v14  ;;  %v4608_v15 = vadd.f32 %v4599_v19, %v13342_v62 }
 0x642   : > { %v4603_v54 = vpop.f32.mrf.mxu1  ;;  %v4313_v58 = vmul.f32 %v9992_v52, %v11646_v23  ;;  %9993 = vpow2.f32 %v8628_v2  ;;  %v8629_v28 = vmul.f32 -1.442695, %v4607_v48 }
 0x643   : > { %v4563_v13 = vpop.f32.mrf.mxu0  ;;  %v8630_v3 = vmul.f32 -1.442695, %v4609_v11 }
 0x644   : > { %v4604_v12 = vpop.f32.mrf.mxu1  ;;  %v4315_v35 = vadd.f32 %v4314_v49, %v4313_v58  ;;  %9995 = vpow2.f32 %v8629_v28 }
 0x645   : > { %9997 = vrcp.f32 %v4310_v59 }
 0x646   : > { %9999 = vtanh.f32 %v4315_v35  ;;  %v11980_v21 = vsel %vm3801_vm7, %v4315_v35, %v11646_v23 }
 0x647   : > { %10001 = vtanh.f32 %v4608_v15 }
 0x648   : > { %10003 = vpow2.f32 %v8630_v3 }
 0x64f   : > { %v9994_v9 = vpop.eup %9993 }
 0x650   : > { %v4613_v60 = vadd.f32 1.0, %v9994_v9 }
 0x651   : > { %v9996_v2 = vpop.eup %9995 }
 0x652   : > { %v9998_v48 = vpop.eup %9997  ;;  %10005 = vrcp.f32 %v4613_v60  ;;  %v4619_v52 = vadd.f32 1.0, %v9996_v2  ;;  %v13380_v2 = vld [vmem:[#allocation61_spill] sm:$0xff] }
 0x653   : > { %v10000_v59 = vpop.eup %9999 }
 0x654   : > { %10007 = vrcp.f32 %v4619_v52  ;;  %v4317_v6 = vmul.f32 %v10000_v59, %v9998_v48  ;;  %v10002_v54 = vpop.eup %10001  ;;  %v13381_v48 = vld [vmem:[#allocation62_spill] sm:$0xff]  ;;  %v13382_v52 = vld [vmem:[#allocation63_spill] sm:$0xff]  ;;  %v13383_v59 = vld [vmem:[#allocation64_spill] sm:$0xff] }
 0x655   : > { %v10004_v49 = vpop.eup %10003 }
 0x656   : > { %v11987_v35 = vsel %vm3801_vm7, %v4317_v6, %v11653_v36  ;;  %v4320_v23 = vsel %vm3801_vm7, %v4317_v6, 0.0  ;;  %v4626_v12 = vadd.f32 1.0, %v10004_v49  ;;  %v11994_v36 = vpop.permute.xlu1 %4636  ;;  %v13384_v6 = vld [vmem:[#allocation65_spill] sm:$0xff] }
 0x657   : > { %v4321_v19 = vpack.c.bf16 %v4320_v23, %v4320_v23  ;;  %v4642_v4 = vpack.c.bf16 %v11987_v35, %v11987_v35  ;;  %vm4638_vm8 = vcmp.eq.s32.totalorder %v11994_v36, 1  ;;  %v13385_v23 = vld [vmem:[#allocation66_spill] sm:$0xff]  ;;  %v13389_v49 = vld [vmem:[#allocation69_spill] sm:$0xff] }
 0x658   : > { %10009 = vrcp.f32 %v4626_v12  ;;  %v13393_v12 = vld [vmem:[#allocation76_spill] sm:$0xff] }
 0x659   : > { %4323 = vst [vmem:[#allocation7 + $0xc] sm:$0xf] %v4321_v19  ;;  %5081 = vmatprep.mubr.bf16.mxu0 %v4642_v4  ;;  %5122 = vmatprep.mubr.bf16.mxu1 %v4642_v4  ;;  %v13386_v19 = vld [vmem:[#allocation68_spill] sm:$0xff]  ;;  %v13387_v4 = vld [vmem:[#allocation70_spill] sm:$0xff] }
 0x65f   : > { %v10006_v58 = vpop.eup %10005 }
 0x660   : > { %v4630_v28 = vmul.f32 %v10006_v58, %v10002_v54  ;;  %v13388_v54 = vld [vmem:[#allocation67_spill] sm:$0xff] }
 0x661   : > { %v10008_v13 = vpop.eup %10007  ;;  %v13390_v58 = vld [vmem:[#allocation71_spill] sm:$0xff] }
 0x662   : > { %v4629_v14 = vmul.f32 %v10008_v13, %v11666_v18  ;;  %v13392_v13 = vld [vmem:[#allocation74_spill] sm:$0xff] }
 0x664   : > { %v4631_v11 = vadd.f32 %v4630_v28, %v4629_v14  ;;  %v13391_v28 = vld [vmem:[#allocation72_spill] sm:$0xff]  ;;  %v13394_v14 = vld [vmem:[#allocation73_spill] sm:$0xff] }
 0x665   : > { %v10010_v62 = vpop.eup %10009 }
 0x666   : > { %10011 = vtanh.f32 %v4631_v11  ;;  %v12000_v10 = vsel %vm4638_vm8, %v4631_v11, %v11666_v18  ;;  %v13343_v18 = vld [vmem:[#allocation86_spill] sm:$0xff]  ;;  %v13395_v11 = vld [vmem:[#allocation75_spill] sm:$0xff] }
 0x673   : > { %v10012_v15 = vpop.eup %10011 }
 0x674   : > { %v4633_v3 = vmul.f32 %v10012_v15, %v10010_v62  ;;  %v13396_v62 = vld [vmem:[#allocation77_spill] sm:$0xff]  ;;  %v13397_v15 = vld [vmem:[#allocation78_spill] sm:$0xff] }
 0x676   : > { %v12005_v9 = vsel %vm4638_vm8, %v4633_v3, %v11675_v8  ;;  %v13346_v8 = vld [vmem:[#allocation87_spill] sm:$0xff] }
 0x677   : > { %v4641_v60 = vpack.c.bf16 %v12005_v9, %v12005_v9  ;;  %v13398_v3 = vld [vmem:[#allocation79_spill] sm:$0xff] }
 0x679   : > { %5082 = vmatmul.mubr.bf16.vlgmr.msra.gmra.mxu0 %v4641_v60  ;;  %5123 = vmatmul.mubr.bf16.vlgmr.msra.gmra.mxu1 %v4641_v60 }
 0x67a   : > { %5362 = vmatpush1.bf16.msra.mxu0 %v11668_v63  ;;  %5403 = vmatpush1.bf16.msra.mxu1 %v11670_v7  ;;  %v13344_v63 = vld [vmem:[#allocation88_spill] sm:$0xff]  ;;  %v13345_v7 = vld [vmem:[#allocation89_spill] sm:$0xff] }
 0x67b   : > { %5363 = vmatprep.subr.bf16.mxu0 %v11681_v16  ;;  %5404 = vmatprep.subr.bf16.mxu1 %v11683_v31  ;;  %v13347_v16 = vld [vmem:[#allocation28_spill] sm:$0xff]  ;;  %v13348_v31 = vld [vmem:[#allocation29_spill] sm:$0xff] }
 0x67c   : > { %5393 = vmatprep.mubr.bf16.mxu0 %v13057_v5  ;;  %5434 = vmatprep.mubr.bf16.mxu1 %v13057_v5 }
 0x67e   : > { %5364 = vmatpush1.bf16.msra.mxu0 %v11689_v39  ;;  %5405 = vmatpush1.bf16.msra.mxu1 %v11691_v33  ;;  %v13349_v39 = vld [vmem:[#allocation30_spill] sm:$0xff]  ;;  %v13350_v33 = vld [vmem:[#allocation31_spill] sm:$0xff] }
 0x67f   : > { %5365 = vmatprep.subr.bf16.mxu0 %v11695_v43  ;;  %5406 = vmatprep.subr.bf16.mxu1 %v11697_v42  ;;  %v13351_v43 = vld [vmem:[#allocation32_spill] sm:$0xff]  ;;  %v13352_v42 = vld [vmem:[#allocation33_spill] sm:$0xff] }
 0x682   : > { %5366 = vmatpush1.bf16.msra.mxu0 %v11703_v37  ;;  %5407 = vmatpush1.bf16.msra.mxu1 %v11705_v17  ;;  %v13353_v37 = vld [vmem:[#allocation34_spill] sm:$0xff]  ;;  %v13354_v17 = vld [vmem:[#allocation35_spill] sm:$0xff] }
 0x683   : > { %5367 = vmatprep.subr.bf16.mxu0 %v11709_v1  ;;  %5408 = vmatprep.subr.bf16.mxu1 %v11711_v27  ;;  %v13355_v1 = vld [vmem:[#allocation36_spill] sm:$0xff]  ;;  %v13356_v27 = vld [vmem:[#allocation37_spill] sm:$0xff] }
 0x686   : > { %5368 = vmatpush1.bf16.msra.mxu0 %v11715_v24  ;;  %5409 = vmatpush1.bf16.msra.mxu1 %v11717_v22  ;;  %v13357_v24 = vld [vmem:[#allocation38_spill] sm:$0xff]  ;;  %v13358_v22 = vld [vmem:[#allocation39_spill] sm:$0xff] }
 0x687   : > { %5369 = vmatprep.subr.bf16.mxu0 %v11721_v44  ;;  %5410 = vmatprep.subr.bf16.mxu1 %v11723_v20  ;;  %v13359_v44 = vld [vmem:[#allocation40_spill] sm:$0xff]  ;;  %v13360_v20 = vld [vmem:[#allocation41_spill] sm:$0xff] }
 0x68a   : > { %5370 = vmatpush1.bf16.msra.mxu0 %v11727_v38  ;;  %5411 = vmatpush1.bf16.msra.mxu1 %v11729_v46  ;;  %v13361_v38 = vld [vmem:[#allocation42_spill] sm:$0xff]  ;;  %v13362_v46 = vld [vmem:[#allocation43_spill] sm:$0xff] }
 0x68b   : > { %5371 = vmatprep.subr.bf16.mxu0 %v11733_v34  ;;  %5412 = vmatprep.subr.bf16.mxu1 %v11735_v26  ;;  %v13363_v34 = vld [vmem:[#allocation44_spill] sm:$0xff]  ;;  %v13364_v26 = vld [vmem:[#allocation45_spill] sm:$0xff] }
 0x68e   : > { %5372 = vmatpush1.bf16.msra.mxu0 %v11739_v25  ;;  %5413 = vmatpush1.bf16.msra.mxu1 %v11741_v40  ;;  %v13365_v25 = vld [vmem:[#allocation46_spill] sm:$0xff]  ;;  %v13366_v40 = vld [vmem:[#allocation47_spill] sm:$0xff] }
 0x68f   : > { %5373 = vmatprep.subr.bf16.mxu0 %v11745_v0  ;;  %5414 = vmatprep.subr.bf16.mxu1 %v11747_v51  ;;  %v13367_v0 = vld [vmem:[#allocation48_spill] sm:$0xff]  ;;  %v13368_v51 = vld [vmem:[#allocation49_spill] sm:$0xff] }
 0x692   : > { %5374 = vmatpush1.bf16.msra.mxu0 %v11751_v61  ;;  %5415 = vmatpush1.bf16.msra.mxu1 %v11753_v41  ;;  %v13369_v61 = vld [vmem:[#allocation52_spill] sm:$0xff]  ;;  %v13370_v41 = vld [vmem:[#allocation50_spill] sm:$0xff] }
 0x693   : > { %5375 = vmatprep.subr.bf16.mxu0 %v11757_v45  ;;  %5416 = vmatprep.subr.bf16.mxu1 %v11759_v29  ;;  %v13371_v45 = vld [vmem:[#allocation51_spill] sm:$0xff]  ;;  %v13372_v29 = vld [vmem:[#allocation53_spill] sm:$0xff] }
 0x696   : > { %5376 = vmatpush1.bf16.msra.mxu0 %v11763_v30  ;;  %5417 = vmatpush1.bf16.msra.mxu1 %v11765_v47  ;;  %v13373_v30 = vld [vmem:[#allocation54_spill] sm:$0xff]  ;;  %v13374_v47 = vld [vmem:[#allocation55_spill] sm:$0xff] }
 0x697   : > { %5886 = vmatprep.subr.bf16.mxu0 %v11773_v50  ;;  %5927 = vmatprep.subr.bf16.mxu1 %v11775_v53  ;;  %v13375_v50 = vld [vmem:[#allocation56_spill] sm:$0xff]  ;;  %v13376_v53 = vld [vmem:[#allocation57_spill] sm:$0xff] }
 0x699   : > { %5394 = vmatmul.mubr.bf16.vlgmr.msra.gmra.mxu0 %v4641_v60  ;;  %5435 = vmatmul.mubr.bf16.vlgmr.msra.gmra.mxu1 %v4641_v60  ;;  %v13399_v60 = vld [vmem:[#allocation80_spill] sm:$0xff] }
 0x69a   : > { %5887 = vmatpush1.bf16.msra.mxu0 %v11777_v55  ;;  %5928 = vmatpush1.bf16.msra.mxu1 %v11779_v56  ;;  %v13377_v55 = vld [vmem:[#allocation58_spill] sm:$0xff]  ;;  %v13378_v56 = vld [vmem:[#allocation59_spill] sm:$0xff] }
 0x69b   : > { %5888 = vmatprep.subr.bf16.mxu0 %v11785_v57  ;;  %5929 = vmatprep.subr.bf16.mxu1 %v13343_v18  ;;  %v13379_v57 = vld [vmem:[#allocation60_spill] sm:$0xff]  ;;  %v13400_v18 = vld [vmem:[#allocation27_spill] sm:$0xff] }
 0x69e   : > { %5889 = vmatpush1.bf16.msra.mxu0 %v13344_v63  ;;  %5930 = vmatpush1.bf16.msra.mxu1 %v13345_v7  ;;  %v13401_v63 = vld [vmem:[#allocation82_spill] sm:$0xff] }
 0x69f   : > { %5890 = vmatprep.subr.bf16.mxu0 %v13346_v8  ;;  %5931 = vmatprep.subr.bf16.mxu1 %v13347_v16  ;;  %v12105_v7 = vld [vmem:[#allocation11 + $0xe4] ss:$16 sps:$4 sm:$0xff]   ;;  %v12107_v8 = vld [vmem:[#allocation11 + $0xec] ss:$16 sps:$4 sm:$0xff]   ;;  %v4707_v16 = vld [vmem:[%s12710_s6] sm:$0xf] }
 0x6a2   : > { %5891 = vmatpush1.bf16.msra.mxu0 %v13348_v31  ;;  %5932 = vmatpush1.bf16.msra.mxu1 %v13349_v39  ;;  %v13402_v31 = vld [vmem:[#allocation24_spill] sm:$0xff] }
 0x6a3   : > { %5892 = vmatprep.subr.bf16.mxu0 %v13350_v33  ;;  %5933 = vmatprep.subr.bf16.mxu1 %v13351_v43  ;;  %v4712_v39 = vrot.slane %v4707_v16, %v13402_v31  ;;  %v13403_v33 = vld [vmem:[#allocation26_spill] sm:$0xff] }
 0x6a4   : > { %v4716_v43 = vrot.slane %v4707_v16, %v13403_v33 }
 0x6a6   : > { %5893 = vmatpush1.bf16.msra.mxu0 %v13352_v42  ;;  %5934 = vmatpush1.bf16.msra.mxu1 %v13353_v37 }
 0x6a7   : > { %5894 = vmatprep.subr.bf16.mxu0 %v13354_v17  ;;  %5935 = vmatprep.subr.bf16.mxu1 %v13355_v1 }
 0x6aa   : > { %5895 = vmatpush1.bf16.msra.mxu0 %v13356_v27  ;;  %5936 = vmatpush1.bf16.msra.mxu1 %v13357_v24 }
 0x6ab   : > { %5896 = vmatprep.subr.bf16.mxu0 %v13358_v22  ;;  %5937 = vmatprep.subr.bf16.mxu1 %v13359_v44 }
 0x6ae   : > { %5897 = vmatpush1.bf16.msra.mxu0 %v13360_v20  ;;  %5938 = vmatpush1.bf16.msra.mxu1 %v13361_v38 }
 0x6af   : > { %5898 = vmatprep.subr.bf16.mxu0 %v13362_v46  ;;  %5939 = vmatprep.subr.bf16.mxu1 %v13363_v34 }
 0x6b2   : > { %5899 = vmatpush1.bf16.msra.mxu0 %v13364_v26  ;;  %5940 = vmatpush1.bf16.msra.mxu1 %v13365_v25  ;;  %v4724_v26 = vrot.slane %v4707_v16, %v13141_v32 }
 0x6b3   : > { %5900 = vmatprep.subr.bf16.mxu0 %v13366_v40  ;;  %5941 = vmatprep.subr.bf16.mxu1 %v13367_v0  ;;  %v13404_v40 = vld [vmem:[#allocation25_spill] sm:$0xff] }
 0x6b4   : > { %v4720_v0 = vrot.slane %v4707_v16, %v13404_v40 }
 0x6b6   : > { %5901 = vmatpush1.bf16.msra.mxu0 %v13368_v51  ;;  %5942 = vmatpush1.bf16.msra.mxu1 %v13369_v61 }
 0x6b7   : > { %5902 = vmatprep.subr.bf16.mxu0 %v13370_v41  ;;  %5943 = vmatprep.subr.bf16.mxu1 %v13371_v45 }
 0x6ba   : > { %5903 = vmatpush2.bf16.msra.mxu0 %v13372_v29  ;;  %5944 = vmatpush2.bf16.msra.mxu1 %v13373_v30 }
 0x6bb   : > { %5904 = vmatprep.subr.bf16.mxu0 %v13374_v47  ;;  %5945 = vmatprep.subr.bf16.mxu1 %v13375_v50 }
 0x6be   : > { %5905 = vmatpush2.bf16.msra.mxu0 %v13376_v53  ;;  %5946 = vmatpush2.bf16.msra.mxu1 %v13377_v55  ;;  %v13405_v55 = vld [vmem:[#allocation98_spill] sm:$0xff] }
 0x6bf   : > { %5906 = vmatprep.subr.bf16.mxu0 %v13378_v56  ;;  %5947 = vmatprep.subr.bf16.mxu1 %v13379_v57 }
 0x6c2   : > { %5907 = vmatpush2.bf16.msra.mxu0 %v13380_v2  ;;  %5948 = vmatpush2.bf16.msra.mxu1 %v13381_v48 }
 0x6c3   : > { %5908 = vmatprep.subr.bf16.mxu0 %v13382_v52  ;;  %5949 = vmatprep.subr.bf16.mxu1 %v13383_v59 }
 0x6c6   : > { %5909 = vmatpush2.bf16.msra.mxu0 %v13384_v6  ;;  %5950 = vmatpush2.bf16.msra.mxu1 %v13385_v23  ;;  %v13406_v6 = vld [vmem:[#allocation100_spill] sm:$0xff] }
 0x6c7   : > { %5910 = vmatprep.subr.bf16.mxu0 %v13386_v19  ;;  %5951 = vmatprep.subr.bf16.mxu1 %v13387_v4 }
 0x6ca   : > { %5911 = vmatpush2.bf16.msra.mxu0 %v13388_v54  ;;  %5952 = vmatpush2.bf16.msra.mxu1 %v13389_v49 }
 0x6cb   : > { %5912 = vmatprep.subr.bf16.mxu0 %v13390_v58  ;;  %5953 = vmatprep.subr.bf16.mxu1 %v13391_v28 }
 0x6ce   : > { %5913 = vmatpush2.bf16.msra.mxu0 %v13392_v13  ;;  %5954 = vmatpush2.bf16.msra.mxu1 %v13393_v12 }
 0x6cf   : > { %5914 = vmatprep.subr.bf16.mxu0 %v13394_v14  ;;  %5955 = vmatprep.subr.bf16.mxu1 %v13395_v11 }
 0x6d2   : > { %5915 = vmatpush2.bf16.msra.mxu0 %v13396_v62  ;;  %5956 = vmatpush2.bf16.msra.mxu1 %v13397_v15  ;;  %v13407_v15 = vld [vmem:[#allocation101_spill] sm:$0xff] }
 0x6d3   : > { %5916 = vmatprep.subr.bf16.mxu0 %v13398_v3  ;;  %5957 = vmatprep.subr.bf16.mxu1 %v13399_v60  ;;  %v13408_v60 = vld [vmem:[#allocation99_spill] sm:$0xff] }
 0x6d6   : > { %5917 = vmatpush2.bf16.msra.mxu0 %v13400_v18  ;;  %5958 = vmatpush2.bf16.msra.mxu1 %v13401_v63 }
 0x6d7   : > { %6198 = vmatprep.subr.bf16.mxu0 %v12105_v7  ;;  %6239 = vmatprep.subr.bf16.mxu1 %v12107_v8 }
 0x739   : > { %v5083_v42 = vpop.f32.mrf.mxu0  ;;  %v5124_v37 = vpop.f32.mrf.mxu1 }
 0x73a   : > { %v5084_v17 = vadd.f32 %v5083_v42, %v4712_v39  ;;  %v5125_v41 = vadd.f32 %v5124_v37, %v4720_v0 }
 0x73b   : > { %v5085_v1 = vpop.f32.mrf.mxu0  ;;  %v5126_v27 = vpop.f32.mrf.mxu1 }
 0x73c   : > { %v8695_v24 = vmul.f32 -1.442695, %v5084_v17  ;;  %v5086_v22 = vadd.f32 %v5085_v1, %v4716_v43  ;;  %v5127_v25 = vadd.f32 %v5126_v27, %v4724_v26 }
 0x73d   : > { %v5087_v44 = vpop.f32.mrf.mxu0  ;;  %v5128_v20 = vpop.f32.mrf.mxu1 }
 0x73e   : > { %10013 = vpow2.f32 %v8695_v24  ;;  %v8696_v38 = vmul.f32 -1.442695, %v5086_v22  ;;  %v8697_v51 = vmul.f32 -1.442695, %v5127_v25 }
 0x73f   : > { %v5088_v46 = vpop.f32.mrf.mxu0  ;;  %v5129_v34 = vpop.f32.mrf.mxu1 }
 0x740   : > { %10015 = vpow2.f32 %v8696_v38 }
 0x741   : > { %10017 = vpow2.f32 %v8697_v51 }
 0x74b   : > { %v10014_v61 = vpop.eup %10013 }
 0x74c   : > { %v5134_v45 = vadd.f32 1.0, %v10014_v61 }
 0x74d   : > { %v10016_v29 = vpop.eup %10015 }
 0x74e   : > { %10019 = vrcp.f32 %v5134_v45  ;;  %v5140_v30 = vadd.f32 1.0, %v10016_v29  ;;  %v10018_v53 = vpop.eup %10017  ;;  %v12146_v45 = vld [vmem:[#allocation11 + $0xe0] ss:$16 sps:$4 sm:$0xff]   ;;  %v12148_v29 = vld [vmem:[#allocation11 + $0xe8] ss:$16 sps:$4 sm:$0xff]  }
 0x74f   : > { %10021 = vtanh.f32 %v5125_v41  ;;  %v5147_v4 = vadd.f32 1.0, %v10018_v53  ;;  %v12167_v53 = vld [vmem:[#allocation11 + $0xc0] ss:$16 sps:$4 sm:$0xff]  }
 0x750   : > { %10023 = vrcp.f32 %v5140_v30 }
 0x759   : > { %v5395_v47 = vpop.f32.mrf.mxu0  ;;  %v5436_v50 = vpop.f32.mrf.mxu1 }
 0x75a   : > { %v5443_v56 = vadd.f32 %v5395_v47, %v13405_v55  ;;  %v5445_v18 = vadd.f32 %v5436_v50, %v13408_v60  ;;  %v12159_v50 = vld [vmem:[#allocation11 + $0xc4] ss:$16 sps:$4 sm:$0xff]   ;;  %v12237_v60 = vld [vmem:[#allocation11 + $0xc] ss:$16 sps:$4 sm:$0xff]  }
 0x75b   : > { %v10020_v57 = vpop.eup %10019  ;;  %v5397_v2 = vpop.f32.mrf.mxu0  ;;  %v12173_v55 = vld [vmem:[#allocation11 + $0xa4] ss:$16 sps:$4 sm:$0xff]  }
 0x75c   : > { %v5438_v48 = vpop.f32.mrf.mxu1  ;;  %v10022_v52 = vpop.eup %10021  ;;  %v8730_v59 = vmul.f32 -1.442695, %v5443_v56  ;;  %v5444_v23 = vadd.f32 %v5397_v2, %v13406_v6  ;;  %v12175_v56 = vld [vmem:[#allocation11 + $0xac] ss:$16 sps:$4 sm:$0xff]   ;;  %v12183_v2 = vld [vmem:[#allocation11 + $0xa8] ss:$16 sps:$4 sm:$0xff]  }
 0x75d   : > { %v10024_v19 = vpop.eup %10023  ;;  %v5399_v54 = vpop.f32.mrf.mxu0  ;;  %v5151_v58 = vmul.f32 %v10022_v52, %v10020_v57  ;;  %v5446_v3 = vadd.f32 %v5438_v48, %v13407_v15  ;;  %v12181_v57 = vld [vmem:[#allocation11 + $0xa0] ss:$16 sps:$4 sm:$0xff]   ;;  %v12187_v48 = vld [vmem:[#allocation11 + $0x84] ss:$16 sps:$4 sm:$0xff]   ;;  %v12189_v52 = vld [vmem:[#allocation11 + $0x8c] ss:$16 sps:$4 sm:$0xff]  }
 0x75e   : > { %v5440_v49 = vpop.f32.mrf.mxu1  ;;  %v5150_v28 = vmul.f32 %v10024_v19, %v11980_v21  ;;  %10025 = vpow2.f32 %v8730_v59  ;;  %v8731_v13 = vmul.f32 -1.442695, %v5444_v23  ;;  %v12193_v59 = vld [vmem:[#allocation11 + $0x80] ss:$16 sps:$4 sm:$0xff]   ;;  %v12195_v6 = vld [vmem:[#allocation11 + $0x88] ss:$16 sps:$4 sm:$0xff]  }
 0x75f   : > { %v5400_v12 = vpop.f32.mrf.mxu0  ;;  %v8732_v63 = vmul.f32 -1.442695, %v5446_v3  ;;  %v12199_v23 = vld [vmem:[#allocation11 + $0x64] ss:$16 sps:$4 sm:$0xff]   ;;  %v12201_v19 = vld [vmem:[#allocation11 + $0x6c] ss:$16 sps:$4 sm:$0xff]  }
 0x760   : > { %v5441_v14 = vpop.f32.mrf.mxu1  ;;  %v5152_v11 = vadd.f32 %v5151_v58, %v5150_v28  ;;  %10027 = vpow2.f32 %v8731_v13  ;;  %v12207_v54 = vld [vmem:[#allocation11 + $0x68] ss:$16 sps:$4 sm:$0xff]   ;;  %v12211_v49 = vld [vmem:[#allocation11 + $0x44] ss:$16 sps:$4 sm:$0xff]   ;;  %v12213_v58 = vld [vmem:[#allocation11 + $0x4c] ss:$16 sps:$4 sm:$0xff]  }
 0x761   : > { %10029 = vrcp.f32 %v5147_v4  ;;  %v12205_v4 = vld [vmem:[#allocation11 + $0x60] ss:$16 sps:$4 sm:$0xff]   ;;  %v12219_v13 = vld [vmem:[#allocation11 + $0x48] ss:$16 sps:$4 sm:$0xff]   ;;  %v12223_v12 = vld [vmem:[#allocation11 + $0x24] ss:$16 sps:$4 sm:$0xff]  }
 0x762   : > { %10031 = vtanh.f32 %v5152_v11  ;;  %v12124_v62 = vsel %vm4638_vm8, %v5152_v11, %v11980_v21  ;;  %v12217_v28 = vld [vmem:[#allocation11 + $0x40] ss:$16 sps:$4 sm:$0xff]   ;;  %v12225_v14 = vld [vmem:[#allocation11 + $0x2c] ss:$16 sps:$4 sm:$0xff]   ;;  %v12231_v15 = vld [vmem:[#allocation11 + $0x28] ss:$16 sps:$4 sm:$0xff]  }
 0x763   : > { %10033 = vtanh.f32 %v5445_v18  ;;  %v12229_v11 = vld [vmem:[#allocation11 + $0x20] ss:$16 sps:$4 sm:$0xff]   ;;  %v12235_v3 = vld [vmem:[#allocation11 + $0x4] ss:$16 sps:$4 sm:$0xff]  }
 0x764   : > { %10035 = vpow2.f32 %v8732_v63  ;;  %v12241_v18 = vld [vmem:[#allocation11] ss:$16 sps:$4 sm:$0xff]   ;;  %v12243_v63 = vld [vmem:[#allocation11 + $0x8] ss:$16 sps:$4 sm:$0xff]  }
 0x76b   : > { %v10026_v16 = vpop.eup %10025 }
 0x76c   : > { %v5450_v39 = vadd.f32 1.0, %v10026_v16  ;;  %v12251_v16 = vld [vmem:[#allocation13 + $0xe4] ss:$16 sps:$4 sm:$0xff]  }
 0x76d   : > { %v10028_v43 = vpop.eup %10027 }
 0x76e   : > { %v10030_v42 = vpop.eup %10029  ;;  %10037 = vrcp.f32 %v5450_v39  ;;  %v5456_v37 = vadd.f32 1.0, %v10028_v43  ;;  %v12253_v39 = vld [vmem:[#allocation13 + $0xec] ss:$16 sps:$4 sm:$0xff]   ;;  %v12255_v43 = vld [vmem:[#allocation13 + $0xe0] ss:$16 sps:$4 sm:$0xff]  }
 0x76f   : > { %v10032_v17 = vpop.eup %10031 }
 0x770   : > { %10039 = vrcp.f32 %v5456_v37  ;;  %v5154_v1 = vmul.f32 %v10032_v17, %v10030_v42  ;;  %v10034_v44 = vpop.eup %10033  ;;  %v12257_v42 = vld [vmem:[#allocation13 + $0xe8] ss:$16 sps:$4 sm:$0xff]   ;;  %v12263_v37 = vld [vmem:[#allocation13 + $0xc4] ss:$16 sps:$4 sm:$0xff]   ;;  %v12265_v17 = vld [vmem:[#allocation13 + $0xcc] ss:$16 sps:$4 sm:$0xff]  }
 0x771   : > { %v10036_v20 = vpop.eup %10035  ;;  %13409 = vst [vmem:[#allocation84_spill] sm:$0xff] %v12265_v17 }
 0x772   : > { %v12131_v21 = vsel %vm4638_vm8, %v5154_v1, %v11987_v35  ;;  %v5157_v27 = vsel %vm4638_vm8, %v5154_v1, 0.0  ;;  %v5463_v26 = vadd.f32 1.0, %v10036_v20  ;;  %v12138_v35 = vpop.permute.xlu0 %5473  ;;  %v12267_v1 = vld [vmem:[#allocation13 + $0xc0] ss:$16 sps:$4 sm:$0xff]   ;;  %v12281_v20 = vld [vmem:[#allocation13 + $0xa8] ss:$16 sps:$4 sm:$0xff]  }
 0x773   : > { %v5158_v24 = vpack.c.bf16 %v5157_v27, %v5157_v27  ;;  %v5479_v22 = vpack.c.bf16 %v12131_v21, %v12131_v21  ;;  %vm5475_vm9 = vcmp.eq.s32.totalorder %v12138_v35, 1  ;;  %13410 = vst [vmem:[#allocation85_spill] sm:$0xff] %v12267_v1  ;;  %v12269_v27 = vld [vmem:[#allocation13 + $0xc8] ss:$16 sps:$4 sm:$0xff]   ;;  %13415 = vst [vmem:[#allocation90_spill] sm:$0xff] %v12281_v20 }
 0x774   : > { %10041 = vrcp.f32 %v5463_v26  ;;  %13411 = vst [vmem:[#allocation83_spill] sm:$0xff] %v12269_v27  ;;  %v12293_v26 = vld [vmem:[#allocation13 + $0x88] ss:$16 sps:$4 sm:$0xff]  }
 0x775   : > { %5160 = vst [vmem:[#allocation7 + $0x10] sm:$0xf] %v5158_v24  ;;  %5918 = vmatprep.mubr.bf16.mxu0 %v5479_v22  ;;  %5959 = vmatprep.mubr.bf16.mxu1 %v5479_v22  ;;  %v12275_v24 = vld [vmem:[#allocation13 + $0xa4] ss:$16 sps:$4 sm:$0xff]   ;;  %v12277_v22 = vld [vmem:[#allocation13 + $0xac] ss:$16 sps:$4 sm:$0xff]  }
 0x776   : > { %13412 = vst [vmem:[#allocation81_spill] sm:$0xff] %v12275_v24  ;;  %13413 = vst [vmem:[#allocation110_spill] sm:$0xff] %v12277_v22 }
 0x777   : > { %13419 = vst [vmem:[#allocation94_spill] sm:$0xff] %v12293_v26 }
 0x77b   : > { %v10038_v38 = vpop.eup %10037 }
 0x77c   : > { %v5467_v46 = vmul.f32 %v10038_v38, %v10034_v44  ;;  %v12279_v44 = vld [vmem:[#allocation13 + $0xa0] ss:$16 sps:$4 sm:$0xff]   ;;  %v12287_v38 = vld [vmem:[#allocation13 + $0x84] ss:$16 sps:$4 sm:$0xff]  }
 0x77d   : > { %v10040_v34 = vpop.eup %10039  ;;  %13414 = vst [vmem:[#allocation111_spill] sm:$0xff] %v12279_v44  ;;  %13416 = vst [vmem:[#allocation92_spill] sm:$0xff] %v12287_v38 }
 0x77e   : > { %v5466_v25 = vmul.f32 %v10040_v34, %v12000_v10  ;;  %v12291_v34 = vld [vmem:[#allocation13 + $0x80] ss:$16 sps:$4 sm:$0xff]  }
 0x77f   : > { %13418 = vst [vmem:[#allocation91_spill] sm:$0xff] %v12291_v34 }
 0x780   : > { %v5468_v0 = vadd.f32 %v5467_v46, %v5466_v25  ;;  %v12289_v46 = vld [vmem:[#allocation13 + $0x8c] ss:$16 sps:$4 sm:$0xff]   ;;  %v12299_v25 = vld [vmem:[#allocation13 + $0x64] ss:$16 sps:$4 sm:$0xff]  }
 0x781   : > { %v10042_v51 = vpop.eup %10041  ;;  %13417 = vst [vmem:[#allocation93_spill] sm:$0xff] %v12289_v46  ;;  %13420 = vst [vmem:[#allocation96_spill] sm:$0xff] %v12299_v25 }
 0x782   : > { %10043 = vtanh.f32 %v5468_v0  ;;  %v12144_v36 = vsel %vm5475_vm9, %v5468_v0, %v12000_v10  ;;  %v12161_v10 = vld [vmem:[#allocation11 + $0xcc] ss:$16 sps:$4 sm:$0xff]  }
 0x783   : > { %v12301_v0 = vld [vmem:[#allocation13 + $0x6c] ss:$16 sps:$4 sm:$0xff]  }
 0x784   : > { %13421 = vst [vmem:[#allocation97_spill] sm:$0xff] %v12301_v0 }
 0x78f   : > { %v10044_v61 = vpop.eup %10043 }
 0x790   : > { %v5470_v41 = vmul.f32 %v10044_v61, %v10042_v51  ;;  %v12303_v51 = vld [vmem:[#allocation13 + $0x60] ss:$16 sps:$4 sm:$0xff]   ;;  %v12305_v61 = vld [vmem:[#allocation13 + $0x68] ss:$16 sps:$4 sm:$0xff]  }
 0x791   : > { %13422 = vst [vmem:[#allocation95_spill] sm:$0xff] %v12303_v51  ;;  %13423 = vst [vmem:[#allocation86_spill] sm:$0xff] %v12305_v61 }
 0x792   : > { %v12153_v30 = vsel %vm5475_vm9, %v5470_v41, %v12005_v9  ;;  %v12169_v9 = vld [vmem:[#allocation11 + $0xc8] ss:$16 sps:$4 sm:$0xff]   ;;  %v12311_v41 = vld [vmem:[#allocation13 + $0x44] ss:$16 sps:$4 sm:$0xff]  }
 0x793   : > { %v12157_v47 = vpack.c.bf16 %v12153_v30, %v12153_v30  ;;  %13424 = vst [vmem:[#allocation88_spill] sm:$0xff] %v12311_v41 }
 0x795   : > { %5919 = vmatmul.mubr.bf16.vlgmr.msra.gmra.mxu0 %v12157_v47  ;;  %5960 = vmatmul.mubr.bf16.vlgmr.msra.gmra.mxu1 %v12157_v47 }
 0x796   : > { %6199 = vmatpush1.bf16.msra.mxu0 %v12146_v45  ;;  %6240 = vmatpush1.bf16.msra.mxu1 %v12148_v29 }
 0x797   : > { %6200 = vmatprep.subr.bf16.mxu0 %v12159_v50  ;;  %6241 = vmatprep.subr.bf16.mxu1 %v12161_v10 }
 0x798   : > { %6230 = vmatprep.mubr.bf16.mxu0 %v13057_v5  ;;  %6271 = vmatprep.mubr.bf16.mxu1 %v13057_v5 }
 0x79a   : > { %6201 = vmatpush1.bf16.msra.mxu0 %v12167_v53  ;;  %6242 = vmatpush1.bf16.msra.mxu1 %v12169_v9 }
 0x79b   : > { %6202 = vmatprep.subr.bf16.mxu0 %v12173_v55  ;;  %6243 = vmatprep.subr.bf16.mxu1 %v12175_v56 }
 0x79e   : > { %6203 = vmatpush1.bf16.msra.mxu0 %v12181_v57  ;;  %6244 = vmatpush1.bf16.msra.mxu1 %v12183_v2 }
 0x79f   : > { %6204 = vmatprep.subr.bf16.mxu0 %v12187_v48  ;;  %6245 = vmatprep.subr.bf16.mxu1 %v12189_v52 }
 0x7a2   : > { %6205 = vmatpush1.bf16.msra.mxu0 %v12193_v59  ;;  %6246 = vmatpush1.bf16.msra.mxu1 %v12195_v6 }
 0x7a3   : > { %6206 = vmatprep.subr.bf16.mxu0 %v12199_v23  ;;  %6247 = vmatprep.subr.bf16.mxu1 %v12201_v19 }
 0x7a6   : > { %6207 = vmatpush1.bf16.msra.mxu0 %v12205_v4  ;;  %6248 = vmatpush1.bf16.msra.mxu1 %v12207_v54 }
 0x7a7   : > { %6208 = vmatprep.subr.bf16.mxu0 %v12211_v49  ;;  %6249 = vmatprep.subr.bf16.mxu1 %v12213_v58 }
 0x7aa   : > { %6209 = vmatpush1.bf16.msra.mxu0 %v12217_v28  ;;  %6250 = vmatpush1.bf16.msra.mxu1 %v12219_v13 }
 0x7ab   : > { %6210 = vmatprep.subr.bf16.mxu0 %v12223_v12  ;;  %6251 = vmatprep.subr.bf16.mxu1 %v12225_v14 }
 0x7ae   : > { %6211 = vmatpush1.bf16.msra.mxu0 %v12229_v11  ;;  %6252 = vmatpush1.bf16.msra.mxu1 %v12231_v15 }
 0x7af   : > { %6212 = vmatprep.subr.bf16.mxu0 %v12235_v3  ;;  %6253 = vmatprep.subr.bf16.mxu1 %v12237_v60 }
 0x7b2   : > { %6213 = vmatpush1.bf16.msra.mxu0 %v12241_v18  ;;  %6254 = vmatpush1.bf16.msra.mxu1 %v12243_v63 }
 0x7b3   : > { %6723 = vmatprep.subr.bf16.mxu0 %v12251_v16  ;;  %6764 = vmatprep.subr.bf16.mxu1 %v12253_v39 }
 0x7b5   : > { %6231 = vmatmul.mubr.bf16.vlgmr.msra.gmra.mxu0 %v12157_v47  ;;  %6272 = vmatmul.mubr.bf16.vlgmr.msra.gmra.mxu1 %v12157_v47  ;;  %v12313_v47 = vld [vmem:[#allocation13 + $0x4c] ss:$16 sps:$4 sm:$0xff]  }
 0x7b6   : > { %6724 = vmatpush1.bf16.msra.mxu0 %v12255_v43  ;;  %6765 = vmatpush1.bf16.msra.mxu1 %v12257_v42  ;;  %13425 = vst [vmem:[#allocation89_spill] sm:$0xff] %v12313_v47 }
 0x7b7   : > { %6725 = vmatprep.subr.bf16.mxu0 %v12263_v37  ;;  %6766 = vmatprep.subr.bf16.mxu1 %v12265_v17 }
 0x7ba   : > { %6726 = vmatpush1.bf16.msra.mxu0 %v12267_v1  ;;  %6767 = vmatpush1.bf16.msra.mxu1 %v12269_v27 }
 0x7bb   : > { %6727 = vmatprep.subr.bf16.mxu0 %v12275_v24  ;;  %6768 = vmatprep.subr.bf16.mxu1 %v12277_v22 }
 0x7be   : > { %6728 = vmatpush1.bf16.msra.mxu0 %v12279_v44  ;;  %6769 = vmatpush1.bf16.msra.mxu1 %v12281_v20 }
 0x7bf   : > { %6729 = vmatprep.subr.bf16.mxu0 %v12287_v38  ;;  %6770 = vmatprep.subr.bf16.mxu1 %v12289_v46  ;;  %v12403_v46 = vld [vmem:[#allocation13 + $0x144] ss:$16 sps:$4 sm:$0xff]   ;;  %v12406_v38 = vld [vmem:[#allocation13 + $0x14c] ss:$16 sps:$4 sm:$0xff]  }
 0x7c0   : > { %13456 = vst [vmem:[#allocation57_spill] sm:$0xff] %v12403_v46  ;;  %13457 = vst [vmem:[#allocation58_spill] sm:$0xff] %v12406_v38 }
 0x7c2   : > { %6730 = vmatpush1.bf16.msra.mxu0 %v12291_v34  ;;  %6771 = vmatpush1.bf16.msra.mxu1 %v12293_v26  ;;  %v12315_v26 = vld [vmem:[#allocation13 + $0x40] ss:$16 sps:$4 sm:$0xff]   ;;  %v12317_v34 = vld [vmem:[#allocation13 + $0x48] ss:$16 sps:$4 sm:$0xff]  }
 0x7c3   : > { %6731 = vmatprep.subr.bf16.mxu0 %v12299_v25  ;;  %6772 = vmatprep.subr.bf16.mxu1 %v12301_v0  ;;  %13426 = vst [vmem:[#allocation87_spill] sm:$0xff] %v12315_v26  ;;  %13427 = vst [vmem:[#allocation28_spill] sm:$0xff] %v12317_v34  ;;  %v12323_v0 = vld [vmem:[#allocation13 + $0x24] ss:$16 sps:$4 sm:$0xff]   ;;  %v12329_v25 = vld [vmem:[#allocation13 + $0x28] ss:$16 sps:$4 sm:$0xff]  }
 0x7c4   : > { %13428 = vst [vmem:[#allocation29_spill] sm:$0xff] %v12323_v0  ;;  %13431 = vst [vmem:[#allocation32_spill] sm:$0xff] %v12329_v25 }
 0x7c6   : > { %6732 = vmatpush1.bf16.msra.mxu0 %v12303_v51  ;;  %6773 = vmatpush1.bf16.msra.mxu1 %v12305_v61  ;;  %v12325_v51 = vld [vmem:[#allocation13 + $0x2c] ss:$16 sps:$4 sm:$0xff]   ;;  %v12327_v61 = vld [vmem:[#allocation13 + $0x20] ss:$16 sps:$4 sm:$0xff]  }
 0x7c7   : > { %6733 = vmatprep.subr.bf16.mxu0 %v12311_v41  ;;  %6774 = vmatprep.subr.bf16.mxu1 %v12313_v47  ;;  %13429 = vst [vmem:[#allocation30_spill] sm:$0xff] %v12325_v51  ;;  %13430 = vst [vmem:[#allocation31_spill] sm:$0xff] %v12327_v61  ;;  %v12335_v47 = vld [vmem:[#allocation13 + $0x4] ss:$16 sps:$4 sm:$0xff]   ;;  %v12341_v41 = vld [vmem:[#allocation13 + $0x8] ss:$16 sps:$4 sm:$0xff]  }
 0x7c8   : > { %13432 = vst [vmem:[#allocation33_spill] sm:$0xff] %v12335_v47  ;;  %13435 = vst [vmem:[#allocation36_spill] sm:$0xff] %v12341_v41 }
 0x7ca   : > { %6734 = vmatpush1.bf16.msra.mxu0 %v12315_v26  ;;  %6775 = vmatpush1.bf16.msra.mxu1 %v12317_v34  ;;  %v12337_v26 = vld [vmem:[#allocation13 + $0xc] ss:$16 sps:$4 sm:$0xff]   ;;  %v12339_v34 = vld [vmem:[#allocation13] ss:$16 sps:$4 sm:$0xff]  }
 0x7cb   : > { %6735 = vmatprep.subr.bf16.mxu0 %v12323_v0  ;;  %6776 = vmatprep.subr.bf16.mxu1 %v12325_v51  ;;  %13433 = vst [vmem:[#allocation34_spill] sm:$0xff] %v12337_v26  ;;  %13434 = vst [vmem:[#allocation35_spill] sm:$0xff] %v12339_v34  ;;  %v12347_v51 = vld [vmem:[#allocation13 + $0x1e4] ss:$16 sps:$4 sm:$0xff]   ;;  %v12353_v0 = vld [vmem:[#allocation13 + $0x1e8] ss:$16 sps:$4 sm:$0xff]  }
 0x7cc   : > { %13436 = vst [vmem:[#allocation37_spill] sm:$0xff] %v12347_v51  ;;  %13439 = vst [vmem:[#allocation40_spill] sm:$0xff] %v12353_v0 }
 0x7ce   : > { %6736 = vmatpush1.bf16.msra.mxu0 %v12327_v61  ;;  %6777 = vmatpush1.bf16.msra.mxu1 %v12329_v25  ;;  %v12349_v61 = vld [vmem:[#allocation13 + $0x1ec] ss:$16 sps:$4 sm:$0xff]   ;;  %v12351_v25 = vld [vmem:[#allocation13 + $0x1e0] ss:$16 sps:$4 sm:$0xff]  }
 0x7cf   : > { %6737 = vmatprep.subr.bf16.mxu0 %v12335_v47  ;;  %6778 = vmatprep.subr.bf16.mxu1 %v12337_v26  ;;  %13437 = vst [vmem:[#allocation38_spill] sm:$0xff] %v12349_v61  ;;  %13438 = vst [vmem:[#allocation39_spill] sm:$0xff] %v12351_v25  ;;  %v12359_v26 = vld [vmem:[#allocation13 + $0x1c4] ss:$16 sps:$4 sm:$0xff]   ;;  %v12365_v47 = vld [vmem:[#allocation13 + $0x1c8] ss:$16 sps:$4 sm:$0xff]  }
 0x7d0   : > { %13440 = vst [vmem:[#allocation41_spill] sm:$0xff] %v12359_v26  ;;  %13443 = vst [vmem:[#allocation44_spill] sm:$0xff] %v12365_v47 }
 0x7d2   : > { %6738 = vmatpush1.bf16.msra.mxu0 %v12339_v34  ;;  %6779 = vmatpush1.bf16.msra.mxu1 %v12341_v41  ;;  %v12361_v34 = vld [vmem:[#allocation13 + $0x1cc] ss:$16 sps:$4 sm:$0xff]   ;;  %v12363_v41 = vld [vmem:[#allocation13 + $0x1c0] ss:$16 sps:$4 sm:$0xff]  }
 0x7d3   : > { %6739 = vmatprep.subr.bf16.mxu0 %v12347_v51  ;;  %6780 = vmatprep.subr.bf16.mxu1 %v12349_v61  ;;  %13441 = vst [vmem:[#allocation42_spill] sm:$0xff] %v12361_v34  ;;  %13442 = vst [vmem:[#allocation43_spill] sm:$0xff] %v12363_v41  ;;  %v12371_v61 = vld [vmem:[#allocation13 + $0x1a4] ss:$16 sps:$4 sm:$0xff]   ;;  %v12377_v51 = vld [vmem:[#allocation13 + $0x1a8] ss:$16 sps:$4 sm:$0xff]  }
 0x7d4   : > { %13444 = vst [vmem:[#allocation45_spill] sm:$0xff] %v12371_v61  ;;  %13447 = vst [vmem:[#allocation48_spill] sm:$0xff] %v12377_v51 }
 0x7d6   : > { %6740 = vmatpush2.bf16.msra.mxu0 %v12351_v25  ;;  %6781 = vmatpush2.bf16.msra.mxu1 %v12353_v0  ;;  %v12373_v25 = vld [vmem:[#allocation13 + $0x1ac] ss:$16 sps:$4 sm:$0xff]   ;;  %v12375_v0 = vld [vmem:[#allocation13 + $0x1a0] ss:$16 sps:$4 sm:$0xff]  }
 0x7d7   : > { %6741 = vmatprep.subr.bf16.mxu0 %v12359_v26  ;;  %6782 = vmatprep.subr.bf16.mxu1 %v12361_v34  ;;  %13445 = vst [vmem:[#allocation46_spill] sm:$0xff] %v12373_v25  ;;  %13446 = vst [vmem:[#allocation47_spill] sm:$0xff] %v12375_v0  ;;  %v12383_v34 = vld [vmem:[#allocation13 + $0x184] ss:$16 sps:$4 sm:$0xff]   ;;  %v12389_v26 = vld [vmem:[#allocation13 + $0x188] ss:$16 sps:$4 sm:$0xff]  }
 0x7d8   : > { %13448 = vst [vmem:[#allocation49_spill] sm:$0xff] %v12383_v34  ;;  %13451 = vst [vmem:[#allocation51_spill] sm:$0xff] %v12389_v26 }
 0x7da   : > { %6742 = vmatpush2.bf16.msra.mxu0 %v12363_v41  ;;  %6783 = vmatpush2.bf16.msra.mxu1 %v12365_v47  ;;  %v12385_v41 = vld [vmem:[#allocation13 + $0x18c] ss:$16 sps:$4 sm:$0xff]   ;;  %v12387_v47 = vld [vmem:[#allocation13 + $0x180] ss:$16 sps:$4 sm:$0xff]  }
 0x7db   : > { %6743 = vmatprep.subr.bf16.mxu0 %v12371_v61  ;;  %6784 = vmatprep.subr.bf16.mxu1 %v12373_v25  ;;  %13449 = vst [vmem:[#allocation52_spill] sm:$0xff] %v12385_v41  ;;  %13450 = vst [vmem:[#allocation50_spill] sm:$0xff] %v12387_v47  ;;  %v12395_v25 = vld [vmem:[#allocation13 + $0x160] ss:$16 sps:$4 sm:$0xff]   ;;  %v12401_v61 = vld [vmem:[#allocation13 + $0x16c] ss:$16 sps:$4 sm:$0xff]  }
 0x7dc   : > { %13452 = vst [vmem:[#allocation53_spill] sm:$0xff] %v12395_v25  ;;  %13455 = vst [vmem:[#allocation56_spill] sm:$0xff] %v12401_v61 }
 0x7de   : > { %6744 = vmatpush2.bf16.msra.mxu0 %v12375_v0  ;;  %6785 = vmatpush2.bf16.msra.mxu1 %v12377_v51  ;;  %v12397_v0 = vld [vmem:[#allocation13 + $0x164] ss:$16 sps:$4 sm:$0xff]   ;;  %v12399_v51 = vld [vmem:[#allocation13 + $0x168] ss:$16 sps:$4 sm:$0xff]  }
 0x7df   : > { %6745 = vmatprep.subr.bf16.mxu0 %v12383_v34  ;;  %6786 = vmatprep.subr.bf16.mxu1 %v12385_v41  ;;  %13453 = vst [vmem:[#allocation54_spill] sm:$0xff] %v12397_v0  ;;  %13454 = vst [vmem:[#allocation55_spill] sm:$0xff] %v12399_v51  ;;  %v12417_v41 = vld [vmem:[#allocation13 + $0x124] ss:$16 sps:$4 sm:$0xff]   ;;  %v12419_v34 = vld [vmem:[#allocation13 + $0x12c] ss:$16 sps:$4 sm:$0xff]  }
 0x7e0   : > { %13460 = vst [vmem:[#allocation61_spill] sm:$0xff] %v12417_v41  ;;  %13461 = vst [vmem:[#allocation62_spill] sm:$0xff] %v12419_v34 }
 0x7e2   : > { %6746 = vmatpush2.bf16.msra.mxu0 %v12387_v47  ;;  %6787 = vmatpush2.bf16.msra.mxu1 %v12389_v26  ;;  %v12411_v26 = vld [vmem:[#allocation13 + $0x140] ss:$16 sps:$4 sm:$0xff]   ;;  %v12413_v47 = vld [vmem:[#allocation13 + $0x148] ss:$16 sps:$4 sm:$0xff]  }
 0x7e3   : > { %6747 = vmatprep.subr.bf16.mxu0 %v12397_v0  ;;  %6788 = vmatprep.subr.bf16.mxu1 %v12401_v61  ;;  %13458 = vst [vmem:[#allocation59_spill] sm:$0xff] %v12411_v26  ;;  %13459 = vst [vmem:[#allocation60_spill] sm:$0xff] %v12413_v47  ;;  %v12423_v61 = vld [vmem:[#allocation13 + $0x120] ss:$16 sps:$4 sm:$0xff]  }
 0x7e4   : > { %13462 = vst [vmem:[#allocation63_spill] sm:$0xff] %v12423_v61 }
 0x7e6   : > { %6748 = vmatpush2.bf16.msra.mxu0 %v12395_v25  ;;  %6789 = vmatpush2.bf16.msra.mxu1 %v12399_v51  ;;  %v12425_v25 = vld [vmem:[#allocation13 + $0x128] ss:$16 sps:$4 sm:$0xff]   ;;  %v12429_v51 = vld [vmem:[#allocation13 + $0x104] ss:$16 sps:$4 sm:$0xff]  }
 0x7e7   : > { %6749 = vmatprep.subr.bf16.mxu0 %v12403_v46  ;;  %6790 = vmatprep.subr.bf16.mxu1 %v12406_v38  ;;  %13463 = vst [vmem:[#allocation64_spill] sm:$0xff] %v12425_v25  ;;  %13464 = vst [vmem:[#allocation65_spill] sm:$0xff] %v12429_v51  ;;  %v12431_v46 = vld [vmem:[#allocation13 + $0x10c] ss:$16 sps:$4 sm:$0xff]   ;;  %v12435_v38 = vld [vmem:[#allocation13 + $0x100] ss:$16 sps:$4 sm:$0xff]  }
 0x7e8   : > { %13465 = vst [vmem:[#allocation66_spill] sm:$0xff] %v12431_v46  ;;  %13466 = vst [vmem:[#allocation68_spill] sm:$0xff] %v12435_v38 }
 0x7ea   : > { %6750 = vmatpush2.bf16.msra.mxu0 %v12411_v26  ;;  %6791 = vmatpush2.bf16.msra.mxu1 %v12413_v47  ;;  %v12437_v26 = vld [vmem:[#allocation13 + $0x108] ss:$16 sps:$4 sm:$0xff]  }
 0x7eb   : > { %6751 = vmatprep.subr.bf16.mxu0 %v12417_v41  ;;  %6792 = vmatprep.subr.bf16.mxu1 %v12419_v34  ;;  %13467 = vst [vmem:[#allocation70_spill] sm:$0xff] %v12437_v26 }
 0x7ee   : > { %6752 = vmatpush2.bf16.msra.mxu0 %v12423_v61  ;;  %6793 = vmatpush2.bf16.msra.mxu1 %v12425_v25  ;;  %v5544_v25 = vld [vmem:[%s12710_s6] sm:$0xf] }
 0x7ef   : > { %6753 = vmatprep.subr.bf16.mxu0 %v12429_v51  ;;  %6794 = vmatprep.subr.bf16.mxu1 %v12431_v46  ;;  %v5549_v61 = vrot.slane %v5544_v25, %v13402_v31  ;;  %v5553_v34 = vrot.slane %v5544_v25, %v13403_v33  ;;  %v5561_v24 = vrot.slane %v5544_v25, %v13141_v32 }
 0x7f0   : > { %v5557_v31 = vrot.slane %v5544_v25, %v13404_v40 }
 0x7f2   : > { %6754 = vmatpush2.bf16.msra.mxu0 %v12435_v38  ;;  %6795 = vmatpush2.bf16.msra.mxu1 %v12437_v26 }
 0x7f3   : > { %7035 = vmatprep.subr.bf16.mxu0 %v12105_v7  ;;  %7076 = vmatprep.subr.bf16.mxu1 %v12107_v8 }
 0x855   : > { %v5920_v41 = vpop.f32.mrf.mxu0  ;;  %v5961_v51 = vpop.f32.mrf.mxu1 }
 0x856   : > { %v5921_v47 = vadd.f32 %v5920_v41, %v5549_v61  ;;  %v5962_v17 = vadd.f32 %v5961_v51, %v5557_v31 }
 0x857   : > { %v5922_v46 = vpop.f32.mrf.mxu0  ;;  %v5963_v0 = vpop.f32.mrf.mxu1 }
 0x858   : > { %v8797_v38 = vmul.f32 -1.442695, %v5921_v47  ;;  %v5923_v20 = vadd.f32 %v5922_v46, %v5553_v34  ;;  %v5964_v27 = vadd.f32 %v5963_v0, %v5561_v24 }
 0x859   : > { %v5924_v26 = vpop.f32.mrf.mxu0  ;;  %v5965_v44 = vpop.f32.mrf.mxu1 }
 0x85a   : > { %10045 = vpow2.f32 %v8797_v38  ;;  %v8798_v7 = vmul.f32 -1.442695, %v5923_v20  ;;  %v8799_v33 = vmul.f32 -1.442695, %v5964_v27  ;;  %v13469_v27 = vld [vmem:[#allocation104_spill] sm:$0xff] }
 0x85b   : > { %v5925_v8 = vpop.f32.mrf.mxu0  ;;  %v5966_v22 = vpop.f32.mrf.mxu1 }
 0x85c   : > { %10047 = vpow2.f32 %v8798_v7  ;;  %v13468_v22 = vld [vmem:[#allocation102_spill] sm:$0xff] }
 0x85d   : > { %10049 = vpow2.f32 %v8799_v33 }
 0x867   : > { %v10046_v1 = vpop.eup %10045 }
 0x868   : > { %v5971_v61 = vadd.f32 1.0, %v10046_v1 }
 0x869   : > { %v10048_v41 = vpop.eup %10047 }
 0x86a   : > { %10051 = vrcp.f32 %v5971_v61  ;;  %v5977_v46 = vadd.f32 1.0, %v10048_v41  ;;  %v10050_v38 = vpop.eup %10049 }
 0x86b   : > { %10053 = vtanh.f32 %v5962_v17  ;;  %v5984_v1 = vadd.f32 1.0, %v10050_v38 }
 0x86c   : > { %10055 = vrcp.f32 %v5977_v46 }
 0x875   : > { %v6232_v44 = vpop.f32.mrf.mxu0  ;;  %v6273_v20 = vpop.f32.mrf.mxu1 }
 0x876   : > { %v6280_v34 = vadd.f32 %v6232_v44, %v13468_v22  ;;  %v13470_v22 = vld [vmem:[#allocation105_spill] sm:$0xff] }
 0x877   : > { %v10052_v26 = vpop.eup %10051  ;;  %v6234_v47 = vpop.f32.mrf.mxu0 }
 0x878   : > { %v6275_v24 = vpop.f32.mrf.mxu1  ;;  %v10054_v0 = vpop.eup %10053  ;;  %v8832_v25 = vmul.f32 -1.442695, %v6280_v34  ;;  %v6281_v7 = vadd.f32 %v6234_v47, %v13469_v27  ;;  %v13471_v34 = vld [vmem:[#allocation103_spill] sm:$0xff] }
 0x879   : > { %v10056_v31 = vpop.eup %10055  ;;  %v6236_v51 = vpop.f32.mrf.mxu0  ;;  %v5988_v8 = vmul.f32 %v10054_v0, %v10052_v26  ;;  %v6283_v38 = vadd.f32 %v6275_v24, %v13470_v22  ;;  %v6282_v47 = vadd.f32 %v6273_v20, %v13471_v34 }
 0x87a   : > { %v6277_v33 = vpop.f32.mrf.mxu1  ;;  %v5987_v17 = vmul.f32 %v10056_v31, %v12124_v62  ;;  %10057 = vpow2.f32 %v8832_v25  ;;  %v8833_v61 = vmul.f32 -1.442695, %v6281_v7  ;;  %v12471_v22 = vpop.permute.xlu1 %6310 }
 0x87b   : > { %v6237_v41 = vpop.f32.mrf.mxu0  ;;  %v8834_v26 = vmul.f32 -1.442695, %v6283_v38  ;;  %vm6312_vm10 = vcmp.eq.s32.totalorder %v12471_v22, 1 }
 0x87c   : > { %v6278_v46 = vpop.f32.mrf.mxu1  ;;  %v5989_v40 = vadd.f32 %v5988_v8, %v5987_v17  ;;  %10059 = vpow2.f32 %v8833_v61 }
 0x87d   : > { %10061 = vrcp.f32 %v5984_v1 }
 0x87e   : > { %10063 = vtanh.f32 %v5989_v40  ;;  %v12458_v44 = vsel %vm5475_vm9, %v5989_v40, %v12124_v62 }
 0x87f   : > { %10065 = vtanh.f32 %v6282_v47 }
 0x880   : > { %10067 = vpow2.f32 %v8834_v26 }
 0x887   : > { %v10058_v0 = vpop.eup %10057 }
 0x888   : > { %v6287_v27 = vadd.f32 1.0, %v10058_v0 }
 0x889   : > { %v10060_v25 = vpop.eup %10059 }
 0x88a   : > { %v10062_v7 = vpop.eup %10061  ;;  %10069 = vrcp.f32 %v6287_v27  ;;  %v6293_v31 = vadd.f32 1.0, %v10060_v25  ;;  %v13510_v25 = vld [vmem:[#allocation48_spill] sm:$0xff] }
 0x88b   : > { %v10064_v1 = vpop.eup %10063 }
 0x88c   : > { %10071 = vrcp.f32 %v6293_v31  ;;  %v5991_v51 = vmul.f32 %v10064_v1, %v10062_v7  ;;  %v10066_v33 = vpop.eup %10065  ;;  %v13511_v7 = vld [vmem:[#allocation49_spill] sm:$0xff]  ;;  %v13512_v31 = vld [vmem:[#allocation52_spill] sm:$0xff]  ;;  %v13513_v1 = vld [vmem:[#allocation50_spill] sm:$0xff] }
 0x88d   : > { %v10068_v8 = vpop.eup %10067 }
 0x88e   : > { %v12465_v40 = vsel %vm5475_vm9, %v5991_v51, %v12131_v21  ;;  %v5994_v62 = vsel %vm5475_vm9, %v5991_v51, 0.0  ;;  %v6300_v46 = vadd.f32 1.0, %v10068_v8  ;;  %v13514_v51 = vld [vmem:[#allocation51_spill] sm:$0xff]  ;;  %v13519_v8 = vld [vmem:[#allocation57_spill] sm:$0xff] }
 0x88f   : > { %v5995_v20 = vpack.c.bf16 %v5994_v62, %v5994_v62  ;;  %v6316_v24 = vpack.c.bf16 %v12465_v40, %v12465_v40  ;;  %v13515_v62 = vld [vmem:[#allocation54_spill] sm:$0xff] }
 0x890   : > { %10073 = vrcp.f32 %v6300_v46  ;;  %v13523_v46 = vld [vmem:[#allocation61_spill] sm:$0xff] }
 0x891   : > { %5997 = vst [vmem:[#allocation7 + $0x14] sm:$0xf] %v5995_v20  ;;  %6755 = vmatprep.mubr.bf16.mxu0 %v6316_v24  ;;  %6796 = vmatprep.mubr.bf16.mxu1 %v6316_v24  ;;  %v13516_v20 = vld [vmem:[#allocation56_spill] sm:$0xff]  ;;  %v13517_v24 = vld [vmem:[#allocation53_spill] sm:$0xff] }
 0x897   : > { %v10070_v17 = vpop.eup %10069 }
 0x898   : > { %v6304_v61 = vmul.f32 %v10070_v17, %v10066_v33  ;;  %v13518_v33 = vld [vmem:[#allocation55_spill] sm:$0xff]  ;;  %v13520_v17 = vld [vmem:[#allocation58_spill] sm:$0xff] }
 0x899   : > { %v10072_v41 = vpop.eup %10071 }
 0x89a   : > { %v6303_v21 = vmul.f32 %v10072_v41, %v12144_v36  ;;  %v13522_v41 = vld [vmem:[#allocation60_spill] sm:$0xff] }
 0x89c   : > { %v6305_v38 = vadd.f32 %v6304_v61, %v6303_v21  ;;  %v13521_v61 = vld [vmem:[#allocation59_spill] sm:$0xff]  ;;  %v13524_v21 = vld [vmem:[#allocation62_spill] sm:$0xff] }
 0x89d   : > { %v10074_v34 = vpop.eup %10073 }
 0x89e   : > { %10075 = vtanh.f32 %v6305_v38  ;;  %v12478_v35 = vsel %vm6312_vm10, %v6305_v38, %v12144_v36  ;;  %v13473_v36 = vld [vmem:[#allocation85_spill] sm:$0xff]  ;;  %v13525_v38 = vld [vmem:[#allocation63_spill] sm:$0xff] }
 0x8ab   : > { %v10076_v47 = vpop.eup %10075 }
 0x8ac   : > { %v6307_v26 = vmul.f32 %v10076_v47, %v10074_v34  ;;  %v13526_v34 = vld [vmem:[#allocation64_spill] sm:$0xff]  ;;  %v13527_v47 = vld [vmem:[#allocation65_spill] sm:$0xff] }
 0x8ae   : > { %v12483_v0 = vsel %vm6312_vm10, %v6307_v26, %v12153_v30  ;;  %v13476_v30 = vld [vmem:[#allocation110_spill] sm:$0xff] }
 0x8af   : > { %v6315_v27 = vpack.c.bf16 %v12483_v0, %v12483_v0  ;;  %v13528_v26 = vld [vmem:[#allocation66_spill] sm:$0xff] }
 0x8b1   : > { %6756 = vmatmul.mubr.bf16.vlgmr.msra.gmra.mxu0 %v6315_v27  ;;  %6797 = vmatmul.mubr.bf16.vlgmr.msra.gmra.mxu1 %v6315_v27 }
 0x8b2   : > { %7036 = vmatpush1.bf16.msra.mxu0 %v12146_v45  ;;  %7077 = vmatpush1.bf16.msra.mxu1 %v12148_v29  ;;  %v13474_v45 = vld [vmem:[#allocation83_spill] sm:$0xff]  ;;  %v13475_v29 = vld [vmem:[#allocation81_spill] sm:$0xff] }
 0x8b3   : > { %7037 = vmatprep.subr.bf16.mxu0 %v12159_v50  ;;  %7078 = vmatprep.subr.bf16.mxu1 %v12161_v10  ;;  %v13477_v50 = vld [vmem:[#allocation111_spill] sm:$0xff]  ;;  %v13478_v10 = vld [vmem:[#allocation90_spill] sm:$0xff] }
 0x8b4   : > { %7067 = vmatprep.mubr.bf16.mxu0 %v13057_v5  ;;  %7108 = vmatprep.mubr.bf16.mxu1 %v13057_v5  ;;  %v13472_v5 = vld [vmem:[#allocation84_spill] sm:$0xff] }
 0x8b6   : > { %7038 = vmatpush1.bf16.msra.mxu0 %v12167_v53  ;;  %7079 = vmatpush1.bf16.msra.mxu1 %v12169_v9  ;;  %v13479_v53 = vld [vmem:[#allocation92_spill] sm:$0xff]  ;;  %v13480_v9 = vld [vmem:[#allocation93_spill] sm:$0xff] }
 0x8b7   : > { %7039 = vmatprep.subr.bf16.mxu0 %v12173_v55  ;;  %7080 = vmatprep.subr.bf16.mxu1 %v12175_v56  ;;  %v13481_v55 = vld [vmem:[#allocation91_spill] sm:$0xff]  ;;  %v13482_v56 = vld [vmem:[#allocation94_spill] sm:$0xff] }
 0x8ba   : > { %7040 = vmatpush1.bf16.msra.mxu0 %v12181_v57  ;;  %7081 = vmatpush1.bf16.msra.mxu1 %v12183_v2  ;;  %v13483_v57 = vld [vmem:[#allocation96_spill] sm:$0xff]  ;;  %v13484_v2 = vld [vmem:[#allocation97_spill] sm:$0xff] }
 0x8bb   : > { %7041 = vmatprep.subr.bf16.mxu0 %v12187_v48  ;;  %7082 = vmatprep.subr.bf16.mxu1 %v12189_v52  ;;  %v13485_v48 = vld [vmem:[#allocation95_spill] sm:$0xff]  ;;  %v13486_v52 = vld [vmem:[#allocation86_spill] sm:$0xff] }
 0x8be   : > { %7042 = vmatpush1.bf16.msra.mxu0 %v12193_v59  ;;  %7083 = vmatpush1.bf16.msra.mxu1 %v12195_v6  ;;  %v13487_v59 = vld [vmem:[#allocation88_spill] sm:$0xff]  ;;  %v13488_v6 = vld [vmem:[#allocation89_spill] sm:$0xff] }
 0x8bf   : > { %7043 = vmatprep.subr.bf16.mxu0 %v12199_v23  ;;  %7084 = vmatprep.subr.bf16.mxu1 %v12201_v19  ;;  %v13489_v23 = vld [vmem:[#allocation87_spill] sm:$0xff]  ;;  %v13490_v19 = vld [vmem:[#allocation28_spill] sm:$0xff] }
 0x8c2   : > { %7044 = vmatpush1.bf16.msra.mxu0 %v12205_v4  ;;  %7085 = vmatpush1.bf16.msra.mxu1 %v12207_v54  ;;  %v13491_v4 = vld [vmem:[#allocation29_spill] sm:$0xff]  ;;  %v13492_v54 = vld [vmem:[#allocation30_spill] sm:$0xff] }
 0x8c3   : > { %7045 = vmatprep.subr.bf16.mxu0 %v12211_v49  ;;  %7086 = vmatprep.subr.bf16.mxu1 %v12213_v58  ;;  %v13493_v49 = vld [vmem:[#allocation31_spill] sm:$0xff]  ;;  %v13494_v58 = vld [vmem:[#allocation32_spill] sm:$0xff] }
 0x8c6   : > { %7046 = vmatpush1.bf16.msra.mxu0 %v12217_v28  ;;  %7087 = vmatpush1.bf16.msra.mxu1 %v12219_v13  ;;  %v13495_v28 = vld [vmem:[#allocation33_spill] sm:$0xff]  ;;  %v13496_v13 = vld [vmem:[#allocation34_spill] sm:$0xff] }
 0x8c7   : > { %7047 = vmatprep.subr.bf16.mxu0 %v12223_v12  ;;  %7088 = vmatprep.subr.bf16.mxu1 %v12225_v14  ;;  %v13497_v12 = vld [vmem:[#allocation35_spill] sm:$0xff]  ;;  %v13498_v14 = vld [vmem:[#allocation36_spill] sm:$0xff] }
 0x8ca   : > { %7048 = vmatpush1.bf16.msra.mxu0 %v12229_v11  ;;  %7089 = vmatpush1.bf16.msra.mxu1 %v12231_v15  ;;  %v13499_v11 = vld [vmem:[#allocation37_spill] sm:$0xff]  ;;  %v13500_v15 = vld [vmem:[#allocation38_spill] sm:$0xff] }
 0x8cb   : > { %7049 = vmatprep.subr.bf16.mxu0 %v12235_v3  ;;  %7090 = vmatprep.subr.bf16.mxu1 %v12237_v60  ;;  %v13501_v3 = vld [vmem:[#allocation39_spill] sm:$0xff]  ;;  %v13502_v60 = vld [vmem:[#allocation40_spill] sm:$0xff] }
 0x8ce   : > { %7050 = vmatpush1.bf16.msra.mxu0 %v12241_v18  ;;  %7091 = vmatpush1.bf16.msra.mxu1 %v12243_v63  ;;  %v13503_v18 = vld [vmem:[#allocation41_spill] sm:$0xff]  ;;  %v13504_v63 = vld [vmem:[#allocation42_spill] sm:$0xff] }
 0x8cf   : > { %7560 = vmatprep.subr.bf16.mxu0 %v12251_v16  ;;  %7601 = vmatprep.subr.bf16.mxu1 %v12253_v39  ;;  %v13505_v16 = vld [vmem:[#allocation43_spill] sm:$0xff]  ;;  %v13506_v39 = vld [vmem:[#allocation44_spill] sm:$0xff] }
 0x8d1   : > { %7068 = vmatmul.mubr.bf16.vlgmr.msra.gmra.mxu0 %v6315_v27  ;;  %7109 = vmatmul.mubr.bf16.vlgmr.msra.gmra.mxu1 %v6315_v27  ;;  %v13529_v27 = vld [vmem:[#allocation68_spill] sm:$0xff] }
 0x8d2   : > { %7561 = vmatpush1.bf16.msra.mxu0 %v12255_v43  ;;  %7602 = vmatpush1.bf16.msra.mxu1 %v12257_v42  ;;  %v13507_v43 = vld [vmem:[#allocation45_spill] sm:$0xff]  ;;  %v13508_v42 = vld [vmem:[#allocation46_spill] sm:$0xff] }
 0x8d3   : > { %7562 = vmatprep.subr.bf16.mxu0 %v12263_v37  ;;  %7603 = vmatprep.subr.bf16.mxu1 %v13472_v5  ;;  %v13509_v37 = vld [vmem:[#allocation47_spill] sm:$0xff]  ;;  %v13530_v5 = vld [vmem:[#allocation70_spill] sm:$0xff] }
 0x8d6   : > { %7563 = vmatpush1.bf16.msra.mxu0 %v13473_v36  ;;  %7604 = vmatpush1.bf16.msra.mxu1 %v13474_v45  ;;  %v12583_v36 = vld [vmem:[#allocation14 + $0x38] sm:$0xff]   ;;  %v6381_v45 = vld [vmem:[%s12710_s6] sm:$0xf] }
 0x8d7   : > { %7564 = vmatprep.subr.bf16.mxu0 %v13475_v29  ;;  %7605 = vmatprep.subr.bf16.mxu1 %v13476_v30  ;;  %v13531_v29 = vld [vmem:[#allocation24_spill] sm:$0xff] }
 0x8d8   : > { %v6386_v30 = vrot.slane %v6381_v45, %v13531_v29 }
 0x8da   : > { %7565 = vmatpush1.bf16.msra.mxu0 %v13477_v50  ;;  %7606 = vmatpush1.bf16.msra.mxu1 %v13478_v10  ;;  %v13532_v50 = vld [vmem:[#allocation26_spill] sm:$0xff] }
 0x8db   : > { %7566 = vmatprep.subr.bf16.mxu0 %v13479_v53  ;;  %7607 = vmatprep.subr.bf16.mxu1 %v13480_v9  ;;  %v6390_v10 = vrot.slane %v6381_v45, %v13532_v50 }
 0x8de   : > { %7567 = vmatpush1.bf16.msra.mxu0 %v13481_v55  ;;  %7608 = vmatpush1.bf16.msra.mxu1 %v13482_v56 }
 0x8df   : > { %7568 = vmatprep.subr.bf16.mxu0 %v13483_v57  ;;  %7609 = vmatprep.subr.bf16.mxu1 %v13484_v2 }
 0x8e2   : > { %7569 = vmatpush1.bf16.msra.mxu0 %v13485_v48  ;;  %7610 = vmatpush1.bf16.msra.mxu1 %v13486_v52 }
 0x8e3   : > { %7570 = vmatprep.subr.bf16.mxu0 %v13487_v59  ;;  %7611 = vmatprep.subr.bf16.mxu1 %v13488_v6 }
 0x8e6   : > { %7571 = vmatpush1.bf16.msra.mxu0 %v13489_v23  ;;  %7612 = vmatpush1.bf16.msra.mxu1 %v13490_v19 }
 0x8e7   : > { %7572 = vmatprep.subr.bf16.mxu0 %v13491_v4  ;;  %7613 = vmatprep.subr.bf16.mxu1 %v13492_v54  ;;  %v6398_v4 = vrot.slane %v6381_v45, %v13141_v32 }
 0x8ea   : > { %7573 = vmatpush1.bf16.msra.mxu0 %v13493_v49  ;;  %7614 = vmatpush1.bf16.msra.mxu1 %v13494_v58  ;;  %v13533_v49 = vld [vmem:[#allocation25_spill] sm:$0xff] }
 0x8eb   : > { %7574 = vmatprep.subr.bf16.mxu0 %v13495_v28  ;;  %7615 = vmatprep.subr.bf16.mxu1 %v13496_v13  ;;  %v6394_v58 = vrot.slane %v6381_v45, %v13533_v49 }
 0x8ee   : > { %7575 = vmatpush1.bf16.msra.mxu0 %v13497_v12  ;;  %7616 = vmatpush1.bf16.msra.mxu1 %v13498_v14 }
 0x8ef   : > { %7576 = vmatprep.subr.bf16.mxu0 %v13499_v11  ;;  %7617 = vmatprep.subr.bf16.mxu1 %v13500_v15 }
 0x8f2   : > { %7577 = vmatpush2.bf16.msra.mxu0 %v13501_v3  ;;  %7618 = vmatpush2.bf16.msra.mxu1 %v13502_v60 }
 0x8f3   : > { %7578 = vmatprep.subr.bf16.mxu0 %v13503_v18  ;;  %7619 = vmatprep.subr.bf16.mxu1 %v13504_v63  ;;  %v13534_v63 = vld [vmem:[#allocation106_spill] sm:$0xff] }
 0x8f6   : > { %7579 = vmatpush2.bf16.msra.mxu0 %v13505_v16  ;;  %7620 = vmatpush2.bf16.msra.mxu1 %v13506_v39 }
 0x8f7   : > { %7580 = vmatprep.subr.bf16.mxu0 %v13507_v43  ;;  %7621 = vmatprep.subr.bf16.mxu1 %v13508_v42 }
 0x8fa   : > { %7581 = vmatpush2.bf16.msra.mxu0 %v13509_v37  ;;  %7622 = vmatpush2.bf16.msra.mxu1 %v13510_v25 }
 0x8fb   : > { %7582 = vmatprep.subr.bf16.mxu0 %v13511_v7  ;;  %7623 = vmatprep.subr.bf16.mxu1 %v13512_v31  ;;  %v13535_v7 = vld [vmem:[#allocation108_spill] sm:$0xff] }
 0x8fe   : > { %7583 = vmatpush2.bf16.msra.mxu0 %v13513_v1  ;;  %7624 = vmatpush2.bf16.msra.mxu1 %v13514_v51 }
 0x8ff   : > { %7584 = vmatprep.subr.bf16.mxu0 %v13515_v62  ;;  %7625 = vmatprep.subr.bf16.mxu1 %v13516_v20 }
 0x902   : > { %7585 = vmatpush2.bf16.msra.mxu0 %v13517_v24  ;;  %7626 = vmatpush2.bf16.msra.mxu1 %v13518_v33 }
 0x903   : > { %7586 = vmatprep.subr.bf16.mxu0 %v13519_v8  ;;  %7627 = vmatprep.subr.bf16.mxu1 %v13520_v17 }
 0x906   : > { %7587 = vmatpush2.bf16.msra.mxu0 %v13521_v61  ;;  %7628 = vmatpush2.bf16.msra.mxu1 %v13522_v41 }
 0x907   : > { %7588 = vmatprep.subr.bf16.mxu0 %v13523_v46  ;;  %7629 = vmatprep.subr.bf16.mxu1 %v13524_v21  ;;  %v13536_v21 = vld [vmem:[#allocation109_spill] sm:$0xff] }
 0x90a   : > { %7589 = vmatpush2.bf16.msra.mxu0 %v13525_v38  ;;  %7630 = vmatpush2.bf16.msra.mxu1 %v13526_v34  ;;  %v13537_v34 = vld [vmem:[#allocation107_spill] sm:$0xff] }
 0x90b   : > { %7590 = vmatprep.subr.bf16.mxu0 %v13527_v47  ;;  %7631 = vmatprep.subr.bf16.mxu1 %v13528_v26 }
 0x90e   : > { %7591 = vmatpush2.bf16.msra.mxu0 %v13529_v27  ;;  %7632 = vmatpush2.bf16.msra.mxu1 %v13530_v5 }
 0x90f   : > { %9076 = vmatprep.subr.bf16.mxu0 %v12583_v36 }
 0x971   : > { %v6757_v53 = vpop.f32.mrf.mxu0  ;;  %v6798_v9 = vpop.f32.mrf.mxu1 }
 0x972   : > { %v6758_v55 = vadd.f32 %v6757_v53, %v6386_v30  ;;  %v6799_v12 = vadd.f32 %v6798_v9, %v6394_v58 }
 0x973   : > { %v6759_v56 = vpop.f32.mrf.mxu0  ;;  %v6800_v57 = vpop.f32.mrf.mxu1 }
 0x974   : > { %v8899_v2 = vmul.f32 -1.442695, %v6758_v55  ;;  %v6760_v48 = vadd.f32 %v6759_v56, %v6390_v10  ;;  %v6801_v54 = vadd.f32 %v6800_v57, %v6398_v4 }
 0x975   : > { %v6761_v52 = vpop.f32.mrf.mxu0  ;;  %v6802_v59 = vpop.f32.mrf.mxu1 }
 0x976   : > { %10077 = vpow2.f32 %v8899_v2  ;;  %v8900_v6 = vmul.f32 -1.442695, %v6760_v48  ;;  %v8901_v28 = vmul.f32 -1.442695, %v6801_v54 }
 0x977   : > { %v6762_v23 = vpop.f32.mrf.mxu0  ;;  %v6803_v19 = vpop.f32.mrf.mxu1 }
 0x978   : > { %10079 = vpow2.f32 %v8900_v6  ;;  %v12612_v19 = vpop.permute.xlu0 %7147 }
 0x979   : > { %10081 = vpow2.f32 %v8901_v28  ;;  %vm7149_vm11 = vcmp.eq.s32.totalorder %v12612_v19, 1 }
 0x983   : > { %v10078_v13 = vpop.eup %10077 }
 0x984   : > { %v6808_v14 = vadd.f32 1.0, %v10078_v13 }
 0x985   : > { %v10080_v11 = vpop.eup %10079 }
 0x986   : > { %10083 = vrcp.f32 %v6808_v14  ;;  %v6814_v15 = vadd.f32 1.0, %v10080_v11  ;;  %v10082_v18 = vpop.eup %10081  ;;  %v9851_v14 = vld [vmem:[#allocation14 + $0x30] sm:$0xff]   ;;  %v9850_v11 = vld [vmem:[#allocation7] sm:$0xff]  }
 0x987   : > { %10085 = vtanh.f32 %v6799_v12  ;;  %v6821_v51 = vadd.f32 1.0, %v10082_v18  ;;  %v9857_v18 = vld [vmem:[#allocation14] sm:$0xff]  }
 0x988   : > { %10087 = vrcp.f32 %v6814_v15  ;;  %v9852_v15 = vld [vmem:[#allocation14 + $0x28] sm:$0xff]  }
 0x991   : > { %v7069_v3 = vpop.f32.mrf.mxu0  ;;  %v7110_v60 = vpop.f32.mrf.mxu1 }
 0x992   : > { %v7117_v16 = vadd.f32 %v7069_v3, %v13534_v63  ;;  %v7119_v47 = vadd.f32 %v7110_v60, %v13537_v34  ;;  %v9854_v3 = vld [vmem:[#allocation14 + $0x18] sm:$0xff]   ;;  %v9856_v60 = vld [vmem:[#allocation14 + $0x8] sm:$0xff]   ;;  %v9859_v63 = vld [vmem:[#allocation7 + $0x10] sm:$0xff]  }
 0x993   : > { %v10084_v39 = vpop.eup %10083  ;;  %v7071_v43 = vpop.f32.mrf.mxu0 }
 0x994   : > { %v7112_v42 = vpop.f32.mrf.mxu1  ;;  %v10086_v37 = vpop.eup %10085  ;;  %v8934_v25 = vmul.f32 -1.442695, %v7117_v16  ;;  %v7118_v31 = vadd.f32 %v7071_v43, %v13535_v7  ;;  %v9860_v16 = vld [vmem:[#allocation16 + $0x38] sm:$0xff]   ;;  %v9862_v43 = vld [vmem:[#allocation16 + $0x28] sm:$0xff]  }
 0x995   : > { %v10088_v1 = vpop.eup %10087  ;;  %v7073_v62 = vpop.f32.mrf.mxu0  ;;  %v6825_v24 = vmul.f32 %v10086_v37, %v10084_v39  ;;  %v7120_v38 = vadd.f32 %v7112_v42, %v13536_v21  ;;  %9100 = vmatprep.subr.bf16.mxu1 %v9860_v16  ;;  %v9861_v39 = vld [vmem:[#allocation16 + $0x30] sm:$0xff]   ;;  %v9863_v42 = vld [vmem:[#allocation16 + $0x20] sm:$0xff]   ;;  %v9864_v37 = vld [vmem:[#allocation16 + $0x18] sm:$0xff]  }
 0x996   : > { %v7114_v20 = vpop.f32.mrf.mxu1  ;;  %v6824_v33 = vmul.f32 %v10088_v1, %v12458_v44  ;;  %10089 = vpow2.f32 %v8934_v25  ;;  %v8935_v8 = vmul.f32 -1.442695, %v7118_v31  ;;  %v9865_v25 = vld [vmem:[#allocation16 + $0x10] sm:$0xff]   ;;  %v9866_v7 = vld [vmem:[#allocation16 + $0x8] sm:$0xff]   ;;  %v9867_v31 = vld [vmem:[#allocation16] sm:$0xff]  }
 0x997   : > { %v7074_v17 = vpop.f32.mrf.mxu0  ;;  %v8936_v26 = vmul.f32 -1.442695, %v7120_v38  ;;  %v7218_v1 = vld [vmem:[%s12710_s6] sm:$0xf] }
 0x998   : > { %v7115_v61 = vpop.f32.mrf.mxu1  ;;  %v6826_v41 = vadd.f32 %v6825_v24, %v6824_v33  ;;  %10091 = vpow2.f32 %v8935_v8  ;;  %v7227_v62 = vrot.slane %v7218_v1, %v13532_v50 }
 0x999   : > { %10093 = vrcp.f32 %v6821_v51  ;;  %v7223_v51 = vrot.slane %v7218_v1, %v13531_v29  ;;  %v7231_v29 = vrot.slane %v7218_v1, %v13533_v49 }
 0x99a   : > { %10095 = vtanh.f32 %v6826_v41  ;;  %v12599_v46 = vsel %vm6312_vm10, %v6826_v41, %v12458_v44 }
 0x99b   : > { %10097 = vtanh.f32 %v7119_v47 }
 0x99c   : > { %10099 = vpow2.f32 %v8936_v26 }
 0x9a3   : > { %v10090_v27 = vpop.eup %10089 }
 0x9a4   : > { %v7124_v5 = vadd.f32 1.0, %v10090_v27  ;;  %v7235_v27 = vrot.slane %v7218_v1, %v13141_v32  ;;  %v9004_v32 = vld [vmem:[%s12712_s8] ss:$0 sm:$0xff] }
 0x9a5   : > { %v10092_v45 = vpop.eup %10091 }
 0x9a6   : > { %v10094_v30 = vpop.eup %10093  ;;  %10101 = vrcp.f32 %v7124_v5  ;;  %v7130_v10 = vadd.f32 1.0, %v10092_v45 }
 0x9a7   : > { %v10096_v53 = vpop.eup %10095 }
 0x9a8   : > { %10103 = vrcp.f32 %v7130_v10  ;;  %v6828_v9 = vmul.f32 %v10096_v53, %v10094_v30  ;;  %v10098_v2 = vpop.eup %10097 }
 0x9a9   : > { %v10100_v48 = vpop.eup %10099 }
 0x9aa   : > { %v12606_v44 = vsel %vm6312_vm10, %v6828_v9, %v12465_v40  ;;  %v6831_v55 = vsel %vm6312_vm10, %v6828_v9, 0.0  ;;  %v7137_v23 = vadd.f32 1.0, %v10100_v48 }
 0x9ab   : > { %v6832_v56 = vpack.c.bf16 %v6831_v55, %v6831_v55  ;;  %v7153_v57 = vpack.c.bf16 %v12606_v44, %v12606_v44 }
 0x9ac   : > { %10105 = vrcp.f32 %v7137_v23 }
 0x9ad   : > { %6834 = vst [vmem:[#allocation7 + $0x18] sm:$0xf] %v6832_v56  ;;  %7592 = vmatprep.mubr.bf16.mxu0 %v7153_v57  ;;  %7633 = vmatprep.mubr.bf16.mxu1 %v7153_v57 }
 0x9b3   : > { %v10102_v52 = vpop.eup %10101 }
 0x9b4   : > { %v7141_v59 = vmul.f32 %v10102_v52, %v10098_v2 }
 0x9b5   : > { %v10104_v6 = vpop.eup %10103 }
 0x9b6   : > { %v7140_v40 = vmul.f32 %v10104_v6, %v12478_v35 }
 0x9b8   : > { %v7142_v4 = vadd.f32 %v7141_v59, %v7140_v40 }
 0x9b9   : > { %v10106_v54 = vpop.eup %10105 }
 0x9ba   : > { %10107 = vtanh.f32 %v7142_v4  ;;  %v7151_v22 = vsel %vm7149_vm11, %v7142_v4, %v12478_v35  ;;  %v9853_v35 = vld [vmem:[#allocation14 + $0x20] sm:$0xff]  }
 0x9bb   : > { %7673 = vst [vmem:[#allocation3] sm:$0xff] %v7151_v22 }
 0x9c7   : > { %v10108_v58 = vpop.eup %10107 }
 0x9c8   : > { %v7144_v28 = vmul.f32 %v10108_v58, %v10106_v54 }
 0x9ca   : > { %v7150_v13 = vsel %vm7149_vm11, %v7144_v28, %v12483_v0  ;;  %v9855_v0 = vld [vmem:[#allocation14 + $0x10] sm:$0xff]  }
 0x9cb   : > { %v7152_v12 = vpack.c.bf16 %v7150_v13, %v7150_v13  ;;  %7672 = vst [vmem:[#allocation2] sm:$0xff] %v7150_v13 }
 0x9cd   : > { %7593 = vmatmul.mubr.bf16.vlgmr.msra.gmra.mxu0 %v7152_v12  ;;  %7634 = vmatmul.mubr.bf16.vlgmr.msra.gmra.mxu1 %v7152_v12 }
 0x9ce   : > { %9077 = vmatpush3.bf16.msra.mxu0 %v12583_v36  ;;  %9092 = vmatprep.mubr.bf16.mxu0 %v9850_v11  ;;  %v9858_v36 = vld [vmem:[#allocation7 + $0x8] sm:$0xff]  }
 0x9cf   : > { %9078 = vmatprep.subr.bf16.mxu0 %v9851_v14  ;;  %9101 = vmatpush3.bf16.msra.mxu1 %v9860_v16 }
 0x9d0   : > { %9102 = vmatprep.subr.bf16.mxu1 %v9861_v39 }
 0x9d2   : > { %9079 = vmatpush3.bf16.msra.mxu0 %v9851_v14 }
 0x9d3   : > { %9080 = vmatprep.subr.bf16.mxu0 %v9852_v15  ;;  %9103 = vmatpush3.bf16.msra.mxu1 %v9861_v39  ;;  %v9017_v39 = vld [vmem:[%s12714_s10] ss:$0 sm:$0xff] }
 0x9d4   : > { %9104 = vmatprep.subr.bf16.mxu1 %v9862_v43 }
 0x9d6   : > { %9081 = vmatpush3.bf16.msra.mxu0 %v9852_v15 }
 0x9d7   : > { %9082 = vmatprep.subr.bf16.mxu0 %v9853_v35  ;;  %9105 = vmatpush3.bf16.msra.mxu1 %v9862_v43 }
 0x9d8   : > { %9106 = vmatprep.subr.bf16.mxu1 %v9863_v42 }
 0x9da   : > { %9083 = vmatpush3.bf16.msra.mxu0 %v9853_v35 }
 0x9db   : > { %9084 = vmatprep.subr.bf16.mxu0 %v9854_v3  ;;  %9107 = vmatpush3.bf16.msra.mxu1 %v9863_v42 }
 0x9dc   : > { %9108 = vmatprep.subr.bf16.mxu1 %v9864_v37 }
 0x9de   : > { %9085 = vmatpush3.bf16.msra.mxu0 %v9854_v3 }
 0x9df   : > { %9086 = vmatprep.subr.bf16.mxu0 %v9855_v0  ;;  %9109 = vmatpush3.bf16.msra.mxu1 %v9864_v37 }
 0x9e0   : > { %9110 = vmatprep.subr.bf16.mxu1 %v9865_v25 }
 0x9e2   : > { %9087 = vmatpush3.bf16.msra.mxu0 %v9855_v0 }
 0x9e3   : > { %9088 = vmatprep.subr.bf16.mxu0 %v9856_v60  ;;  %9111 = vmatpush3.bf16.msra.mxu1 %v9865_v25 }
 0x9e4   : > { %9112 = vmatprep.subr.bf16.mxu1 %v9866_v7 }
 0x9e6   : > { %9089 = vmatpush3.bf16.msra.mxu0 %v9856_v60 }
 0x9e7   : > { %9090 = vmatprep.subr.bf16.mxu0 %v9857_v18  ;;  %9113 = vmatpush3.bf16.msra.mxu1 %v9866_v7 }
 0x9e8   : > { %9114 = vmatprep.subr.bf16.mxu1 %v9867_v31 }
 0x9ea   : > { %9091 = vmatpush3.bf16.msra.mxu0 %v9857_v18 }
 0x9eb   : > { %9115 = vmatpush3.bf16.msra.mxu1 %v9867_v31 }
 0x9ed   : > { %9093 = vmatmul.mubr.bf16.vlgmr.msra.gmra.mxu0 %v9858_v36 }
 0x9ee   : > { %9096 = vmatprep.mubr.bf16.mxu0 %v9859_v63 }
 0xa8d   : > { %v7594_v20 = vpop.f32.mrf.mxu0  ;;  %v7635_v24 = vpop.f32.mrf.mxu1 }
 0xa8e   : > { %v7595_v33 = vadd.f32 %v7594_v20, %v7223_v51  ;;  %v7636_v30 = vadd.f32 %v7635_v24, %v7231_v29 }
 0xa8f   : > { %v7596_v8 = vpop.f32.mrf.mxu0  ;;  %v7637_v17 = vpop.f32.mrf.mxu1 }
 0xa90   : > { %v9001_v61 = vmul.f32 -1.442695, %v7595_v33  ;;  %v7597_v41 = vadd.f32 %v7596_v8, %v7227_v62  ;;  %v7638_v5 = vadd.f32 %v7637_v17, %v7235_v27 }
 0xa91   : > { %v7598_v21 = vpop.f32.mrf.mxu0  ;;  %v7639_v38 = vpop.f32.mrf.mxu1 }
 0xa92   : > { %10109 = vpow2.f32 %v9001_v61  ;;  %v9002_v34 = vmul.f32 -1.442695, %v7597_v41  ;;  %v9003_v50 = vmul.f32 -1.442695, %v7638_v5 }
 0xa93   : > { %v7599_v47 = vpop.f32.mrf.mxu0  ;;  %v7640_v26 = vpop.f32.mrf.mxu1 }
 0xa94   : > { %10111 = vpow2.f32 %v9002_v34 }
 0xa95   : > { %10113 = vpow2.f32 %v9003_v50 }
 0xa9f   : > { %v10110_v45 = vpop.eup %10109 }
 0xaa0   : > { %v7645_v10 = vadd.f32 1.0, %v10110_v45 }
 0xaa1   : > { %v10112_v53 = vpop.eup %10111 }
 0xaa2   : > { %10115 = vrcp.f32 %v7645_v10  ;;  %v7651_v9 = vadd.f32 1.0, %v10112_v53  ;;  %v10114_v56 = vpop.eup %10113 }
 0xaa3   : > { %10117 = vtanh.f32 %v7636_v30  ;;  %v7658_v52 = vadd.f32 1.0, %v10114_v56 }
 0xaa4   : > { %10119 = vrcp.f32 %v7651_v9 }
 0xaa5   : > { %10121 = vrcp.f32 %v7658_v52 }
 0xaad   : > { %v9094_v55 = vpop.f32.mrf.mxu0 }
 0xaae   : > { %v7822_v22 = vadd.f32 %v9094_v55, %v9004_v32 }
 0xaaf   : > { %v10116_v57 = vpop.eup %10115  ;;  %v7813_v2 = vpop.f32.mrf.mxu0 }
 0xab0   : > { %v10118_v48 = vpop.eup %10117  ;;  %v7814_v40 = vadd.f32 %v9004_v32, %v7813_v2  ;;  %v7846_v15 = vmax.f32 %v7822_v22, 0.0 }
 0xab1   : > { %v10120_v49 = vpop.eup %10119  ;;  %v9095_v59 = vpop.f32.mrf.mxu0  ;;  %v7662_v6 = vmul.f32 %v10118_v48, %v10116_v57 }
 0xab2   : > { %v7661_v23 = vmul.f32 %v10120_v49, %v12599_v46  ;;  %v7825_v4 = vadd.f32 %v9095_v59, %v9004_v32  ;;  %v7844_v14 = vmax.f32 %v7814_v40, 0.0  ;;  %v10122_v0 = vpop.eup %10121 }
 0xab3   : > { %v7816_v54 = vpop.f32.mrf.mxu0 }
 0xab4   : > { %v7663_v58 = vadd.f32 %v7662_v6, %v7661_v23  ;;  %v7817_v28 = vadd.f32 %v9004_v32, %v7816_v54  ;;  %v7847_v13 = vmax.f32 %v7825_v4, 0.0 }
 0xab6   : > { %10123 = vtanh.f32 %v7663_v58  ;;  %v7667_v12 = vsel %vm7149_vm11, %v7663_v58, %v12599_v46  ;;  %v7845_v11 = vmax.f32 %v7817_v28, 0.0  ;;  %v7853_v3 = vpack.c.bf16 %v7847_v13, %v7846_v15 }
 0xab7   : > { %7675 = vst [vmem:[#allocation5] sm:$0xff] %v7667_v12 }
 0xab8   : > { %v7852_v35 = vpack.c.bf16 %v7845_v11, %v7844_v14 }
 0xaba   : > { %9116 = vmatprep.mubr.bf16.mxu1 %v7852_v35 }
 0xabb   : > { %9117 = vmatmul.mubr.bf16.vlgmr.msra.gmra.mxu1 %v7853_v3 }
 0xac3   : > { %v10124_v60 = vpop.eup %10123 }
 0xac4   : > { %v7665_v18 = vmul.f32 %v10124_v60, %v10122_v0 }
 0xac6   : > { %v7666_v36 = vsel %vm7149_vm11, %v7665_v18, %v12606_v44  ;;  %v7668_v46 = vsel %vm7149_vm11, %v7665_v18, 0.0 }
 0xac7   : > { %v7669_v63 = vpack.c.bf16 %v7668_v46, %v7668_v46  ;;  %7674 = vst [vmem:[#allocation4] sm:$0xff] %v7666_v36 }
 0xac9   : > { %7671 = vst [vmem:[#allocation7 + $0x1c] sm:$0xf] %v7669_v63 }
 0xad0   : > { %v9868_v16 = vld [vmem:[#allocation7 + $0x18] sm:$0xff]  }
 0xad1   : > { %9097 = vmatmul.mubr.bf16.gmra.mxu0 %v9868_v16 }
 0xb7b   : > { %v9118_v43 = vpop.f32.mrf.mxu1 }
 0xb7c   : > { %v7970_v42 = vadd.f32 %v9118_v43, %v9017_v39 }
 0xb7d   : > { %v7961_v37 = vpop.f32.mrf.mxu1 }
 0xb7e   : > { %7994 = vst [vmem:[%s10549_s24 + $0x10] sm:$0xff] %v7970_v42  ;;  %v7962_v25 = vadd.f32 %v9017_v39, %v7961_v37 }
 0xb7f   : > { %v9119_v44 = vpop.f32.mrf.mxu1 }
 0xb80   : > { %7992 = vst [vmem:[%s10549_s24] sm:$0xff] %v7962_v25  ;;  %v7973_v19 = vadd.f32 %v9119_v44, %v9017_v39 }
 0xb81   : > { %v7964_v7 = vpop.f32.mrf.mxu1 }
 0xb82   : > { %7995 = vst [vmem:[%s10549_s24 + $0x18] sm:$0xff] %v7973_v19  ;;  %v7965_v31 = vadd.f32 %v9017_v39, %v7964_v7 }
 0xb84   : > { %7993 = vst [vmem:[%s10549_s24 + $0x8] sm:$0xff] %v7965_v31 }
 0xb91   : > { %v9098_v1 = vpop.f32.mrf.mxu0 }
 0xb92   : > { %v7838_v33 = vadd.f32 %v9098_v1, %v9004_v32 }
 0xb93   : > { %v7829_v51 = vpop.f32.mrf.mxu0 }
 0xb94   : > { %v7830_v20 = vadd.f32 %v9004_v32, %v7829_v51  ;;  %v7850_v38 = vmax.f32 %v7838_v33, 0.0 }
 0xb95   : > { %v9099_v62 = vpop.f32.mrf.mxu0 }
 0xb96   : > { %v7841_v24 = vadd.f32 %v9099_v62, %v9004_v32  ;;  %v7848_v41 = vmax.f32 %v7830_v20, 0.0 }
 0xb97   : > { %v7832_v8 = vpop.f32.mrf.mxu0 }
 0xb98   : > { %v7833_v17 = vadd.f32 %v9004_v32, %v7832_v8  ;;  %v7851_v61 = vmax.f32 %v7841_v24, 0.0 }
 0xb9a   : > { %v7849_v21 = vmax.f32 %v7833_v17, 0.0  ;;  %v7855_v47 = vpack.c.bf16 %v7851_v61, %v7850_v38 }
 0xb9c   : > { %v7854_v34 = vpack.c.bf16 %v7849_v21, %v7848_v41 }
 0xb9e   : > { %9120 = vmatprep.mubr.bf16.mxu1 %v7854_v34 }
 0xb9f   : > { %9121 = vmatmul.mubr.bf16.gmra.mxu1 %v7855_v47 }
 0xc5f   : > { %v9122_v26 = vpop.f32.mrf.mxu1 }
 0xc60   : > { %v7986_v27 = vadd.f32 %v9122_v26, %v9017_v39 }
 0xc61   : > { %v7977_v5 = vpop.f32.mrf.mxu1 }
 0xc62   : > { %7998 = vst [vmem:[%s10549_s24 + $0x30] sm:$0xff] %v7986_v27  ;;  %v7978_v29 = vadd.f32 %v9017_v39, %v7977_v5 }
 0xc63   : > { %v9123_v50 = vpop.f32.mrf.mxu1 }
 0xc64   : > { %7996 = vst [vmem:[%s10549_s24 + $0x20] sm:$0xff] %v7978_v29  ;;  %v7989_v45 = vadd.f32 %v9123_v50, %v9017_v39 }
 0xc65   : > { %v7980_v30 = vpop.f32.mrf.mxu1 }
 0xc66   : > { %7999 = vst [vmem:[%s10549_s24 + $0x38] sm:$0xff] %v7989_v45  ;;  %v7981_v10 = vadd.f32 %v9017_v39, %v7980_v30 }
 0xc68   : > { %7997 = vst [vmem:[%s10549_s24 + $0x28] sm:$0xff] %v7981_v10 }
 0xc69   : > { %10273 = shalt.err (!%p10270_p12)
}
 0xc6a   : > { %s10274_s19 = scalar_lea.hbm %s12656_s29, 1024  ;;  %s10278_s14 = scalar_lea.hbm %s12715_s11, 2048 }
 0xc6b   : > { %p10275_p2 = scmp.ne.s32.totalorder %s12656_s29, %s10274_s19  ;;  %p10279_p13 = scmp.lt.s32.totalorder %s12656_s29, %s12715_s11 }
 0xc6c   : > { %p10280_p11 = scmp.lt.s32.totalorder %s10278_s14, %s10274_s19 }
 0xc6d   : > { %p10276_p1 = pnand %p10275_p2, %p10447_p5 }
 0xc6e   : > { %p10281_p3 = por %p10280_p11, %p10279_p13 }
 0xc6f   : > { %p10277_p4 = pneg %p10276_p1 }
 0xc71   : > { %p10282_p6 = pnand %p10281_p3, %p10277_p4 }
 0xc73   : > { %10285 = shalt.err (!%p10282_p6)
}
 0xc74   : > { %s10347_s3 = smov 128   ;;  %s10348_s13 = smov 8  }
 0xc75   : > { %9144 = dma.vmem_to_hbm [thread:$0]  (%p10447_p5), %s12658_s22, 1024, %s12656_s29, %s12664_s21, %s10347_s3, %s10347_s3, %s10348_s13  }
 0xc76 PF: > { %p9176_p10 = scmp.ge.s32.totalorder %s10332_s20, 2  ;;  %s8029_s16 = sand.u32 1, %s10320_s17  }
 0xc77   : > { %p13538_p7 = scmp.ne.s32.totalorder %s12978_s28, 0  ;;  %s8030_s30 = scalar_lea.sflag [#allocation10], %s8029_s16 }
 0xc79   : > { %p9163_p8 = pnand %p9176_p10, %p13538_p7 }
 0xc7b   : > { %p9164_p9 = pneg %p9163_p8 }
 0xc7d   : > { %10315 = dma.done.wait (%p9164_p9), %s8030_s30, 1024  }
 0xc7e   : > { %10317 = vsyncadd (%p9164_p9), %s8030_s30, 4294966272  ;;  %s13539_s15 = sld [smem:[#allocation22_spill]]  ;;  %p24_p0 = scmp.ge.s32.totalorder %s10434_s23, 4  }
 0xc7f   : > { %s13540_s19 = sld [smem:[#allocation23_spill]]  ;;  %s13541_s17 = smov %s10324_s18 }
 0xc80   : > { %s13543_s20 = smov %s10434_s23  ;;  %26 = sbr.rel (!%p24_p0) target bundleno = 8 (0x8), region = 138 }
 0xc84   : > { %s13542_s18 = smov %s13539_s15 }
 0xc85   :  { %8035 = vsyncpa [#allocation9], 1 }
 0xc86   :  { %8037 = vsyncpa [#allocation9 + $0x1], 1 }
 0xc87   :  { %8038 = vsyncpa [#allocation12], 1 }
 0xc88   :  { %8039 = vsyncpa [#allocation15], 1 }
 0xc89   :  { %8040 = vsyncpa [#allocation10], 1 }
 0xc8a   :  { %8042 = vsyncpa [#allocation10 + $0x1], 1 }

</bundles_post_ra>
